<compile_context>
chip_gen: v6e
topology: v6e:2x2x1
jax: 0.10.0
libtpu: 0.0.40
codegen_flags: <defaults>
</compile_context>

<pallas_src>
import functools

import jax
import jax.numpy as jnp
from jax.experimental import pallas as pl
from jax.experimental.pallas import tpu as pltpu

NUM_CLASSES = 2
BN_EPS = 1e-5

LANE = 128
TILE_M = 128
TILE_N = 128                       # lane-dense output tiles
VMEM_LIMIT = 32 * 1024 * 1024      # safe on v5e/v6e (128 MiB) and v7x (64 MiB)


def _round_up(x, m):
    return (x + m - 1) // m * m


def _cpad(c):
    """Channel padding carried through the network (lane-aligned)."""
    return _round_up(c, LANE)


def _vmem_spec():
    return pl.BlockSpec(memory_space=pltpu.MemorySpace.VMEM)


# --------------------------- Pallas kernels ---------------------------------

def _mm_bias_kernel(a_ref, b_ref, bias_ref, o_ref, *, relu):
    """One (tm, tn) tile of A@B + bias (+relu); full K in a single step."""
    y = jnp.dot(a_ref[...], b_ref[...], preferred_element_type=jnp.float32)
    y = y + bias_ref[...]                       # f32 epilogue
    if relu:
        y = jnp.maximum(y, 0.0)
    o_ref[...] = y.astype(o_ref.dtype)


def _mm_bias_res_kernel(a_ref, b_ref, bias_ref, r_ref, o_ref):
    """A@B + bias + residual, then ReLU (BasicBlock tail, identity shortcut)."""
    y = jnp.dot(a_ref[...], b_ref[...], preferred_element_type=jnp.float32)
    y = y + bias_ref[...] + r_ref[...].astype(jnp.float32)
    o_ref[...] = jnp.maximum(y, 0.0).astype(o_ref.dtype)


def _mm_bias_down_kernel(a_ref, b_ref, bias_ref, xs_ref, wd_ref, bd_ref, o_ref):
    """A@B + bias + (Xs@Wd + bias_d), then ReLU.

    Fuses the 1x1 BN-folded downsample shortcut into the conv2 matmul call.
    """
    y = jnp.dot(a_ref[...], b_ref[...], preferred_element_type=jnp.float32)
    y = y + bias_ref[...]
    idn = jnp.dot(xs_ref[...], wd_ref[...], preferred_element_type=jnp.float32)
    idn = idn + bd_ref[...]
    o_ref[...] = jnp.maximum(y + idn, 0.0).astype(o_ref.dtype)


def _avgpool_fc_kernel(x_ref, w_ref, b_ref, o_ref):
    # x_ref: (N, H*W, C); adaptive avg pool to (1,1) == mean over spatial.
    pooled = jnp.mean(x_ref[...].astype(jnp.float32), axis=1)          # (N, C)
    y = jnp.dot(pooled.astype(jnp.bfloat16), w_ref[...],
                preferred_element_type=jnp.float32) + b_ref[...]
    o_ref[...] = y


# --------------------------- fused matmul wrapper -----------------------------

def _conv_matmul(a, b, bias, *, relu=False, residual=None, down=None,
                 out_dtype=jnp.bfloat16):
    """(M,K)@(K,Np) + bias [+ residual | + fused 1x1 downsample] [+ relu].

    b / bias (and down weights) are pre-padded / pre-cast at init time:
      b: (K, Np) bf16 with K, Np multiples of 128; bias: (1, Np) f32.
    The contraction is a single grid step per output tile (no accumulator).
    """
    assert residual is None or down is None
    M, K = a.shape
    Np = b.shape[1]

    tm = min(TILE_M, _round_up(M, 16))          # bf16 output sublane multiple
    tn = TILE_N
    Mp = _round_up(M, tm)

    def pad_m(t):
        return t if Mp == M else jnp.pad(t, ((0, Mp - M), (0, 0)))

    a_p = pad_m(a)

    a_spec = pl.BlockSpec((tm, K), lambda i, j: (i, 0))
    b_spec = pl.BlockSpec((K, tn), lambda i, j: (0, j))
    bias_spec = pl.BlockSpec((1, tn), lambda i, j: (0, j))
    out_spec = pl.BlockSpec((tm, tn), lambda i, j: (i, j))

    if down is not None:
        xs, wd, bd = down
        Kd = wd.shape[0]
        kernel = _mm_bias_down_kernel
        in_specs = [a_spec, b_spec, bias_spec,
                    pl.BlockSpec((tm, Kd), lambda i, j: (i, 0)),
                    pl.BlockSpec((Kd, tn), lambda i, j: (0, j)),
                    pl.BlockSpec((1, tn), lambda i, j: (0, j))]
        operands = (a_p, b, bias, pad_m(xs), wd, bd)
    elif residual is not None:
        kernel = _mm_bias_res_kernel
        in_specs = [a_spec, b_spec, bias_spec,
                    pl.BlockSpec((tm, tn), lambda i, j: (i, j))]
        operands = (a_p, b, bias, pad_m(residual))
    else:
        kernel = functools.partial(_mm_bias_kernel, relu=relu)
        in_specs = [a_spec, b_spec, bias_spec]
        operands = (a_p, b, bias)

    out = pl.pallas_call(
        kernel,
        out_shape=jax.ShapeDtypeStruct((Mp, Np), out_dtype),
        grid_spec=pltpu.PrefetchScalarGridSpec(
            num_scalar_prefetch=0,
            grid=(Mp // tm, Np // tn),
            in_specs=in_specs,
            out_specs=out_spec,
        ),
        compiler_params=pltpu.CompilerParams(
            dimension_semantics=("parallel", "parallel"),
            vmem_limit_bytes=VMEM_LIMIT,
        ),
    )(*operands)
    return out if Mp == M else out[:M]


# --------------------------- conv / pool wrappers -----------------------------

def _im2col(x, kh, kw, stride, pad):
    """x: (N,H,W,C) -> (N*Ho*Wo, kh*kw*C), element order (i, j, c).

    `stride` / `pad` must be static Python ints (NOT traced values).
    """
    N, H, W, C = x.shape
    xp = jnp.pad(x, ((0, 0), (pad, pad), (pad, pad), (0, 0))) if pad else x
    Ho = (H + 2 * pad - kh) // stride + 1
    Wo = (W + 2 * pad - kw) // stride + 1
    cols = [xp[:, i:i + stride * Ho:stride, j:j + stride * Wo:stride, :]
            for i in range(kh) for j in range(kw)]
    patches = jnp.concatenate(cols, axis=-1)
    return patches.reshape(N * Ho * Wo, kh * kw * C), Ho, Wo


def conv_bn(x, w2d, bias, kh, kw, stride, pad, *, relu=False,
            residual=None, down=None):
    """x: NHWC bf16 with channel-padded C; w2d: (K, Cout_pad) bf16 pre-folded,
    pre-transposed, pre-padded; bias: (1, Cout_pad) f32 (folded BN shift)."""
    n_batch = x.shape[0]
    a, Ho, Wo = _im2col(x, kh, kw, stride, pad)
    K = w2d.shape[0]
    if a.shape[1] < K:                          # stem only: 7*7*1 = 49 -> 128
        a = jnp.pad(a, ((0, 0), (0, K - a.shape[1])))
    cout_p = w2d.shape[1]
    if residual is not None:
        residual = residual.reshape(n_batch * Ho * Wo, cout_p)
    if down is not None:
        xs, wd, bd = down
        xs = xs.reshape(n_batch * Ho * Wo, xs.shape[-1])
        down = (xs, wd, bd)
    y = _conv_matmul(a, w2d, bias, relu=relu, residual=residual, down=down)
    return y.reshape(n_batch, Ho, Wo, cout_p)


def maxpool_3x3_s2_p1(x):
    """3x3/stride-2/pad-1 max pool as a fused jnp.maximum tree over the 9
    strided views (plain JAX; channel padding stays zero: relu>=0, and every
    window contains at least one non-(-inf) spatial position)."""
    N, H, W, C = x.shape
    kh = kw = 3
    stride, pad = 2, 1
    xp = jnp.pad(x, ((0, 0), (pad, pad), (pad, pad), (0, 0)),
                 constant_values=-jnp.inf)
    Ho = (H + 2 * pad - kh) // stride + 1
    Wo = (W + 2 * pad - kw) // stride + 1
    out = None
    for i in range(kh):
        for j in range(kw):
            v = xp[:, i:i + stride * Ho:stride, j:j + stride * Wo:stride, :]
            out = v if out is None else jnp.maximum(out, v)
    return out


def avgpool_fc(x, w_p, b_p, num_cls):
    """x: NHWC (channel-padded); w_p: (C_pad, cls_pad) bf16; b_p: (1, cls_pad)
    f32, both pre-padded at init.  Lane-dense store, sliced afterwards."""
    N, H, W, C = x.shape
    out = pl.pallas_call(
        _avgpool_fc_kernel,
        out_shape=jax.ShapeDtypeStruct((N, w_p.shape[1]), jnp.float32),
        in_specs=[_vmem_spec()] * 3,
        out_specs=_vmem_spec(),
        compiler_params=pltpu.CompilerParams(vmem_limit_bytes=VMEM_LIMIT),
    )(x.reshape(N, H * W, C), w_p, b_p)
    return out[:, :num_cls]


# --------------------------- parameters --------------------------------------

def _kaiming_conv(key, cout, cin, kh, kw):
    fan_out = cout * kh * kw                       # mode='fan_out', relu gain
    std = (2.0 / fan_out) ** 0.5
    return jax.random.normal(key, (cout, cin, kh, kw), jnp.float32) * std


def _fold_bn(w, c):
    """Fold inference-form BatchNorm (PyTorch default-init running stats:
    gamma=1, beta=0, mean=0, var=1) into the conv weight and a bias."""
    gamma = jnp.ones((c,), jnp.float32)
    beta = jnp.zeros((c,), jnp.float32)
    mean = jnp.zeros((c,), jnp.float32)
    var = jnp.ones((c,), jnp.float32)
    scale = gamma / jnp.sqrt(var + BN_EPS)
    shift = beta - mean * scale
    return w * scale[:, None, None, None], shift


def _prep_conv(w, shift, cin_runtime):
    """PyTorch-layout (BN-scale-folded) conv weight (cout,cin,kh,kw) + shift ->
    (K, Cout_pad) bf16 matmul operand (im2col order (i,j,c), cin zero-padded to
    the runtime channel-padded width, K padded to a multiple of 128) and a
    (1, Cout_pad) f32 bias.  Done ONCE at parameter construction."""
    cout, cin, kh, kw = w.shape
    cout_p = _cpad(cout)
    w = jnp.transpose(w, (2, 3, 1, 0))             # (kh, kw, cin, cout)
    w = jnp.pad(w, ((0, 0), (0, 0),
                    (0, cin_runtime - cin), (0, cout_p - cout)))
    w2d = w.reshape(kh * kw * cin_runtime, cout_p)
    K = w2d.shape[0]
    Kp = _round_up(K, LANE)
    if Kp != K:
        w2d = jnp.pad(w2d, ((0, Kp - K), (0, 0)))
    bias = jnp.pad(shift.reshape(1, cout), ((0, 0), (0, cout_p - cout)))
    return w2d.astype(jnp.bfloat16), bias.astype(jnp.float32)


def _make_layer(key, inplanes, planes, blocks, stride):
    params = []
    cin_rt = _cpad(inplanes)                       # runtime (padded) channels
    for b in range(blocks):
        key, k1, k2, k3 = jax.random.split(key, 4)
        w1, s1 = _fold_bn(_kaiming_conv(k1, planes, inplanes, 3, 3), planes)
        w2, s2 = _fold_bn(_kaiming_conv(k2, planes, planes, 3, 3), planes)
        p = {}
        p["conv1_w"], p["conv1_b"] = _prep_conv(w1, s1, cin_rt)
        p["conv2_w"], p["conv2_b"] = _prep_conv(w2, s2, _cpad(planes))
        if b == 0 and (stride != 1 or inplanes != planes):
            wd, sd = _fold_bn(_kaiming_conv(k3, planes, inplanes, 1, 1), planes)
            p["down_w"], p["down_b"] = _prep_conv(wd, sd, cin_rt)
        params.append(p)
        inplanes = planes
        cin_rt = _cpad(planes)
    return params, inplanes, key


def init_resnet_params(key, layers=(1, 1, 1), num_classes=NUM_CLASSES):
    key, k1, kf1, kf2 = jax.random.split(key, 4)
    w_stem, s_stem = _fold_bn(_kaiming_conv(k1, 64, 1, 7, 7), 64)
    params = {}
    params["conv1_w"], params["conv1_b"] = _prep_conv(w_stem, s_stem, 1)
    inplanes = 64
    params["layer1"], inplanes, key = _make_layer(key, inplanes, 64, layers[0], 1)
    params["layer2"], inplanes, key = _make_layer(key, inplanes, 128, layers[1], 2)
    params["layer3"], inplanes, key = _make_layer(key, inplanes, 256, layers[2], 1)
    # nn.Linear default init: U(-1/sqrt(fan_in), 1/sqrt(fan_in))
    bound = 1.0 / (inplanes ** 0.5)
    fc_w = jax.random.uniform(kf1, (num_classes, inplanes), jnp.float32,
                              -bound, bound)
    fc_b = jax.random.uniform(kf2, (num_classes,), jnp.float32, -bound, bound)
    fc_in_p, fc_out_p = _cpad(inplanes), _cpad(num_classes)
    params["fc_w"] = jnp.pad(jnp.transpose(fc_w),
                             ((0, fc_in_p - inplanes),
                              (0, fc_out_p - num_classes))).astype(jnp.bfloat16)
    params["fc_b"] = jnp.pad(fc_b.reshape(1, num_classes),
                             ((0, 0), (0, fc_out_p - num_classes))
                             ).astype(jnp.float32)
    return params


# --------------------------- forward ------------------------------------------

# Strides are STATIC architecture config (never threaded through the params
# pytree, where jit would turn them into tracers and break strided slicing).
_LAYER_STRIDES = (("layer1", 1), ("layer2", 2), ("layer3", 1))


def _basic_block(x, p, stride):
    out = conv_bn(x, p["conv1_w"], p["conv1_b"], 3, 3, stride, 1, relu=True)
    if "down_w" in p:
        # 1x1/stride-s downsample fused into conv2's kernel epilogue.
        xs = x[:, ::stride, ::stride, :] if stride > 1 else x
        out = conv_bn(out, p["conv2_w"], p["conv2_b"], 3, 3, 1, 1,
                      down=(xs, p["down_w"], p["down_b"]))
    else:
        out = conv_bn(out, p["conv2_w"], p["conv2_b"], 3, 3, 1, 1, residual=x)
    return out


def resnet_forward(params, x_nchw):
    # NCHW -> NHWC; bf16 activations (MXU-native), f32 accumulation in-kernel.
    x = jnp.transpose(x_nchw, (0, 2, 3, 1)).astype(jnp.bfloat16)
    x = conv_bn(x, params["conv1_w"], params["conv1_b"], 7, 7, 2, 3, relu=True)
    x = maxpool_3x3_s2_p1(x)
    for layer_name, layer_stride in _LAYER_STRIDES:
        for bi, blk in enumerate(params[layer_name]):
            x = _basic_block(x, blk, layer_stride if bi == 0 else 1)
    return avgpool_fc(x, params["fc_w"], params["fc_b"], NUM_CLASSES)


# --------------------------- main ---------------------------------------------

if __name__ == "__main__":
    key = jax.random.PRNGKey(0)
    kp, kx = jax.random.split(key)

    params = init_resnet_params(kp, layers=(1, 1, 1), num_classes=NUM_CLASSES)
    x = jax.random.normal(kx, (2, 1, 32, 32), jnp.float32)     # NCHW, 1 channel

    fwd = jax.jit(resnet_forward)
    out = jax.block_until_ready(fwd(params, x))

    assert out.shape == (2, NUM_CLASSES), out.shape
    assert out.dtype == jnp.float32
    print("KERNEL_OK")
</pallas_src>

<mosaic_0001>
module attributes {stable_mosaic.version = 11 : i64} {
  func.func @_mm_bias_kernel(%arg0: i32, %arg1: i32, %arg2: memref<128x128xbf16, #tpu.memory_space<vmem>>, %arg3: memref<128x128xbf16, #tpu.memory_space<vmem>>, %arg4: memref<1x128xf32, #tpu.memory_space<vmem>>, %arg5: memref<128x128xbf16, #tpu.memory_space<vmem>>) attributes {dimension_semantics = [#tpu.dimension_semantics<parallel>, #tpu.dimension_semantics<parallel>], iteration_bounds = array<i64: 4, 1>, scalar_prefetch = 0 : i64, scratch_operands = 0 : i64, tpu.core_type = #tpu.core_type<tc>, window_params = [{transform_indices = @transform_0, window_bounds = array<i64: 128, 128>}, {transform_indices = @transform_1, window_bounds = array<i64: 128, 128>}, {transform_indices = @transform_2, window_bounds = array<i64: 1, 128>}, {transform_indices = @transform_3, window_bounds = array<i64: 128, 128>}]} {
    %c0 = arith.constant 0 : index
    %c0_0 = arith.constant 0 : index
    %0 = vector.load %arg2[%c0, %c0_0] : memref<128x128xbf16, #tpu.memory_space<vmem>>, vector<128x128xbf16>
    %c0_1 = arith.constant 0 : index
    %c0_2 = arith.constant 0 : index
    %1 = vector.load %arg3[%c0_1, %c0_2] : memref<128x128xbf16, #tpu.memory_space<vmem>>, vector<128x128xbf16>
    %cst = arith.constant dense<0.000000e+00> : vector<128x128xf32>
    %2 = tpu.matmul %0, %1, %cst {dimension_numbers = #tpu.dot_dimension_numbers<[1], [0], [0], [1], [0, 0, 1, 1], [], []>} : vector<128x128xbf16>, vector<128x128xbf16>, vector<128x128xf32> -> vector<128x128xf32>
    %c0_3 = arith.constant 0 : index
    %c0_4 = arith.constant 0 : index
    %3 = vector.load %arg4[%c0_3, %c0_4] : memref<1x128xf32, #tpu.memory_space<vmem>>, vector<1x128xf32>
    %4 = vector.broadcast %3 : vector<1x128xf32> to vector<128x128xf32>
    %5 = arith.addf %2, %4 : vector<128x128xf32>
    %cst_5 = arith.constant 0.000000e+00 : f32
    %6 = vector.broadcast %cst_5 : f32 to vector<128x128xf32>
    %7 = arith.maximumf %5, %6 : vector<128x128xf32>
    %8 = arith.truncf %7 : vector<128x128xf32> to vector<128x128xbf16>
    %c0_6 = arith.constant 0 : index
    %c0_7 = arith.constant 0 : index
    %9 = vector.load %arg5[%c0_6, %c0_7] : memref<128x128xbf16, #tpu.memory_space<vmem>>, vector<128x128xbf16>
    tpu.vector_store %arg5[%c0_6, %c0_7], %8 {strides = array<i32>} : memref<128x128xbf16, #tpu.memory_space<vmem>>, vector<128x128xbf16>,
    return
  }
  func.func @transform_0(%arg0: i32, %arg1: i32) -> (i32, i32) {
    %c0_i32 = arith.constant 0 : i32
    %c0_i32_0 = arith.constant 0 : i32
    return %arg0, %c0_i32 : i32, i32
  }
  func.func @transform_1(%arg0: i32, %arg1: i32) -> (i32, i32) {
    %c0_i32 = arith.constant 0 : i32
    %c0_i32_0 = arith.constant 0 : i32
    return %c0_i32, %arg1 : i32, i32
  }
  func.func @transform_2(%arg0: i32, %arg1: i32) -> (i32, i32) {
    %c0_i32 = arith.constant 0 : i32
    %c0_i32_0 = arith.constant 0 : i32
    return %c0_i32, %arg1 : i32, i32
  }
  func.func @transform_3(%arg0: i32, %arg1: i32) -> (i32, i32) {
    %c0_i32 = arith.constant 0 : i32
    return %arg0, %arg1 : i32, i32
  }
}

module attributes {stable_mosaic.version = 11 : i64} {
  func.func @_mm_bias_kernel(%arg0: i32, %arg1: i32, %arg2: memref<128x1152xbf16, #tpu.memory_space<vmem>>, %arg3: memref<1152x128xbf16, #tpu.memory_space<vmem>>, %arg4: memref<1x128xf32, #tpu.memory_space<vmem>>, %arg5: memref<128x128xbf16, #tpu.memory_space<vmem>>) attributes {dimension_semantics = [#tpu.dimension_semantics<parallel>, #tpu.dimension_semantics<parallel>], iteration_bounds = array<i64: 1, 1>, scalar_prefetch = 0 : i64, scratch_operands = 0 : i64, tpu.core_type = #tpu.core_type<tc>, window_params = [{transform_indices = @transform_0, window_bounds = array<i64: 128, 1152>}, {transform_indices = @transform_1, window_bounds = array<i64: 1152, 128>}, {transform_indices = @transform_2, window_bounds = array<i64: 1, 128>}, {transform_indices = @transform_3, window_bounds = array<i64: 128, 128>}]} {
    %c0 = arith.constant 0 : index
    %c0_0 = arith.constant 0 : index
    %0 = vector.load %arg2[%c0, %c0_0] : memref<128x1152xbf16, #tpu.memory_space<vmem>>, vector<128x1152xbf16>
    %c0_1 = arith.constant 0 : index
    %c0_2 = arith.constant 0 : index
    %1 = vector.load %arg3[%c0_1, %c0_2] : memref<1152x128xbf16, #tpu.memory_space<vmem>>, vector<1152x128xbf16>
    %cst = arith.constant dense<0.000000e+00> : vector<128x128xf32>
    %2 = tpu.matmul %0, %1, %cst {dimension_numbers = #tpu.dot_dimension_numbers<[1], [0], [0], [1], [0, 0, 1, 1], [], []>} : vector<128x1152xbf16>, vector<1152x128xbf16>, vector<128x128xf32> -> vector<128x128xf32>
    %c0_3 = arith.constant 0 : index
    %c0_4 = arith.constant 0 : index
    %3 = vector.load %arg4[%c0_3, %c0_4] : memref<1x128xf32, #tpu.memory_space<vmem>>, vector<1x128xf32>
    %4 = vector.broadcast %3 : vector<1x128xf32> to vector<128x128xf32>
    %5 = arith.addf %2, %4 : vector<128x128xf32>
    %cst_5 = arith.constant 0.000000e+00 : f32
    %6 = vector.broadcast %cst_5 : f32 to vector<128x128xf32>
    %7 = arith.maximumf %5, %6 : vector<128x128xf32>
    %8 = arith.truncf %7 : vector<128x128xf32> to vector<128x128xbf16>
    %c0_6 = arith.constant 0 : index
    %c0_7 = arith.constant 0 : index
    %9 = vector.load %arg5[%c0_6, %c0_7] : memref<128x128xbf16, #tpu.memory_space<vmem>>, vector<128x128xbf16>
    tpu.vector_store %arg5[%c0_6, %c0_7], %8 {strides = array<i32>} : memref<128x128xbf16, #tpu.memory_space<vmem>>, vector<128x128xbf16>,
    return
  }
  func.func @transform_0(%arg0: i32, %arg1: i32) -> (i32, i32) {
    %c0_i32 = arith.constant 0 : i32
    %c0_i32_0 = arith.constant 0 : i32
    return %arg0, %c0_i32 : i32, i32
  }
  func.func @transform_1(%arg0: i32, %arg1: i32) -> (i32, i32) {
    %c0_i32 = arith.constant 0 : i32
    %c0_i32_0 = arith.constant 0 : i32
    return %c0_i32, %arg1 : i32, i32
  }
  func.func @transform_2(%arg0: i32, %arg1: i32) -> (i32, i32) {
    %c0_i32 = arith.constant 0 : i32
    %c0_i32_0 = arith.constant 0 : i32
    return %c0_i32, %arg1 : i32, i32
  }
  func.func @transform_3(%arg0: i32, %arg1: i32) -> (i32, i32) {
    %c0_i32 = arith.constant 0 : i32
    return %arg0, %arg1 : i32, i32
  }
}

module attributes {stable_mosaic.version = 11 : i64} {
  func.func @_mm_bias_res_kernel(%arg0: i32, %arg1: i32, %arg2: memref<128x1152xbf16, #tpu.memory_space<vmem>>, %arg3: memref<1152x128xbf16, #tpu.memory_space<vmem>>, %arg4: memref<1x128xf32, #tpu.memory_space<vmem>>, %arg5: memref<128x128xbf16, #tpu.memory_space<vmem>>, %arg6: memref<128x128xbf16, #tpu.memory_space<vmem>>) attributes {dimension_semantics = [#tpu.dimension_semantics<parallel>, #tpu.dimension_semantics<parallel>], iteration_bounds = array<i64: 1, 1>, scalar_prefetch = 0 : i64, scratch_operands = 0 : i64, tpu.core_type = #tpu.core_type<tc>, window_params = [{transform_indices = @transform_0, window_bounds = array<i64: 128, 1152>}, {transform_indices = @transform_1, window_bounds = array<i64: 1152, 128>}, {transform_indices = @transform_2, window_bounds = array<i64: 1, 128>}, {transform_indices = @transform_3, window_bounds = array<i64: 128, 128>}, {transform_indices = @transform_4, window_bounds = array<i64: 128, 128>}]} {
    %c0 = arith.constant 0 : index
    %c0_0 = arith.constant 0 : index
    %0 = vector.load %arg2[%c0, %c0_0] : memref<128x1152xbf16, #tpu.memory_space<vmem>>, vector<128x1152xbf16>
    %c0_1 = arith.constant 0 : index
    %c0_2 = arith.constant 0 : index
    %1 = vector.load %arg3[%c0_1, %c0_2] : memref<1152x128xbf16, #tpu.memory_space<vmem>>, vector<1152x128xbf16>
    %cst = arith.constant dense<0.000000e+00> : vector<128x128xf32>
    %2 = tpu.matmul %0, %1, %cst {dimension_numbers = #tpu.dot_dimension_numbers<[1], [0], [0], [1], [0, 0, 1, 1], [], []>} : vector<128x1152xbf16>, vector<1152x128xbf16>, vector<128x128xf32> -> vector<128x128xf32>
    %c0_3 = arith.constant 0 : index
    %c0_4 = arith.constant 0 : index
    %3 = vector.load %arg4[%c0_3, %c0_4] : memref<1x128xf32, #tpu.memory_space<vmem>>, vector<1x128xf32>
    %4 = vector.broadcast %3 : vector<1x128xf32> to vector<128x128xf32>
    %5 = arith.addf %2, %4 : vector<128x128xf32>
    %c0_5 = arith.constant 0 : index
    %c0_6 = arith.constant 0 : index
    %6 = vector.load %arg5[%c0_5, %c0_6] : memref<128x128xbf16, #tpu.memory_space<vmem>>, vector<128x128xbf16>
    %7 = arith.extf %6 : vector<128x128xbf16> to vector<128x128xf32>
    %8 = arith.addf %5, %7 : vector<128x128xf32>
    %cst_7 = arith.constant 0.000000e+00 : f32
    %9 = vector.broadcast %cst_7 : f32 to vector<128x128xf32>
    %10 = arith.maximumf %8, %9 : vector<128x128xf32>
    %11 = arith.truncf %10 : vector<128x128xf32> to vector<128x128xbf16>
    %c0_8 = arith.constant 0 : index
    %c0_9 = arith.constant 0 : index
    %12 = vector.load %arg6[%c0_8, %c0_9] : memref<128x128xbf16, #tpu.memory_space<vmem>>, vector<128x128xbf16>
    tpu.vector_store %arg6[%c0_8, %c0_9], %11 {strides = array<i32>} : memref<128x128xbf16, #tpu.memory_space<vmem>>, vector<128x128xbf16>,
    return
  }
  func.func @transform_0(%arg0: i32, %arg1: i32) -> (i32, i32) {
    %c0_i32 = arith.constant 0 : i32
    %c0_i32_0 = arith.constant 0 : i32
    return %arg0, %c0_i32 : i32, i32
  }
  func.func @transform_1(%arg0: i32, %arg1: i32) -> (i32, i32) {
    %c0_i32 = arith.constant 0 : i32
    %c0_i32_0 = arith.constant 0 : i32
    return %c0_i32, %arg1 : i32, i32
  }
  func.func @transform_2(%arg0: i32, %arg1: i32) -> (i32, i32) {
    %c0_i32 = arith.constant 0 : i32
    %c0_i32_0 = arith.constant 0 : i32
    return %c0_i32, %arg1 : i32, i32
  }
  func.func @transform_3(%arg0: i32, %arg1: i32) -> (i32, i32) {
    %c0_i32 = arith.constant 0 : i32
    return %arg0, %arg1 : i32, i32
  }
  func.func @transform_4(%arg0: i32, %arg1: i32) -> (i32, i32) {
    %c0_i32 = arith.constant 0 : i32
    return %arg0, %arg1 : i32, i32
  }
}

module attributes {stable_mosaic.version = 11 : i64} {
  func.func @_mm_bias_kernel(%arg0: i32, %arg1: i32, %arg2: memref<32x1152xbf16, #tpu.memory_space<vmem>>, %arg3: memref<1152x128xbf16, #tpu.memory_space<vmem>>, %arg4: memref<1x128xf32, #tpu.memory_space<vmem>>, %arg5: memref<32x128xbf16, #tpu.memory_space<vmem>>) attributes {dimension_semantics = [#tpu.dimension_semantics<parallel>, #tpu.dimension_semantics<parallel>], iteration_bounds = array<i64: 1, 1>, scalar_prefetch = 0 : i64, scratch_operands = 0 : i64, tpu.core_type = #tpu.core_type<tc>, window_params = [{transform_indices = @transform_0, window_bounds = array<i64: 32, 1152>}, {transform_indices = @transform_1, window_bounds = array<i64: 1152, 128>}, {transform_indices = @transform_2, window_bounds = array<i64: 1, 128>}, {transform_indices = @transform_3, window_bounds = array<i64: 32, 128>}]} {
    %c0 = arith.constant 0 : index
    %c0_0 = arith.constant 0 : index
    %0 = vector.load %arg2[%c0, %c0_0] : memref<32x1152xbf16, #tpu.memory_space<vmem>>, vector<32x1152xbf16>
    %c0_1 = arith.constant 0 : index
    %c0_2 = arith.constant 0 : index
    %1 = vector.load %arg3[%c0_1, %c0_2] : memref<1152x128xbf16, #tpu.memory_space<vmem>>, vector<1152x128xbf16>
    %cst = arith.constant dense<0.000000e+00> : vector<32x128xf32>
    %2 = tpu.matmul %0, %1, %cst {dimension_numbers = #tpu.dot_dimension_numbers<[1], [0], [0], [1], [0, 0, 1, 1], [], []>} : vector<32x1152xbf16>, vector<1152x128xbf16>, vector<32x128xf32> -> vector<32x128xf32>
    %c0_3 = arith.constant 0 : index
    %c0_4 = arith.constant 0 : index
    %3 = vector.load %arg4[%c0_3, %c0_4] : memref<1x128xf32, #tpu.memory_space<vmem>>, vector<1x128xf32>
    %4 = vector.broadcast %3 : vector<1x128xf32> to vector<32x128xf32>
    %5 = arith.addf %2, %4 : vector<32x128xf32>
    %cst_5 = arith.constant 0.000000e+00 : f32
    %6 = vector.broadcast %cst_5 : f32 to vector<32x128xf32>
    %7 = arith.maximumf %5, %6 : vector<32x128xf32>
    %8 = arith.truncf %7 : vector<32x128xf32> to vector<32x128xbf16>
    %c0_6 = arith.constant 0 : index
    %c0_7 = arith.constant 0 : index
    %9 = vector.load %arg5[%c0_6, %c0_7] : memref<32x128xbf16, #tpu.memory_space<vmem>>, vector<32x128xbf16>
    tpu.vector_store %arg5[%c0_6, %c0_7], %8 {strides = array<i32>} : memref<32x128xbf16, #tpu.memory_space<vmem>>, vector<32x128xbf16>,
    return
  }
  func.func @transform_0(%arg0: i32, %arg1: i32) -> (i32, i32) {
    %c0_i32 = arith.constant 0 : i32
    %c0_i32_0 = arith.constant 0 : i32
    return %arg0, %c0_i32 : i32, i32
  }
  func.func @transform_1(%arg0: i32, %arg1: i32) -> (i32, i32) {
    %c0_i32 = arith.constant 0 : i32
    %c0_i32_0 = arith.constant 0 : i32
    return %c0_i32, %arg1 : i32, i32
  }
  func.func @transform_2(%arg0: i32, %arg1: i32) -> (i32, i32) {
    %c0_i32 = arith.constant 0 : i32
    %c0_i32_0 = arith.constant 0 : i32
    return %c0_i32, %arg1 : i32, i32
  }
  func.func @transform_3(%arg0: i32, %arg1: i32) -> (i32, i32) {
    %c0_i32 = arith.constant 0 : i32
    return %arg0, %arg1 : i32, i32
  }
}

module attributes {stable_mosaic.version = 11 : i64} {
  func.func @_mm_bias_kernel(%arg0: i32, %arg1: i32, %arg2: memref<32x1152xbf16, #tpu.memory_space<vmem>>, %arg3: memref<1152x128xbf16, #tpu.memory_space<vmem>>, %arg4: memref<1x128xf32, #tpu.memory_space<vmem>>, %arg5: memref<32x128xbf16, #tpu.memory_space<vmem>>) attributes {dimension_semantics = [#tpu.dimension_semantics<parallel>, #tpu.dimension_semantics<parallel>], iteration_bounds = array<i64: 1, 2>, scalar_prefetch = 0 : i64, scratch_operands = 0 : i64, tpu.core_type = #tpu.core_type<tc>, window_params = [{transform_indices = @transform_0, window_bounds = array<i64: 32, 1152>}, {transform_indices = @transform_1, window_bounds = array<i64: 1152, 128>}, {transform_indices = @transform_2, window_bounds = array<i64: 1, 128>}, {transform_indices = @transform_3, window_bounds = array<i64: 32, 128>}]} {
    %c0 = arith.constant 0 : index
    %c0_0 = arith.constant 0 : index
    %0 = vector.load %arg2[%c0, %c0_0] : memref<32x1152xbf16, #tpu.memory_space<vmem>>, vector<32x1152xbf16>
    %c0_1 = arith.constant 0 : index
    %c0_2 = arith.constant 0 : index
    %1 = vector.load %arg3[%c0_1, %c0_2] : memref<1152x128xbf16, #tpu.memory_space<vmem>>, vector<1152x128xbf16>
    %cst = arith.constant dense<0.000000e+00> : vector<32x128xf32>
    %2 = tpu.matmul %0, %1, %cst {dimension_numbers = #tpu.dot_dimension_numbers<[1], [0], [0], [1], [0, 0, 1, 1], [], []>} : vector<32x1152xbf16>, vector<1152x128xbf16>, vector<32x128xf32> -> vector<32x128xf32>
    %c0_3 = arith.constant 0 : index
    %c0_4 = arith.constant 0 : index
    %3 = vector.load %arg4[%c0_3, %c0_4] : memref<1x128xf32, #tpu.memory_space<vmem>>, vector<1x128xf32>
    %4 = vector.broadcast %3 : vector<1x128xf32> to vector<32x128xf32>
    %5 = arith.addf %2, %4 : vector<32x128xf32>
    %cst_5 = arith.constant 0.000000e+00 : f32
    %6 = vector.broadcast %cst_5 : f32 to vector<32x128xf32>
    %7 = arith.maximumf %5, %6 : vector<32x128xf32>
    %8 = arith.truncf %7 : vector<32x128xf32> to vector<32x128xbf16>
    %c0_6 = arith.constant 0 : index
    %c0_7 = arith.constant 0 : index
    %9 = vector.load %arg5[%c0_6, %c0_7] : memref<32x128xbf16, #tpu.memory_space<vmem>>, vector<32x128xbf16>
    tpu.vector_store %arg5[%c0_6, %c0_7], %8 {strides = array<i32>} : memref<32x128xbf16, #tpu.memory_space<vmem>>, vector<32x128xbf16>,
    return
  }
  func.func @transform_0(%arg0: i32, %arg1: i32) -> (i32, i32) {
    %c0_i32 = arith.constant 0 : i32
    %c0_i32_0 = arith.constant 0 : i32
    return %arg0, %c0_i32 : i32, i32
  }
  func.func @transform_1(%arg0: i32, %arg1: i32) -> (i32, i32) {
    %c0_i32 = arith.constant 0 : i32
    %c0_i32_0 = arith.constant 0 : i32
    return %c0_i32, %arg1 : i32, i32
  }
  func.func @transform_2(%arg0: i32, %arg1: i32) -> (i32, i32) {
    %c0_i32 = arith.constant 0 : i32
    %c0_i32_0 = arith.constant 0 : i32
    return %c0_i32, %arg1 : i32, i32
  }
  func.func @transform_3(%arg0: i32, %arg1: i32) -> (i32, i32) {
    %c0_i32 = arith.constant 0 : i32
    return %arg0, %arg1 : i32, i32
  }
}

module attributes {stable_mosaic.version = 11 : i64} {
  func.func @_mm_bias_down_kernel(%arg0: i32, %arg1: i32, %arg2: memref<32x1152xbf16, #tpu.memory_space<vmem>>, %arg3: memref<1152x128xbf16, #tpu.memory_space<vmem>>, %arg4: memref<1x128xf32, #tpu.memory_space<vmem>>, %arg5: memref<32x128xbf16, #tpu.memory_space<vmem>>, %arg6: memref<128x128xbf16, #tpu.memory_space<vmem>>, %arg7: memref<1x128xf32, #tpu.memory_space<vmem>>, %arg8: memref<32x128xbf16, #tpu.memory_space<vmem>>) attributes {dimension_semantics = [#tpu.dimension_semantics<parallel>, #tpu.dimension_semantics<parallel>], iteration_bounds = array<i64: 1, 1>, scalar_prefetch = 0 : i64, scratch_operands = 0 : i64, tpu.core_type = #tpu.core_type<tc>, window_params = [{transform_indices = @transform_0, window_bounds = array<i64: 32, 1152>}, {transform_indices = @transform_1, window_bounds = array<i64: 1152, 128>}, {transform_indices = @transform_2, window_bounds = array<i64: 1, 128>}, {transform_indices = @transform_3, window_bounds = array<i64: 32, 128>}, {transform_indices = @transform_4, window_bounds = array<i64: 128, 128>}, {transform_indices = @transform_5, window_bounds = array<i64: 1, 128>}, {transform_indices = @transform_6, window_bounds = array<i64: 32, 128>}]} {
    %c0 = arith.constant 0 : index
    %c0_0 = arith.constant 0 : index
    %0 = vector.load %arg2[%c0, %c0_0] : memref<32x1152xbf16, #tpu.memory_space<vmem>>, vector<32x1152xbf16>
    %c0_1 = arith.constant 0 : index
    %c0_2 = arith.constant 0 : index
    %1 = vector.load %arg3[%c0_1, %c0_2] : memref<1152x128xbf16, #tpu.memory_space<vmem>>, vector<1152x128xbf16>
    %cst = arith.constant dense<0.000000e+00> : vector<32x128xf32>
    %2 = tpu.matmul %0, %1, %cst {dimension_numbers = #tpu.dot_dimension_numbers<[1], [0], [0], [1], [0, 0, 1, 1], [], []>} : vector<32x1152xbf16>, vector<1152x128xbf16>, vector<32x128xf32> -> vector<32x128xf32>
    %c0_3 = arith.constant 0 : index
    %c0_4 = arith.constant 0 : index
    %3 = vector.load %arg4[%c0_3, %c0_4] : memref<1x128xf32, #tpu.memory_space<vmem>>, vector<1x128xf32>
    %4 = vector.broadcast %3 : vector<1x128xf32> to vector<32x128xf32>
    %5 = arith.addf %2, %4 : vector<32x128xf32>
    %c0_5 = arith.constant 0 : index
    %c0_6 = arith.constant 0 : index
    %6 = vector.load %arg5[%c0_5, %c0_6] : memref<32x128xbf16, #tpu.memory_space<vmem>>, vector<32x128xbf16>
    %c0_7 = arith.constant 0 : index
    %c0_8 = arith.constant 0 : index
    %7 = vector.load %arg6[%c0_7, %c0_8] : memref<128x128xbf16, #tpu.memory_space<vmem>>, vector<128x128xbf16>
    %cst_9 = arith.constant dense<0.000000e+00> : vector<32x128xf32>
    %8 = tpu.matmul %6, %7, %cst_9 {dimension_numbers = #tpu.dot_dimension_numbers<[1], [0], [0], [1], [0, 0, 1, 1], [], []>} : vector<32x128xbf16>, vector<128x128xbf16>, vector<32x128xf32> -> vector<32x128xf32>
    %c0_10 = arith.constant 0 : index
    %c0_11 = arith.constant 0 : index
    %9 = vector.load %arg7[%c0_10, %c0_11] : memref<1x128xf32, #tpu.memory_space<vmem>>, vector<1x128xf32>
    %10 = vector.broadcast %9 : vector<1x128xf32> to vector<32x128xf32>
    %11 = arith.addf %8, %10 : vector<32x128xf32>
    %12 = arith.addf %5, %11 : vector<32x128xf32>
    %cst_12 = arith.constant 0.000000e+00 : f32
    %13 = vector.broadcast %cst_12 : f32 to vector<32x128xf32>
    %14 = arith.maximumf %12, %13 : vector<32x128xf32>
    %15 = arith.truncf %14 : vector<32x128xf32> to vector<32x128xbf16>
    %c0_13 = arith.constant 0 : index
    %c0_14 = arith.constant 0 : index
    %16 = vector.load %arg8[%c0_13, %c0_14] : memref<32x128xbf16, #tpu.memory_space<vmem>>, vector<32x128xbf16>
    tpu.vector_store %arg8[%c0_13, %c0_14], %15 {strides = array<i32>} : memref<32x128xbf16, #tpu.memory_space<vmem>>, vector<32x128xbf16>,
    return
  }
  func.func @transform_0(%arg0: i32, %arg1: i32) -> (i32, i32) {
    %c0_i32 = arith.constant 0 : i32
    %c0_i32_0 = arith.constant 0 : i32
    return %arg0, %c0_i32 : i32, i32
  }
  func.func @transform_1(%arg0: i32, %arg1: i32) -> (i32, i32) {
    %c0_i32 = arith.constant 0 : i32
    %c0_i32_0 = arith.constant 0 : i32
    return %c0_i32, %arg1 : i32, i32
  }
  func.func @transform_2(%arg0: i32, %arg1: i32) -> (i32, i32) {
    %c0_i32 = arith.constant 0 : i32
    %c0_i32_0 = arith.constant 0 : i32
    return %c0_i32, %arg1 : i32, i32
  }
  func.func @transform_3(%arg0: i32, %arg1: i32) -> (i32, i32) {
    %c0_i32 = arith.constant 0 : i32
    %c0_i32_0 = arith.constant 0 : i32
    return %arg0, %c0_i32 : i32, i32
  }
  func.func @transform_4(%arg0: i32, %arg1: i32) -> (i32, i32) {
    %c0_i32 = arith.constant 0 : i32
    %c0_i32_0 = arith.constant 0 : i32
    return %c0_i32, %arg1 : i32, i32
  }
  func.func @transform_5(%arg0: i32, %arg1: i32) -> (i32, i32) {
    %c0_i32 = arith.constant 0 : i32
    %c0_i32_0 = arith.constant 0 : i32
    return %c0_i32, %arg1 : i32, i32
  }
  func.func @transform_6(%arg0: i32, %arg1: i32) -> (i32, i32) {
    %c0_i32 = arith.constant 0 : i32
    return %arg0, %arg1 : i32, i32
  }
}

module attributes {stable_mosaic.version = 11 : i64} {
  func.func @_avgpool_fc_kernel(%arg0: memref<2x16x256xbf16, #tpu.memory_space<vmem>>, %arg1: memref<256x128xbf16, #tpu.memory_space<vmem>>, %arg2: memref<1x128xf32, #tpu.memory_space<vmem>>, %arg3: memref<2x128xf32, #tpu.memory_space<vmem>>) attributes {dimension_semantics = [], scalar_prefetch = 0 : i64, scratch_operands = 0 : i64, tpu.core_type = #tpu.core_type<tc>} {
    %c0 = arith.constant 0 : index
    %c0_0 = arith.constant 0 : index
    %c0_1 = arith.constant 0 : index
    %0 = vector.load %arg0[%c0, %c0_0, %c0_1] : memref<2x16x256xbf16, #tpu.memory_space<vmem>>, vector<2x16x256xbf16>
    %1 = arith.extf %0 : vector<2x16x256xbf16> to vector<2x16x256xf32>
    %cst = arith.constant dense<0.000000e+00> : vector<2x256xf32>
    %2 = vector.multi_reduction <add>, %1, %cst [1] : vector<2x16x256xf32> to vector<2x256xf32>
    %cst_2 = arith.constant 1.600000e+01 : f32
    %3 = vector.broadcast %cst_2 : f32 to vector<2x256xf32>
    %4 = arith.divf %2, %3 : vector<2x256xf32>
    %5 = arith.truncf %4 : vector<2x256xf32> to vector<2x256xbf16>
    %c0_3 = arith.constant 0 : index
    %c0_4 = arith.constant 0 : index
    %6 = vector.load %arg1[%c0_3, %c0_4] : memref<256x128xbf16, #tpu.memory_space<vmem>>, vector<256x128xbf16>
    %cst_5 = arith.constant dense<0.000000e+00> : vector<2x128xf32>
    %7 = tpu.matmul %5, %6, %cst_5 {dimension_numbers = #tpu.dot_dimension_numbers<[1], [0], [0], [1], [0, 0, 1, 1], [], []>} : vector<2x256xbf16>, vector<256x128xbf16>, vector<2x128xf32> -> vector<2x128xf32>
    %c0_6 = arith.constant 0 : index
    %c0_7 = arith.constant 0 : index
    %8 = vector.load %arg2[%c0_6, %c0_7] : memref<1x128xf32, #tpu.memory_space<vmem>>, vector<1x128xf32>
    %9 = vector.broadcast %8 : vector<1x128xf32> to vector<2x128xf32>
    %10 = arith.addf %7, %9 : vector<2x128xf32>
    %c0_8 = arith.constant 0 : index
    %c0_9 = arith.constant 0 : index
    %11 = vector.load %arg3[%c0_8, %c0_9] : memref<2x128xf32, #tpu.memory_space<vmem>>, vector<2x128xf32>
    tpu.vector_store %arg3[%c0_8, %c0_9], %10 {strides = array<i32>} : memref<2x128xf32, #tpu.memory_space<vmem>>, vector<2x128xf32>,
    return
  }
}

module attributes {stable_mosaic.version = 11 : i64} {
  func.func @_mm_bias_down_kernel(%arg0: i32, %arg1: i32, %arg2: memref<32x2304xbf16, #tpu.memory_space<vmem>>, %arg3: memref<2304x128xbf16, #tpu.memory_space<vmem>>, %arg4: memref<1x128xf32, #tpu.memory_space<vmem>>, %arg5: memref<32x128xbf16, #tpu.memory_space<vmem>>, %arg6: memref<128x128xbf16, #tpu.memory_space<vmem>>, %arg7: memref<1x128xf32, #tpu.memory_space<vmem>>, %arg8: memref<32x128xbf16, #tpu.memory_space<vmem>>) attributes {dimension_semantics = [#tpu.dimension_semantics<parallel>, #tpu.dimension_semantics<parallel>], iteration_bounds = array<i64: 1, 2>, scalar_prefetch = 0 : i64, scratch_operands = 0 : i64, tpu.core_type = #tpu.core_type<tc>, window_params = [{transform_indices = @transform_0, window_bounds = array<i64: 32, 2304>}, {transform_indices = @transform_1, window_bounds = array<i64: 2304, 128>}, {transform_indices = @transform_2, window_bounds = array<i64: 1, 128>}, {transform_indices = @transform_3, window_bounds = array<i64: 32, 128>}, {transform_indices = @transform_4, window_bounds = array<i64: 128, 128>}, {transform_indices = @transform_5, window_bounds = array<i64: 1, 128>}, {transform_indices = @transform_6, window_bounds = array<i64: 32, 128>}]} {
    %c0 = arith.constant 0 : index
    %c0_0 = arith.constant 0 : index
    %0 = vector.load %arg2[%c0, %c0_0] : memref<32x2304xbf16, #tpu.memory_space<vmem>>, vector<32x2304xbf16>
    %c0_1 = arith.constant 0 : index
    %c0_2 = arith.constant 0 : index
    %1 = vector.load %arg3[%c0_1, %c0_2] : memref<2304x128xbf16, #tpu.memory_space<vmem>>, vector<2304x128xbf16>
    %cst = arith.constant dense<0.000000e+00> : vector<32x128xf32>
    %2 = tpu.matmul %0, %1, %cst {dimension_numbers = #tpu.dot_dimension_numbers<[1], [0], [0], [1], [0, 0, 1, 1], [], []>} : vector<32x2304xbf16>, vector<2304x128xbf16>, vector<32x128xf32> -> vector<32x128xf32>
    %c0_3 = arith.constant 0 : index
    %c0_4 = arith.constant 0 : index
    %3 = vector.load %arg4[%c0_3, %c0_4] : memref<1x128xf32, #tpu.memory_space<vmem>>, vector<1x128xf32>
    %4 = vector.broadcast %3 : vector<1x128xf32> to vector<32x128xf32>
    %5 = arith.addf %2, %4 : vector<32x128xf32>
    %c0_5 = arith.constant 0 : index
    %c0_6 = arith.constant 0 : index
    %6 = vector.load %arg5[%c0_5, %c0_6] : memref<32x128xbf16, #tpu.memory_space<vmem>>, vector<32x128xbf16>
    %c0_7 = arith.constant 0 : index
    %c0_8 = arith.constant 0 : index
    %7 = vector.load %arg6[%c0_7, %c0_8] : memref<128x128xbf16, #tpu.memory_space<vmem>>, vector<128x128xbf16>
    %cst_9 = arith.constant dense<0.000000e+00> : vector<32x128xf32>
    %8 = tpu.matmul %6, %7, %cst_9 {dimension_numbers = #tpu.dot_dimension_numbers<[1], [0], [0], [1], [0, 0, 1, 1], [], []>} : vector<32x128xbf16>, vector<128x128xbf16>, vector<32x128xf32> -> vector<32x128xf32>
    %c0_10 = arith.constant 0 : index
    %c0_11 = arith.constant 0 : index
    %9 = vector.load %arg7[%c0_10, %c0_11] : memref<1x128xf32, #tpu.memory_space<vmem>>, vector<1x128xf32>
    %10 = vector.broadcast %9 : vector<1x128xf32> to vector<32x128xf32>
    %11 = arith.addf %8, %10 : vector<32x128xf32>
    %12 = arith.addf %5, %11 : vector<32x128xf32>
    %cst_12 = arith.constant 0.000000e+00 : f32
    %13 = vector.broadcast %cst_12 : f32 to vector<32x128xf32>
    %14 = arith.maximumf %12, %13 : vector<32x128xf32>
    %15 = arith.truncf %14 : vector<32x128xf32> to vector<32x128xbf16>
    %c0_13 = arith.constant 0 : index
    %c0_14 = arith.constant 0 : index
    %16 = vector.load %arg8[%c0_13, %c0_14] : memref<32x128xbf16, #tpu.memory_space<vmem>>, vector<32x128xbf16>
    tpu.vector_store %arg8[%c0_13, %c0_14], %15 {strides = array<i32>} : memref<32x128xbf16, #tpu.memory_space<vmem>>, vector<32x128xbf16>,
    return
  }
  func.func @transform_0(%arg0: i32, %arg1: i32) -> (i32, i32) {
    %c0_i32 = arith.constant 0 : i32
    %c0_i32_0 = arith.constant 0 : i32
    return %arg0, %c0_i32 : i32, i32
  }
  func.func @transform_1(%arg0: i32, %arg1: i32) -> (i32, i32) {
    %c0_i32 = arith.constant 0 : i32
    %c0_i32_0 = arith.constant 0 : i32
    return %c0_i32, %arg1 : i32, i32
  }
  func.func @transform_2(%arg0: i32, %arg1: i32) -> (i32, i32) {
    %c0_i32 = arith.constant 0 : i32
    %c0_i32_0 = arith.constant 0 : i32
    return %c0_i32, %arg1 : i32, i32
  }
  func.func @transform_3(%arg0: i32, %arg1: i32) -> (i32, i32) {
    %c0_i32 = arith.constant 0 : i32
    %c0_i32_0 = arith.constant 0 : i32
    return %arg0, %c0_i32 : i32, i32
  }
  func.func @transform_4(%arg0: i32, %arg1: i32) -> (i32, i32) {
    %c0_i32 = arith.constant 0 : i32
    %c0_i32_0 = arith.constant 0 : i32
    return %c0_i32, %arg1 : i32, i32
  }
  func.func @transform_5(%arg0: i32, %arg1: i32) -> (i32, i32) {
    %c0_i32 = arith.constant 0 : i32
    %c0_i32_0 = arith.constant 0 : i32
    return %c0_i32, %arg1 : i32, i32
  }
  func.func @transform_6(%arg0: i32, %arg1: i32) -> (i32, i32) {
    %c0_i32 = arith.constant 0 : i32
    return %arg0, %arg1 : i32, i32
  }
}

</mosaic_0001>

<bundles_post_ra>
// kernel: resnet_forward.8
= control target key start
LH: loop header
LB: loop body
LE: loop exit
PB: predicated region body
PF: predicated region fallthrough
CT: control target
= control target key end

     0   :  { %s913_s12 = smov 0   ;;  %s915_s13 = smov 0   ;;  %s1000_s0 = inlined_call_operand.vmem [shape: bf16[512,128], index: 0, kind: input, shape index: {}]   ;;  %s1001_s1 = inlined_call_operand.vmem [shape: bf16[128,128], index: 1, kind: input, shape index: {}]   ;;  %s1002_s2 = inlined_call_operand.vmem [shape: f32[1,128], index: 2, kind: input, shape index: {}]   ;;  %s1003_s3 = inlined_call_operand.vmem [shape: bf16[512,128], index: 3, kind: output, shape index: {}]  }
   0x1   :  { %s917_s14 = smov 0  }
   0x2 LB: > { %s25_s15 = sadd.s32 1, %s887_s13  ;;  %p662_p0 = scmp.ge.s32.totalorder %s891_s14, 1  ;;  %s891_s14 = sphi %s917_s14, %s13_s14   ;;  %s887_s13 = sphi %s915_s13, %s1005_s13   ;;  %s883_s12 = sphi %s913_s12, %s1004_s12  }
   0x3   : > { %p27_p1 = scmp.ge.s32.totalorder %s25_s15, 4  ;;  %p169_p2 = scmp.lt.s32.totalorder %s891_s14, 5 }
   0x5   : > { %s1007_s15 = smov (%p27_p1, %s25_s15), 0  ;;  %p170_p3 = pnand %p662_p0, %p169_p2 }
   0x6   : > { %s663_s18 = sshll.u32 (!%p170_p3), %s883_s12, 4 }
   0x7   : > { %173 = sbr.rel (%p170_p3) target bundleno = 259 (0x103), region = 32  ;;  %p204_p4 = scmp.lt.s32.totalorder (!%p170_p3), %s663_s18, 63 }
   0xc   : > { %v853_v0 = vld [vmem:[%s1001_s1 + $0x38] sm:$0xff]   ;;  %v854_v1 = vld [vmem:[%s1001_s1 + $0x30] sm:$0xff]   ;;  %s1009_s18 = smov (!%p204_p4, %s663_s18), 63  ;;  %v855_v2 = vld [vmem:[%s1001_s1 + $0x28] sm:$0xff]  }
   0xd   : > { %781 = vmatprep.subr.bf16.mxu0 %v853_v0  ;;  %813 = vmatprep.subr.bf16.mxu1 %v853_v0  ;;  %s664_s23 = sshll.u32 %s1009_s18, 2  ;;  %v856_v3 = vld [vmem:[%s1001_s1 + $0x20] sm:$0xff]   ;;  %v857_v6 = vld [vmem:[%s1001_s1 + $0x18] sm:$0xff]   ;;  %v858_v7 = vld [vmem:[%s1001_s1 + $0x10] sm:$0xff]  }
   0xe   : > { %782 = vmatpush3.bf16.msra.mxu0 %v853_v0  ;;  %821 = vmatpush3.bf16.msra.mxu1 %v853_v0  ;;  %s948_s26 = scalar_lea.vmem %s1000_s0, %s664_s23  ;;  %v859_v8 = vld [vmem:[%s1001_s1 + $0x8] sm:$0xff]   ;;  %v860_v9 = vld [vmem:[%s1001_s1] sm:$0xff]   ;;  %s981_s17 = scalar_lea.vmem %s1003_s3, %s664_s23 }
   0xf   : > { %783 = vmatprep.subr.bf16.mxu0 %v854_v1  ;;  %814 = vmatprep.subr.bf16.mxu1 %v854_v1  ;;  %v861_v4 = vld [vmem:[%s948_s26] sm:$0xff]   ;;  %v863_v10 = vld [vmem:[%s948_s26 + $0x8] sm:$0xff]   ;;  %v865_v12 = vld [vmem:[%s948_s26 + $0x10] sm:$0xff]  }
  0x10   : > { %v862_v5 = vld [vmem:[%s948_s26 + $0x20] sm:$0xff]   ;;  %797 = vmatprep.mubr.bf16.mxu0 %v861_v4  ;;  %v864_v11 = vld [vmem:[%s948_s26 + $0x28] sm:$0xff]   ;;  %v866_v13 = vld [vmem:[%s948_s26 + $0x30] sm:$0xff]  }
  0x11   : > { %805 = vmatprep.mubr.bf16.mxu1 %v862_v5  ;;  %v867_v14 = vld [vmem:[%s948_s26 + $0x18] sm:$0xff]   ;;  %v667_v16 = vld [vmem:[%s1002_s2] ss:$0 sm:$0xff] }
  0x12   : > { %784 = vmatpush3.bf16.msra.mxu0 %v854_v1  ;;  %822 = vmatpush3.bf16.msra.mxu1 %v854_v1  ;;  %v868_v15 = vld [vmem:[%s948_s26 + $0x38] sm:$0xff]  }
  0x13   : > { %785 = vmatprep.subr.bf16.mxu0 %v855_v2  ;;  %815 = vmatprep.subr.bf16.mxu1 %v855_v2 }
  0x16   : > { %786 = vmatpush3.bf16.msra.mxu0 %v855_v2  ;;  %823 = vmatpush3.bf16.msra.mxu1 %v855_v2 }
  0x17   : > { %787 = vmatprep.subr.bf16.mxu0 %v856_v3  ;;  %816 = vmatprep.subr.bf16.mxu1 %v856_v3 }
  0x1a   : > { %788 = vmatpush3.bf16.msra.mxu0 %v856_v3  ;;  %824 = vmatpush3.bf16.msra.mxu1 %v856_v3 }
  0x1b   : > { %789 = vmatprep.subr.bf16.mxu0 %v857_v6  ;;  %817 = vmatprep.subr.bf16.mxu1 %v857_v6 }
  0x1e   : > { %790 = vmatpush3.bf16.msra.mxu0 %v857_v6  ;;  %825 = vmatpush3.bf16.msra.mxu1 %v857_v6 }
  0x1f   : > { %791 = vmatprep.subr.bf16.mxu0 %v858_v7  ;;  %818 = vmatprep.subr.bf16.mxu1 %v858_v7 }
  0x22   : > { %792 = vmatpush3.bf16.msra.mxu0 %v858_v7  ;;  %826 = vmatpush3.bf16.msra.mxu1 %v858_v7 }
  0x23   : > { %793 = vmatprep.subr.bf16.mxu0 %v859_v8  ;;  %819 = vmatprep.subr.bf16.mxu1 %v859_v8 }
  0x26   : > { %794 = vmatpush3.bf16.msra.mxu0 %v859_v8  ;;  %827 = vmatpush3.bf16.msra.mxu1 %v859_v8 }
  0x27   : > { %795 = vmatprep.subr.bf16.mxu0 %v860_v9  ;;  %820 = vmatprep.subr.bf16.mxu1 %v860_v9 }
  0x2a   : > { %796 = vmatpush3.bf16.msra.mxu0 %v860_v9  ;;  %828 = vmatpush3.bf16.msra.mxu1 %v860_v9 }
  0x2d   : > { %798 = vmatmul.mubr.bf16.vlgmr.msra.gmra.mxu0 %v863_v10  ;;  %806 = vmatmul.mubr.bf16.vlgmr.msra.gmra.mxu1 %v864_v11 }
  0x2e   : > { %801 = vmatprep.mubr.bf16.mxu0 %v865_v12  ;;  %809 = vmatprep.mubr.bf16.mxu1 %v866_v13 }
  0x35   : > { %802 = vmatmul.mubr.bf16.gmra.mxu0 %v867_v14  ;;  %810 = vmatmul.mubr.bf16.gmra.mxu1 %v868_v15 }
  0xed   : > { %v799_v17 = vpop.f32.mrf.mxu0  ;;  %v807_v18 = vpop.f32.mrf.mxu1 }
  0xee   : > { %v404_v19 = vadd.f32 %v799_v17, %v667_v16  ;;  %v436_v20 = vadd.f32 %v807_v18, %v667_v16 }
  0xef   : > { %v395_v21 = vpop.f32.mrf.mxu0  ;;  %v427_v22 = vpop.f32.mrf.mxu1 }
  0xf0   : > { %v396_v23 = vadd.f32 %v667_v16, %v395_v21  ;;  %v428_v24 = vadd.f32 %v667_v16, %v427_v22  ;;  %v460_v29 = vmax.f32 %v404_v19, 0.0  ;;  %v468_v30 = vmax.f32 %v436_v20, 0.0 }
  0xf1   : > { %v800_v25 = vpop.f32.mrf.mxu0  ;;  %v808_v26 = vpop.f32.mrf.mxu1 }
  0xf2   : > { %v407_v27 = vadd.f32 %v800_v25, %v667_v16  ;;  %v439_v28 = vadd.f32 %v808_v26, %v667_v16  ;;  %v458_v37 = vmax.f32 %v396_v23, 0.0  ;;  %v466_v38 = vmax.f32 %v428_v24, 0.0 }
  0xf3   : > { %v398_v31 = vpop.f32.mrf.mxu0  ;;  %v430_v32 = vpop.f32.mrf.mxu1 }
  0xf4   : > { %v461_v33 = vmax.f32 %v407_v27, 0.0  ;;  %v469_v34 = vmax.f32 %v439_v28, 0.0  ;;  %v399_v35 = vadd.f32 %v667_v16, %v398_v31  ;;  %v431_v36 = vadd.f32 %v667_v16, %v430_v32 }
  0xf5   : > { %v803_v39 = vpop.f32.mrf.mxu0  ;;  %v811_v40 = vpop.f32.mrf.mxu1 }
  0xf6   : > { %v726_v41 = vpack.c.bf16 %v461_v33, %v460_v29  ;;  %v746_v42 = vpack.c.bf16 %v469_v34, %v468_v30  ;;  %v459_v43 = vmax.f32 %v399_v35, 0.0  ;;  %v467_v44 = vmax.f32 %v431_v36, 0.0 }
  0xf7   : > { %v420_v45 = vadd.f32 %v803_v39, %v667_v16  ;;  %v452_v46 = vadd.f32 %v811_v40, %v667_v16  ;;  %v411_v47 = vpop.f32.mrf.mxu0  ;;  %v443_v48 = vpop.f32.mrf.mxu1 }
  0xf8   : > { %758 = vst [vmem:[%s981_s17 + $0x8] sm:$0xff] %v726_v41   ;;  %762 = vst [vmem:[%s981_s17 + $0x28] sm:$0xff] %v746_v42   ;;  %v721_v49 = vpack.c.bf16 %v459_v43, %v458_v37  ;;  %v741_v50 = vpack.c.bf16 %v467_v44, %v466_v38  ;;  %v412_v51 = vadd.f32 %v667_v16, %v411_v47 }
  0xf9   : > { %v444_v52 = vadd.f32 %v667_v16, %v443_v48  ;;  %v804_v53 = vpop.f32.mrf.mxu0  ;;  %v812_v54 = vpop.f32.mrf.mxu1  ;;  %v464_v57 = vmax.f32 %v420_v45, 0.0  ;;  %v472_v58 = vmax.f32 %v452_v46, 0.0 }
  0xfa   : > { %722 = vst [vmem:[%s981_s17] sm:$0xff] %v721_v49   ;;  %761 = vst [vmem:[%s981_s17 + $0x20] sm:$0xff] %v741_v50   ;;  %v423_v55 = vadd.f32 %v804_v53, %v667_v16  ;;  %v455_v56 = vadd.f32 %v812_v54, %v667_v16  ;;  %v462_v1 = vmax.f32 %v412_v51, 0.0 }
  0xfb   : > { %v414_v59 = vpop.f32.mrf.mxu0  ;;  %v446_v60 = vpop.f32.mrf.mxu1  ;;  %v470_v2 = vmax.f32 %v444_v52, 0.0 }
  0xfc   : > { %v465_v61 = vmax.f32 %v423_v55, 0.0  ;;  %v473_v62 = vmax.f32 %v455_v56, 0.0  ;;  %v415_v63 = vadd.f32 %v667_v16, %v414_v59  ;;  %v447_v0 = vadd.f32 %v667_v16, %v446_v60 }
  0xfe   : > { %v736_v3 = vpack.c.bf16 %v465_v61, %v464_v57  ;;  %v756_v4 = vpack.c.bf16 %v473_v62, %v472_v58  ;;  %v463_v5 = vmax.f32 %v415_v63, 0.0  ;;  %v471_v6 = vmax.f32 %v447_v0, 0.0 }
 0x100   : > { %760 = vst [vmem:[%s981_s17 + $0x18] sm:$0xff] %v736_v3   ;;  %764 = vst [vmem:[%s981_s17 + $0x38] sm:$0xff] %v756_v4   ;;  %v731_v7 = vpack.c.bf16 %v463_v5, %v462_v1  ;;  %v751_v8 = vpack.c.bf16 %v471_v6, %v470_v2 }
 0x102   : > { %759 = vst [vmem:[%s981_s17 + $0x10] sm:$0xff] %v731_v7   ;;  %763 = vst [vmem:[%s981_s17 + $0x30] sm:$0xff] %v751_v8  }
 0x103 PF: > { %s13_s14 = sadd.s32 1, %s891_s14   ;;  %s1004_s12 = smov %s887_s13 }
 0x104   : > { %p10_p5 = scmp.ge.s32.totalorder %s13_s14, 6   ;;  %s1005_s13 = smov %s1007_s15 }
 0x106   :  { %12 = sbr.rel (!%p10_p5) target bundleno = 2 (0x2), region = 68 }

// kernel: resnet_forward.9
= control target key start
LH: loop header
LB: loop body
LE: loop exit
PB: predicated region body
PF: predicated region fallthrough
CT: control target
= control target key end

     0   :  { %s2950_s1 = inlined_call_operand.vmem [shape: bf16[1152,128], index: 1, kind: input, shape index: {}]   ;;  %s2951_s0 = inlined_call_operand.vmem [shape: bf16[128,1152], index: 0, kind: input, shape index: {}]   ;;  %s2952_s2 = inlined_call_operand.vmem [shape: f32[1,128], index: 2, kind: input, shape index: {}]   ;;  %s2953_s3 = inlined_call_operand.vmem [shape: bf16[128,128], index: 3, kind: output, shape index: {}]  }
   0x1   :  { %v2175_v0 = vld [vmem:[%s2950_s1 + $0x78] sm:$0xff]   ;;  %v2179_v4 = vld [vmem:[%s2950_s1 + $0x70] sm:$0xff]   ;;  %v2183_v8 = vld [vmem:[%s2950_s1 + $0x68] sm:$0xff]  }
   0x2   :  { %v2176_v1 = vld [vmem:[%s2950_s1 + $0xf8] sm:$0xff]   ;;  %1855 = vmatprep.subr.bf16.mxu0 %v2175_v0  ;;  %v2180_v5 = vld [vmem:[%s2950_s1 + $0xf0] sm:$0xff]   ;;  %v2184_v9 = vld [vmem:[%s2950_s1 + $0xe8] sm:$0xff]  }
   0x3   :  { %v2177_v2 = vld [vmem:[%s2950_s1 + $0x38] sm:$0xff]   ;;  %1919 = vmatprep.subr.bf16.mxu1 %v2176_v1  ;;  %v2181_v6 = vld [vmem:[%s2950_s1 + $0x30] sm:$0xff]   ;;  %v2185_v10 = vld [vmem:[%s2950_s1 + $0x28] sm:$0xff]  }
   0x4   :  { %v2178_v3 = vld [vmem:[%s2950_s1 + $0xb8] sm:$0xff]   ;;  %1856 = vmatpush3.bf16.msra.mxu0 %v2177_v2  ;;  %v2182_v7 = vld [vmem:[%s2950_s1 + $0xb0] sm:$0xff]   ;;  %v2186_v11 = vld [vmem:[%s2950_s1 + $0xa8] sm:$0xff]  }
   0x5   :  { %1920 = vmatpush3.bf16.msra.mxu1 %v2178_v3  ;;  %1857 = vmatprep.subr.bf16.mxu0 %v2179_v4  ;;  %v2187_v12 = vld [vmem:[%s2950_s1 + $0x60] sm:$0xff]   ;;  %v2191_v16 = vld [vmem:[%s2950_s1 + $0x58] sm:$0xff]   ;;  %v2195_v20 = vld [vmem:[%s2950_s1 + $0x50] sm:$0xff]  }
   0x6   :  { %1921 = vmatprep.subr.bf16.mxu1 %v2180_v5  ;;  %v2188_v13 = vld [vmem:[%s2950_s1 + $0xe0] sm:$0xff]   ;;  %v2192_v17 = vld [vmem:[%s2950_s1 + $0xd8] sm:$0xff]   ;;  %v2196_v21 = vld [vmem:[%s2950_s1 + $0xd0] sm:$0xff]  }
   0x7   :  { %v2189_v14 = vld [vmem:[%s2950_s1 + $0x20] sm:$0xff]   ;;  %v2193_v18 = vld [vmem:[%s2950_s1 + $0x18] sm:$0xff]   ;;  %v2197_v22 = vld [vmem:[%s2950_s1 + $0x10] sm:$0xff]  }
   0x8   :  { %1858 = vmatpush3.bf16.msra.mxu0 %v2181_v6  ;;  %v2190_v15 = vld [vmem:[%s2950_s1 + $0xa0] sm:$0xff]   ;;  %v2194_v19 = vld [vmem:[%s2950_s1 + $0x98] sm:$0xff]   ;;  %v2198_v23 = vld [vmem:[%s2950_s1 + $0x90] sm:$0xff]  }
   0x9   :  { %1922 = vmatpush3.bf16.msra.mxu1 %v2182_v7  ;;  %1859 = vmatprep.subr.bf16.mxu0 %v2183_v8  ;;  %v2199_v24 = vld [vmem:[%s2950_s1 + $0x48] sm:$0xff]   ;;  %v2203_v28 = vld [vmem:[%s2950_s1 + $0x40] sm:$0xff]   ;;  %v2213_v36 = vld [vmem:[%s2950_s1 + $0x178] sm:$0xff]  }
   0xa   :  { %1923 = vmatprep.subr.bf16.mxu1 %v2184_v9  ;;  %v2200_v25 = vld [vmem:[%s2950_s1 + $0xc8] sm:$0xff]   ;;  %v2204_v29 = vld [vmem:[%s2950_s1 + $0xc0] sm:$0xff]   ;;  %v2214_v37 = vld [vmem:[%s2950_s1 + $0x1f8] sm:$0xff]  }
   0xb   :  { %v2201_v26 = vld [vmem:[%s2950_s1 + $0x8] sm:$0xff]   ;;  %v2205_v30 = vld [vmem:[%s2950_s1] sm:$0xff]   ;;  %v2215_v38 = vld [vmem:[%s2950_s1 + $0x138] sm:$0xff]  }
   0xc   :  { %1860 = vmatpush3.bf16.msra.mxu0 %v2185_v10  ;;  %v2202_v27 = vld [vmem:[%s2950_s1 + $0x88] sm:$0xff]   ;;  %v2206_v31 = vld [vmem:[%s2950_s1 + $0x80] sm:$0xff]   ;;  %v2216_v39 = vld [vmem:[%s2950_s1 + $0x1b8] sm:$0xff]  }
   0xd   :  { %1924 = vmatpush3.bf16.msra.mxu1 %v2186_v11  ;;  %1861 = vmatprep.subr.bf16.mxu0 %v2187_v12  ;;  %v2207_v32 = vld [vmem:[%s2951_s0] ss:$36 sps:$4 sm:$0xff]   ;;  %v2210_v34 = vld [vmem:[%s2951_s0 + $0x8] ss:$36 sps:$4 sm:$0xff]   ;;  %v2219_v41 = vld [vmem:[%s2951_s0 + $0x54] ss:$36 sps:$4 sm:$0xff]  }
   0xe   :  { %1925 = vmatprep.subr.bf16.mxu1 %v2188_v13  ;;  %v2209_v33 = vld [vmem:[%s2951_s0 + $0x4] ss:$36 sps:$4 sm:$0xff]   ;;  %v2212_v35 = vld [vmem:[%s2951_s0 + $0xc] ss:$36 sps:$4 sm:$0xff]   ;;  %v2227_v48 = vld [vmem:[%s2951_s0 + $0x94] ss:$36 sps:$4 sm:$0xff]  }
   0xf   :  { %1078 = vmatprep.mubr.bf16.mxu0 %v2209_v33  ;;  %1175 = vmatprep.mubr.bf16.mxu1 %v2212_v35  ;;  %v2217_v40 = vld [vmem:[%s2951_s0 + $0x4c] ss:$36 sps:$4 sm:$0xff]   ;;  %v2229_v49 = vld [vmem:[%s2951_s0 + $0x9c] ss:$36 sps:$4 sm:$0xff]   ;;  %v2239_v57 = vld [vmem:[%s2951_s0 + $0xe4] ss:$36 sps:$4 sm:$0xff]  }
  0x10   :  { %1862 = vmatpush3.bf16.msra.mxu0 %v2189_v14  ;;  %v2221_v42 = vld [vmem:[%s2951_s0 + $0x48] ss:$36 sps:$4 sm:$0xff]   ;;  %v2222_v43 = vld [vmem:[%s2951_s0 + $0x50] ss:$36 sps:$4 sm:$0xff]   ;;  %v2232_v51 = vld [vmem:[%s2951_s0 + $0x98] ss:$36 sps:$4 sm:$0xff]  }
  0x11   :  { %1926 = vmatpush3.bf16.msra.mxu1 %v2190_v15  ;;  %1863 = vmatprep.subr.bf16.mxu0 %v2191_v16  ;;  %v2223_v44 = vld [vmem:[%s2950_s1 + $0x170] sm:$0xff]   ;;  %v2233_v52 = vld [vmem:[%s2950_s1 + $0x168] sm:$0xff]   ;;  %v2237_v56 = vld [vmem:[%s2951_s0 + $0xdc] ss:$36 sps:$4 sm:$0xff]  }
  0x12   :  { %1927 = vmatprep.subr.bf16.mxu1 %v2192_v17  ;;  %v2224_v45 = vld [vmem:[%s2950_s1 + $0x1f0] sm:$0xff]   ;;  %v2234_v53 = vld [vmem:[%s2950_s1 + $0x1e8] sm:$0xff]   ;;  %v2241_v58 = vld [vmem:[%s2951_s0 + $0xd8] ss:$36 sps:$4 sm:$0xff]  }
  0x13   :  { %v2225_v46 = vld [vmem:[%s2950_s1 + $0x130] sm:$0xff]   ;;  %v2235_v54 = vld [vmem:[%s2950_s1 + $0x128] sm:$0xff]   ;;  %v2242_v59 = vld [vmem:[%s2951_s0 + $0xe0] ss:$36 sps:$4 sm:$0xff]  }
  0x14   :  { %1864 = vmatpush3.bf16.msra.mxu0 %v2193_v18  ;;  %v2226_v47 = vld [vmem:[%s2950_s1 + $0x1b0] sm:$0xff]   ;;  %v2236_v55 = vld [vmem:[%s2950_s1 + $0x1a8] sm:$0xff]   ;;  %v2243_v60 = vld [vmem:[%s2950_s1 + $0x160] sm:$0xff]  }
  0x15   :  { %1928 = vmatpush3.bf16.msra.mxu1 %v2194_v19  ;;  %1865 = vmatprep.subr.bf16.mxu0 %v2195_v20  ;;  %v2231_v50 = vld [vmem:[%s2951_s0 + $0x90] ss:$36 sps:$4 sm:$0xff]   ;;  %v2244_v61 = vld [vmem:[%s2950_s1 + $0x1e0] sm:$0xff]   ;;  %v2253_v3 = vld [vmem:[%s2950_s1 + $0x158] sm:$0xff]  }
  0x16   :  { %1929 = vmatprep.subr.bf16.mxu1 %v2196_v21  ;;  %v2245_v62 = vld [vmem:[%s2950_s1 + $0x120] sm:$0xff]   ;;  %v2249_v1 = vld [vmem:[%s2951_s0 + $0x12c] ss:$36 sps:$4 sm:$0xff]   ;;  %v2254_v5 = vld [vmem:[%s2950_s1 + $0x1d8] sm:$0xff]  }
  0x17   :  { %v2246_v63 = vld [vmem:[%s2950_s1 + $0x1a0] sm:$0xff]   ;;  %v2252_v4 = vld [vmem:[%s2951_s0 + $0x128] ss:$36 sps:$4 sm:$0xff]   ;;  %v2255_v6 = vld [vmem:[%s2950_s1 + $0x118] sm:$0xff]  }
  0x18   :  { %1866 = vmatpush3.bf16.msra.mxu0 %v2197_v22  ;;  %v2247_v0 = vld [vmem:[%s2951_s0 + $0x124] ss:$36 sps:$4 sm:$0xff]   ;;  %v2256_v7 = vld [vmem:[%s2950_s1 + $0x198] sm:$0xff]   ;;  %v2257_v8 = vld [vmem:[%s2951_s0 + $0x16c] ss:$36 sps:$4 sm:$0xff]  }
  0x19   :  { %1930 = vmatpush3.bf16.msra.mxu1 %v2198_v23  ;;  %1867 = vmatprep.subr.bf16.mxu0 %v2199_v24  ;;  %v2251_v2 = vld [vmem:[%s2951_s0 + $0x120] ss:$36 sps:$4 sm:$0xff]   ;;  %v2259_v9 = vld [vmem:[%s2951_s0 + $0x174] ss:$36 sps:$4 sm:$0xff]   ;;  %v2261_v12 = vld [vmem:[%s2951_s0 + $0x168] ss:$36 sps:$4 sm:$0xff]  }
  0x1a   :  { %1931 = vmatprep.subr.bf16.mxu1 %v2200_v25  ;;  %v2263_v10 = vld [vmem:[%s2950_s1 + $0x150] sm:$0xff]   ;;  %v2269_v17 = vld [vmem:[%s2951_s0 + $0x1bc] ss:$36 sps:$4 sm:$0xff]   ;;  %v2273_v18 = vld [vmem:[%s2950_s1 + $0x148] sm:$0xff]  }
  0x1b   :  { %v2264_v11 = vld [vmem:[%s2950_s1 + $0x1d0] sm:$0xff]   ;;  %v2274_v19 = vld [vmem:[%s2950_s1 + $0x1c8] sm:$0xff]   ;;  %v2272_v23 = vld [vmem:[%s2951_s0 + $0x1b8] ss:$36 sps:$4 sm:$0xff]  }
  0x1c   :  { %1868 = vmatpush3.bf16.msra.mxu0 %v2201_v26  ;;  %v2265_v13 = vld [vmem:[%s2950_s1 + $0x110] sm:$0xff]   ;;  %v2275_v20 = vld [vmem:[%s2950_s1 + $0x108] sm:$0xff]   ;;  %v2277_v24 = vld [vmem:[%s2951_s0 + $0x1fc] ss:$36 sps:$4 sm:$0xff]  }
  0x1d   :  { %1932 = vmatpush3.bf16.msra.mxu1 %v2202_v27  ;;  %1869 = vmatprep.subr.bf16.mxu0 %v2203_v28  ;;  %v2266_v14 = vld [vmem:[%s2950_s1 + $0x190] sm:$0xff]   ;;  %v2276_v21 = vld [vmem:[%s2950_s1 + $0x188] sm:$0xff]   ;;  %v2283_v26 = vld [vmem:[%s2950_s1 + $0x140] sm:$0xff]  }
  0x1e   :  { %1933 = vmatprep.subr.bf16.mxu1 %v2204_v29  ;;  %v2262_v15 = vld [vmem:[%s2951_s0 + $0x170] ss:$36 sps:$4 sm:$0xff]   ;;  %v2279_v25 = vld [vmem:[%s2951_s0 + $0x204] ss:$36 sps:$4 sm:$0xff]  }
  0x1f   :  { %v2267_v16 = vld [vmem:[%s2951_s0 + $0x1b4] ss:$36 sps:$4 sm:$0xff]   ;;  %v2284_v27 = vld [vmem:[%s2950_s1 + $0x1c0] sm:$0xff]  }
  0x20   :  { %1870 = vmatpush3.bf16.msra.mxu0 %v2205_v30  ;;  %v2271_v22 = vld [vmem:[%s2951_s0 + $0x1b0] ss:$36 sps:$4 sm:$0xff]   ;;  %v2285_v28 = vld [vmem:[%s2950_s1 + $0x100] sm:$0xff]   ;;  %v2281_v30 = vld [vmem:[%s2951_s0 + $0x1f8] ss:$36 sps:$4 sm:$0xff]  }
  0x21   :  { %1934 = vmatpush3.bf16.msra.mxu1 %v2206_v31  ;;  %1983 = vmatprep.subr.bf16.mxu0 %v2213_v36  ;;  %v2286_v29 = vld [vmem:[%s2950_s1 + $0x180] sm:$0xff]   ;;  %v2289_v33 = vld [vmem:[%s2951_s0 + $0x14] ss:$36 sps:$4 sm:$0xff]  }
  0x22   :  { %2047 = vmatprep.subr.bf16.mxu1 %v2214_v37  ;;  %v2282_v31 = vld [vmem:[%s2951_s0 + $0x200] ss:$36 sps:$4 sm:$0xff]   ;;  %v2287_v35 = vld [vmem:[%s2951_s0 + $0x10] ss:$36 sps:$4 sm:$0xff]   ;;  %v2290_v36 = vld [vmem:[%s2951_s0 + $0x18] ss:$36 sps:$4 sm:$0xff]  }
  0x23   :  { %1079 = vmatmul.mubr.bf16.vlgmr.msra.gmra.mxu0 %v2207_v32  ;;  %v2293_v32 = vld [vmem:[%s2950_s1 + $0x238] sm:$0xff]  }
  0x24   :  { %1176 = vmatmul.mubr.bf16.vlgmr.msra.gmra.mxu1 %v2210_v34  ;;  %1984 = vmatpush3.bf16.msra.mxu0 %v2215_v38  ;;  %v2292_v34 = vld [vmem:[%s2951_s0 + $0x1c] ss:$36 sps:$4 sm:$0xff]   ;;  %v2296_v38 = vld [vmem:[%s2951_s0 + $0x64] ss:$36 sps:$4 sm:$0xff]  }
  0x25   :  { %2048 = vmatpush3.bf16.msra.mxu1 %v2216_v39  ;;  %1086 = vmatprep.mubr.bf16.mxu0 %v2217_v40  ;;  %v2294_v37 = vld [vmem:[%s2951_s0 + $0x5c] ss:$36 sps:$4 sm:$0xff]   ;;  %v2300_v39 = vld [vmem:[%s2950_s1 + $0x230] sm:$0xff]   ;;  %v2307_v40 = vld [vmem:[%s2950_s1 + $0x228] sm:$0xff]  }
  0x26   :  { %1183 = vmatprep.mubr.bf16.mxu1 %v2219_v41  ;;  %1985 = vmatprep.subr.bf16.mxu0 %v2223_v44  ;;  %v2298_v41 = vld [vmem:[%s2951_s0 + $0x58] ss:$36 sps:$4 sm:$0xff]   ;;  %v2303_v44 = vld [vmem:[%s2951_s0 + $0xac] ss:$36 sps:$4 sm:$0xff]  }
  0x27   :  { %2049 = vmatprep.subr.bf16.mxu1 %v2224_v45  ;;  %v2314_v45 = vld [vmem:[%s2950_s1 + $0x220] sm:$0xff]  }
  0x28   :  { %1986 = vmatpush3.bf16.msra.mxu0 %v2225_v46  ;;  %v2321_v46 = vld [vmem:[%s2950_s1 + $0x218] sm:$0xff]  }
  0x29   :  { %2050 = vmatpush3.bf16.msra.mxu1 %v2226_v47  ;;  %1987 = vmatprep.subr.bf16.mxu0 %v2233_v52  ;;  %v2305_v47 = vld [vmem:[%s2951_s0 + $0xa0] ss:$36 sps:$4 sm:$0xff]   ;;  %v2312_v52 = vld [vmem:[%s2951_s0 + $0xe8] ss:$36 sps:$4 sm:$0xff]  }
  0x2a   :  { %2051 = vmatprep.subr.bf16.mxu1 %v2234_v53  ;;  %v2335_v53 = vld [vmem:[%s2950_s1 + $0x208] sm:$0xff]  }
  0x2b   :  { %1087 = vmatmul.mubr.bf16.gmra.mxu0 %v2221_v42  ;;  %v2299_v42 = vld [vmem:[%s2951_s0 + $0x60] ss:$36 sps:$4 sm:$0xff]  }
  0x2c   :  { %1184 = vmatmul.mubr.bf16.gmra.mxu1 %v2222_v43  ;;  %1094 = vmatprep.mubr.bf16.mxu0 %v2227_v48  ;;  %v2301_v43 = vld [vmem:[%s2951_s0 + $0xa4] ss:$36 sps:$4 sm:$0xff]  }
  0x2d   :  { %1191 = vmatprep.mubr.bf16.mxu1 %v2229_v49  ;;  %1988 = vmatpush3.bf16.msra.mxu0 %v2235_v54  ;;  %v2306_v48 = vld [vmem:[%s2951_s0 + $0xa8] ss:$36 sps:$4 sm:$0xff]   ;;  %v2313_v54 = vld [vmem:[%s2951_s0 + $0xf0] ss:$36 sps:$4 sm:$0xff]  }
  0x2e   :  { %2052 = vmatpush3.bf16.msra.mxu1 %v2236_v55  ;;  %1989 = vmatprep.subr.bf16.mxu0 %v2243_v60  ;;  %v2308_v49 = vld [vmem:[%s2951_s0 + $0xec] ss:$36 sps:$4 sm:$0xff]   ;;  %v2315_v55 = vld [vmem:[%s2951_s0 + $0x134] ss:$36 sps:$4 sm:$0xff]   ;;  %v2322_v60 = vld [vmem:[%s2951_s0 + $0x17c] ss:$36 sps:$4 sm:$0xff]  }
  0x2f   :  { %2053 = vmatprep.subr.bf16.mxu1 %v2244_v61  ;;  %v2324_v61 = vld [vmem:[%s2951_s0 + $0x184] ss:$36 sps:$4 sm:$0xff]  }
  0x31   :  { %1990 = vmatpush3.bf16.msra.mxu0 %v2245_v62  ;;  %v2326_v62 = vld [vmem:[%s2951_s0 + $0x178] ss:$36 sps:$4 sm:$0xff]  }
  0x32   :  { %2054 = vmatpush3.bf16.msra.mxu1 %v2246_v63  ;;  %1991 = vmatprep.subr.bf16.mxu0 %v2253_v3  ;;  %v2327_v63 = vld [vmem:[%s2951_s0 + $0x180] ss:$36 sps:$4 sm:$0xff]   ;;  %v2334_v3 = vld [vmem:[%s2951_s0 + $0x1c8] ss:$36 sps:$4 sm:$0xff]  }
  0x33   :  { %1095 = vmatmul.mubr.bf16.gmra.mxu0 %v2231_v50  ;;  %2055 = vmatprep.subr.bf16.mxu1 %v2254_v5  ;;  %v2310_v50 = vld [vmem:[%s2951_s0 + $0xf4] ss:$36 sps:$4 sm:$0xff]  }
  0x34   :  { %1192 = vmatmul.mubr.bf16.gmra.mxu1 %v2232_v51  ;;  %1102 = vmatprep.mubr.bf16.mxu0 %v2237_v56  ;;  %v2328_v51 = vld [vmem:[%s2950_s1 + $0x210] sm:$0xff]   ;;  %v2317_v56 = vld [vmem:[%s2951_s0 + $0x13c] ss:$36 sps:$4 sm:$0xff]  }
  0x35   :  { %1199 = vmatprep.mubr.bf16.mxu1 %v2239_v57  ;;  %1992 = vmatpush3.bf16.msra.mxu0 %v2255_v6  ;;  %v2342_v57 = vld [vmem:[%s2950_s1 + $0x200] sm:$0xff]   ;;  %v2338_v5 = vld [vmem:[%s2951_s0 + $0x214] ss:$36 sps:$4 sm:$0xff]   ;;  %v2340_v6 = vld [vmem:[%s2951_s0 + $0x208] ss:$36 sps:$4 sm:$0xff]  }
  0x36   :  { %2056 = vmatpush3.bf16.msra.mxu1 %v2256_v7  ;;  %1993 = vmatprep.subr.bf16.mxu0 %v2263_v10  ;;  %v2341_v7 = vld [vmem:[%s2951_s0 + $0x210] ss:$36 sps:$4 sm:$0xff]   ;;  %v2345_v10 = vld [vmem:[%s2951_s0 + $0x68] ss:$36 sps:$4 sm:$0xff]  }
  0x37   :  { %2057 = vmatprep.subr.bf16.mxu1 %v2264_v11  ;;  %v2346_v11 = vld [vmem:[%s2951_s0 + $0x188] ss:$36 sps:$4 sm:$0xff]  }
  0x39   :  { %1994 = vmatpush3.bf16.msra.mxu0 %v2265_v13  ;;  %v2348_v13 = vld [vmem:[%s2951_s0 + $0x1d0] ss:$36 sps:$4 sm:$0xff]  }
  0x3a   :  { %2058 = vmatpush3.bf16.msra.mxu1 %v2266_v14  ;;  %1995 = vmatprep.subr.bf16.mxu0 %v2273_v18  ;;  %v2349_v14 = vld [vmem:[%s2951_s0 + $0xf8] ss:$36 sps:$4 sm:$0xff]   ;;  %v2806_v18 = vld [vmem:[%s2952_s2] ss:$0 sm:$0xff] }
  0x3b   :  { %1103 = vmatmul.mubr.bf16.gmra.mxu0 %v2241_v58  ;;  %2059 = vmatprep.subr.bf16.mxu1 %v2274_v19  ;;  %v2319_v58 = vld [vmem:[%s2951_s0 + $0x130] ss:$36 sps:$4 sm:$0xff]  }
  0x3c   :  { %1200 = vmatmul.mubr.bf16.gmra.mxu1 %v2242_v59  ;;  %1110 = vmatprep.mubr.bf16.mxu0 %v2247_v0  ;;  %v2320_v59 = vld [vmem:[%s2951_s0 + $0x138] ss:$36 sps:$4 sm:$0xff]   ;;  %v2329_v0 = vld [vmem:[%s2951_s0 + $0x1c4] ss:$36 sps:$4 sm:$0xff]  }
  0x3d   :  { %1207 = vmatprep.mubr.bf16.mxu1 %v2249_v1  ;;  %1996 = vmatpush3.bf16.msra.mxu0 %v2275_v20  ;;  %v2331_v1 = vld [vmem:[%s2951_s0 + $0x1cc] ss:$36 sps:$4 sm:$0xff]  }
  0x3e   :  { %2060 = vmatpush3.bf16.msra.mxu1 %v2276_v21  ;;  %1997 = vmatprep.subr.bf16.mxu0 %v2283_v26 }
  0x3f   :  { %2061 = vmatprep.subr.bf16.mxu1 %v2284_v27 }
  0x41   :  { %1998 = vmatpush3.bf16.msra.mxu0 %v2285_v28 }
  0x42   :  { %2062 = vmatpush3.bf16.msra.mxu1 %v2286_v29  ;;  %2127 = vmatprep.subr.bf16.mxu0 %v2293_v32 }
  0x43   :  { %1111 = vmatmul.mubr.bf16.gmra.mxu0 %v2251_v2  ;;  %2159 = vmatprep.subr.bf16.mxu1 %v2293_v32  ;;  %v2333_v2 = vld [vmem:[%s2951_s0 + $0x1c0] ss:$36 sps:$4 sm:$0xff]  }
  0x44   :  { %1208 = vmatmul.mubr.bf16.gmra.mxu1 %v2252_v4  ;;  %1118 = vmatprep.mubr.bf16.mxu0 %v2257_v8  ;;  %v2336_v4 = vld [vmem:[%s2951_s0 + $0x20c] ss:$36 sps:$4 sm:$0xff]   ;;  %v2343_v8 = vld [vmem:[%s2951_s0 + $0x20] ss:$36 sps:$4 sm:$0xff]  }
  0x45   :  { %1215 = vmatprep.mubr.bf16.mxu1 %v2259_v9  ;;  %v2344_v9 = vld [vmem:[%s2951_s0 + $0x140] ss:$36 sps:$4 sm:$0xff]  }
  0x4b   :  { %1119 = vmatmul.mubr.bf16.gmra.mxu0 %v2261_v12  ;;  %v2347_v12 = vld [vmem:[%s2951_s0 + $0xb0] ss:$36 sps:$4 sm:$0xff]  }
  0x4c   :  { %1216 = vmatmul.mubr.bf16.gmra.mxu1 %v2262_v15  ;;  %1126 = vmatprep.mubr.bf16.mxu0 %v2267_v16  ;;  %v2350_v15 = vld [vmem:[%s2951_s0 + $0x218] ss:$36 sps:$4 sm:$0xff]  }
  0x4d   :  { %1223 = vmatprep.mubr.bf16.mxu1 %v2269_v17 }
  0x53   :  { %1127 = vmatmul.mubr.bf16.gmra.mxu0 %v2271_v22 }
  0x54   :  { %1224 = vmatmul.mubr.bf16.gmra.mxu1 %v2272_v23  ;;  %1134 = vmatprep.mubr.bf16.mxu0 %v2277_v24 }
  0x55   :  { %1231 = vmatprep.mubr.bf16.mxu1 %v2279_v25 }
  0x5b   :  { %1135 = vmatmul.mubr.bf16.gmra.mxu0 %v2281_v30 }
  0x5c   :  { %1232 = vmatmul.mubr.bf16.gmra.mxu1 %v2282_v31  ;;  %1272 = vmatprep.mubr.bf16.mxu0 %v2289_v33 }
  0x5d   :  { %1369 = vmatprep.mubr.bf16.mxu1 %v2292_v34 }
  0x63   :  { %1273 = vmatmul.mubr.bf16.vlgmr.msra.gmra.mxu0 %v2287_v35 }
  0x64   :  { %1370 = vmatmul.mubr.bf16.vlgmr.msra.gmra.mxu1 %v2290_v36  ;;  %2128 = vmatpush3.bf16.msra.mxu0 %v2293_v32 }
  0x65   :  { %2167 = vmatpush3.bf16.msra.mxu1 %v2293_v32  ;;  %1280 = vmatprep.mubr.bf16.mxu0 %v2294_v37 }
  0x66   :  { %1377 = vmatprep.mubr.bf16.mxu1 %v2296_v38  ;;  %2129 = vmatprep.subr.bf16.mxu0 %v2300_v39 }
  0x67   :  { %2160 = vmatprep.subr.bf16.mxu1 %v2300_v39 }
  0x68   :  { %2130 = vmatpush3.bf16.msra.mxu0 %v2300_v39 }
  0x69   :  { %2168 = vmatpush3.bf16.msra.mxu1 %v2300_v39  ;;  %2131 = vmatprep.subr.bf16.mxu0 %v2307_v40 }
  0x6a   :  { %2161 = vmatprep.subr.bf16.mxu1 %v2307_v40 }
  0x6b   :  { %1281 = vmatmul.mubr.bf16.gmra.mxu0 %v2298_v41 }
  0x6c   :  { %1378 = vmatmul.mubr.bf16.gmra.mxu1 %v2299_v42  ;;  %1288 = vmatprep.mubr.bf16.mxu0 %v2301_v43 }
  0x6d   :  { %1385 = vmatprep.mubr.bf16.mxu1 %v2303_v44  ;;  %2132 = vmatpush3.bf16.msra.mxu0 %v2307_v40 }
  0x6e   :  { %2169 = vmatpush3.bf16.msra.mxu1 %v2307_v40  ;;  %2133 = vmatprep.subr.bf16.mxu0 %v2314_v45 }
  0x6f   :  { %2162 = vmatprep.subr.bf16.mxu1 %v2314_v45 }
  0x71   :  { %2134 = vmatpush3.bf16.msra.mxu0 %v2314_v45 }
  0x72   :  { %2170 = vmatpush3.bf16.msra.mxu1 %v2314_v45  ;;  %2135 = vmatprep.subr.bf16.mxu0 %v2321_v46 }
  0x73   :  { %1289 = vmatmul.mubr.bf16.gmra.mxu0 %v2305_v47  ;;  %2163 = vmatprep.subr.bf16.mxu1 %v2321_v46 }
  0x74   :  { %1386 = vmatmul.mubr.bf16.gmra.mxu1 %v2306_v48  ;;  %1296 = vmatprep.mubr.bf16.mxu0 %v2308_v49 }
  0x75   :  { %1393 = vmatprep.mubr.bf16.mxu1 %v2310_v50  ;;  %2136 = vmatpush3.bf16.msra.mxu0 %v2321_v46 }
  0x76   :  { %2171 = vmatpush3.bf16.msra.mxu1 %v2321_v46  ;;  %2137 = vmatprep.subr.bf16.mxu0 %v2328_v51 }
  0x77   :  { %2164 = vmatprep.subr.bf16.mxu1 %v2328_v51 }
  0x79   :  { %2138 = vmatpush3.bf16.msra.mxu0 %v2328_v51 }
  0x7a   :  { %2172 = vmatpush3.bf16.msra.mxu1 %v2328_v51  ;;  %2139 = vmatprep.subr.bf16.mxu0 %v2335_v53 }
  0x7b   :  { %1297 = vmatmul.mubr.bf16.gmra.mxu0 %v2312_v52  ;;  %2165 = vmatprep.subr.bf16.mxu1 %v2335_v53 }
  0x7c   :  { %1394 = vmatmul.mubr.bf16.gmra.mxu1 %v2313_v54  ;;  %1304 = vmatprep.mubr.bf16.mxu0 %v2315_v55 }
  0x7d   :  { %1401 = vmatprep.mubr.bf16.mxu1 %v2317_v56  ;;  %2140 = vmatpush3.bf16.msra.mxu0 %v2335_v53 }
  0x7e   :  { %2173 = vmatpush3.bf16.msra.mxu1 %v2335_v53  ;;  %2141 = vmatprep.subr.bf16.mxu0 %v2342_v57 }
  0x7f   :  { %2166 = vmatprep.subr.bf16.mxu1 %v2342_v57 }
  0x81   :  { %2142 = vmatpush3.bf16.msra.mxu0 %v2342_v57 }
  0x82   :  { %2174 = vmatpush3.bf16.msra.mxu1 %v2342_v57 }
  0x83   :  { %1305 = vmatmul.mubr.bf16.gmra.mxu0 %v2319_v58 }
  0x84   :  { %1402 = vmatmul.mubr.bf16.gmra.mxu1 %v2320_v59  ;;  %1312 = vmatprep.mubr.bf16.mxu0 %v2322_v60 }
  0x85   :  { %1409 = vmatprep.mubr.bf16.mxu1 %v2324_v61 }
  0x8b   :  { %1313 = vmatmul.mubr.bf16.gmra.mxu0 %v2326_v62 }
  0x8c   :  { %1410 = vmatmul.mubr.bf16.gmra.mxu1 %v2327_v63  ;;  %1320 = vmatprep.mubr.bf16.mxu0 %v2329_v0 }
  0x8d   :  { %1417 = vmatprep.mubr.bf16.mxu1 %v2331_v1 }
  0x93   :  { %1321 = vmatmul.mubr.bf16.gmra.mxu0 %v2333_v2 }
  0x94   :  { %1418 = vmatmul.mubr.bf16.gmra.mxu1 %v2334_v3  ;;  %1328 = vmatprep.mubr.bf16.mxu0 %v2336_v4 }
  0x95   :  { %1425 = vmatprep.mubr.bf16.mxu1 %v2338_v5 }
  0x9b   :  { %1329 = vmatmul.mubr.bf16.gmra.mxu0 %v2340_v6 }
  0x9c   :  { %1426 = vmatmul.mubr.bf16.gmra.mxu1 %v2341_v7  ;;  %2143 = vmatprep.mubr.bf16.mxu0 %v2343_v8 }
  0x9d   :  { %2151 = vmatprep.mubr.bf16.mxu1 %v2344_v9 }
  0xa3   :  { %2144 = vmatmul.mubr.bf16.vlgmr.msra.gmra.mxu0 %v2345_v10 }
  0xa4   :  { %2152 = vmatmul.mubr.bf16.vlgmr.msra.gmra.mxu1 %v2346_v11  ;;  %2147 = vmatprep.mubr.bf16.mxu0 %v2347_v12 }
  0xa5   :  { %2155 = vmatprep.mubr.bf16.mxu1 %v2348_v13 }
  0xab   :  { %2148 = vmatmul.mubr.bf16.gmra.mxu0 %v2349_v14 }
  0xac   :  { %2156 = vmatmul.mubr.bf16.gmra.mxu1 %v2350_v15 }
  0xe3   :  { %v1871_v16 = vpop.f32.mrf.mxu0 }
  0xe4   :  { %v1935_v17 = vpop.f32.mrf.mxu1 }
  0xe5   :  { %v1872_v19 = vpop.f32.mrf.mxu0 }
  0xe6   :  { %v1873_v20 = vadd.f32 %v1872_v19, %v1871_v16  ;;  %v1936_v21 = vpop.f32.mrf.mxu1 }
  0xe7   :  { %v1937_v22 = vadd.f32 %v1936_v21, %v1935_v17  ;;  %v1874_v23 = vpop.f32.mrf.mxu0 }
  0xe8   :  { %v1081_v24 = vadd.f32 %v1873_v20, %v2806_v18  ;;  %v1938_v25 = vpop.f32.mrf.mxu1 }
  0xe9   :  { %v1875_v26 = vpop.f32.mrf.mxu0 }
  0xea   :  { %v2809_v27 = vadd.f32 %v1937_v22, %v1081_v24  ;;  %v1876_v28 = vadd.f32 %v1875_v26, %v1874_v23  ;;  %v1939_v29 = vpop.f32.mrf.mxu1 }
  0xeb   :  { %v1940_v30 = vadd.f32 %v1939_v29, %v1938_v25  ;;  %v1877_v31 = vpop.f32.mrf.mxu0 }
  0xec   :  { %v1084_v32 = vadd.f32 %v1876_v28, %v2806_v18  ;;  %v1941_v33 = vpop.f32.mrf.mxu1 }
  0xed   :  { %v1878_v34 = vpop.f32.mrf.mxu0 }
  0xee   :  { %v2812_v35 = vadd.f32 %v1940_v30, %v1084_v32  ;;  %v1879_v36 = vadd.f32 %v1878_v34, %v1877_v31  ;;  %v1942_v37 = vpop.f32.mrf.mxu1 }
  0xef   :  { %v1943_v38 = vadd.f32 %v1942_v37, %v1941_v33  ;;  %v1880_v39 = vpop.f32.mrf.mxu0 }
  0xf0   :  { %v1089_v40 = vadd.f32 %v1879_v36, %v2806_v18  ;;  %v1944_v41 = vpop.f32.mrf.mxu1 }
  0xf1   :  { %v1881_v42 = vpop.f32.mrf.mxu0 }
  0xf2   :  { %v2815_v43 = vadd.f32 %v1943_v38, %v1089_v40  ;;  %v1882_v44 = vadd.f32 %v1881_v42, %v1880_v39  ;;  %v1945_v45 = vpop.f32.mrf.mxu1 }
  0xf3   :  { %v1946_v46 = vadd.f32 %v1945_v45, %v1944_v41  ;;  %v1883_v47 = vpop.f32.mrf.mxu0 }
  0xf4   :  { %v1092_v48 = vadd.f32 %v1882_v44, %v2806_v18  ;;  %v1947_v49 = vpop.f32.mrf.mxu1 }
  0xf5   :  { %v1884_v50 = vpop.f32.mrf.mxu0 }
  0xf6   :  { %v2818_v51 = vadd.f32 %v1946_v46, %v1092_v48  ;;  %v1885_v52 = vadd.f32 %v1884_v50, %v1883_v47  ;;  %v1948_v53 = vpop.f32.mrf.mxu1 }
  0xf7   :  { %v1949_v54 = vadd.f32 %v1948_v53, %v1947_v49  ;;  %v1886_v55 = vpop.f32.mrf.mxu0 }
  0xf8   :  { %v1097_v56 = vadd.f32 %v1885_v52, %v2806_v18  ;;  %v1950_v57 = vpop.f32.mrf.mxu1 }
  0xf9   :  { %v1887_v58 = vpop.f32.mrf.mxu0 }
  0xfa   :  { %v2821_v59 = vadd.f32 %v1949_v54, %v1097_v56  ;;  %v1888_v60 = vadd.f32 %v1887_v58, %v1886_v55  ;;  %v1951_v61 = vpop.f32.mrf.mxu1 }
  0xfb   :  { %v1952_v62 = vadd.f32 %v1951_v61, %v1950_v57  ;;  %v1889_v63 = vpop.f32.mrf.mxu0 }
  0xfc   :  { %v1100_v0 = vadd.f32 %v1888_v60, %v2806_v18  ;;  %v1953_v1 = vpop.f32.mrf.mxu1 }
  0xfd   :  { %v1890_v2 = vpop.f32.mrf.mxu0 }
  0xfe   :  { %v2824_v3 = vadd.f32 %v1952_v62, %v1100_v0  ;;  %v1891_v4 = vadd.f32 %v1890_v2, %v1889_v63  ;;  %v1954_v5 = vpop.f32.mrf.mxu1 }
  0xff   :  { %v1955_v6 = vadd.f32 %v1954_v5, %v1953_v1  ;;  %v1892_v7 = vpop.f32.mrf.mxu0 }
 0x100   :  { %2954 = vst [vmem:[#allocation2_spill] sm:$0xff] %v2824_v3  ;;  %v1105_v8 = vadd.f32 %v1891_v4, %v2806_v18  ;;  %v1956_v9 = vpop.f32.mrf.mxu1 }
 0x101   :  { %v1893_v10 = vpop.f32.mrf.mxu0 }
 0x102   :  { %v2827_v11 = vadd.f32 %v1955_v6, %v1105_v8  ;;  %v1894_v12 = vadd.f32 %v1893_v10, %v1892_v7  ;;  %v1957_v13 = vpop.f32.mrf.mxu1 }
 0x103   :  { %v1958_v14 = vadd.f32 %v1957_v13, %v1956_v9  ;;  %v1895_v15 = vpop.f32.mrf.mxu0 }
 0x104   :  { %v1108_v16 = vadd.f32 %v1894_v12, %v2806_v18  ;;  %v1959_v17 = vpop.f32.mrf.mxu1 }
 0x105   :  { %v1896_v19 = vpop.f32.mrf.mxu0 }
 0x106   :  { %v2830_v20 = vadd.f32 %v1958_v14, %v1108_v16  ;;  %v1897_v21 = vadd.f32 %v1896_v19, %v1895_v15  ;;  %v1960_v22 = vpop.f32.mrf.mxu1 }
 0x107   :  { %v1961_v23 = vadd.f32 %v1960_v22, %v1959_v17  ;;  %v1898_v24 = vpop.f32.mrf.mxu0 }
 0x108   :  { %2955 = vst [vmem:[#allocation3_spill] sm:$0xff] %v2830_v20  ;;  %v1113_v25 = vadd.f32 %v1897_v21, %v2806_v18  ;;  %v1962_v26 = vpop.f32.mrf.mxu1 }
 0x109   :  { %v1899_v28 = vpop.f32.mrf.mxu0 }
 0x10a   :  { %v2833_v29 = vadd.f32 %v1961_v23, %v1113_v25  ;;  %v1900_v30 = vadd.f32 %v1899_v28, %v1898_v24  ;;  %v1963_v31 = vpop.f32.mrf.mxu1 }
 0x10b   :  { %v1964_v32 = vadd.f32 %v1963_v31, %v1962_v26  ;;  %v1901_v33 = vpop.f32.mrf.mxu0 }
 0x10c   :  { %v1116_v34 = vadd.f32 %v1900_v30, %v2806_v18  ;;  %v1965_v36 = vpop.f32.mrf.mxu1 }
 0x10d   :  { %v1902_v37 = vpop.f32.mrf.mxu0 }
 0x10e   :  { %v2836_v38 = vadd.f32 %v1964_v32, %v1116_v34  ;;  %v1903_v39 = vadd.f32 %v1902_v37, %v1901_v33  ;;  %v1966_v40 = vpop.f32.mrf.mxu1 }
 0x10f   :  { %v1967_v41 = vadd.f32 %v1966_v40, %v1965_v36  ;;  %v1904_v42 = vpop.f32.mrf.mxu0 }
 0x110   :  { %2956 = vst [vmem:[#allocation4_spill] sm:$0xff] %v2836_v38  ;;  %v1121_v44 = vadd.f32 %v1903_v39, %v2806_v18  ;;  %v1968_v45 = vpop.f32.mrf.mxu1 }
 0x111   :  { %v1905_v46 = vpop.f32.mrf.mxu0 }
 0x112   :  { %v2839_v47 = vadd.f32 %v1967_v41, %v1121_v44  ;;  %v1906_v48 = vadd.f32 %v1905_v46, %v1904_v42  ;;  %v1969_v49 = vpop.f32.mrf.mxu1 }
 0x113   :  { %v1970_v50 = vadd.f32 %v1969_v49, %v1968_v45  ;;  %v1907_v52 = vpop.f32.mrf.mxu0 }
 0x114   :  { %v1124_v53 = vadd.f32 %v1906_v48, %v2806_v18  ;;  %v1971_v54 = vpop.f32.mrf.mxu1 }
 0x115   :  { %v1908_v55 = vpop.f32.mrf.mxu0 }
 0x116   :  { %v2842_v56 = vadd.f32 %v1970_v50, %v1124_v53  ;;  %v1909_v57 = vadd.f32 %v1908_v55, %v1907_v52  ;;  %v1972_v58 = vpop.f32.mrf.mxu1 }
 0x117   :  { %v1973_v60 = vadd.f32 %v1972_v58, %v1971_v54  ;;  %v1910_v61 = vpop.f32.mrf.mxu0 }
 0x118   :  { %2957 = vst [vmem:[#allocation5_spill] sm:$0xff] %v2842_v56  ;;  %v1129_v62 = vadd.f32 %v1909_v57, %v2806_v18  ;;  %v1974_v63 = vpop.f32.mrf.mxu1 }
 0x119   :  { %v1911_v0 = vpop.f32.mrf.mxu0 }
 0x11a   :  { %v2845_v1 = vadd.f32 %v1973_v60, %v1129_v62  ;;  %v1912_v2 = vadd.f32 %v1911_v0, %v1910_v61  ;;  %v1975_v4 = vpop.f32.mrf.mxu1 }
 0x11b   :  { %v1976_v5 = vadd.f32 %v1975_v4, %v1974_v63  ;;  %v1913_v6 = vpop.f32.mrf.mxu0 }
 0x11c   :  { %2958 = vst [vmem:[#allocation6_spill] sm:$0xff] %v2845_v1  ;;  %v1132_v7 = vadd.f32 %v1912_v2, %v2806_v18  ;;  %v1977_v8 = vpop.f32.mrf.mxu1 }
 0x11d   :  { %v1914_v9 = vpop.f32.mrf.mxu0 }
 0x11e   :  { %v2848_v10 = vadd.f32 %v1976_v5, %v1132_v7  ;;  %v1915_v12 = vadd.f32 %v1914_v9, %v1913_v6  ;;  %v1978_v13 = vpop.f32.mrf.mxu1 }
 0x11f   :  { %v1979_v14 = vadd.f32 %v1978_v13, %v1977_v8  ;;  %v1916_v15 = vpop.f32.mrf.mxu0 }
 0x120   :  { %2959 = vst [vmem:[#allocation7_spill] sm:$0xff] %v2848_v10  ;;  %v1137_v16 = vadd.f32 %v1915_v12, %v2806_v18  ;;  %v1980_v17 = vpop.f32.mrf.mxu1 }
 0x121   :  { %v1917_v19 = vpop.f32.mrf.mxu0 }
 0x122   :  { %v2851_v21 = vadd.f32 %v1979_v14, %v1137_v16  ;;  %v1918_v22 = vadd.f32 %v1917_v19, %v1916_v15  ;;  %v1981_v23 = vpop.f32.mrf.mxu1 }
 0x123   :  { %v1982_v24 = vadd.f32 %v1981_v23, %v1980_v17  ;;  %v1999_v25 = vpop.f32.mrf.mxu0 }
 0x124   :  { %2960 = vst [vmem:[#allocation8_spill] sm:$0xff] %v2851_v21  ;;  %v1140_v26 = vadd.f32 %v1918_v22, %v2806_v18  ;;  %v2063_v28 = vpop.f32.mrf.mxu1 }
 0x125   :  { %v2000_v30 = vpop.f32.mrf.mxu0 }
 0x126   :  { %v2854_v31 = vadd.f32 %v1982_v24, %v1140_v26  ;;  %v2001_v32 = vadd.f32 %v2000_v30, %v1999_v25  ;;  %v2064_v33 = vpop.f32.mrf.mxu1 }
 0x127   :  { %v2002_v34 = vpop.f32.mrf.mxu0  ;;  %v2065_v37 = vadd.f32 %v2064_v33, %v2063_v28 }
 0x128   :  { %2961 = vst [vmem:[#allocation9_spill] sm:$0xff] %v2854_v31  ;;  %v1275_v36 = vadd.f32 %v2001_v32, %v2809_v27  ;;  %v2857_v39 = vpop.f32.mrf.mxu1 }
 0x129   :  { %v2003_v40 = vpop.f32.mrf.mxu0 }
 0x12a   :  { %v2859_v41 = vpop.f32.mrf.mxu1  ;;  %v2861_v42 = vadd.f32 %v2065_v37, %v1275_v36  ;;  %v2004_v10 = vadd.f32 %v2003_v40, %v2002_v34 }
 0x12b   :  { %v2005_v44 = vpop.f32.mrf.mxu0 }
 0x12c   :  { %2962 = vst [vmem:[#allocation10_spill] sm:$0xff] %v2861_v42  ;;  %v2069_v45 = vpop.f32.mrf.mxu1  ;;  %v1278_v56 = vadd.f32 %v2004_v10, %v2812_v35 }
 0x12d   :  { %v2006_v18 = vpop.f32.mrf.mxu0 }
 0x12e   :  { %v2070_v46 = vpop.f32.mrf.mxu1  ;;  %v2007_v42 = vadd.f32 %v2006_v18, %v2005_v44  ;;  %v2068_v44 = vadd.f32 %v2859_v41, %v2857_v39 }
 0x12f   :  { %v2008_v48 = vpop.f32.mrf.mxu0  ;;  %v2071_v18 = vadd.f32 %v2070_v46, %v2069_v45 }
 0x130   :  { %v2072_v49 = vpop.f32.mrf.mxu1 }
 0x131   :  { %v2009_v50 = vpop.f32.mrf.mxu0 }
 0x132   :  { %v2073_v52 = vpop.f32.mrf.mxu1  ;;  %v2010_v21 = vadd.f32 %v2009_v50, %v2008_v48 }
 0x133   :  { %v2011_v53 = vpop.f32.mrf.mxu0  ;;  %v2074_v48 = vadd.f32 %v2073_v52, %v2072_v49 }
 0x134   :  { %v2075_v54 = vpop.f32.mrf.mxu1 }
 0x135   :  { %v2012_v55 = vpop.f32.mrf.mxu0 }
 0x136   :  { %v2076_v27 = vpop.f32.mrf.mxu1 }
 0x137   :  { %v2014_v57 = vpop.f32.mrf.mxu0 }
 0x138   :  { %v2863_v58 = vpop.f32.mrf.mxu1 }
 0x139   :  { %v2015_v60 = vpop.f32.mrf.mxu0 }
 0x13a   :  { %v2865_v61 = vpop.f32.mrf.mxu1  ;;  %v2016_v35 = vadd.f32 %v2015_v60, %v2014_v57 }
 0x13b   :  { %v2017_v62 = vpop.f32.mrf.mxu0  ;;  %v2899_v41 = vadd.f32 %v2865_v61, %v2863_v58 }
 0x13c   :  { %v2867_v63 = vpop.f32.mrf.mxu1 }
 0x13d   :  { %v2018_v0 = vpop.f32.mrf.mxu0 }
 0x13e   :  { %v2082_v2 = vpop.f32.mrf.mxu1  ;;  %v2019_v38 = vadd.f32 %v2018_v0, %v2017_v62 }
 0x13f   :  { %v2020_v4 = vpop.f32.mrf.mxu0  ;;  %v2083_v45 = vadd.f32 %v2082_v2, %v2867_v63 }
 0x140   :  { %v2869_v5 = vpop.f32.mrf.mxu1 }
 0x141   :  { %2963 = vst [vmem:[#allocation11_spill] sm:$0xff] %v2869_v5  ;;  %v2021_v6 = vpop.f32.mrf.mxu0 }
 0x142   :  { %v2871_v7 = vpop.f32.mrf.mxu1  ;;  %v2022_v46 = vadd.f32 %v2021_v6, %v2020_v4 }
 0x143   :  { %2964 = vst [vmem:[#allocation12_spill] sm:$0xff] %v2871_v7  ;;  %v2023_v8 = vpop.f32.mrf.mxu0  ;;  %v2013_v7 = vadd.f32 %v2012_v55, %v2011_v53  ;;  %v2077_v55 = vadd.f32 %v2076_v27, %v2075_v54  ;;  %v2971_v27 = vld [vmem:[#allocation5_spill] sm:$0xff] }
 0x144   :  { %v2873_v9 = vpop.f32.mrf.mxu1 }
 0x145   :  { %2965 = vst [vmem:[#allocation13_spill] sm:$0xff] %v2873_v9  ;;  %v2024_v12 = vpop.f32.mrf.mxu0  ;;  %v1291_v34 = vadd.f32 %v2013_v7, %v2821_v59 }
 0x146   :  { %v2088_v13 = vpop.f32.mrf.mxu1  ;;  %v2025_v50 = vadd.f32 %v2024_v12, %v2023_v8 }
 0x147   :  { %v2026_v14 = vpop.f32.mrf.mxu0  ;;  %v2895_v39 = vadd.f32 %v2077_v55, %v1291_v34  ;;  %v2981_v55 = vld [vmem:[#allocation7_spill] sm:$0xff] }
 0x148   :  { %v2090_v15 = vpop.f32.mrf.mxu1  ;;  %v1307_v49 = vadd.f32 %v2025_v50, %v2833_v29 }
 0x149   :  { %v2027_v16 = vpop.f32.mrf.mxu0 }
 0x14a   :  { %v2091_v17 = vpop.f32.mrf.mxu1  ;;  %v2028_v10 = vadd.f32 %v2027_v16, %v2026_v14 }
 0x14b   :  { %v2029_v19 = vpop.f32.mrf.mxu0  ;;  %v2092_v14 = vadd.f32 %v2091_v17, %v2090_v15 }
 0x14c   :  { %v2093_v22 = vpop.f32.mrf.mxu1  ;;  %v2972_v8 = vld [vmem:[#allocation13_spill] sm:$0xff] }
 0x14d   :  { %v2030_v23 = vpop.f32.mrf.mxu0  ;;  %v2089_v12 = vadd.f32 %v2088_v13, %v2972_v8 }
 0x14e   :  { %v2094_v24 = vpop.f32.mrf.mxu1  ;;  %v2031_v40 = vadd.f32 %v2030_v23, %v2029_v19  ;;  %v2973_v23 = vld [vmem:[#allocation3_spill] sm:$0xff] }
 0x14f   :  { %v2032_v25 = vpop.f32.mrf.mxu0  ;;  %v2095_v54 = vadd.f32 %v2094_v24, %v2093_v22  ;;  %v1404_v24 = vadd.f32 %v2089_v12, %v1307_v49 }
 0x150   :  { %v2096_v26 = vpop.f32.mrf.mxu1  ;;  %v1315_v59 = vadd.f32 %v2031_v40, %v2839_v47 }
 0x151   :  { %v2033_v28 = vpop.f32.mrf.mxu0 }
 0x152   :  { %v2097_v30 = vpop.f32.mrf.mxu1  ;;  %v2034_v62 = vadd.f32 %v2033_v28, %v2032_v25  ;;  %v1412_v29 = vadd.f32 %v2095_v54, %v1315_v59  ;;  %v1302_v25 = vadd.f32 %v2022_v46, %v2973_v23  ;;  %v2974_v28 = vld [vmem:[#allocation11_spill] sm:$0xff]  ;;  %v2982_v46 = vld [vmem:[#allocation9_spill] sm:$0xff] }
 0x153   :  { %v2035_v32 = vpop.f32.mrf.mxu0  ;;  %v2098_v63 = vadd.f32 %v2097_v30, %v2096_v26  ;;  %v2978_v30 = vld [vmem:[#allocation8_spill] sm:$0xff] }
 0x154   :  { %v2875_v33 = vpop.f32.mrf.mxu1  ;;  %v1318_v57 = vadd.f32 %v2034_v62, %v2971_v27 }
 0x155   :  { %2966 = vst [vmem:[#allocation14_spill] sm:$0xff] %v2875_v33  ;;  %v2036_v36 = vpop.f32.mrf.mxu0  ;;  %v1283_v33 = vadd.f32 %v2007_v42, %v2815_v43  ;;  %v1299_v43 = vadd.f32 %v2019_v38, %v2827_v11  ;;  %v2969_v38 = vld [vmem:[#allocation2_spill] sm:$0xff] }
 0x156   :  { %v2877_v37 = vpop.f32.mrf.mxu1  ;;  %v2904_v52 = vadd.f32 %v2016_v35, %v2969_v38  ;;  %v2037_v2 = vadd.f32 %v2036_v36, %v2035_v32  ;;  %v1415_v15 = vadd.f32 %v2098_v63, %v1318_v57 }
 0x157   :  { %2967 = vst [vmem:[#allocation15_spill] sm:$0xff] %v2877_v37  ;;  %v2038_v31 = vpop.f32.mrf.mxu0  ;;  %v1286_v37 = vadd.f32 %v2010_v21, %v2818_v51  ;;  %v1375_v51 = vadd.f32 %v2068_v44, %v1278_v56  ;;  %v1380_v7 = vadd.f32 %v2071_v18, %v1283_v33  ;;  %v2970_v56 = vld [vmem:[#allocation4_spill] sm:$0xff]  ;;  %v1396_v16 = vadd.f32 %v2083_v45, %v1299_v43 }
 0x158   :  { %v2879_v1 = vpop.f32.mrf.mxu1  ;;  %v1310_v47 = vadd.f32 %v2028_v10, %v2970_v56  ;;  %v2975_v33 = vld [vmem:[#allocation12_spill] sm:$0xff] }
 0x159   :  { %2968 = vst [vmem:[#allocation16_spill] sm:$0xff] %v2879_v1  ;;  %v2039_v5 = vpop.f32.mrf.mxu0  ;;  %v1383_v19 = vadd.f32 %v2074_v48, %v1286_v37  ;;  %v2086_v37 = vadd.f32 %v2975_v33, %v2974_v28  ;;  %v2980_v48 = vld [vmem:[#allocation6_spill] sm:$0xff] }
 0x15a   :  { %v2881_v20 = vpop.f32.mrf.mxu1  ;;  %v2040_v4 = vadd.f32 %v2039_v5, %v2038_v31  ;;  %v2979_v5 = vld [vmem:[#allocation10_spill] sm:$0xff]  ;;  %v1323_v50 = vadd.f32 %v2037_v2, %v2980_v48 }
 0x15b   :  { %v2041_v9 = vpop.f32.mrf.mxu0 }
 0x15c   :  { %v2884_v3 = vpop.f32.mrf.mxu1  ;;  %v1326_v35 = vadd.f32 %v2040_v4, %v2981_v55  ;;  %v1399_v4 = vadd.f32 %v2086_v37, %v1302_v25  ;;  %v1391_v25 = vadd.f32 %v2899_v41, %v2904_v52 }
 0x15d   :  { %v2042_v1 = vpop.f32.mrf.mxu0 }
 0x15e   :  { %v2106_v53 = vpop.f32.mrf.mxu1  ;;  %v2043_v58 = vadd.f32 %v2042_v1, %v2041_v9  ;;  %v1407_v1 = vadd.f32 %v2092_v14, %v1310_v47  ;;  %v2976_v9 = vld [vmem:[#allocation14_spill] sm:$0xff]  ;;  %v2977_v17 = vld [vmem:[#allocation15_spill] sm:$0xff] }
 0x15f   :  { %v2044_v0 = vpop.f32.mrf.mxu0  ;;  %v2101_v26 = vadd.f32 %v2977_v17, %v2976_v9  ;;  %v2107_v43 = vadd.f32 %v2106_v53, %v2884_v3 }
 0x160   :  { %v2892_v42 = vpop.f32.mrf.mxu1  ;;  %v1331_v31 = vadd.f32 %v2043_v58, %v2978_v30 }
 0x161   :  { %v2045_v21 = vpop.f32.mrf.mxu0  ;;  %v1420_v63 = vadd.f32 %v2101_v26, %v1323_v50 }
 0x162   :  { %v2109_v11 = vpop.f32.mrf.mxu1  ;;  %v2046_v40 = vadd.f32 %v2045_v21, %v2044_v0 }
 0x163   :  { %v2145_v60 = vpop.f32.mrf.mxu0  ;;  %v2110_v12 = vadd.f32 %v2109_v11, %v2892_v42 }
 0x164   :  { %v2153_v61 = vpop.f32.mrf.mxu1  ;;  %v1477_v22 = vadd.f32 %v2145_v60, %v1380_v7  ;;  %v1334_v49 = vadd.f32 %v2046_v40, %v2982_v46  ;;  %v1428_v60 = vadd.f32 %v2107_v43, %v1331_v31 }
 0x165   :  { %v1468_v6 = vpop.f32.mrf.mxu0  ;;  %v1509_v44 = vadd.f32 %v2153_v61, %v1412_v29  ;;  %v2983_v29 = vld [vmem:[#allocation16_spill] sm:$0xff] }
 0x166   :  { %v1500_v34 = vpop.f32.mrf.mxu1  ;;  %v1469_v32 = vadd.f32 %v1468_v6, %v2979_v5  ;;  %v1533_v59 = vmax.f32 %v1477_v22, 0.0  ;;  %v2104_v6 = vadd.f32 %v2881_v20, %v2983_v29  ;;  %v1431_v28 = vadd.f32 %v2110_v12, %v1334_v49 }
 0x167   :  { %v2146_v13 = vpop.f32.mrf.mxu0  ;;  %v1501_v10 = vadd.f32 %v1500_v34, %v1404_v24  ;;  %v1541_v38 = vmax.f32 %v1509_v44, 0.0 }
 0x168   :  { %v1480_v36 = vadd.f32 %v2146_v13, %v1383_v19  ;;  %v2154_v18 = vpop.f32.mrf.mxu1  ;;  %v1531_v54 = vmax.f32 %v1469_v32, 0.0  ;;  %v1423_v34 = vadd.f32 %v2104_v6, %v1326_v35 }
 0x169   :  { %v1512_v62 = vadd.f32 %v2154_v18, %v1415_v15  ;;  %v1471_v0 = vpop.f32.mrf.mxu0  ;;  %v1539_v14 = vmax.f32 %v1501_v10, 0.0 }
 0x16a   :  { %v1534_v21 = vmax.f32 %v1480_v36, 0.0  ;;  %v1472_v7 = vadd.f32 %v1471_v0, %v1375_v51  ;;  %v1503_v45 = vpop.f32.mrf.mxu1 }
 0x16b   :  { %v1542_v56 = vmax.f32 %v1512_v62, 0.0  ;;  %v1504_v47 = vadd.f32 %v1503_v45, %v1407_v1  ;;  %v2149_v19 = vpop.f32.mrf.mxu0 }
 0x16c   :  { %v1816_v27 = vpack.c.bf16 %v1534_v21, %v1533_v59  ;;  %v1532_v57 = vmax.f32 %v1472_v7, 0.0  ;;  %v2157_v8 = vpop.f32.mrf.mxu1  ;;  %v1493_v61 = vadd.f32 %v2149_v19, %v1396_v16 }
 0x16d   :  { %v1836_v58 = vpack.c.bf16 %v1542_v56, %v1541_v38  ;;  %v1540_v3 = vmax.f32 %v1504_v47, 0.0  ;;  %v1484_v53 = vpop.f32.mrf.mxu0  ;;  %v1525_v11 = vadd.f32 %v2157_v8, %v1428_v60 }
 0x16e   :  { %1848 = vst [vmem:[%s2953_s3 + $0x8] sm:$0xff] %v1816_v27   ;;  %v1811_v51 = vpack.c.bf16 %v1532_v57, %v1531_v54  ;;  %v1516_v2 = vpop.f32.mrf.mxu1  ;;  %v1485_v16 = vadd.f32 %v1484_v53, %v2895_v39  ;;  %v1537_v40 = vmax.f32 %v1493_v61, 0.0 }
 0x16f   :  { %1852 = vst [vmem:[%s2953_s3 + $0x28] sm:$0xff] %v1836_v58   ;;  %v1831_v42 = vpack.c.bf16 %v1540_v3, %v1539_v14  ;;  %v2150_v23 = vpop.f32.mrf.mxu0  ;;  %v1517_v20 = vadd.f32 %v1516_v2, %v1420_v63  ;;  %v1545_v1 = vmax.f32 %v1525_v11, 0.0 }
 0x170   :  { %1812 = vst [vmem:[%s2953_s3] sm:$0xff] %v1811_v51   ;;  %v1496_v33 = vadd.f32 %v2150_v23, %v1399_v4  ;;  %v2158_v22 = vpop.f32.mrf.mxu1  ;;  %v1535_v17 = vmax.f32 %v1485_v16, 0.0 }
 0x171   :  { %1851 = vst [vmem:[%s2953_s3 + $0x20] sm:$0xff] %v1831_v42   ;;  %v1528_v37 = vadd.f32 %v2158_v22, %v1431_v28  ;;  %v1487_v24 = vpop.f32.mrf.mxu0  ;;  %v1543_v31 = vmax.f32 %v1517_v20, 0.0 }
 0x172   :  { %v1538_v44 = vmax.f32 %v1496_v33, 0.0  ;;  %v1488_v13 = vadd.f32 %v1487_v24, %v1391_v25  ;;  %v1519_v15 = vpop.f32.mrf.mxu1 }
 0x173   :  { %v1546_v9 = vmax.f32 %v1528_v37, 0.0  ;;  %v1520_v39 = vadd.f32 %v1519_v15, %v1423_v34 }
 0x174   :  { %v1826_v26 = vpack.c.bf16 %v1538_v44, %v1537_v40  ;;  %v1536_v30 = vmax.f32 %v1488_v13, 0.0 }
 0x175   :  { %v1846_v41 = vpack.c.bf16 %v1546_v9, %v1545_v1  ;;  %v1544_v52 = vmax.f32 %v1520_v39, 0.0 }
 0x176   :  { %1850 = vst [vmem:[%s2953_s3 + $0x18] sm:$0xff] %v1826_v26   ;;  %v1821_v5 = vpack.c.bf16 %v1536_v30, %v1535_v17 }
 0x177   :  { %1854 = vst [vmem:[%s2953_s3 + $0x38] sm:$0xff] %v1846_v41   ;;  %v1841_v32 = vpack.c.bf16 %v1544_v52, %v1543_v31 }
 0x178   :  { %1849 = vst [vmem:[%s2953_s3 + $0x10] sm:$0xff] %v1821_v5  }
 0x179   :  { %1853 = vst [vmem:[%s2953_s3 + $0x30] sm:$0xff] %v1841_v32  }

// kernel: resnet_forward.10
= control target key start
LH: loop header
LB: loop body
LE: loop exit
PB: predicated region body
PF: predicated region fallthrough
CT: control target
= control target key end

     0   :  { %s3196_s1 = inlined_call_operand.vmem [shape: bf16[1152,128], index: 1, kind: input, shape index: {}]   ;;  %s3197_s0 = inlined_call_operand.vmem [shape: bf16[128,1152], index: 0, kind: input, shape index: {}]   ;;  %s3198_s2 = inlined_call_operand.vmem [shape: f32[1,128], index: 2, kind: input, shape index: {}]   ;;  %s3199_s3 = inlined_call_operand.vmem [shape: bf16[128,128], index: 3, kind: input, shape index: {}]   ;;  %s3200_s4 = inlined_call_operand.vmem [shape: bf16[128,128], index: 4, kind: output, shape index: {}]  }
   0x1   :  { %v2265_v0 = vld [vmem:[%s3196_s1 + $0x78] sm:$0xff]   ;;  %v2269_v4 = vld [vmem:[%s3196_s1 + $0x70] sm:$0xff]   ;;  %v2273_v8 = vld [vmem:[%s3196_s1 + $0x68] sm:$0xff]  }
   0x2   :  { %v2266_v1 = vld [vmem:[%s3196_s1 + $0xf8] sm:$0xff]   ;;  %1945 = vmatprep.subr.bf16.mxu0 %v2265_v0  ;;  %v2270_v5 = vld [vmem:[%s3196_s1 + $0xf0] sm:$0xff]   ;;  %v2274_v9 = vld [vmem:[%s3196_s1 + $0xe8] sm:$0xff]  }
   0x3   :  { %v2267_v2 = vld [vmem:[%s3196_s1 + $0x38] sm:$0xff]   ;;  %2009 = vmatprep.subr.bf16.mxu1 %v2266_v1  ;;  %v2271_v6 = vld [vmem:[%s3196_s1 + $0x30] sm:$0xff]   ;;  %v2275_v10 = vld [vmem:[%s3196_s1 + $0x28] sm:$0xff]  }
   0x4   :  { %v2268_v3 = vld [vmem:[%s3196_s1 + $0xb8] sm:$0xff]   ;;  %1946 = vmatpush3.bf16.msra.mxu0 %v2267_v2  ;;  %v2272_v7 = vld [vmem:[%s3196_s1 + $0xb0] sm:$0xff]   ;;  %v2276_v11 = vld [vmem:[%s3196_s1 + $0xa8] sm:$0xff]  }
   0x5   :  { %2010 = vmatpush3.bf16.msra.mxu1 %v2268_v3  ;;  %1947 = vmatprep.subr.bf16.mxu0 %v2269_v4  ;;  %v2277_v12 = vld [vmem:[%s3196_s1 + $0x60] sm:$0xff]   ;;  %v2281_v16 = vld [vmem:[%s3196_s1 + $0x58] sm:$0xff]   ;;  %v2285_v20 = vld [vmem:[%s3196_s1 + $0x50] sm:$0xff]  }
   0x6   :  { %2011 = vmatprep.subr.bf16.mxu1 %v2270_v5  ;;  %v2278_v13 = vld [vmem:[%s3196_s1 + $0xe0] sm:$0xff]   ;;  %v2282_v17 = vld [vmem:[%s3196_s1 + $0xd8] sm:$0xff]   ;;  %v2286_v21 = vld [vmem:[%s3196_s1 + $0xd0] sm:$0xff]  }
   0x7   :  { %v2279_v14 = vld [vmem:[%s3196_s1 + $0x20] sm:$0xff]   ;;  %v2283_v18 = vld [vmem:[%s3196_s1 + $0x18] sm:$0xff]   ;;  %v2287_v22 = vld [vmem:[%s3196_s1 + $0x10] sm:$0xff]  }
   0x8   :  { %1948 = vmatpush3.bf16.msra.mxu0 %v2271_v6  ;;  %v2280_v15 = vld [vmem:[%s3196_s1 + $0xa0] sm:$0xff]   ;;  %v2284_v19 = vld [vmem:[%s3196_s1 + $0x98] sm:$0xff]   ;;  %v2288_v23 = vld [vmem:[%s3196_s1 + $0x90] sm:$0xff]  }
   0x9   :  { %2012 = vmatpush3.bf16.msra.mxu1 %v2272_v7  ;;  %1949 = vmatprep.subr.bf16.mxu0 %v2273_v8  ;;  %v2289_v24 = vld [vmem:[%s3196_s1 + $0x48] sm:$0xff]   ;;  %v2293_v28 = vld [vmem:[%s3196_s1 + $0x40] sm:$0xff]   ;;  %v2303_v36 = vld [vmem:[%s3196_s1 + $0x178] sm:$0xff]  }
   0xa   :  { %2013 = vmatprep.subr.bf16.mxu1 %v2274_v9  ;;  %v2290_v25 = vld [vmem:[%s3196_s1 + $0xc8] sm:$0xff]   ;;  %v2294_v29 = vld [vmem:[%s3196_s1 + $0xc0] sm:$0xff]   ;;  %v2304_v37 = vld [vmem:[%s3196_s1 + $0x1f8] sm:$0xff]  }
   0xb   :  { %v2291_v26 = vld [vmem:[%s3196_s1 + $0x8] sm:$0xff]   ;;  %v2295_v30 = vld [vmem:[%s3196_s1] sm:$0xff]   ;;  %v2305_v38 = vld [vmem:[%s3196_s1 + $0x138] sm:$0xff]  }
   0xc   :  { %1950 = vmatpush3.bf16.msra.mxu0 %v2275_v10  ;;  %v2292_v27 = vld [vmem:[%s3196_s1 + $0x88] sm:$0xff]   ;;  %v2296_v31 = vld [vmem:[%s3196_s1 + $0x80] sm:$0xff]   ;;  %v2306_v39 = vld [vmem:[%s3196_s1 + $0x1b8] sm:$0xff]  }
   0xd   :  { %2014 = vmatpush3.bf16.msra.mxu1 %v2276_v11  ;;  %1951 = vmatprep.subr.bf16.mxu0 %v2277_v12  ;;  %v2297_v32 = vld [vmem:[%s3197_s0] ss:$36 sps:$4 sm:$0xff]   ;;  %v2300_v34 = vld [vmem:[%s3197_s0 + $0x8] ss:$36 sps:$4 sm:$0xff]   ;;  %v2309_v41 = vld [vmem:[%s3197_s0 + $0x54] ss:$36 sps:$4 sm:$0xff]  }
   0xe   :  { %2015 = vmatprep.subr.bf16.mxu1 %v2278_v13  ;;  %v2299_v33 = vld [vmem:[%s3197_s0 + $0x4] ss:$36 sps:$4 sm:$0xff]   ;;  %v2302_v35 = vld [vmem:[%s3197_s0 + $0xc] ss:$36 sps:$4 sm:$0xff]   ;;  %v2317_v48 = vld [vmem:[%s3197_s0 + $0x94] ss:$36 sps:$4 sm:$0xff]  }
   0xf   :  { %1081 = vmatprep.mubr.bf16.mxu0 %v2299_v33  ;;  %1178 = vmatprep.mubr.bf16.mxu1 %v2302_v35  ;;  %v2307_v40 = vld [vmem:[%s3197_s0 + $0x4c] ss:$36 sps:$4 sm:$0xff]   ;;  %v2319_v49 = vld [vmem:[%s3197_s0 + $0x9c] ss:$36 sps:$4 sm:$0xff]   ;;  %v2329_v57 = vld [vmem:[%s3197_s0 + $0xe4] ss:$36 sps:$4 sm:$0xff]  }
  0x10   :  { %1952 = vmatpush3.bf16.msra.mxu0 %v2279_v14  ;;  %v2311_v42 = vld [vmem:[%s3197_s0 + $0x48] ss:$36 sps:$4 sm:$0xff]   ;;  %v2312_v43 = vld [vmem:[%s3197_s0 + $0x50] ss:$36 sps:$4 sm:$0xff]   ;;  %v2322_v51 = vld [vmem:[%s3197_s0 + $0x98] ss:$36 sps:$4 sm:$0xff]  }
  0x11   :  { %2016 = vmatpush3.bf16.msra.mxu1 %v2280_v15  ;;  %1953 = vmatprep.subr.bf16.mxu0 %v2281_v16  ;;  %v2313_v44 = vld [vmem:[%s3196_s1 + $0x170] sm:$0xff]   ;;  %v2323_v52 = vld [vmem:[%s3196_s1 + $0x168] sm:$0xff]   ;;  %v2327_v56 = vld [vmem:[%s3197_s0 + $0xdc] ss:$36 sps:$4 sm:$0xff]  }
  0x12   :  { %2017 = vmatprep.subr.bf16.mxu1 %v2282_v17  ;;  %v2314_v45 = vld [vmem:[%s3196_s1 + $0x1f0] sm:$0xff]   ;;  %v2324_v53 = vld [vmem:[%s3196_s1 + $0x1e8] sm:$0xff]   ;;  %v2331_v58 = vld [vmem:[%s3197_s0 + $0xd8] ss:$36 sps:$4 sm:$0xff]  }
  0x13   :  { %v2315_v46 = vld [vmem:[%s3196_s1 + $0x130] sm:$0xff]   ;;  %v2325_v54 = vld [vmem:[%s3196_s1 + $0x128] sm:$0xff]   ;;  %v2332_v59 = vld [vmem:[%s3197_s0 + $0xe0] ss:$36 sps:$4 sm:$0xff]  }
  0x14   :  { %1954 = vmatpush3.bf16.msra.mxu0 %v2283_v18  ;;  %v2316_v47 = vld [vmem:[%s3196_s1 + $0x1b0] sm:$0xff]   ;;  %v2326_v55 = vld [vmem:[%s3196_s1 + $0x1a8] sm:$0xff]   ;;  %v2333_v60 = vld [vmem:[%s3196_s1 + $0x160] sm:$0xff]  }
  0x15   :  { %2018 = vmatpush3.bf16.msra.mxu1 %v2284_v19  ;;  %1955 = vmatprep.subr.bf16.mxu0 %v2285_v20  ;;  %v2321_v50 = vld [vmem:[%s3197_s0 + $0x90] ss:$36 sps:$4 sm:$0xff]   ;;  %v2334_v61 = vld [vmem:[%s3196_s1 + $0x1e0] sm:$0xff]   ;;  %v2343_v3 = vld [vmem:[%s3196_s1 + $0x158] sm:$0xff]  }
  0x16   :  { %2019 = vmatprep.subr.bf16.mxu1 %v2286_v21  ;;  %v2335_v62 = vld [vmem:[%s3196_s1 + $0x120] sm:$0xff]   ;;  %v2339_v1 = vld [vmem:[%s3197_s0 + $0x12c] ss:$36 sps:$4 sm:$0xff]   ;;  %v2344_v5 = vld [vmem:[%s3196_s1 + $0x1d8] sm:$0xff]  }
  0x17   :  { %v2336_v63 = vld [vmem:[%s3196_s1 + $0x1a0] sm:$0xff]   ;;  %v2342_v4 = vld [vmem:[%s3197_s0 + $0x128] ss:$36 sps:$4 sm:$0xff]   ;;  %v2345_v6 = vld [vmem:[%s3196_s1 + $0x118] sm:$0xff]  }
  0x18   :  { %1956 = vmatpush3.bf16.msra.mxu0 %v2287_v22  ;;  %v2337_v0 = vld [vmem:[%s3197_s0 + $0x124] ss:$36 sps:$4 sm:$0xff]   ;;  %v2346_v7 = vld [vmem:[%s3196_s1 + $0x198] sm:$0xff]   ;;  %v2347_v8 = vld [vmem:[%s3197_s0 + $0x16c] ss:$36 sps:$4 sm:$0xff]  }
  0x19   :  { %2020 = vmatpush3.bf16.msra.mxu1 %v2288_v23  ;;  %1957 = vmatprep.subr.bf16.mxu0 %v2289_v24  ;;  %v2341_v2 = vld [vmem:[%s3197_s0 + $0x120] ss:$36 sps:$4 sm:$0xff]   ;;  %v2349_v9 = vld [vmem:[%s3197_s0 + $0x174] ss:$36 sps:$4 sm:$0xff]   ;;  %v2351_v12 = vld [vmem:[%s3197_s0 + $0x168] ss:$36 sps:$4 sm:$0xff]  }
  0x1a   :  { %2021 = vmatprep.subr.bf16.mxu1 %v2290_v25  ;;  %v2353_v10 = vld [vmem:[%s3196_s1 + $0x150] sm:$0xff]   ;;  %v2359_v17 = vld [vmem:[%s3197_s0 + $0x1bc] ss:$36 sps:$4 sm:$0xff]   ;;  %v2363_v18 = vld [vmem:[%s3196_s1 + $0x148] sm:$0xff]  }
  0x1b   :  { %v2354_v11 = vld [vmem:[%s3196_s1 + $0x1d0] sm:$0xff]   ;;  %v2364_v19 = vld [vmem:[%s3196_s1 + $0x1c8] sm:$0xff]   ;;  %v2362_v23 = vld [vmem:[%s3197_s0 + $0x1b8] ss:$36 sps:$4 sm:$0xff]  }
  0x1c   :  { %1958 = vmatpush3.bf16.msra.mxu0 %v2291_v26  ;;  %v2355_v13 = vld [vmem:[%s3196_s1 + $0x110] sm:$0xff]   ;;  %v2365_v20 = vld [vmem:[%s3196_s1 + $0x108] sm:$0xff]   ;;  %v2367_v24 = vld [vmem:[%s3197_s0 + $0x1fc] ss:$36 sps:$4 sm:$0xff]  }
  0x1d   :  { %2022 = vmatpush3.bf16.msra.mxu1 %v2292_v27  ;;  %1959 = vmatprep.subr.bf16.mxu0 %v2293_v28  ;;  %v2356_v14 = vld [vmem:[%s3196_s1 + $0x190] sm:$0xff]   ;;  %v2366_v21 = vld [vmem:[%s3196_s1 + $0x188] sm:$0xff]   ;;  %v2373_v26 = vld [vmem:[%s3196_s1 + $0x140] sm:$0xff]  }
  0x1e   :  { %2023 = vmatprep.subr.bf16.mxu1 %v2294_v29  ;;  %v2352_v15 = vld [vmem:[%s3197_s0 + $0x170] ss:$36 sps:$4 sm:$0xff]   ;;  %v2369_v25 = vld [vmem:[%s3197_s0 + $0x204] ss:$36 sps:$4 sm:$0xff]  }
  0x1f   :  { %v2357_v16 = vld [vmem:[%s3197_s0 + $0x1b4] ss:$36 sps:$4 sm:$0xff]   ;;  %v2374_v27 = vld [vmem:[%s3196_s1 + $0x1c0] sm:$0xff]  }
  0x20   :  { %1960 = vmatpush3.bf16.msra.mxu0 %v2295_v30  ;;  %v2361_v22 = vld [vmem:[%s3197_s0 + $0x1b0] ss:$36 sps:$4 sm:$0xff]   ;;  %v2375_v28 = vld [vmem:[%s3196_s1 + $0x100] sm:$0xff]   ;;  %v2371_v30 = vld [vmem:[%s3197_s0 + $0x1f8] ss:$36 sps:$4 sm:$0xff]  }
  0x21   :  { %2024 = vmatpush3.bf16.msra.mxu1 %v2296_v31  ;;  %2073 = vmatprep.subr.bf16.mxu0 %v2303_v36  ;;  %v2376_v29 = vld [vmem:[%s3196_s1 + $0x180] sm:$0xff]   ;;  %v2379_v33 = vld [vmem:[%s3197_s0 + $0x14] ss:$36 sps:$4 sm:$0xff]  }
  0x22   :  { %2137 = vmatprep.subr.bf16.mxu1 %v2304_v37  ;;  %v2372_v31 = vld [vmem:[%s3197_s0 + $0x200] ss:$36 sps:$4 sm:$0xff]   ;;  %v2377_v35 = vld [vmem:[%s3197_s0 + $0x10] ss:$36 sps:$4 sm:$0xff]   ;;  %v2380_v36 = vld [vmem:[%s3197_s0 + $0x18] ss:$36 sps:$4 sm:$0xff]  }
  0x23   :  { %1082 = vmatmul.mubr.bf16.vlgmr.msra.gmra.mxu0 %v2297_v32  ;;  %v2383_v32 = vld [vmem:[%s3196_s1 + $0x238] sm:$0xff]  }
  0x24   :  { %1179 = vmatmul.mubr.bf16.vlgmr.msra.gmra.mxu1 %v2300_v34  ;;  %2074 = vmatpush3.bf16.msra.mxu0 %v2305_v38  ;;  %v2382_v34 = vld [vmem:[%s3197_s0 + $0x1c] ss:$36 sps:$4 sm:$0xff]   ;;  %v2386_v38 = vld [vmem:[%s3197_s0 + $0x64] ss:$36 sps:$4 sm:$0xff]  }
  0x25   :  { %2138 = vmatpush3.bf16.msra.mxu1 %v2306_v39  ;;  %1089 = vmatprep.mubr.bf16.mxu0 %v2307_v40  ;;  %v2384_v37 = vld [vmem:[%s3197_s0 + $0x5c] ss:$36 sps:$4 sm:$0xff]   ;;  %v2390_v39 = vld [vmem:[%s3196_s1 + $0x230] sm:$0xff]   ;;  %v2397_v40 = vld [vmem:[%s3196_s1 + $0x228] sm:$0xff]  }
  0x26   :  { %1186 = vmatprep.mubr.bf16.mxu1 %v2309_v41  ;;  %2075 = vmatprep.subr.bf16.mxu0 %v2313_v44  ;;  %v2388_v41 = vld [vmem:[%s3197_s0 + $0x58] ss:$36 sps:$4 sm:$0xff]   ;;  %v2393_v44 = vld [vmem:[%s3197_s0 + $0xac] ss:$36 sps:$4 sm:$0xff]  }
  0x27   :  { %2139 = vmatprep.subr.bf16.mxu1 %v2314_v45  ;;  %v2404_v45 = vld [vmem:[%s3196_s1 + $0x220] sm:$0xff]  }
  0x28   :  { %2076 = vmatpush3.bf16.msra.mxu0 %v2315_v46  ;;  %v2411_v46 = vld [vmem:[%s3196_s1 + $0x218] sm:$0xff]  }
  0x29   :  { %2140 = vmatpush3.bf16.msra.mxu1 %v2316_v47  ;;  %2077 = vmatprep.subr.bf16.mxu0 %v2323_v52  ;;  %v2395_v47 = vld [vmem:[%s3197_s0 + $0xa0] ss:$36 sps:$4 sm:$0xff]   ;;  %v2402_v52 = vld [vmem:[%s3197_s0 + $0xe8] ss:$36 sps:$4 sm:$0xff]  }
  0x2a   :  { %2141 = vmatprep.subr.bf16.mxu1 %v2324_v53  ;;  %v2425_v53 = vld [vmem:[%s3196_s1 + $0x208] sm:$0xff]  }
  0x2b   :  { %1090 = vmatmul.mubr.bf16.gmra.mxu0 %v2311_v42  ;;  %v2389_v42 = vld [vmem:[%s3197_s0 + $0x60] ss:$36 sps:$4 sm:$0xff]  }
  0x2c   :  { %1187 = vmatmul.mubr.bf16.gmra.mxu1 %v2312_v43  ;;  %1097 = vmatprep.mubr.bf16.mxu0 %v2317_v48  ;;  %v2391_v43 = vld [vmem:[%s3197_s0 + $0xa4] ss:$36 sps:$4 sm:$0xff]  }
  0x2d   :  { %1194 = vmatprep.mubr.bf16.mxu1 %v2319_v49  ;;  %2078 = vmatpush3.bf16.msra.mxu0 %v2325_v54  ;;  %v2396_v48 = vld [vmem:[%s3197_s0 + $0xa8] ss:$36 sps:$4 sm:$0xff]   ;;  %v2403_v54 = vld [vmem:[%s3197_s0 + $0xf0] ss:$36 sps:$4 sm:$0xff]  }
  0x2e   :  { %2142 = vmatpush3.bf16.msra.mxu1 %v2326_v55  ;;  %2079 = vmatprep.subr.bf16.mxu0 %v2333_v60  ;;  %v2398_v49 = vld [vmem:[%s3197_s0 + $0xec] ss:$36 sps:$4 sm:$0xff]   ;;  %v2405_v55 = vld [vmem:[%s3197_s0 + $0x134] ss:$36 sps:$4 sm:$0xff]   ;;  %v2412_v60 = vld [vmem:[%s3197_s0 + $0x17c] ss:$36 sps:$4 sm:$0xff]  }
  0x2f   :  { %2143 = vmatprep.subr.bf16.mxu1 %v2334_v61  ;;  %v2414_v61 = vld [vmem:[%s3197_s0 + $0x184] ss:$36 sps:$4 sm:$0xff]  }
  0x31   :  { %2080 = vmatpush3.bf16.msra.mxu0 %v2335_v62  ;;  %v2416_v62 = vld [vmem:[%s3197_s0 + $0x178] ss:$36 sps:$4 sm:$0xff]  }
  0x32   :  { %2144 = vmatpush3.bf16.msra.mxu1 %v2336_v63  ;;  %2081 = vmatprep.subr.bf16.mxu0 %v2343_v3  ;;  %v2417_v63 = vld [vmem:[%s3197_s0 + $0x180] ss:$36 sps:$4 sm:$0xff]   ;;  %v2424_v3 = vld [vmem:[%s3197_s0 + $0x1c8] ss:$36 sps:$4 sm:$0xff]  }
  0x33   :  { %1098 = vmatmul.mubr.bf16.gmra.mxu0 %v2321_v50  ;;  %2145 = vmatprep.subr.bf16.mxu1 %v2344_v5  ;;  %v2400_v50 = vld [vmem:[%s3197_s0 + $0xf4] ss:$36 sps:$4 sm:$0xff]  }
  0x34   :  { %1195 = vmatmul.mubr.bf16.gmra.mxu1 %v2322_v51  ;;  %1105 = vmatprep.mubr.bf16.mxu0 %v2327_v56  ;;  %v2418_v51 = vld [vmem:[%s3196_s1 + $0x210] sm:$0xff]   ;;  %v2407_v56 = vld [vmem:[%s3197_s0 + $0x13c] ss:$36 sps:$4 sm:$0xff]  }
  0x35   :  { %1202 = vmatprep.mubr.bf16.mxu1 %v2329_v57  ;;  %2082 = vmatpush3.bf16.msra.mxu0 %v2345_v6  ;;  %v2432_v57 = vld [vmem:[%s3196_s1 + $0x200] sm:$0xff]   ;;  %v2428_v5 = vld [vmem:[%s3197_s0 + $0x214] ss:$36 sps:$4 sm:$0xff]   ;;  %v2430_v6 = vld [vmem:[%s3197_s0 + $0x208] ss:$36 sps:$4 sm:$0xff]  }
  0x36   :  { %2146 = vmatpush3.bf16.msra.mxu1 %v2346_v7  ;;  %2083 = vmatprep.subr.bf16.mxu0 %v2353_v10  ;;  %v2431_v7 = vld [vmem:[%s3197_s0 + $0x210] ss:$36 sps:$4 sm:$0xff]   ;;  %v2435_v10 = vld [vmem:[%s3197_s0 + $0x68] ss:$36 sps:$4 sm:$0xff]  }
  0x37   :  { %2147 = vmatprep.subr.bf16.mxu1 %v2354_v11  ;;  %v2436_v11 = vld [vmem:[%s3197_s0 + $0x188] ss:$36 sps:$4 sm:$0xff]  }
  0x39   :  { %2084 = vmatpush3.bf16.msra.mxu0 %v2355_v13  ;;  %v2438_v13 = vld [vmem:[%s3197_s0 + $0x1d0] ss:$36 sps:$4 sm:$0xff]  }
  0x3a   :  { %2148 = vmatpush3.bf16.msra.mxu1 %v2356_v14  ;;  %2085 = vmatprep.subr.bf16.mxu0 %v2363_v18  ;;  %v2439_v14 = vld [vmem:[%s3197_s0 + $0xf8] ss:$36 sps:$4 sm:$0xff]   ;;  %v2901_v18 = vld [vmem:[%s3198_s2] ss:$0 sm:$0xff] }
  0x3b   :  { %1106 = vmatmul.mubr.bf16.gmra.mxu0 %v2331_v58  ;;  %2149 = vmatprep.subr.bf16.mxu1 %v2364_v19  ;;  %v2409_v58 = vld [vmem:[%s3197_s0 + $0x130] ss:$36 sps:$4 sm:$0xff]  }
  0x3c   :  { %1203 = vmatmul.mubr.bf16.gmra.mxu1 %v2332_v59  ;;  %1113 = vmatprep.mubr.bf16.mxu0 %v2337_v0  ;;  %v2410_v59 = vld [vmem:[%s3197_s0 + $0x138] ss:$36 sps:$4 sm:$0xff]   ;;  %v2419_v0 = vld [vmem:[%s3197_s0 + $0x1c4] ss:$36 sps:$4 sm:$0xff]  }
  0x3d   :  { %1210 = vmatprep.mubr.bf16.mxu1 %v2339_v1  ;;  %2086 = vmatpush3.bf16.msra.mxu0 %v2365_v20  ;;  %v2421_v1 = vld [vmem:[%s3197_s0 + $0x1cc] ss:$36 sps:$4 sm:$0xff]  }
  0x3e   :  { %2150 = vmatpush3.bf16.msra.mxu1 %v2366_v21  ;;  %2087 = vmatprep.subr.bf16.mxu0 %v2373_v26 }
  0x3f   :  { %2151 = vmatprep.subr.bf16.mxu1 %v2374_v27 }
  0x41   :  { %2088 = vmatpush3.bf16.msra.mxu0 %v2375_v28 }
  0x42   :  { %2152 = vmatpush3.bf16.msra.mxu1 %v2376_v29  ;;  %2217 = vmatprep.subr.bf16.mxu0 %v2383_v32 }
  0x43   :  { %1114 = vmatmul.mubr.bf16.gmra.mxu0 %v2341_v2  ;;  %2249 = vmatprep.subr.bf16.mxu1 %v2383_v32  ;;  %v2423_v2 = vld [vmem:[%s3197_s0 + $0x1c0] ss:$36 sps:$4 sm:$0xff]  }
  0x44   :  { %1211 = vmatmul.mubr.bf16.gmra.mxu1 %v2342_v4  ;;  %1121 = vmatprep.mubr.bf16.mxu0 %v2347_v8  ;;  %v2426_v4 = vld [vmem:[%s3197_s0 + $0x20c] ss:$36 sps:$4 sm:$0xff]   ;;  %v2433_v8 = vld [vmem:[%s3197_s0 + $0x20] ss:$36 sps:$4 sm:$0xff]  }
  0x45   :  { %1218 = vmatprep.mubr.bf16.mxu1 %v2349_v9  ;;  %v2434_v9 = vld [vmem:[%s3197_s0 + $0x140] ss:$36 sps:$4 sm:$0xff]  }
  0x4b   :  { %1122 = vmatmul.mubr.bf16.gmra.mxu0 %v2351_v12  ;;  %v2437_v12 = vld [vmem:[%s3197_s0 + $0xb0] ss:$36 sps:$4 sm:$0xff]  }
  0x4c   :  { %1219 = vmatmul.mubr.bf16.gmra.mxu1 %v2352_v15  ;;  %1129 = vmatprep.mubr.bf16.mxu0 %v2357_v16  ;;  %v2440_v15 = vld [vmem:[%s3197_s0 + $0x218] ss:$36 sps:$4 sm:$0xff]  }
  0x4d   :  { %1226 = vmatprep.mubr.bf16.mxu1 %v2359_v17 }
  0x53   :  { %1130 = vmatmul.mubr.bf16.gmra.mxu0 %v2361_v22 }
  0x54   :  { %1227 = vmatmul.mubr.bf16.gmra.mxu1 %v2362_v23  ;;  %1137 = vmatprep.mubr.bf16.mxu0 %v2367_v24 }
  0x55   :  { %1234 = vmatprep.mubr.bf16.mxu1 %v2369_v25 }
  0x5b   :  { %1138 = vmatmul.mubr.bf16.gmra.mxu0 %v2371_v30 }
  0x5c   :  { %1235 = vmatmul.mubr.bf16.gmra.mxu1 %v2372_v31  ;;  %1275 = vmatprep.mubr.bf16.mxu0 %v2379_v33 }
  0x5d   :  { %1372 = vmatprep.mubr.bf16.mxu1 %v2382_v34 }
  0x63   :  { %1276 = vmatmul.mubr.bf16.vlgmr.msra.gmra.mxu0 %v2377_v35 }
  0x64   :  { %1373 = vmatmul.mubr.bf16.vlgmr.msra.gmra.mxu1 %v2380_v36  ;;  %2218 = vmatpush3.bf16.msra.mxu0 %v2383_v32 }
  0x65   :  { %2257 = vmatpush3.bf16.msra.mxu1 %v2383_v32  ;;  %1283 = vmatprep.mubr.bf16.mxu0 %v2384_v37 }
  0x66   :  { %1380 = vmatprep.mubr.bf16.mxu1 %v2386_v38  ;;  %2219 = vmatprep.subr.bf16.mxu0 %v2390_v39 }
  0x67   :  { %2250 = vmatprep.subr.bf16.mxu1 %v2390_v39 }
  0x68   :  { %2220 = vmatpush3.bf16.msra.mxu0 %v2390_v39 }
  0x69   :  { %2258 = vmatpush3.bf16.msra.mxu1 %v2390_v39  ;;  %2221 = vmatprep.subr.bf16.mxu0 %v2397_v40 }
  0x6a   :  { %2251 = vmatprep.subr.bf16.mxu1 %v2397_v40 }
  0x6b   :  { %1284 = vmatmul.mubr.bf16.gmra.mxu0 %v2388_v41 }
  0x6c   :  { %1381 = vmatmul.mubr.bf16.gmra.mxu1 %v2389_v42  ;;  %1291 = vmatprep.mubr.bf16.mxu0 %v2391_v43 }
  0x6d   :  { %1388 = vmatprep.mubr.bf16.mxu1 %v2393_v44  ;;  %2222 = vmatpush3.bf16.msra.mxu0 %v2397_v40 }
  0x6e   :  { %2259 = vmatpush3.bf16.msra.mxu1 %v2397_v40  ;;  %2223 = vmatprep.subr.bf16.mxu0 %v2404_v45 }
  0x6f   :  { %2252 = vmatprep.subr.bf16.mxu1 %v2404_v45 }
  0x71   :  { %2224 = vmatpush3.bf16.msra.mxu0 %v2404_v45 }
  0x72   :  { %2260 = vmatpush3.bf16.msra.mxu1 %v2404_v45  ;;  %2225 = vmatprep.subr.bf16.mxu0 %v2411_v46 }
  0x73   :  { %1292 = vmatmul.mubr.bf16.gmra.mxu0 %v2395_v47  ;;  %2253 = vmatprep.subr.bf16.mxu1 %v2411_v46 }
  0x74   :  { %1389 = vmatmul.mubr.bf16.gmra.mxu1 %v2396_v48  ;;  %1299 = vmatprep.mubr.bf16.mxu0 %v2398_v49 }
  0x75   :  { %1396 = vmatprep.mubr.bf16.mxu1 %v2400_v50  ;;  %2226 = vmatpush3.bf16.msra.mxu0 %v2411_v46 }
  0x76   :  { %2261 = vmatpush3.bf16.msra.mxu1 %v2411_v46  ;;  %2227 = vmatprep.subr.bf16.mxu0 %v2418_v51 }
  0x77   :  { %2254 = vmatprep.subr.bf16.mxu1 %v2418_v51 }
  0x79   :  { %2228 = vmatpush3.bf16.msra.mxu0 %v2418_v51 }
  0x7a   :  { %2262 = vmatpush3.bf16.msra.mxu1 %v2418_v51  ;;  %2229 = vmatprep.subr.bf16.mxu0 %v2425_v53 }
  0x7b   :  { %1300 = vmatmul.mubr.bf16.gmra.mxu0 %v2402_v52  ;;  %2255 = vmatprep.subr.bf16.mxu1 %v2425_v53 }
  0x7c   :  { %1397 = vmatmul.mubr.bf16.gmra.mxu1 %v2403_v54  ;;  %1307 = vmatprep.mubr.bf16.mxu0 %v2405_v55 }
  0x7d   :  { %1404 = vmatprep.mubr.bf16.mxu1 %v2407_v56  ;;  %2230 = vmatpush3.bf16.msra.mxu0 %v2425_v53 }
  0x7e   :  { %2263 = vmatpush3.bf16.msra.mxu1 %v2425_v53  ;;  %2231 = vmatprep.subr.bf16.mxu0 %v2432_v57 }
  0x7f   :  { %2256 = vmatprep.subr.bf16.mxu1 %v2432_v57 }
  0x81   :  { %2232 = vmatpush3.bf16.msra.mxu0 %v2432_v57 }
  0x82   :  { %2264 = vmatpush3.bf16.msra.mxu1 %v2432_v57 }
  0x83   :  { %1308 = vmatmul.mubr.bf16.gmra.mxu0 %v2409_v58 }
  0x84   :  { %1405 = vmatmul.mubr.bf16.gmra.mxu1 %v2410_v59  ;;  %1315 = vmatprep.mubr.bf16.mxu0 %v2412_v60 }
  0x85   :  { %1412 = vmatprep.mubr.bf16.mxu1 %v2414_v61 }
  0x8b   :  { %1316 = vmatmul.mubr.bf16.gmra.mxu0 %v2416_v62 }
  0x8c   :  { %1413 = vmatmul.mubr.bf16.gmra.mxu1 %v2417_v63  ;;  %1323 = vmatprep.mubr.bf16.mxu0 %v2419_v0 }
  0x8d   :  { %1420 = vmatprep.mubr.bf16.mxu1 %v2421_v1 }
  0x93   :  { %1324 = vmatmul.mubr.bf16.gmra.mxu0 %v2423_v2 }
  0x94   :  { %1421 = vmatmul.mubr.bf16.gmra.mxu1 %v2424_v3  ;;  %1331 = vmatprep.mubr.bf16.mxu0 %v2426_v4 }
  0x95   :  { %1428 = vmatprep.mubr.bf16.mxu1 %v2428_v5 }
  0x9b   :  { %1332 = vmatmul.mubr.bf16.gmra.mxu0 %v2430_v6 }
  0x9c   :  { %1429 = vmatmul.mubr.bf16.gmra.mxu1 %v2431_v7  ;;  %2233 = vmatprep.mubr.bf16.mxu0 %v2433_v8 }
  0x9d   :  { %2241 = vmatprep.mubr.bf16.mxu1 %v2434_v9 }
  0xa3   :  { %2234 = vmatmul.mubr.bf16.vlgmr.msra.gmra.mxu0 %v2435_v10 }
  0xa4   :  { %2242 = vmatmul.mubr.bf16.vlgmr.msra.gmra.mxu1 %v2436_v11  ;;  %2237 = vmatprep.mubr.bf16.mxu0 %v2437_v12 }
  0xa5   :  { %2245 = vmatprep.mubr.bf16.mxu1 %v2438_v13 }
  0xab   :  { %2238 = vmatmul.mubr.bf16.gmra.mxu0 %v2439_v14 }
  0xac   :  { %2246 = vmatmul.mubr.bf16.gmra.mxu1 %v2440_v15 }
  0xe3   :  { %v1961_v16 = vpop.f32.mrf.mxu0 }
  0xe4   :  { %v2025_v17 = vpop.f32.mrf.mxu1 }
  0xe5   :  { %v1962_v19 = vpop.f32.mrf.mxu0 }
  0xe6   :  { %v1963_v20 = vadd.f32 %v1962_v19, %v1961_v16  ;;  %v2026_v21 = vpop.f32.mrf.mxu1 }
  0xe7   :  { %v2027_v22 = vadd.f32 %v2026_v21, %v2025_v17  ;;  %v1964_v23 = vpop.f32.mrf.mxu0 }
  0xe8   :  { %v1084_v24 = vadd.f32 %v1963_v20, %v2901_v18  ;;  %v2028_v25 = vpop.f32.mrf.mxu1 }
  0xe9   :  { %v1965_v26 = vpop.f32.mrf.mxu0 }
  0xea   :  { %v2904_v27 = vadd.f32 %v2027_v22, %v1084_v24  ;;  %v1966_v28 = vadd.f32 %v1965_v26, %v1964_v23  ;;  %v2029_v29 = vpop.f32.mrf.mxu1 }
  0xeb   :  { %v2030_v30 = vadd.f32 %v2029_v29, %v2028_v25  ;;  %v1967_v31 = vpop.f32.mrf.mxu0 }
  0xec   :  { %v1087_v32 = vadd.f32 %v1966_v28, %v2901_v18  ;;  %v2031_v33 = vpop.f32.mrf.mxu1 }
  0xed   :  { %v1968_v34 = vpop.f32.mrf.mxu0 }
  0xee   :  { %v2907_v35 = vadd.f32 %v2030_v30, %v1087_v32  ;;  %v1969_v36 = vadd.f32 %v1968_v34, %v1967_v31  ;;  %v2032_v37 = vpop.f32.mrf.mxu1 }
  0xef   :  { %v2033_v38 = vadd.f32 %v2032_v37, %v2031_v33  ;;  %v1970_v39 = vpop.f32.mrf.mxu0 }
  0xf0   :  { %v1092_v40 = vadd.f32 %v1969_v36, %v2901_v18  ;;  %v2034_v41 = vpop.f32.mrf.mxu1 }
  0xf1   :  { %v1971_v42 = vpop.f32.mrf.mxu0 }
  0xf2   :  { %v2910_v43 = vadd.f32 %v2033_v38, %v1092_v40  ;;  %v1972_v44 = vadd.f32 %v1971_v42, %v1970_v39  ;;  %v2035_v45 = vpop.f32.mrf.mxu1 }
  0xf3   :  { %v2036_v46 = vadd.f32 %v2035_v45, %v2034_v41  ;;  %v1973_v47 = vpop.f32.mrf.mxu0 }
  0xf4   :  { %v1095_v48 = vadd.f32 %v1972_v44, %v2901_v18  ;;  %v2037_v49 = vpop.f32.mrf.mxu1 }
  0xf5   :  { %v1974_v50 = vpop.f32.mrf.mxu0 }
  0xf6   :  { %v2913_v51 = vadd.f32 %v2036_v46, %v1095_v48  ;;  %v1975_v52 = vadd.f32 %v1974_v50, %v1973_v47  ;;  %v2038_v53 = vpop.f32.mrf.mxu1 }
  0xf7   :  { %v2039_v54 = vadd.f32 %v2038_v53, %v2037_v49  ;;  %v1976_v55 = vpop.f32.mrf.mxu0 }
  0xf8   :  { %v1100_v56 = vadd.f32 %v1975_v52, %v2901_v18  ;;  %v2040_v57 = vpop.f32.mrf.mxu1 }
  0xf9   :  { %v1977_v58 = vpop.f32.mrf.mxu0 }
  0xfa   :  { %v2916_v59 = vadd.f32 %v2039_v54, %v1100_v56  ;;  %v1978_v60 = vadd.f32 %v1977_v58, %v1976_v55  ;;  %v2041_v61 = vpop.f32.mrf.mxu1 }
  0xfb   :  { %v2042_v62 = vadd.f32 %v2041_v61, %v2040_v57  ;;  %v1979_v63 = vpop.f32.mrf.mxu0 }
  0xfc   :  { %v1103_v0 = vadd.f32 %v1978_v60, %v2901_v18  ;;  %v2043_v1 = vpop.f32.mrf.mxu1 }
  0xfd   :  { %v1980_v2 = vpop.f32.mrf.mxu0 }
  0xfe   :  { %v2919_v3 = vadd.f32 %v2042_v62, %v1103_v0  ;;  %v1981_v4 = vadd.f32 %v1980_v2, %v1979_v63  ;;  %v2044_v5 = vpop.f32.mrf.mxu1 }
  0xff   :  { %v2045_v6 = vadd.f32 %v2044_v5, %v2043_v1  ;;  %v1982_v7 = vpop.f32.mrf.mxu0 }
 0x100   :  { %v1108_v8 = vadd.f32 %v1981_v4, %v2901_v18  ;;  %v2046_v9 = vpop.f32.mrf.mxu1 }
 0x101   :  { %v1983_v10 = vpop.f32.mrf.mxu0 }
 0x102   :  { %v2922_v11 = vadd.f32 %v2045_v6, %v1108_v8  ;;  %v1984_v12 = vadd.f32 %v1983_v10, %v1982_v7  ;;  %v2047_v13 = vpop.f32.mrf.mxu1 }
 0x103   :  { %v2048_v14 = vadd.f32 %v2047_v13, %v2046_v9  ;;  %v1985_v15 = vpop.f32.mrf.mxu0 }
 0x104   :  { %v1111_v16 = vadd.f32 %v1984_v12, %v2901_v18  ;;  %v2049_v17 = vpop.f32.mrf.mxu1 }
 0x105   :  { %v1986_v19 = vpop.f32.mrf.mxu0 }
 0x106   :  { %v2925_v20 = vadd.f32 %v2048_v14, %v1111_v16  ;;  %v1987_v21 = vadd.f32 %v1986_v19, %v1985_v15  ;;  %v2050_v22 = vpop.f32.mrf.mxu1 }
 0x107   :  { %v2051_v23 = vadd.f32 %v2050_v22, %v2049_v17  ;;  %v1988_v24 = vpop.f32.mrf.mxu0 }
 0x108   :  { %v1116_v25 = vadd.f32 %v1987_v21, %v2901_v18  ;;  %v2052_v26 = vpop.f32.mrf.mxu1 }
 0x109   :  { %v1989_v28 = vpop.f32.mrf.mxu0 }
 0x10a   :  { %v2928_v29 = vadd.f32 %v2051_v23, %v1116_v25  ;;  %v1990_v30 = vadd.f32 %v1989_v28, %v1988_v24  ;;  %v2053_v31 = vpop.f32.mrf.mxu1 }
 0x10b   :  { %v2054_v32 = vadd.f32 %v2053_v31, %v2052_v26  ;;  %v1991_v33 = vpop.f32.mrf.mxu0 }
 0x10c   :  { %v1119_v34 = vadd.f32 %v1990_v30, %v2901_v18  ;;  %v2055_v36 = vpop.f32.mrf.mxu1 }
 0x10d   :  { %v1992_v37 = vpop.f32.mrf.mxu0 }
 0x10e   :  { %v2931_v38 = vadd.f32 %v2054_v32, %v1119_v34  ;;  %v1993_v39 = vadd.f32 %v1992_v37, %v1991_v33  ;;  %v2056_v40 = vpop.f32.mrf.mxu1 }
 0x10f   :  { %v2057_v41 = vadd.f32 %v2056_v40, %v2055_v36  ;;  %v1994_v42 = vpop.f32.mrf.mxu0 }
 0x110   :  { %3207 = vst [vmem:[#allocation2_spill] sm:$0xff] %v2931_v38  ;;  %v1124_v44 = vadd.f32 %v1993_v39, %v2901_v18  ;;  %v2058_v45 = vpop.f32.mrf.mxu1 }
 0x111   :  { %v1995_v46 = vpop.f32.mrf.mxu0 }
 0x112   :  { %v2934_v47 = vadd.f32 %v2057_v41, %v1124_v44  ;;  %v1996_v48 = vadd.f32 %v1995_v46, %v1994_v42  ;;  %v2059_v49 = vpop.f32.mrf.mxu1 }
 0x113   :  { %v2060_v50 = vadd.f32 %v2059_v49, %v2058_v45  ;;  %v1997_v52 = vpop.f32.mrf.mxu0 }
 0x114   :  { %v1127_v53 = vadd.f32 %v1996_v48, %v2901_v18  ;;  %v2061_v54 = vpop.f32.mrf.mxu1 }
 0x115   :  { %v1998_v55 = vpop.f32.mrf.mxu0 }
 0x116   :  { %v2937_v56 = vadd.f32 %v2060_v50, %v1127_v53  ;;  %v1999_v57 = vadd.f32 %v1998_v55, %v1997_v52  ;;  %v2062_v58 = vpop.f32.mrf.mxu1 }
 0x117   :  { %v2063_v60 = vadd.f32 %v2062_v58, %v2061_v54  ;;  %v2000_v61 = vpop.f32.mrf.mxu0 }
 0x118   :  { %3208 = vst [vmem:[#allocation3_spill] sm:$0xff] %v2937_v56  ;;  %v1132_v62 = vadd.f32 %v1999_v57, %v2901_v18  ;;  %v2064_v63 = vpop.f32.mrf.mxu1 }
 0x119   :  { %v2001_v0 = vpop.f32.mrf.mxu0 }
 0x11a   :  { %v2940_v1 = vadd.f32 %v2063_v60, %v1132_v62  ;;  %v2002_v2 = vadd.f32 %v2001_v0, %v2000_v61  ;;  %v2065_v4 = vpop.f32.mrf.mxu1 }
 0x11b   :  { %v2066_v5 = vadd.f32 %v2065_v4, %v2064_v63  ;;  %v2003_v6 = vpop.f32.mrf.mxu0 }
 0x11c   :  { %3209 = vst [vmem:[#allocation4_spill] sm:$0xff] %v2940_v1  ;;  %v1135_v7 = vadd.f32 %v2002_v2, %v2901_v18  ;;  %v2067_v8 = vpop.f32.mrf.mxu1 }
 0x11d   :  { %v2004_v9 = vpop.f32.mrf.mxu0 }
 0x11e   :  { %v2943_v10 = vadd.f32 %v2066_v5, %v1135_v7  ;;  %v2005_v12 = vadd.f32 %v2004_v9, %v2003_v6  ;;  %v2068_v13 = vpop.f32.mrf.mxu1 }
 0x11f   :  { %v2069_v14 = vadd.f32 %v2068_v13, %v2067_v8  ;;  %v2006_v15 = vpop.f32.mrf.mxu0 }
 0x120   :  { %3210 = vst [vmem:[#allocation5_spill] sm:$0xff] %v2943_v10  ;;  %v1140_v16 = vadd.f32 %v2005_v12, %v2901_v18  ;;  %v2070_v17 = vpop.f32.mrf.mxu1 }
 0x121   :  { %v2007_v19 = vpop.f32.mrf.mxu0 }
 0x122   :  { %v2946_v21 = vadd.f32 %v2069_v14, %v1140_v16  ;;  %v2008_v22 = vadd.f32 %v2007_v19, %v2006_v15  ;;  %v2071_v23 = vpop.f32.mrf.mxu1 }
 0x123   :  { %v2072_v24 = vadd.f32 %v2071_v23, %v2070_v17  ;;  %v2089_v25 = vpop.f32.mrf.mxu0 }
 0x124   :  { %3211 = vst [vmem:[#allocation6_spill] sm:$0xff] %v2946_v21  ;;  %v1143_v26 = vadd.f32 %v2008_v22, %v2901_v18  ;;  %v2153_v28 = vpop.f32.mrf.mxu1 }
 0x125   :  { %v2090_v30 = vpop.f32.mrf.mxu0 }
 0x126   :  { %v2949_v31 = vadd.f32 %v2072_v24, %v1143_v26  ;;  %v2091_v32 = vadd.f32 %v2090_v30, %v2089_v25  ;;  %v2154_v33 = vpop.f32.mrf.mxu1 }
 0x127   :  { %v2092_v34 = vpop.f32.mrf.mxu0  ;;  %v2155_v37 = vadd.f32 %v2154_v33, %v2153_v28  ;;  %v3015_v33 = vld [vmem:[%s3199_s3 + $0x8] sm:$0xff]  }
 0x128   :  { %3212 = vst [vmem:[#allocation7_spill] sm:$0xff] %v2949_v31  ;;  %v1278_v36 = vadd.f32 %v2091_v32, %v2904_v27  ;;  %v2952_v39 = vpop.f32.mrf.mxu1  ;;  %3221 = vst [vmem:[#allocation16_spill] sm:$0xff] %v3015_v33  ;;  %v3032_v31 = vld [vmem:[%s3199_s3 + $0x20] sm:$0xff]  }
 0x129   :  { %v2093_v40 = vpop.f32.mrf.mxu0 }
 0x12a   :  { %v2954_v41 = vpop.f32.mrf.mxu1  ;;  %v2956_v42 = vadd.f32 %v2155_v37, %v1278_v36  ;;  %v3020_v36 = vld [vmem:[%s3199_s3 + $0x28] sm:$0xff]   ;;  %v3025_v37 = vld [vmem:[%s3199_s3] sm:$0xff]  }
 0x12b   :  { %v2095_v44 = vpop.f32.mrf.mxu0  ;;  %3222 = vst [vmem:[#allocation17_spill] sm:$0xff] %v3020_v36  ;;  %3223 = vst [vmem:[#allocation18_spill] sm:$0xff] %v3025_v37 }
 0x12c   :  { %3213 = vst [vmem:[#allocation8_spill] sm:$0xff] %v2956_v42  ;;  %v2958_v45 = vpop.f32.mrf.mxu1  ;;  %v2094_v42 = vadd.f32 %v2093_v40, %v2092_v34 }
 0x12d   :  { %v2096_v18 = vpop.f32.mrf.mxu0 }
 0x12e   :  { %v2960_v46 = vpop.f32.mrf.mxu1  ;;  %v2097_v1 = vadd.f32 %v2096_v18, %v2095_v44 }
 0x12f   :  { %v2098_v48 = vpop.f32.mrf.mxu0 }
 0x130   :  { %v2962_v49 = vpop.f32.mrf.mxu1 }
 0x131   :  { %v2099_v50 = vpop.f32.mrf.mxu0 }
 0x132   :  { %v2964_v52 = vpop.f32.mrf.mxu1 }
 0x133   :  { %v2101_v27 = vpop.f32.mrf.mxu0 }
 0x134   :  { %v2966_v53 = vpop.f32.mrf.mxu1 }
 0x135   :  { %v2102_v54 = vpop.f32.mrf.mxu0 }
 0x136   :  { %v2968_v55 = vpop.f32.mrf.mxu1  ;;  %v2103_v56 = vadd.f32 %v2102_v54, %v2101_v27 }
 0x137   :  { %v2970_v57 = vpop.f32.mrf.mxu0 }
 0x138   :  { %v2972_v58 = vpop.f32.mrf.mxu1 }
 0x139   :  { %v2974_v60 = vpop.f32.mrf.mxu0 }
 0x13a   :  { %v2976_v61 = vpop.f32.mrf.mxu1 }
 0x13b   :  { %v2107_v62 = vpop.f32.mrf.mxu0 }
 0x13c   :  { %v2978_v63 = vpop.f32.mrf.mxu1 }
 0x13d   :  { %v2108_v0 = vpop.f32.mrf.mxu0 }
 0x13e   :  { %v2980_v2 = vpop.f32.mrf.mxu1 }
 0x13f   :  { %v2982_v4 = vpop.f32.mrf.mxu0 }
 0x140   :  { %v2984_v5 = vpop.f32.mrf.mxu1 }
 0x141   :  { %3214 = vst [vmem:[#allocation9_spill] sm:$0xff] %v2984_v5  ;;  %v2986_v6 = vpop.f32.mrf.mxu0  ;;  %v3063_v5 = vld [vmem:[%s3199_s3 + $0x30] sm:$0xff]  }
 0x142   :  { %v2988_v7 = vpop.f32.mrf.mxu1  ;;  %v1886_v54 = vunpack.c.h.bf16 %v3063_v5 }
 0x143   :  { %3215 = vst [vmem:[#allocation10_spill] sm:$0xff] %v2988_v7  ;;  %v2113_v8 = vpop.f32.mrf.mxu0  ;;  %v3042_v7 = vld [vmem:[%s3199_s3 + $0x18] sm:$0xff]  }
 0x144   :  { %v2990_v9 = vpop.f32.mrf.mxu1  ;;  %v1873_v36 = vunpack.c.l.bf16 %v3042_v7  ;;  %v1874_v18 = vunpack.c.h.bf16 %v3042_v7 }
 0x145   :  { %v2114_v12 = vpop.f32.mrf.mxu0 }
 0x146   :  { %v2992_v13 = vpop.f32.mrf.mxu1  ;;  %v2115_v44 = vadd.f32 %v2114_v12, %v2113_v8 }
 0x147   :  { %3216 = vst [vmem:[#allocation11_spill] sm:$0xff] %v2992_v13  ;;  %v2994_v14 = vpop.f32.mrf.mxu0  ;;  %v1294_v13 = vadd.f32 %v2103_v56, %v2916_v59  ;;  %v2112_v59 = vadd.f32 %v2986_v6, %v2982_v4  ;;  %v3111_v6 = vadd.f32 %v2976_v61, %v2972_v58 }
 0x148   :  { %v2996_v15 = vpop.f32.mrf.mxu1 }
 0x149   :  { %3217 = vst [vmem:[#allocation12_spill] sm:$0xff] %v2996_v15  ;;  %v2998_v16 = vpop.f32.mrf.mxu0  ;;  %v2109_v15 = vadd.f32 %v2108_v0, %v2107_v62  ;;  %v1286_v62 = vadd.f32 %v2097_v1, %v2910_v43  ;;  %v2164_v43 = vadd.f32 %v2964_v52, %v2962_v49  ;;  %v1310_v49 = vadd.f32 %v2115_v44, %v2928_v29 }
 0x14a   :  { %v3000_v17 = vpop.f32.mrf.mxu1  ;;  %v2118_v56 = vadd.f32 %v2998_v16, %v2994_v14  ;;  %v3228_v14 = vld [vmem:[#allocation2_spill] sm:$0xff] }
 0x14b   :  { %3218 = vst [vmem:[#allocation13_spill] sm:$0xff] %v3000_v17  ;;  %v2119_v19 = vpop.f32.mrf.mxu0  ;;  %v1281_v17 = vadd.f32 %v2094_v42, %v2907_v35 }
 0x14c   :  { %v3002_v22 = vpop.f32.mrf.mxu1 }
 0x14d   :  { %v2120_v23 = vpop.f32.mrf.mxu0 }
 0x14e   :  { %v3004_v24 = vpop.f32.mrf.mxu1  ;;  %v2121_v35 = vadd.f32 %v2120_v23, %v2119_v19  ;;  %v3227_v29 = vld [vmem:[#allocation11_spill] sm:$0xff] }
 0x14f   :  { %v3006_v25 = vpop.f32.mrf.mxu0  ;;  %v2179_v12 = vadd.f32 %v3227_v29, %v2990_v9 }
 0x150   :  { %v3008_v26 = vpop.f32.mrf.mxu1  ;;  %v3233_v44 = vld [vmem:[#allocation12_spill] sm:$0xff] }
 0x151   :  { %3219 = vst [vmem:[#allocation14_spill] sm:$0xff] %v3008_v26  ;;  %v2123_v28 = vpop.f32.mrf.mxu0  ;;  %v1878_v26 = vunpack.c.h.bf16 %v3032_v31  ;;  %v1407_v9 = vadd.f32 %v2179_v12, %v1310_v49 }
 0x152   :  { %v3010_v30 = vpop.f32.mrf.mxu1 }
 0x153   :  { %3220 = vst [vmem:[#allocation15_spill] sm:$0xff] %v3010_v30  ;;  %v2125_v32 = vpop.f32.mrf.mxu0 }
 0x154   :  { %v3027_v10 = vpop.f32.mrf.mxu1 }
 0x155   :  { %3224 = vst [vmem:[#allocation19_spill] sm:$0xff] %v3027_v10  ;;  %v2126_v21 = vpop.f32.mrf.mxu0  ;;  %v3047_v10 = vld [vmem:[%s3199_s3 + $0x38] sm:$0xff]  }
 0x156   :  { %v3034_v30 = vpop.f32.mrf.mxu1 }
 0x157   :  { %3225 = vst [vmem:[#allocation20_spill] sm:$0xff] %v3034_v30  ;;  %v3049_v34 = vpop.f32.mrf.mxu0  ;;  %v3058_v30 = vld [vmem:[%s3199_s3 + $0x10] sm:$0xff]  }
 0x158   :  { %3226 = vst [vmem:[#allocation21_spill] sm:$0xff] %v3049_v34  ;;  %v2100_v34 = vadd.f32 %v2099_v50, %v2098_v48  ;;  %v3065_v40 = vpop.f32.mrf.mxu1  ;;  %v2158_v50 = vadd.f32 %v2954_v41, %v2952_v39  ;;  %v1870_v27 = vunpack.c.h.bf16 %v3058_v30  ;;  %v2161_v48 = vadd.f32 %v2960_v46, %v2958_v45 }
 0x159   :  { %v2129_v37 = vpop.f32.mrf.mxu0  ;;  %v2106_v39 = vadd.f32 %v2974_v60, %v2970_v57  ;;  %v1302_v41 = vadd.f32 %v2109_v15, %v2922_v11  ;;  %v2173_v45 = vadd.f32 %v2980_v2, %v2978_v63  ;;  %v1318_v11 = vadd.f32 %v2121_v35, %v2934_v47 }
 0x15a   :  { %v3071_v38 = vpop.f32.mrf.mxu1  ;;  %v1289_v0 = vadd.f32 %v2100_v34, %v2913_v51  ;;  %v3089_v23 = vadd.f32 %v2158_v50, %v1281_v17  ;;  %v2167_v51 = vadd.f32 %v2968_v55, %v2966_v53  ;;  %v2124_v46 = vadd.f32 %v2123_v28, %v3006_v25  ;;  %v3230_v25 = vld [vmem:[#allocation4_spill] sm:$0xff]  ;;  %v3231_v34 = vld [vmem:[#allocation9_spill] sm:$0xff] }
 0x15b   :  { %v2131_v42 = vpop.f32.mrf.mxu0  ;;  %v2127_v57 = vadd.f32 %v2126_v21, %v2125_v32  ;;  %v1383_v53 = vadd.f32 %v2161_v48, %v1286_v62  ;;  %v3107_v4 = vadd.f32 %v2106_v39, %v2919_v3  ;;  %v2185_v47 = vadd.f32 %v3004_v24, %v3002_v22  ;;  %v3229_v3 = vld [vmem:[#allocation3_spill] sm:$0xff]  ;;  %v3232_v22 = vld [vmem:[#allocation10_spill] sm:$0xff]  ;;  %v3234_v48 = vld [vmem:[#allocation13_spill] sm:$0xff] }
 0x15c   :  { %v2195_v33 = vpop.f32.mrf.mxu1  ;;  %v1386_v55 = vadd.f32 %v2164_v43, %v1289_v0  ;;  %v3104_v8 = vadd.f32 %v2167_v51, %v1294_v13  ;;  %v1399_v21 = vadd.f32 %v2173_v45, %v1302_v41  ;;  %v1305_v2 = vadd.f32 %v2112_v59, %v2925_v20  ;;  %v3235_v62 = vld [vmem:[#allocation14_spill] sm:$0xff]  ;;  %v3236_v0 = vld [vmem:[#allocation15_spill] sm:$0xff] }
 0x15d   :  { %v2132_v19 = vpop.f32.mrf.mxu0  ;;  %v1313_v13 = vadd.f32 %v2118_v56, %v3228_v14  ;;  %v1321_v17 = vadd.f32 %v2124_v46, %v3229_v3  ;;  %v1326_v28 = vadd.f32 %v2127_v57, %v3230_v25  ;;  %v1415_v32 = vadd.f32 %v2185_v47, %v1318_v11  ;;  %v3237_v39 = vld [vmem:[#allocation19_spill] sm:$0xff]  ;;  %v3240_v45 = vld [vmem:[#allocation6_spill] sm:$0xff]  ;;  %v3241_v46 = vld [vmem:[#allocation8_spill] sm:$0xff] }
 0x15e   :  { %v2196_v1 = vpop.f32.mrf.mxu1  ;;  %v2133_v15 = vadd.f32 %v2132_v19, %v2131_v42  ;;  %v2176_v24 = vadd.f32 %v3232_v22, %v3231_v34  ;;  %v2182_v20 = vadd.f32 %v3234_v48, %v3233_v44  ;;  %v2188_v42 = vadd.f32 %v3236_v0, %v3235_v62  ;;  %v3238_v41 = vld [vmem:[#allocation20_spill] sm:$0xff]  ;;  %v3245_v44 = vld [vmem:[#allocation5_spill] sm:$0xff] }
 0x15f   :  { %v2134_v60 = vpop.f32.mrf.mxu0  ;;  %v2191_v19 = vadd.f32 %v3238_v41, %v3237_v39  ;;  %v3239_v43 = vld [vmem:[#allocation21_spill] sm:$0xff]  ;;  %v2194_v25 = vadd.f32 %v3071_v38, %v3065_v40 }
 0x160   :  { %v2198_v52 = vpop.f32.mrf.mxu1  ;;  %v2130_v51 = vadd.f32 %v2129_v37, %v3239_v43  ;;  %v1334_v11 = vadd.f32 %v2133_v15, %v3240_v45  ;;  %v1410_v47 = vadd.f32 %v2182_v20, %v1313_v13  ;;  %v1418_v14 = vadd.f32 %v2188_v42, %v1321_v17  ;;  %v3243_v37 = vld [vmem:[#allocation16_spill] sm:$0xff]  ;;  %v3246_v13 = vld [vmem:[#allocation17_spill] sm:$0xff] }
 0x161   :  { %v2135_v63 = vpop.f32.mrf.mxu0  ;;  %v1423_v3 = vadd.f32 %v2191_v19, %v1326_v28  ;;  %v3250_v62 = vunpack.c.h.bf16 %v3243_v37 }
 0x162   :  { %v2199_v16 = vpop.f32.mrf.mxu1  ;;  %v2136_v58 = vadd.f32 %v2135_v63, %v2134_v60  ;;  %v1402_v63 = vadd.f32 %v2176_v24, %v1305_v2  ;;  %v1329_v48 = vadd.f32 %v2130_v51, %v3245_v44  ;;  %v3247_v2 = vunpack.c.l.bf16 %v3246_v13 }
 0x163   :  { %v2235_v61 = vpop.f32.mrf.mxu0 }
 0x164   :  { %v1480_v50 = vadd.f32 %v2235_v61, %v1383_v53  ;;  %v2243_v35 = vpop.f32.mrf.mxu1  ;;  %v3242_v53 = vld [vmem:[#allocation7_spill] sm:$0xff]  ;;  %v2197_v61 = vadd.f32 %v2196_v1, %v2195_v33 }
 0x165   :  { %v1512_v59 = vadd.f32 %v2243_v35, %v1415_v32  ;;  %v1471_v56 = vpop.f32.mrf.mxu0  ;;  %v1337_v29 = vadd.f32 %v2136_v58, %v3242_v53  ;;  %v3244_v32 = vunpack.c.l.bf16 %v3243_v37  ;;  %v2200_v35 = vadd.f32 %v2199_v16, %v2198_v52 }
 0x166   :  { %v1472_v57 = vadd.f32 %v1471_v56, %v3241_v46  ;;  %v1503_v60 = vpop.f32.mrf.mxu1  ;;  %v1431_v1 = vadd.f32 %v2197_v61, %v1334_v11  ;;  %v3252_v52 = vunpack.c.h.bf16 %v3246_v13  ;;  %v1426_v13 = vadd.f32 %v2194_v25, %v1329_v48 }
 0x167   :  { %v1504_v49 = vadd.f32 %v1503_v60, %v1407_v9  ;;  %v2236_v12 = vpop.f32.mrf.mxu0  ;;  %v1568_v34 = vadd.f32 %v3244_v32, %v1480_v50  ;;  %v1576_v24 = vadd.f32 %v3247_v2, %v1512_v59  ;;  %v3248_v9 = vld [vmem:[#allocation18_spill] sm:$0xff]  ;;  %v1434_v39 = vadd.f32 %v2200_v35, %v1337_v29 }
 0x168   :  { %v1483_v22 = vadd.f32 %v2236_v12, %v1386_v55  ;;  %v2244_v15 = vpop.f32.mrf.mxu1  ;;  %v3249_v17 = vunpack.c.l.bf16 %v3248_v9  ;;  %v3251_v55 = vunpack.c.l.bf16 %v3032_v31  ;;  %v3253_v43 = vunpack.c.h.bf16 %v3248_v9 }
 0x169   :  { %v1515_v58 = vadd.f32 %v2244_v15, %v1418_v14  ;;  %v1474_v20 = vpop.f32.mrf.mxu0  ;;  %v1584_v41 = vmax.f32 %v1568_v34, 0.0  ;;  %v1592_v45 = vmax.f32 %v1576_v24, 0.0  ;;  %v3256_v24 = vunpack.c.l.bf16 %v3063_v5 }
 0x16a   :  { %v1566_v28 = vadd.f32 %v3249_v17, %v1472_v57  ;;  %v1569_v38 = vadd.f32 %v3250_v62, %v1483_v22  ;;  %v1475_v33 = vadd.f32 %v1474_v20, %v3089_v23  ;;  %v1506_v40 = vpop.f32.mrf.mxu1  ;;  %v1574_v50 = vadd.f32 %v3251_v55, %v1504_v49 }
 0x16b   :  { %v1577_v16 = vadd.f32 %v3252_v52, %v1515_v58  ;;  %v1507_v0 = vadd.f32 %v1506_v40, %v1410_v47  ;;  %v2239_v42 = vpop.f32.mrf.mxu0  ;;  %v1394_v22 = vadd.f32 %v3111_v6, %v3107_v4  ;;  %v3257_v25 = vunpack.c.h.bf16 %v3047_v10 }
 0x16c   :  { %v1585_v19 = vmax.f32 %v1569_v38, 0.0  ;;  %v1567_v51 = vadd.f32 %v3253_v43, %v1475_v33  ;;  %v1496_v59 = vadd.f32 %v2239_v42, %v1399_v21  ;;  %v2247_v56 = vpop.f32.mrf.mxu1  ;;  %v1582_v60 = vmax.f32 %v1566_v28, 0.0 }
 0x16d   :  { %v1593_v23 = vmax.f32 %v1577_v16, 0.0  ;;  %v1575_v11 = vadd.f32 %v1878_v26, %v1507_v0  ;;  %v1528_v46 = vadd.f32 %v2247_v56, %v1431_v1  ;;  %v1487_v57 = vpop.f32.mrf.mxu0  ;;  %v1590_v12 = vmax.f32 %v1574_v50, 0.0 }
 0x16e   :  { %v1899_v53 = vpack.c.bf16 %v1585_v19, %v1584_v41  ;;  %v1583_v49 = vmax.f32 %v1567_v51, 0.0  ;;  %v1488_v47 = vadd.f32 %v1487_v57, %v3104_v8  ;;  %v1519_v29 = vpop.f32.mrf.mxu1  ;;  %v1572_v31 = vadd.f32 %v1873_v36, %v1496_v59 }
 0x16f   :  { %v1919_v14 = vpack.c.bf16 %v1593_v23, %v1592_v45  ;;  %v1591_v61 = vmax.f32 %v1575_v11, 0.0  ;;  %v1520_v37 = vadd.f32 %v1519_v29, %v1423_v3  ;;  %v2240_v32 = vpop.f32.mrf.mxu0  ;;  %v3254_v3 = vunpack.c.l.bf16 %v3047_v10 }
 0x170   :  { %1938 = vst [vmem:[%s3200_s4 + $0x8] sm:$0xff] %v1899_v53   ;;  %v1894_v21 = vpack.c.bf16 %v1583_v49, %v1582_v60  ;;  %v1499_v26 = vadd.f32 %v2240_v32, %v1402_v63  ;;  %v2248_v34 = vpop.f32.mrf.mxu1  ;;  %v3255_v36 = vunpack.c.l.bf16 %v3058_v30  ;;  %v1588_v9 = vmax.f32 %v1572_v31, 0.0 }
 0x171   :  { %1942 = vst [vmem:[%s3200_s4 + $0x28] sm:$0xff] %v1919_v14   ;;  %v1914_v8 = vpack.c.bf16 %v1591_v61, %v1590_v12  ;;  %v1580_v15 = vadd.f32 %v3254_v3, %v1528_v46  ;;  %v1531_v44 = vadd.f32 %v2248_v34, %v1434_v39  ;;  %v1490_v35 = vpop.f32.mrf.mxu0  ;;  %v1578_v58 = vadd.f32 %v3256_v24, %v1520_v37 }
 0x172   :  { %1895 = vst [vmem:[%s3200_s4] sm:$0xff] %v1894_v21   ;;  %v1570_v63 = vadd.f32 %v3255_v36, %v1488_v47  ;;  %v1573_v4 = vadd.f32 %v1874_v18, %v1499_v26  ;;  %v1491_v6 = vadd.f32 %v1490_v35, %v1394_v22  ;;  %v1522_v2 = vpop.f32.mrf.mxu1 }
 0x173   :  { %1941 = vst [vmem:[%s3200_s4 + $0x20] sm:$0xff] %v1914_v8   ;;  %v1581_v48 = vadd.f32 %v3257_v25, %v1531_v44  ;;  %v1523_v20 = vadd.f32 %v1522_v2, %v1426_v13  ;;  %v1596_v7 = vmax.f32 %v1580_v15, 0.0  ;;  %v1594_v1 = vmax.f32 %v1578_v58, 0.0 }
 0x174   :  { %v1589_v17 = vmax.f32 %v1573_v4, 0.0  ;;  %v1571_v28 = vadd.f32 %v1870_v27, %v1491_v6  ;;  %v1586_v38 = vmax.f32 %v1570_v63, 0.0 }
 0x175   :  { %v1597_v18 = vmax.f32 %v1581_v48, 0.0  ;;  %v1579_v62 = vadd.f32 %v1886_v54, %v1523_v20 }
 0x176   :  { %v1909_v33 = vpack.c.bf16 %v1589_v17, %v1588_v9  ;;  %v1587_v40 = vmax.f32 %v1571_v28, 0.0 }
 0x177   :  { %v1929_v55 = vpack.c.bf16 %v1597_v18, %v1596_v7  ;;  %v1595_v50 = vmax.f32 %v1579_v62, 0.0 }
 0x178   :  { %1940 = vst [vmem:[%s3200_s4 + $0x18] sm:$0xff] %v1909_v33   ;;  %v1904_v10 = vpack.c.bf16 %v1587_v40, %v1586_v38 }
 0x179   :  { %1944 = vst [vmem:[%s3200_s4 + $0x38] sm:$0xff] %v1929_v55   ;;  %v1924_v30 = vpack.c.bf16 %v1595_v50, %v1594_v1 }
 0x17a   :  { %1939 = vst [vmem:[%s3200_s4 + $0x10] sm:$0xff] %v1904_v10  }
 0x17b   :  { %1943 = vst [vmem:[%s3200_s4 + $0x30] sm:$0xff] %v1924_v30  }

// kernel: resnet_forward.11
= control target key start
LH: loop header
LB: loop body
LE: loop exit
PB: predicated region body
PF: predicated region fallthrough
CT: control target
= control target key end

     0   :  { %s1632_s1 = inlined_call_operand.vmem [shape: bf16[1152,128], index: 1, kind: input, shape index: {}]   ;;  %s1633_s0 = inlined_call_operand.vmem [shape: bf16[32,1152], index: 0, kind: input, shape index: {}]   ;;  %s1634_s2 = inlined_call_operand.vmem [shape: f32[1,128], index: 2, kind: input, shape index: {}]   ;;  %s1635_s3 = inlined_call_operand.vmem [shape: bf16[32,128], index: 3, kind: output, shape index: {}]  }
   0x1   :  { %v1235_v0 = vld [vmem:[%s1632_s1 + $0x78] sm:$0xff]   ;;  %v1239_v4 = vld [vmem:[%s1632_s1 + $0x70] sm:$0xff]   ;;  %v1243_v8 = vld [vmem:[%s1632_s1 + $0x68] sm:$0xff]  }
   0x2   :  { %v1236_v1 = vld [vmem:[%s1632_s1 + $0x38] sm:$0xff]   ;;  %1093 = vmatprep.subr.bf16.mxu0 %v1235_v0  ;;  %v1240_v5 = vld [vmem:[%s1632_s1 + $0x30] sm:$0xff]   ;;  %v1244_v9 = vld [vmem:[%s1632_s1 + $0x28] sm:$0xff]  }
   0x3   :  { %v1237_v2 = vld [vmem:[%s1632_s1 + $0xf8] sm:$0xff]   ;;  %1094 = vmatpush3.bf16.msra.mxu0 %v1236_v1  ;;  %v1241_v6 = vld [vmem:[%s1632_s1 + $0xf0] sm:$0xff]   ;;  %v1245_v10 = vld [vmem:[%s1632_s1 + $0xe8] sm:$0xff]  }
   0x4   :  { %v1238_v3 = vld [vmem:[%s1632_s1 + $0xb8] sm:$0xff]   ;;  %1121 = vmatprep.subr.bf16.mxu1 %v1237_v2  ;;  %1095 = vmatprep.subr.bf16.mxu0 %v1239_v4  ;;  %v1242_v7 = vld [vmem:[%s1632_s1 + $0xb0] sm:$0xff]   ;;  %v1246_v11 = vld [vmem:[%s1632_s1 + $0xa8] sm:$0xff]  }
   0x5   :  { %1122 = vmatpush3.bf16.msra.mxu1 %v1238_v3  ;;  %v1247_v12 = vld [vmem:[%s1632_s1 + $0x60] sm:$0xff]   ;;  %v1251_v16 = vld [vmem:[%s1632_s1 + $0x58] sm:$0xff]   ;;  %v1255_v20 = vld [vmem:[%s1632_s1 + $0x50] sm:$0xff]  }
   0x6   :  { %1123 = vmatprep.subr.bf16.mxu1 %v1241_v6  ;;  %v1248_v13 = vld [vmem:[%s1632_s1 + $0x20] sm:$0xff]   ;;  %v1252_v17 = vld [vmem:[%s1632_s1 + $0x18] sm:$0xff]   ;;  %v1256_v21 = vld [vmem:[%s1632_s1 + $0x10] sm:$0xff]  }
   0x7   :  { %1096 = vmatpush3.bf16.msra.mxu0 %v1240_v5  ;;  %v1249_v14 = vld [vmem:[%s1632_s1 + $0xe0] sm:$0xff]   ;;  %v1253_v18 = vld [vmem:[%s1632_s1 + $0xd8] sm:$0xff]   ;;  %v1257_v22 = vld [vmem:[%s1632_s1 + $0xd0] sm:$0xff]  }
   0x8   :  { %1097 = vmatprep.subr.bf16.mxu0 %v1243_v8  ;;  %v1250_v15 = vld [vmem:[%s1632_s1 + $0xa0] sm:$0xff]   ;;  %v1254_v19 = vld [vmem:[%s1632_s1 + $0x98] sm:$0xff]   ;;  %v1258_v23 = vld [vmem:[%s1632_s1 + $0x90] sm:$0xff]  }
   0x9   :  { %1124 = vmatpush3.bf16.msra.mxu1 %v1242_v7  ;;  %v1259_v24 = vld [vmem:[%s1632_s1 + $0x48] sm:$0xff]   ;;  %v1263_v28 = vld [vmem:[%s1632_s1 + $0x40] sm:$0xff]   ;;  %v1270_v34 = vld [vmem:[%s1632_s1 + $0x178] sm:$0xff]  }
   0xa   :  { %1125 = vmatprep.subr.bf16.mxu1 %v1245_v10  ;;  %v1260_v25 = vld [vmem:[%s1632_s1 + $0x8] sm:$0xff]   ;;  %v1264_v29 = vld [vmem:[%s1632_s1] sm:$0xff]   ;;  %v1274_v37 = vld [vmem:[%s1632_s1 + $0x138] sm:$0xff]  }
   0xb   :  { %1098 = vmatpush3.bf16.msra.mxu0 %v1244_v9  ;;  %v1261_v26 = vld [vmem:[%s1632_s1 + $0xc8] sm:$0xff]   ;;  %v1265_v30 = vld [vmem:[%s1632_s1 + $0xc0] sm:$0xff]   ;;  %v1275_v38 = vld [vmem:[%s1632_s1 + $0x1f8] sm:$0xff]  }
   0xc   :  { %1099 = vmatprep.subr.bf16.mxu0 %v1247_v12  ;;  %v1262_v27 = vld [vmem:[%s1632_s1 + $0x88] sm:$0xff]   ;;  %v1266_v31 = vld [vmem:[%s1633_s0] ss:$36 sps:$4 sm:$0xff]   ;;  %v1276_v39 = vld [vmem:[%s1632_s1 + $0x1b8] sm:$0xff]  }
   0xd   :  { %1126 = vmatpush3.bf16.msra.mxu1 %v1246_v11  ;;  %v1268_v32 = vld [vmem:[%s1633_s0 + $0x4] ss:$36 sps:$4 sm:$0xff]   ;;  %v1273_v36 = vld [vmem:[%s1633_s0 + $0xc] ss:$36 sps:$4 sm:$0xff]   ;;  %v1289_v52 = vld [vmem:[%s1632_s1 + $0x158] sm:$0xff]  }
   0xe   :  { %1127 = vmatprep.subr.bf16.mxu1 %v1249_v14  ;;  %v1269_v33 = vld [vmem:[%s1632_s1 + $0x80] sm:$0xff]   ;;  %742 = vmatprep.mubr.bf16.mxu0 %v1268_v32  ;;  %v1271_v35 = vld [vmem:[%s1633_s0 + $0x8] ss:$36 sps:$4 sm:$0xff]   ;;  %v1277_v40 = vld [vmem:[%s1632_s1 + $0x170] sm:$0xff]  }
   0xf   :  { %1100 = vmatpush3.bf16.msra.mxu0 %v1248_v13  ;;  %791 = vmatprep.mubr.bf16.mxu1 %v1273_v36  ;;  %v1278_v41 = vld [vmem:[%s1632_s1 + $0x130] sm:$0xff]   ;;  %v1281_v44 = vld [vmem:[%s1632_s1 + $0x168] sm:$0xff]   ;;  %v1285_v48 = vld [vmem:[%s1632_s1 + $0x160] sm:$0xff]  }
  0x10   :  { %1101 = vmatprep.subr.bf16.mxu0 %v1251_v16  ;;  %v1279_v42 = vld [vmem:[%s1632_s1 + $0x1f0] sm:$0xff]   ;;  %v1282_v45 = vld [vmem:[%s1632_s1 + $0x128] sm:$0xff]   ;;  %v1286_v49 = vld [vmem:[%s1632_s1 + $0x120] sm:$0xff]  }
  0x11   :  { %1128 = vmatpush3.bf16.msra.mxu1 %v1250_v15  ;;  %v1280_v43 = vld [vmem:[%s1632_s1 + $0x1b0] sm:$0xff]   ;;  %v1283_v46 = vld [vmem:[%s1632_s1 + $0x1e8] sm:$0xff]   ;;  %v1287_v50 = vld [vmem:[%s1632_s1 + $0x1e0] sm:$0xff]  }
  0x12   :  { %1129 = vmatprep.subr.bf16.mxu1 %v1253_v18  ;;  %v1284_v47 = vld [vmem:[%s1632_s1 + $0x1a8] sm:$0xff]   ;;  %v1288_v51 = vld [vmem:[%s1632_s1 + $0x1a0] sm:$0xff]   ;;  %v1290_v53 = vld [vmem:[%s1632_s1 + $0x118] sm:$0xff]  }
  0x13   :  { %1102 = vmatpush3.bf16.msra.mxu0 %v1252_v17  ;;  %v1291_v54 = vld [vmem:[%s1633_s0 + $0x4c] ss:$36 sps:$4 sm:$0xff]   ;;  %v1293_v55 = vld [vmem:[%s1632_s1 + $0x1d8] sm:$0xff]   ;;  %v1307_v4 = vld [vmem:[%s1632_s1 + $0x140] sm:$0xff]  }
  0x14   :  { %1103 = vmatprep.subr.bf16.mxu0 %v1255_v20  ;;  %v1294_v56 = vld [vmem:[%s1633_s0 + $0x48] ss:$36 sps:$4 sm:$0xff]   ;;  %v1295_v57 = vld [vmem:[%s1632_s1 + $0x198] sm:$0xff]   ;;  %v1298_v59 = vld [vmem:[%s1632_s1 + $0x150] sm:$0xff]  }
  0x15   :  { %1130 = vmatpush3.bf16.msra.mxu1 %v1254_v19  ;;  %v1296_v58 = vld [vmem:[%s1633_s0 + $0x54] ss:$36 sps:$4 sm:$0xff]   ;;  %v1303_v0 = vld [vmem:[%s1632_s1 + $0x148] sm:$0xff]   ;;  %v1308_v5 = vld [vmem:[%s1632_s1 + $0x100] sm:$0xff]  }
  0x16   :  { %1131 = vmatprep.subr.bf16.mxu1 %v1257_v22  ;;  %v1299_v60 = vld [vmem:[%s1633_s0 + $0x50] ss:$36 sps:$4 sm:$0xff]   ;;  %v1304_v1 = vld [vmem:[%s1632_s1 + $0x108] sm:$0xff]   ;;  %v1309_v6 = vld [vmem:[%s1632_s1 + $0x1c0] sm:$0xff]  }
  0x17   :  { %1104 = vmatpush3.bf16.msra.mxu0 %v1256_v21  ;;  %v1300_v61 = vld [vmem:[%s1632_s1 + $0x110] sm:$0xff]   ;;  %v1305_v2 = vld [vmem:[%s1632_s1 + $0x1c8] sm:$0xff]   ;;  %v1313_v9 = vld [vmem:[%s1632_s1 + $0x180] sm:$0xff]  }
  0x18   :  { %1105 = vmatprep.subr.bf16.mxu0 %v1259_v24  ;;  %v1301_v62 = vld [vmem:[%s1632_s1 + $0x1d0] sm:$0xff]   ;;  %v1306_v3 = vld [vmem:[%s1632_s1 + $0x188] sm:$0xff]   ;;  %v1314_v10 = vld [vmem:[%s1632_s1 + $0x238] sm:$0xff]  }
  0x19   :  { %1132 = vmatpush3.bf16.msra.mxu1 %v1258_v23  ;;  %v1302_v63 = vld [vmem:[%s1632_s1 + $0x190] sm:$0xff]   ;;  %v1315_v11 = vld [vmem:[%s1633_s0 + $0x18] ss:$36 sps:$4 sm:$0xff]   ;;  %v1322_v16 = vld [vmem:[%s1632_s1 + $0x228] sm:$0xff]  }
  0x1a   :  { %1133 = vmatprep.subr.bf16.mxu1 %v1261_v26  ;;  %v1310_v7 = vld [vmem:[%s1633_s0 + $0x10] ss:$36 sps:$4 sm:$0xff]   ;;  %v1317_v12 = vld [vmem:[%s1633_s0 + $0x1c] ss:$36 sps:$4 sm:$0xff]   ;;  %v1323_v17 = vld [vmem:[%s1633_s0 + $0x64] ss:$36 sps:$4 sm:$0xff]  }
  0x1b   :  { %1106 = vmatpush3.bf16.msra.mxu0 %v1260_v25  ;;  %v1312_v8 = vld [vmem:[%s1633_s0 + $0x14] ss:$36 sps:$4 sm:$0xff]   ;;  %v1319_v14 = vld [vmem:[%s1633_s0 + $0x5c] ss:$36 sps:$4 sm:$0xff]   ;;  %v1329_v23 = vld [vmem:[%s1632_s1 + $0x208] sm:$0xff]  }
  0x1c   :  { %1107 = vmatprep.subr.bf16.mxu0 %v1263_v28  ;;  %v1318_v13 = vld [vmem:[%s1632_s1 + $0x230] sm:$0xff]   ;;  %v1321_v15 = vld [vmem:[%s1633_s0 + $0x58] ss:$36 sps:$4 sm:$0xff]   ;;  %v1325_v18 = vld [vmem:[%s1633_s0 + $0x60] ss:$36 sps:$4 sm:$0xff]  }
  0x1d   :  { %1134 = vmatpush3.bf16.msra.mxu1 %v1262_v27  ;;  %v1326_v19 = vld [vmem:[%s1632_s1 + $0x220] sm:$0xff]   ;;  %v1327_v20 = vld [vmem:[%s1632_s1 + $0x218] sm:$0xff]   ;;  %v1328_v22 = vld [vmem:[%s1632_s1 + $0x210] sm:$0xff]  }
  0x1e   :  { %1135 = vmatprep.subr.bf16.mxu1 %v1265_v30  ;;  %v1331_v21 = vld [vmem:[%s1633_s0 + $0x20] ss:$36 sps:$4 sm:$0xff]   ;;  %v1332_v25 = vld [vmem:[%s1633_s0 + $0x68] ss:$36 sps:$4 sm:$0xff]  }
  0x1f   :  { %1108 = vmatpush3.bf16.msra.mxu0 %v1264_v29  ;;  %v1330_v24 = vld [vmem:[%s1632_s1 + $0x200] sm:$0xff]  }
  0x20   :  { %1149 = vmatprep.subr.bf16.mxu0 %v1270_v34 }
  0x21   :  { %1136 = vmatpush3.bf16.msra.mxu1 %v1269_v33 }
  0x22   :  { %743 = vmatmul.mubr.bf16.vlgmr.msra.gmra.mxu0 %v1266_v31  ;;  %1177 = vmatprep.subr.bf16.mxu1 %v1275_v38 }
  0x23   :  { %1150 = vmatpush3.bf16.msra.mxu0 %v1274_v37  ;;  %750 = vmatprep.mubr.bf16.mxu0 %v1291_v54 }
  0x24   :  { %792 = vmatmul.mubr.bf16.vlgmr.msra.gmra.mxu1 %v1271_v35  ;;  %1151 = vmatprep.subr.bf16.mxu0 %v1277_v40 }
  0x25   :  { %1178 = vmatpush3.bf16.msra.mxu1 %v1276_v39  ;;  %799 = vmatprep.mubr.bf16.mxu1 %v1296_v58 }
  0x26   :  { %1179 = vmatprep.subr.bf16.mxu1 %v1279_v42 }
  0x27   :  { %1152 = vmatpush3.bf16.msra.mxu0 %v1278_v41 }
  0x28   :  { %1153 = vmatprep.subr.bf16.mxu0 %v1281_v44 }
  0x29   :  { %1180 = vmatpush3.bf16.msra.mxu1 %v1280_v43 }
  0x2a   :  { %1181 = vmatprep.subr.bf16.mxu1 %v1283_v46  ;;  %751 = vmatmul.mubr.bf16.gmra.mxu0 %v1294_v56 }
  0x2b   :  { %1154 = vmatpush3.bf16.msra.mxu0 %v1282_v45  ;;  %840 = vmatprep.mubr.bf16.mxu0 %v1312_v8 }
  0x2c   :  { %1155 = vmatprep.subr.bf16.mxu0 %v1285_v48  ;;  %800 = vmatmul.mubr.bf16.gmra.mxu1 %v1299_v60 }
  0x2d   :  { %1182 = vmatpush3.bf16.msra.mxu1 %v1284_v47  ;;  %889 = vmatprep.mubr.bf16.mxu1 %v1317_v12 }
  0x2e   :  { %1183 = vmatprep.subr.bf16.mxu1 %v1287_v50 }
  0x2f   :  { %1156 = vmatpush3.bf16.msra.mxu0 %v1286_v49 }
  0x30   :  { %1157 = vmatprep.subr.bf16.mxu0 %v1289_v52 }
  0x31   :  { %1184 = vmatpush3.bf16.msra.mxu1 %v1288_v51 }
  0x32   :  { %1185 = vmatprep.subr.bf16.mxu1 %v1293_v55 }
  0x33   :  { %1158 = vmatpush3.bf16.msra.mxu0 %v1290_v53 }
  0x34   :  { %1159 = vmatprep.subr.bf16.mxu0 %v1298_v59 }
  0x35   :  { %1186 = vmatpush3.bf16.msra.mxu1 %v1295_v57  ;;  %v983_v57 = vld [vmem:[%s1634_s2] ss:$0 sm:$0xff] }
  0x36   :  { %1187 = vmatprep.subr.bf16.mxu1 %v1301_v62 }
  0x37   :  { %1160 = vmatpush3.bf16.msra.mxu0 %v1300_v61 }
  0x38   :  { %1161 = vmatprep.subr.bf16.mxu0 %v1303_v0 }
  0x39   :  { %1188 = vmatpush3.bf16.msra.mxu1 %v1302_v63 }
  0x3a   :  { %1189 = vmatprep.subr.bf16.mxu1 %v1305_v2 }
  0x3b   :  { %1162 = vmatpush3.bf16.msra.mxu0 %v1304_v1 }
  0x3c   :  { %1163 = vmatprep.subr.bf16.mxu0 %v1307_v4 }
  0x3d   :  { %1190 = vmatpush3.bf16.msra.mxu1 %v1306_v3 }
  0x3e   :  { %1191 = vmatprep.subr.bf16.mxu1 %v1309_v6 }
  0x3f   :  { %1164 = vmatpush3.bf16.msra.mxu0 %v1308_v5 }
  0x40   :  { %1215 = vmatprep.subr.bf16.mxu0 %v1314_v10 }
  0x41   :  { %1192 = vmatpush3.bf16.msra.mxu1 %v1313_v9 }
  0x42   :  { %841 = vmatmul.mubr.bf16.vlgmr.msra.gmra.mxu0 %v1310_v7 }
  0x43   :  { %1216 = vmatpush3.bf16.msra.mxu0 %v1314_v10  ;;  %848 = vmatprep.mubr.bf16.mxu0 %v1319_v14 }
  0x44   :  { %890 = vmatmul.mubr.bf16.vlgmr.msra.gmra.mxu1 %v1315_v11  ;;  %1217 = vmatprep.subr.bf16.mxu0 %v1318_v13 }
  0x45   :  { %897 = vmatprep.mubr.bf16.mxu1 %v1323_v17 }
  0x47   :  { %1218 = vmatpush3.bf16.msra.mxu0 %v1318_v13 }
  0x48   :  { %1219 = vmatprep.subr.bf16.mxu0 %v1322_v16 }
  0x4a   :  { %849 = vmatmul.mubr.bf16.gmra.mxu0 %v1321_v15 }
  0x4b   :  { %1220 = vmatpush3.bf16.msra.mxu0 %v1322_v16  ;;  %1231 = vmatprep.mubr.bf16.mxu0 %v1331_v21 }
  0x4c   :  { %898 = vmatmul.mubr.bf16.gmra.mxu1 %v1325_v18  ;;  %1221 = vmatprep.subr.bf16.mxu0 %v1326_v19 }
  0x4f   :  { %1222 = vmatpush3.bf16.msra.mxu0 %v1326_v19 }
  0x50   :  { %1223 = vmatprep.subr.bf16.mxu0 %v1327_v20 }
  0x53   :  { %1224 = vmatpush3.bf16.msra.mxu0 %v1327_v20 }
  0x54   :  { %1225 = vmatprep.subr.bf16.mxu0 %v1328_v22 }
  0x57   :  { %1226 = vmatpush3.bf16.msra.mxu0 %v1328_v22 }
  0x58   :  { %1227 = vmatprep.subr.bf16.mxu0 %v1329_v23 }
  0x5b   :  { %1228 = vmatpush3.bf16.msra.mxu0 %v1329_v23 }
  0x5c   :  { %1229 = vmatprep.subr.bf16.mxu0 %v1330_v24 }
  0x5f   :  { %1230 = vmatpush3.bf16.msra.mxu0 %v1330_v24 }
  0x62   :  { %1232 = vmatmul.mubr.bf16.vlgmr.msra.gmra.mxu0 %v1332_v25 }
  0xe2   :  { %v1109_v26 = vpop.f32.mrf.mxu0 }
  0xe4   :  { %v1137_v27 = vpop.f32.mrf.mxu1  ;;  %v1110_v28 = vpop.f32.mrf.mxu0 }
  0xe5   :  { %v1111_v54 = vadd.f32 %v1110_v28, %v1109_v26 }
  0xe6   :  { %v1138_v29 = vpop.f32.mrf.mxu1  ;;  %v1112_v30 = vpop.f32.mrf.mxu0 }
  0xe7   :  { %v745_v62 = vadd.f32 %v1111_v54, %v983_v57  ;;  %v1139_v63 = vadd.f32 %v1138_v29, %v1137_v27 }
  0xe8   :  { %v1140_v31 = vpop.f32.mrf.mxu1  ;;  %v1113_v32 = vpop.f32.mrf.mxu0 }
  0xe9   :  { %v1114_v59 = vadd.f32 %v1113_v32, %v1112_v30  ;;  %v794_v10 = vadd.f32 %v1139_v63, %v745_v62 }
  0xea   :  { %v1115_v33 = vpop.f32.mrf.mxu0  ;;  %v1141_v34 = vpop.f32.mrf.mxu1 }
  0xeb   :  { %v748_v5 = vadd.f32 %v1114_v59, %v983_v57  ;;  %v1142_v6 = vadd.f32 %v1141_v34, %v1140_v31 }
  0xec   :  { %v1143_v35 = vpop.f32.mrf.mxu1  ;;  %v1116_v36 = vpop.f32.mrf.mxu0 }
  0xed   :  { %v1117_v53 = vadd.f32 %v1116_v36, %v1115_v33  ;;  %v797_v16 = vadd.f32 %v1142_v6, %v748_v5 }
  0xee   :  { %v1144_v37 = vpop.f32.mrf.mxu1  ;;  %v1118_v38 = vpop.f32.mrf.mxu0 }
  0xef   :  { %v753_v60 = vadd.f32 %v1117_v53, %v983_v57  ;;  %v1145_v61 = vadd.f32 %v1144_v37, %v1143_v35 }
  0xf0   :  { %v1146_v39 = vpop.f32.mrf.mxu1  ;;  %v1119_v40 = vpop.f32.mrf.mxu0 }
  0xf1   :  { %v1120_v58 = vadd.f32 %v1119_v40, %v1118_v38  ;;  %v802_v7 = vadd.f32 %v1145_v61, %v753_v60 }
  0xf2   :  { %v1147_v42 = vpop.f32.mrf.mxu1 }
  0xf3   :  { %v756_v2 = vadd.f32 %v1120_v58, %v983_v57  ;;  %v1148_v3 = vadd.f32 %v1147_v42, %v1146_v39 }
  0xf5   :  { %v805_v12 = vadd.f32 %v1148_v3, %v756_v2 }
 0x102   :  { %v1165_v41 = vpop.f32.mrf.mxu0 }
 0x104   :  { %v1166_v43 = vpop.f32.mrf.mxu0  ;;  %v1193_v44 = vpop.f32.mrf.mxu1 }
 0x105   :  { %v1167_v8 = vadd.f32 %v1166_v43, %v1165_v41 }
 0x106   :  { %v1168_v45 = vpop.f32.mrf.mxu0  ;;  %v1194_v46 = vpop.f32.mrf.mxu1 }
 0x107   :  { %v843_v17 = vadd.f32 %v1167_v8, %v794_v10  ;;  %v1195_v18 = vadd.f32 %v1194_v46, %v1193_v44 }
 0x108   :  { %v1169_v47 = vpop.f32.mrf.mxu0  ;;  %v1196_v48 = vpop.f32.mrf.mxu1 }
 0x109   :  { %v1170_v13 = vadd.f32 %v1169_v47, %v1168_v45  ;;  %v892_v27 = vadd.f32 %v1195_v18, %v843_v17 }
 0x10a   :  { %v1171_v49 = vpop.f32.mrf.mxu0  ;;  %v1197_v50 = vpop.f32.mrf.mxu1 }
 0x10b   :  { %v846_v22 = vadd.f32 %v1170_v13, %v797_v16  ;;  %v1198_v23 = vadd.f32 %v1197_v50, %v1196_v48 }
 0x10c   :  { %v1172_v51 = vpop.f32.mrf.mxu0  ;;  %v1199_v52 = vpop.f32.mrf.mxu1 }
 0x10d   :  { %v1173_v4 = vadd.f32 %v1172_v51, %v1171_v49  ;;  %v895_v32 = vadd.f32 %v1198_v23, %v846_v22 }
 0x10e   :  { %v1174_v55 = vpop.f32.mrf.mxu0  ;;  %v1200_v56 = vpop.f32.mrf.mxu1 }
 0x10f   :  { %v851_v14 = vadd.f32 %v1173_v4, %v802_v7  ;;  %v1201_v15 = vadd.f32 %v1200_v56, %v1199_v52 }
 0x110   :  { %v1175_v0 = vpop.f32.mrf.mxu0  ;;  %v1202_v1 = vpop.f32.mrf.mxu1 }
 0x111   :  { %v1176_v9 = vadd.f32 %v1175_v0, %v1174_v55  ;;  %v900_v24 = vadd.f32 %v1201_v15, %v851_v14 }
 0x112   :  { %v1203_v11 = vpop.f32.mrf.mxu1 }
 0x113   :  { %v854_v19 = vadd.f32 %v1176_v9, %v805_v12  ;;  %v1204_v20 = vadd.f32 %v1203_v11, %v1202_v1 }
 0x115   :  { %v903_v28 = vadd.f32 %v1204_v20, %v854_v19 }
 0x122   :  { %v1233_v21 = vpop.f32.mrf.mxu0 }
 0x123   :  { %v949_v26 = vadd.f32 %v1233_v21, %v900_v24 }
 0x124   :  { %v940_v25 = vpop.f32.mrf.mxu0 }
 0x125   :  { %v941_v30 = vadd.f32 %v940_v25, %v892_v27  ;;  %v957_v34 = vmax.f32 %v949_v26, 0.0 }
 0x126   :  { %v1234_v29 = vpop.f32.mrf.mxu0 }
 0x127   :  { %v952_v31 = vadd.f32 %v1234_v29, %v903_v28  ;;  %v955_v37 = vmax.f32 %v941_v30, 0.0 }
 0x128   :  { %v943_v33 = vpop.f32.mrf.mxu0 }
 0x129   :  { %v958_v35 = vmax.f32 %v952_v31, 0.0  ;;  %v944_v36 = vadd.f32 %v943_v33, %v895_v32 }
 0x12b   :  { %v1090_v38 = vpack.c.bf16 %v958_v35, %v957_v34  ;;  %v956_v39 = vmax.f32 %v944_v36, 0.0 }
 0x12d   :  { %1092 = vst [vmem:[%s1635_s3 + $0x8] sm:$0xff] %v1090_v38   ;;  %v1085_v40 = vpack.c.bf16 %v956_v39, %v955_v37 }
 0x12f   :  { %1086 = vst [vmem:[%s1635_s3] sm:$0xff] %v1085_v40  }

// kernel: resnet_forward.13
= control target key start
LH: loop header
LB: loop body
LE: loop exit
PB: predicated region body
PF: predicated region fallthrough
CT: control target
= control target key end

     0   :  { %s2419_s12 = smov 0   ;;  %s2421_s13 = smov 0   ;;  %s2920_s0 = inlined_call_operand.vmem [shape: bf16[32,1152], index: 0, kind: input, shape index: {}]   ;;  %s2921_s1 = inlined_call_operand.vmem [shape: bf16[1152,256], index: 1, kind: input, shape index: {}]   ;;  %s2922_s2 = inlined_call_operand.vmem [shape: f32[1,256], index: 2, kind: input, shape index: {}]   ;;  %s2923_s3 = inlined_call_operand.vmem [shape: bf16[32,256], index: 3, kind: output, shape index: {}]  }
   0x1   :  { %s2423_s14 = smov 0   ;;  %s2425_s15 = smov 0  }
   0x2   :  { %s2427_s16 = smov 0  }
   0x3 LB: > { %s22_s17 = sadd.s32 1, %s2393_s15  ;;  %s1955_s18 = sadd.s32 4294967295, %s2397_s16   ;;  %s2397_s16 = sphi %s2427_s16, %s13_s16   ;;  %s2393_s15 = sphi %s2425_s15, %s2928_s15   ;;  %s2389_s14 = sphi %s2423_s14, %s2927_s14   ;;  %s2385_s13 = sphi %s2421_s13, %s2926_s13   ;;  %s2381_s12 = sphi %s2419_s12, %s2925_s12  }
   0x4   : > { %p23_p0 = scmp.ge.s32.totalorder %s22_s17, 2  ;;  %p65_p1 = scmp.ne.s32.totalorder %s2385_s13, %s2381_s12 }
   0x5   : > { %p66_p2 = scmp.eq.s32.totalorder %s2397_s16, 0  ;;  %p123_p4 = scmp.eq.s32.totalorder %s1955_s18, 1 }
   0x6   : > { %s2930_s17 = smov (%p23_p0, %s22_s17), 0  ;;  %s58_s20 = sadd.s32 1, %s2385_s13 }
   0x7   : > { %p67_p3 = por %p66_p2, %p65_p1  ;;  %s55_s19 = ssub.s32 %s2393_s15, %s2930_s17 }
   0x8   : > { %p56_p5 = scmp.eq.s32.totalorder %s55_s19, 0  ;;  %p2454_p6 = por %p123_p4, %p65_p1 }
   0x9   : > { %p1959_p7 = scmp.ge.s32.totalorder %s2397_s16, 2 }
   0xa   : > { %s2459_s22 = scalar_select %p56_p5, %s2385_s13, %s58_s20  }
   0xb   : > { %155 = sbr.rel (%p1959_p7) target bundleno = 116 (0x74), region = 20 }
  0x10   : > { %158 = sbr.rel (!%p67_p3) target bundleno = 116 (0x74), region = 24  ;;  %s160_s23 = sand.u32 (%p67_p3), 1, %s2385_s13  }
  0x11   : > { %s1960_s24 = sshll.u32 (%p67_p3), %s2393_s15, 2  ;;  %s2219_s25 = smul.u32 (%p67_p3), 576, %s160_s23 }
  0x12   : > { %s2467_s28 = scalar_lea.vmem (%p67_p3), %s2921_s1, %s1960_s24 }
  0x13   : > { %v181_v0 = vld [vmem:[%s2467_s28] sm:$0xf] (%p67_p3)  ;;  %v183_v1 = vld [vmem:[%s2467_s28 + $0x8] sm:$0xf] (%p67_p3)  ;;  %v185_v2 = vld [vmem:[%s2467_s28 + $0x10] sm:$0xf] (%p67_p3) }
  0x14   : > { %v187_v3 = vld [vmem:[%s2467_s28 + $0x18] sm:$0xf] (%p67_p3)  ;;  %v189_v4 = vld [vmem:[%s2467_s28 + $0x20] sm:$0xf] (%p67_p3)  ;;  %s2474_s29 = scalar_lea.vmem (%p67_p3), [#allocation2], %s2219_s25 }
  0x15   : > { %182 = vst [vmem:[%s2474_s29] sm:$0xf] %v181_v0  ;;  %184 = vst [vmem:[%s2474_s29 + $0x4] sm:$0xf] %v183_v1  ;;  %v191_v5 = vld [vmem:[%s2467_s28 + $0x28] sm:$0xf] }
  0x16   : > { %186 = vst [vmem:[%s2474_s29 + $0x8] sm:$0xf] %v185_v2  ;;  %188 = vst [vmem:[%s2474_s29 + $0xc] sm:$0xf] %v187_v3  ;;  %v193_v6 = vld [vmem:[%s2467_s28 + $0x30] sm:$0xf] }
  0x17   : > { %190 = vst [vmem:[%s2474_s29 + $0x10] sm:$0xf] %v189_v4  ;;  %v195_v7 = vld [vmem:[%s2467_s28 + $0x38] sm:$0xf]  ;;  %192 = vst [vmem:[%s2474_s29 + $0x14] sm:$0xf] %v191_v5 }
  0x18   : > { %194 = vst [vmem:[%s2474_s29 + $0x18] sm:$0xf] %v193_v6  ;;  %196 = vst [vmem:[%s2474_s29 + $0x1c] sm:$0xf] %v195_v7  ;;  %v197_v8 = vld [vmem:[%s2467_s28 + $0x40] sm:$0xf] }
  0x19   : > { %v199_v9 = vld [vmem:[%s2467_s28 + $0x48] sm:$0xf]  ;;  %v201_v10 = vld [vmem:[%s2467_s28 + $0x50] sm:$0xf]  ;;  %198 = vst [vmem:[%s2474_s29 + $0x20] sm:$0xf] %v197_v8 }
  0x1a   : > { %200 = vst [vmem:[%s2474_s29 + $0x24] sm:$0xf] %v199_v9  ;;  %202 = vst [vmem:[%s2474_s29 + $0x28] sm:$0xf] %v201_v10  ;;  %v203_v11 = vld [vmem:[%s2467_s28 + $0x58] sm:$0xf] }
  0x1b   : > { %v205_v12 = vld [vmem:[%s2467_s28 + $0x60] sm:$0xf]  ;;  %v207_v13 = vld [vmem:[%s2467_s28 + $0x68] sm:$0xf]  ;;  %204 = vst [vmem:[%s2474_s29 + $0x2c] sm:$0xf] %v203_v11 }
  0x1c   : > { %206 = vst [vmem:[%s2474_s29 + $0x30] sm:$0xf] %v205_v12  ;;  %208 = vst [vmem:[%s2474_s29 + $0x34] sm:$0xf] %v207_v13  ;;  %v209_v14 = vld [vmem:[%s2467_s28 + $0x70] sm:$0xf] }
  0x1d   : > { %v211_v15 = vld [vmem:[%s2467_s28 + $0x78] sm:$0xf]  ;;  %v213_v16 = vld [vmem:[%s2467_s28 + $0x80] sm:$0xf]  ;;  %210 = vst [vmem:[%s2474_s29 + $0x38] sm:$0xf] %v209_v14 }
  0x1e   : > { %212 = vst [vmem:[%s2474_s29 + $0x3c] sm:$0xf] %v211_v15  ;;  %214 = vst [vmem:[%s2474_s29 + $0x40] sm:$0xf] %v213_v16  ;;  %v215_v17 = vld [vmem:[%s2467_s28 + $0x88] sm:$0xf] }
  0x1f   : > { %v217_v18 = vld [vmem:[%s2467_s28 + $0x90] sm:$0xf]  ;;  %v219_v19 = vld [vmem:[%s2467_s28 + $0x98] sm:$0xf]  ;;  %216 = vst [vmem:[%s2474_s29 + $0x44] sm:$0xf] %v215_v17 }
  0x20   : > { %218 = vst [vmem:[%s2474_s29 + $0x48] sm:$0xf] %v217_v18  ;;  %220 = vst [vmem:[%s2474_s29 + $0x4c] sm:$0xf] %v219_v19  ;;  %v221_v20 = vld [vmem:[%s2467_s28 + $0xa0] sm:$0xf] }
  0x21   : > { %v223_v21 = vld [vmem:[%s2467_s28 + $0xa8] sm:$0xf]  ;;  %v225_v22 = vld [vmem:[%s2467_s28 + $0xb0] sm:$0xf]  ;;  %222 = vst [vmem:[%s2474_s29 + $0x50] sm:$0xf] %v221_v20 }
  0x22   : > { %224 = vst [vmem:[%s2474_s29 + $0x54] sm:$0xf] %v223_v21  ;;  %226 = vst [vmem:[%s2474_s29 + $0x58] sm:$0xf] %v225_v22  ;;  %v227_v23 = vld [vmem:[%s2467_s28 + $0xb8] sm:$0xf] }
  0x23   : > { %v229_v24 = vld [vmem:[%s2467_s28 + $0xc0] sm:$0xf]  ;;  %v231_v25 = vld [vmem:[%s2467_s28 + $0xc8] sm:$0xf]  ;;  %228 = vst [vmem:[%s2474_s29 + $0x5c] sm:$0xf] %v227_v23 }
  0x24   : > { %230 = vst [vmem:[%s2474_s29 + $0x60] sm:$0xf] %v229_v24  ;;  %232 = vst [vmem:[%s2474_s29 + $0x64] sm:$0xf] %v231_v25  ;;  %v233_v26 = vld [vmem:[%s2467_s28 + $0xd0] sm:$0xf] }
  0x25   : > { %v235_v27 = vld [vmem:[%s2467_s28 + $0xd8] sm:$0xf]  ;;  %v237_v28 = vld [vmem:[%s2467_s28 + $0xe0] sm:$0xf]  ;;  %234 = vst [vmem:[%s2474_s29 + $0x68] sm:$0xf] %v233_v26 }
  0x26   : > { %236 = vst [vmem:[%s2474_s29 + $0x6c] sm:$0xf] %v235_v27  ;;  %238 = vst [vmem:[%s2474_s29 + $0x70] sm:$0xf] %v237_v28  ;;  %v239_v29 = vld [vmem:[%s2467_s28 + $0xe8] sm:$0xf] }
  0x27   : > { %v241_v30 = vld [vmem:[%s2467_s28 + $0xf0] sm:$0xf]  ;;  %v243_v31 = vld [vmem:[%s2467_s28 + $0xf8] sm:$0xf]  ;;  %240 = vst [vmem:[%s2474_s29 + $0x74] sm:$0xf] %v239_v29 }
  0x28   : > { %242 = vst [vmem:[%s2474_s29 + $0x78] sm:$0xf] %v241_v30  ;;  %244 = vst [vmem:[%s2474_s29 + $0x7c] sm:$0xf] %v243_v31  ;;  %v245_v32 = vld [vmem:[%s2467_s28 + $0x100] sm:$0xf] }
  0x29   : > { %v247_v33 = vld [vmem:[%s2467_s28 + $0x108] sm:$0xf]  ;;  %v249_v34 = vld [vmem:[%s2467_s28 + $0x110] sm:$0xf]  ;;  %246 = vst [vmem:[%s2474_s29 + $0x80] sm:$0xf] %v245_v32 }
  0x2a   : > { %248 = vst [vmem:[%s2474_s29 + $0x84] sm:$0xf] %v247_v33  ;;  %250 = vst [vmem:[%s2474_s29 + $0x88] sm:$0xf] %v249_v34  ;;  %v251_v35 = vld [vmem:[%s2467_s28 + $0x118] sm:$0xf] }
  0x2b   : > { %v253_v36 = vld [vmem:[%s2467_s28 + $0x120] sm:$0xf]  ;;  %v255_v37 = vld [vmem:[%s2467_s28 + $0x128] sm:$0xf]  ;;  %252 = vst [vmem:[%s2474_s29 + $0x8c] sm:$0xf] %v251_v35 }
  0x2c   : > { %254 = vst [vmem:[%s2474_s29 + $0x90] sm:$0xf] %v253_v36  ;;  %256 = vst [vmem:[%s2474_s29 + $0x94] sm:$0xf] %v255_v37  ;;  %v257_v38 = vld [vmem:[%s2467_s28 + $0x130] sm:$0xf] }
  0x2d   : > { %v259_v39 = vld [vmem:[%s2467_s28 + $0x138] sm:$0xf]  ;;  %v261_v40 = vld [vmem:[%s2467_s28 + $0x140] sm:$0xf]  ;;  %258 = vst [vmem:[%s2474_s29 + $0x98] sm:$0xf] %v257_v38 }
  0x2e   : > { %260 = vst [vmem:[%s2474_s29 + $0x9c] sm:$0xf] %v259_v39  ;;  %262 = vst [vmem:[%s2474_s29 + $0xa0] sm:$0xf] %v261_v40  ;;  %v263_v41 = vld [vmem:[%s2467_s28 + $0x148] sm:$0xf] }
  0x2f   : > { %v265_v42 = vld [vmem:[%s2467_s28 + $0x150] sm:$0xf]  ;;  %v267_v43 = vld [vmem:[%s2467_s28 + $0x158] sm:$0xf]  ;;  %264 = vst [vmem:[%s2474_s29 + $0xa4] sm:$0xf] %v263_v41 }
  0x30   : > { %266 = vst [vmem:[%s2474_s29 + $0xa8] sm:$0xf] %v265_v42  ;;  %268 = vst [vmem:[%s2474_s29 + $0xac] sm:$0xf] %v267_v43  ;;  %v269_v44 = vld [vmem:[%s2467_s28 + $0x160] sm:$0xf] }
  0x31   : > { %v271_v45 = vld [vmem:[%s2467_s28 + $0x168] sm:$0xf]  ;;  %v273_v46 = vld [vmem:[%s2467_s28 + $0x170] sm:$0xf]  ;;  %270 = vst [vmem:[%s2474_s29 + $0xb0] sm:$0xf] %v269_v44 }
  0x32   : > { %272 = vst [vmem:[%s2474_s29 + $0xb4] sm:$0xf] %v271_v45  ;;  %274 = vst [vmem:[%s2474_s29 + $0xb8] sm:$0xf] %v273_v46  ;;  %v275_v47 = vld [vmem:[%s2467_s28 + $0x178] sm:$0xf] }
  0x33   : > { %v277_v48 = vld [vmem:[%s2467_s28 + $0x180] sm:$0xf]  ;;  %v279_v49 = vld [vmem:[%s2467_s28 + $0x188] sm:$0xf]  ;;  %276 = vst [vmem:[%s2474_s29 + $0xbc] sm:$0xf] %v275_v47 }
  0x34   : > { %278 = vst [vmem:[%s2474_s29 + $0xc0] sm:$0xf] %v277_v48  ;;  %280 = vst [vmem:[%s2474_s29 + $0xc4] sm:$0xf] %v279_v49  ;;  %v281_v50 = vld [vmem:[%s2467_s28 + $0x190] sm:$0xf] }
  0x35   : > { %v283_v51 = vld [vmem:[%s2467_s28 + $0x198] sm:$0xf]  ;;  %v285_v52 = vld [vmem:[%s2467_s28 + $0x1a0] sm:$0xf]  ;;  %282 = vst [vmem:[%s2474_s29 + $0xc8] sm:$0xf] %v281_v50 }
  0x36   : > { %284 = vst [vmem:[%s2474_s29 + $0xcc] sm:$0xf] %v283_v51  ;;  %286 = vst [vmem:[%s2474_s29 + $0xd0] sm:$0xf] %v285_v52  ;;  %v287_v53 = vld [vmem:[%s2467_s28 + $0x1a8] sm:$0xf] }
  0x37   : > { %v289_v54 = vld [vmem:[%s2467_s28 + $0x1b0] sm:$0xf]  ;;  %v291_v55 = vld [vmem:[%s2467_s28 + $0x1b8] sm:$0xf]  ;;  %288 = vst [vmem:[%s2474_s29 + $0xd4] sm:$0xf] %v287_v53 }
  0x38   : > { %290 = vst [vmem:[%s2474_s29 + $0xd8] sm:$0xf] %v289_v54  ;;  %292 = vst [vmem:[%s2474_s29 + $0xdc] sm:$0xf] %v291_v55  ;;  %v293_v56 = vld [vmem:[%s2467_s28 + $0x1c0] sm:$0xf] }
  0x39   : > { %v295_v57 = vld [vmem:[%s2467_s28 + $0x1c8] sm:$0xf]  ;;  %v297_v58 = vld [vmem:[%s2467_s28 + $0x1d0] sm:$0xf]  ;;  %294 = vst [vmem:[%s2474_s29 + $0xe0] sm:$0xf] %v293_v56 }
  0x3a   : > { %296 = vst [vmem:[%s2474_s29 + $0xe4] sm:$0xf] %v295_v57  ;;  %298 = vst [vmem:[%s2474_s29 + $0xe8] sm:$0xf] %v297_v58  ;;  %v299_v59 = vld [vmem:[%s2467_s28 + $0x1d8] sm:$0xf] }
  0x3b   : > { %v301_v60 = vld [vmem:[%s2467_s28 + $0x1e0] sm:$0xf]  ;;  %v303_v61 = vld [vmem:[%s2467_s28 + $0x1e8] sm:$0xf]  ;;  %300 = vst [vmem:[%s2474_s29 + $0xec] sm:$0xf] %v299_v59 }
  0x3c   : > { %302 = vst [vmem:[%s2474_s29 + $0xf0] sm:$0xf] %v301_v60  ;;  %304 = vst [vmem:[%s2474_s29 + $0xf4] sm:$0xf] %v303_v61  ;;  %v305_v62 = vld [vmem:[%s2467_s28 + $0x1f0] sm:$0xf] }
  0x3d   : > { %v307_v63 = vld [vmem:[%s2467_s28 + $0x1f8] sm:$0xf]  ;;  %v309_v0 = vld [vmem:[%s2467_s28 + $0x200] sm:$0xf]  ;;  %306 = vst [vmem:[%s2474_s29 + $0xf8] sm:$0xf] %v305_v62 }
  0x3e   : > { %308 = vst [vmem:[%s2474_s29 + $0xfc] sm:$0xf] %v307_v63  ;;  %310 = vst [vmem:[%s2474_s29 + $0x100] sm:$0xf] %v309_v0  ;;  %v311_v1 = vld [vmem:[%s2467_s28 + $0x208] sm:$0xf] }
  0x3f   : > { %v313_v2 = vld [vmem:[%s2467_s28 + $0x210] sm:$0xf]  ;;  %v315_v3 = vld [vmem:[%s2467_s28 + $0x218] sm:$0xf]  ;;  %312 = vst [vmem:[%s2474_s29 + $0x104] sm:$0xf] %v311_v1 }
  0x40   : > { %314 = vst [vmem:[%s2474_s29 + $0x108] sm:$0xf] %v313_v2  ;;  %316 = vst [vmem:[%s2474_s29 + $0x10c] sm:$0xf] %v315_v3  ;;  %v317_v4 = vld [vmem:[%s2467_s28 + $0x220] sm:$0xf] }
  0x41   : > { %v319_v5 = vld [vmem:[%s2467_s28 + $0x228] sm:$0xf]  ;;  %v321_v6 = vld [vmem:[%s2467_s28 + $0x230] sm:$0xf]  ;;  %318 = vst [vmem:[%s2474_s29 + $0x110] sm:$0xf] %v317_v4 }
  0x42   : > { %320 = vst [vmem:[%s2474_s29 + $0x114] sm:$0xf] %v319_v5  ;;  %322 = vst [vmem:[%s2474_s29 + $0x118] sm:$0xf] %v321_v6  ;;  %v323_v7 = vld [vmem:[%s2467_s28 + $0x238] sm:$0xf] }
  0x43   : > { %v325_v8 = vld [vmem:[%s2467_s28 + $0x240] sm:$0xf]  ;;  %v327_v9 = vld [vmem:[%s2467_s28 + $0x248] sm:$0xf]  ;;  %324 = vst [vmem:[%s2474_s29 + $0x11c] sm:$0xf] %v323_v7 }
  0x44   : > { %326 = vst [vmem:[%s2474_s29 + $0x120] sm:$0xf] %v325_v8  ;;  %328 = vst [vmem:[%s2474_s29 + $0x124] sm:$0xf] %v327_v9  ;;  %v329_v10 = vld [vmem:[%s2467_s28 + $0x250] sm:$0xf] }
  0x45   : > { %v331_v11 = vld [vmem:[%s2467_s28 + $0x258] sm:$0xf]  ;;  %v333_v12 = vld [vmem:[%s2467_s28 + $0x260] sm:$0xf]  ;;  %330 = vst [vmem:[%s2474_s29 + $0x128] sm:$0xf] %v329_v10 }
  0x46   : > { %332 = vst [vmem:[%s2474_s29 + $0x12c] sm:$0xf] %v331_v11  ;;  %334 = vst [vmem:[%s2474_s29 + $0x130] sm:$0xf] %v333_v12  ;;  %v335_v13 = vld [vmem:[%s2467_s28 + $0x268] sm:$0xf] }
  0x47   : > { %v337_v14 = vld [vmem:[%s2467_s28 + $0x270] sm:$0xf]  ;;  %v339_v15 = vld [vmem:[%s2467_s28 + $0x278] sm:$0xf]  ;;  %336 = vst [vmem:[%s2474_s29 + $0x134] sm:$0xf] %v335_v13 }
  0x48   : > { %338 = vst [vmem:[%s2474_s29 + $0x138] sm:$0xf] %v337_v14  ;;  %340 = vst [vmem:[%s2474_s29 + $0x13c] sm:$0xf] %v339_v15  ;;  %v341_v16 = vld [vmem:[%s2467_s28 + $0x280] sm:$0xf] }
  0x49   : > { %v343_v17 = vld [vmem:[%s2467_s28 + $0x288] sm:$0xf]  ;;  %v345_v18 = vld [vmem:[%s2467_s28 + $0x290] sm:$0xf]  ;;  %342 = vst [vmem:[%s2474_s29 + $0x140] sm:$0xf] %v341_v16 }
  0x4a   : > { %344 = vst [vmem:[%s2474_s29 + $0x144] sm:$0xf] %v343_v17  ;;  %346 = vst [vmem:[%s2474_s29 + $0x148] sm:$0xf] %v345_v18  ;;  %v347_v19 = vld [vmem:[%s2467_s28 + $0x298] sm:$0xf] }
  0x4b   : > { %v349_v20 = vld [vmem:[%s2467_s28 + $0x2a0] sm:$0xf]  ;;  %v351_v21 = vld [vmem:[%s2467_s28 + $0x2a8] sm:$0xf]  ;;  %348 = vst [vmem:[%s2474_s29 + $0x14c] sm:$0xf] %v347_v19 }
  0x4c   : > { %350 = vst [vmem:[%s2474_s29 + $0x150] sm:$0xf] %v349_v20  ;;  %352 = vst [vmem:[%s2474_s29 + $0x154] sm:$0xf] %v351_v21  ;;  %v353_v22 = vld [vmem:[%s2467_s28 + $0x2b0] sm:$0xf] }
  0x4d   : > { %v355_v23 = vld [vmem:[%s2467_s28 + $0x2b8] sm:$0xf]  ;;  %v357_v24 = vld [vmem:[%s2467_s28 + $0x2c0] sm:$0xf]  ;;  %354 = vst [vmem:[%s2474_s29 + $0x158] sm:$0xf] %v353_v22 }
  0x4e   : > { %356 = vst [vmem:[%s2474_s29 + $0x15c] sm:$0xf] %v355_v23  ;;  %358 = vst [vmem:[%s2474_s29 + $0x160] sm:$0xf] %v357_v24  ;;  %v359_v25 = vld [vmem:[%s2467_s28 + $0x2c8] sm:$0xf] }
  0x4f   : > { %v361_v26 = vld [vmem:[%s2467_s28 + $0x2d0] sm:$0xf]  ;;  %v363_v27 = vld [vmem:[%s2467_s28 + $0x2d8] sm:$0xf]  ;;  %360 = vst [vmem:[%s2474_s29 + $0x164] sm:$0xf] %v359_v25 }
  0x50   : > { %362 = vst [vmem:[%s2474_s29 + $0x168] sm:$0xf] %v361_v26  ;;  %364 = vst [vmem:[%s2474_s29 + $0x16c] sm:$0xf] %v363_v27  ;;  %v365_v28 = vld [vmem:[%s2467_s28 + $0x2e0] sm:$0xf] }
  0x51   : > { %v367_v29 = vld [vmem:[%s2467_s28 + $0x2e8] sm:$0xf]  ;;  %v369_v30 = vld [vmem:[%s2467_s28 + $0x2f0] sm:$0xf]  ;;  %366 = vst [vmem:[%s2474_s29 + $0x170] sm:$0xf] %v365_v28 }
  0x52   : > { %368 = vst [vmem:[%s2474_s29 + $0x174] sm:$0xf] %v367_v29  ;;  %370 = vst [vmem:[%s2474_s29 + $0x178] sm:$0xf] %v369_v30  ;;  %v371_v31 = vld [vmem:[%s2467_s28 + $0x2f8] sm:$0xf] }
  0x53   : > { %v373_v32 = vld [vmem:[%s2467_s28 + $0x300] sm:$0xf]  ;;  %v375_v33 = vld [vmem:[%s2467_s28 + $0x308] sm:$0xf]  ;;  %372 = vst [vmem:[%s2474_s29 + $0x17c] sm:$0xf] %v371_v31 }
  0x54   : > { %374 = vst [vmem:[%s2474_s29 + $0x180] sm:$0xf] %v373_v32  ;;  %376 = vst [vmem:[%s2474_s29 + $0x184] sm:$0xf] %v375_v33  ;;  %v377_v34 = vld [vmem:[%s2467_s28 + $0x310] sm:$0xf] }
  0x55   : > { %v379_v35 = vld [vmem:[%s2467_s28 + $0x318] sm:$0xf]  ;;  %v381_v36 = vld [vmem:[%s2467_s28 + $0x320] sm:$0xf]  ;;  %378 = vst [vmem:[%s2474_s29 + $0x188] sm:$0xf] %v377_v34 }
  0x56   : > { %380 = vst [vmem:[%s2474_s29 + $0x18c] sm:$0xf] %v379_v35  ;;  %382 = vst [vmem:[%s2474_s29 + $0x190] sm:$0xf] %v381_v36  ;;  %v383_v37 = vld [vmem:[%s2467_s28 + $0x328] sm:$0xf] }
  0x57   : > { %v385_v38 = vld [vmem:[%s2467_s28 + $0x330] sm:$0xf]  ;;  %v387_v39 = vld [vmem:[%s2467_s28 + $0x338] sm:$0xf]  ;;  %384 = vst [vmem:[%s2474_s29 + $0x194] sm:$0xf] %v383_v37 }
  0x58   : > { %386 = vst [vmem:[%s2474_s29 + $0x198] sm:$0xf] %v385_v38  ;;  %388 = vst [vmem:[%s2474_s29 + $0x19c] sm:$0xf] %v387_v39  ;;  %v389_v40 = vld [vmem:[%s2467_s28 + $0x340] sm:$0xf] }
  0x59   : > { %v391_v41 = vld [vmem:[%s2467_s28 + $0x348] sm:$0xf]  ;;  %v393_v42 = vld [vmem:[%s2467_s28 + $0x350] sm:$0xf]  ;;  %390 = vst [vmem:[%s2474_s29 + $0x1a0] sm:$0xf] %v389_v40 }
  0x5a   : > { %392 = vst [vmem:[%s2474_s29 + $0x1a4] sm:$0xf] %v391_v41  ;;  %394 = vst [vmem:[%s2474_s29 + $0x1a8] sm:$0xf] %v393_v42  ;;  %v395_v43 = vld [vmem:[%s2467_s28 + $0x358] sm:$0xf] }
  0x5b   : > { %v397_v44 = vld [vmem:[%s2467_s28 + $0x360] sm:$0xf]  ;;  %v399_v45 = vld [vmem:[%s2467_s28 + $0x368] sm:$0xf]  ;;  %396 = vst [vmem:[%s2474_s29 + $0x1ac] sm:$0xf] %v395_v43 }
  0x5c   : > { %398 = vst [vmem:[%s2474_s29 + $0x1b0] sm:$0xf] %v397_v44  ;;  %400 = vst [vmem:[%s2474_s29 + $0x1b4] sm:$0xf] %v399_v45  ;;  %v401_v46 = vld [vmem:[%s2467_s28 + $0x370] sm:$0xf] }
  0x5d   : > { %v403_v47 = vld [vmem:[%s2467_s28 + $0x378] sm:$0xf]  ;;  %v405_v48 = vld [vmem:[%s2467_s28 + $0x380] sm:$0xf]  ;;  %402 = vst [vmem:[%s2474_s29 + $0x1b8] sm:$0xf] %v401_v46 }
  0x5e   : > { %404 = vst [vmem:[%s2474_s29 + $0x1bc] sm:$0xf] %v403_v47  ;;  %406 = vst [vmem:[%s2474_s29 + $0x1c0] sm:$0xf] %v405_v48  ;;  %v407_v49 = vld [vmem:[%s2467_s28 + $0x388] sm:$0xf] }
  0x5f   : > { %v409_v50 = vld [vmem:[%s2467_s28 + $0x390] sm:$0xf]  ;;  %v411_v51 = vld [vmem:[%s2467_s28 + $0x398] sm:$0xf]  ;;  %408 = vst [vmem:[%s2474_s29 + $0x1c4] sm:$0xf] %v407_v49 }
  0x60   : > { %410 = vst [vmem:[%s2474_s29 + $0x1c8] sm:$0xf] %v409_v50  ;;  %412 = vst [vmem:[%s2474_s29 + $0x1cc] sm:$0xf] %v411_v51  ;;  %v413_v52 = vld [vmem:[%s2467_s28 + $0x3a0] sm:$0xf] }
  0x61   : > { %v415_v53 = vld [vmem:[%s2467_s28 + $0x3a8] sm:$0xf]  ;;  %v417_v54 = vld [vmem:[%s2467_s28 + $0x3b0] sm:$0xf]  ;;  %414 = vst [vmem:[%s2474_s29 + $0x1d0] sm:$0xf] %v413_v52 }
  0x62   : > { %416 = vst [vmem:[%s2474_s29 + $0x1d4] sm:$0xf] %v415_v53  ;;  %418 = vst [vmem:[%s2474_s29 + $0x1d8] sm:$0xf] %v417_v54  ;;  %v419_v55 = vld [vmem:[%s2467_s28 + $0x3b8] sm:$0xf] }
  0x63   : > { %v421_v56 = vld [vmem:[%s2467_s28 + $0x3c0] sm:$0xf]  ;;  %v423_v57 = vld [vmem:[%s2467_s28 + $0x3c8] sm:$0xf]  ;;  %420 = vst [vmem:[%s2474_s29 + $0x1dc] sm:$0xf] %v419_v55 }
  0x64   : > { %422 = vst [vmem:[%s2474_s29 + $0x1e0] sm:$0xf] %v421_v56  ;;  %424 = vst [vmem:[%s2474_s29 + $0x1e4] sm:$0xf] %v423_v57  ;;  %v425_v58 = vld [vmem:[%s2467_s28 + $0x3d0] sm:$0xf] }
  0x65   : > { %v427_v59 = vld [vmem:[%s2467_s28 + $0x3d8] sm:$0xf]  ;;  %v429_v60 = vld [vmem:[%s2467_s28 + $0x3e0] sm:$0xf]  ;;  %426 = vst [vmem:[%s2474_s29 + $0x1e8] sm:$0xf] %v425_v58 }
  0x66   : > { %428 = vst [vmem:[%s2474_s29 + $0x1ec] sm:$0xf] %v427_v59  ;;  %430 = vst [vmem:[%s2474_s29 + $0x1f0] sm:$0xf] %v429_v60  ;;  %v431_v61 = vld [vmem:[%s2467_s28 + $0x3e8] sm:$0xf] }
  0x67   : > { %v433_v62 = vld [vmem:[%s2467_s28 + $0x3f0] sm:$0xf]  ;;  %v435_v63 = vld [vmem:[%s2467_s28 + $0x3f8] sm:$0xf]  ;;  %432 = vst [vmem:[%s2474_s29 + $0x1f4] sm:$0xf] %v431_v61 }
  0x68   : > { %434 = vst [vmem:[%s2474_s29 + $0x1f8] sm:$0xf] %v433_v62  ;;  %436 = vst [vmem:[%s2474_s29 + $0x1fc] sm:$0xf] %v435_v63  ;;  %v437_v0 = vld [vmem:[%s2467_s28 + $0x400] sm:$0xf] }
  0x69   : > { %v439_v1 = vld [vmem:[%s2467_s28 + $0x408] sm:$0xf]  ;;  %v441_v2 = vld [vmem:[%s2467_s28 + $0x410] sm:$0xf]  ;;  %438 = vst [vmem:[%s2474_s29 + $0x200] sm:$0xf] %v437_v0 }
  0x6a   : > { %440 = vst [vmem:[%s2474_s29 + $0x204] sm:$0xf] %v439_v1  ;;  %442 = vst [vmem:[%s2474_s29 + $0x208] sm:$0xf] %v441_v2  ;;  %v443_v3 = vld [vmem:[%s2467_s28 + $0x418] sm:$0xf] }
  0x6b   : > { %v445_v4 = vld [vmem:[%s2467_s28 + $0x420] sm:$0xf]  ;;  %v447_v5 = vld [vmem:[%s2467_s28 + $0x428] sm:$0xf]  ;;  %444 = vst [vmem:[%s2474_s29 + $0x20c] sm:$0xf] %v443_v3 }
  0x6c   : > { %446 = vst [vmem:[%s2474_s29 + $0x210] sm:$0xf] %v445_v4  ;;  %448 = vst [vmem:[%s2474_s29 + $0x214] sm:$0xf] %v447_v5  ;;  %v449_v6 = vld [vmem:[%s2467_s28 + $0x430] sm:$0xf] }
  0x6d   : > { %v451_v7 = vld [vmem:[%s2467_s28 + $0x438] sm:$0xf]  ;;  %v453_v8 = vld [vmem:[%s2467_s28 + $0x440] sm:$0xf]  ;;  %450 = vst [vmem:[%s2474_s29 + $0x218] sm:$0xf] %v449_v6 }
  0x6e   : > { %452 = vst [vmem:[%s2474_s29 + $0x21c] sm:$0xf] %v451_v7  ;;  %454 = vst [vmem:[%s2474_s29 + $0x220] sm:$0xf] %v453_v8  ;;  %v455_v9 = vld [vmem:[%s2467_s28 + $0x448] sm:$0xf] }
  0x6f   : > { %v457_v10 = vld [vmem:[%s2467_s28 + $0x450] sm:$0xf]  ;;  %v459_v11 = vld [vmem:[%s2467_s28 + $0x458] sm:$0xf]  ;;  %456 = vst [vmem:[%s2474_s29 + $0x224] sm:$0xf] %v455_v9 }
  0x70   : > { %458 = vst [vmem:[%s2474_s29 + $0x228] sm:$0xf] %v457_v10  ;;  %460 = vst [vmem:[%s2474_s29 + $0x22c] sm:$0xf] %v459_v11  ;;  %v461_v12 = vld [vmem:[%s2467_s28 + $0x460] sm:$0xf] }
  0x71   : > { %v463_v13 = vld [vmem:[%s2467_s28 + $0x468] sm:$0xf]  ;;  %v465_v14 = vld [vmem:[%s2467_s28 + $0x470] sm:$0xf]  ;;  %462 = vst [vmem:[%s2474_s29 + $0x230] sm:$0xf] %v461_v12 }
  0x72   : > { %464 = vst [vmem:[%s2474_s29 + $0x234] sm:$0xf] %v463_v13  ;;  %466 = vst [vmem:[%s2474_s29 + $0x238] sm:$0xf] %v465_v14  ;;  %v467_v15 = vld [vmem:[%s2467_s28 + $0x478] sm:$0xf] }
  0x73   : > { %468 = vst [vmem:[%s2474_s29 + $0x23c] sm:$0xf] %v467_v15 }
  0x74 PF: > { %p1961_p8 = scmp.ge.s32.totalorder %s2397_s16, 1  ;;  %p785_p9 = scmp.lt.s32.totalorder %s2397_s16, 3 }
  0x76   : > { %p786_p10 = pnand %p1961_p8, %p785_p9 }
  0x77   : > { %s792_s30 = sand.u32 (!%p786_p10), 1, %s2381_s12   ;;  %p830_p11 = scmp.lt.s32.totalorder (!%p786_p10), %s2389_s14, 1 }
  0x78   : > { %789 = sbr.rel (%p786_p10) target bundleno = 437 (0x1b5), region = 69  ;;  %s1962_s11 = sshll.u32 (!%p786_p10), %s792_s30, 4 }
  0x79   : > { %s2220_s4 = smul.u32 (!%p786_p10), 576, %s792_s30  ;;  %s822_s18 = scalar_lea.vmem (!%p786_p10), [#allocation3], %s1962_s11 }
  0x7b   : > { %s2770_s9 = scalar_lea.vmem (!%p786_p10), [#allocation2], %s2220_s4 }
  0x7d   : > { %v2294_v16 = vld [vmem:[%s2920_s0 + $0x4] ss:$36 sps:$4 sm:$0xff]   ;;  %v2299_v17 = vld [vmem:[%s2920_s0 + $0xc] ss:$36 sps:$4 sm:$0xff]   ;;  %v2261_v18 = vld [vmem:[%s2770_s9 + $0x78] sm:$0xff]   ;;  %s2059_s19 = sshll.u32 (%p2454_p6), %s2389_s14, 2 }
  0x7e   : > { %1562 = vmatprep.mubr.bf16.mxu0 %v2294_v16  ;;  %1611 = vmatprep.mubr.bf16.mxu1 %v2299_v17  ;;  %v2262_v19 = vld [vmem:[%s2770_s9 + $0x38] sm:$0xff]   ;;  %v2265_v22 = vld [vmem:[%s2770_s9 + $0x70] sm:$0xff]   ;;  %v2269_v26 = vld [vmem:[%s2770_s9 + $0x68] sm:$0xff]   ;;  %s1810_s20 = scalar_lea.vmem (%p2454_p6), %s2923_s3, %s2059_s19 }
  0x7f   : > { %2077 = vmatprep.subr.bf16.mxu0 %v2261_v18  ;;  %v2263_v20 = vld [vmem:[%s2770_s9 + $0xf8] sm:$0xff]   ;;  %v2266_v23 = vld [vmem:[%s2770_s9 + $0x30] sm:$0xff]   ;;  %v2270_v27 = vld [vmem:[%s2770_s9 + $0x28] sm:$0xff]  }
  0x80   : > { %2078 = vmatpush3.bf16.msra.mxu0 %v2262_v19  ;;  %v2264_v21 = vld [vmem:[%s2770_s9 + $0xb8] sm:$0xff]   ;;  %2105 = vmatprep.subr.bf16.mxu1 %v2263_v20  ;;  %v2267_v24 = vld [vmem:[%s2770_s9 + $0xf0] sm:$0xff]   ;;  %v2271_v28 = vld [vmem:[%s2770_s9 + $0xe8] sm:$0xff]  }
  0x81   : > { %2106 = vmatpush3.bf16.msra.mxu1 %v2264_v21  ;;  %2079 = vmatprep.subr.bf16.mxu0 %v2265_v22  ;;  %v2268_v25 = vld [vmem:[%s2770_s9 + $0xb0] sm:$0xff]   ;;  %v2272_v29 = vld [vmem:[%s2770_s9 + $0xa8] sm:$0xff]   ;;  %v2273_v30 = vld [vmem:[%s2770_s9 + $0x60] sm:$0xff]  }
  0x82   : > { %2107 = vmatprep.subr.bf16.mxu1 %v2267_v24  ;;  %v2274_v31 = vld [vmem:[%s2770_s9 + $0x20] sm:$0xff]   ;;  %v2277_v34 = vld [vmem:[%s2770_s9 + $0x58] sm:$0xff]   ;;  %v2281_v38 = vld [vmem:[%s2770_s9 + $0x50] sm:$0xff]  }
  0x83   : > { %v2275_v32 = vld [vmem:[%s2770_s9 + $0xe0] sm:$0xff]   ;;  %v2278_v35 = vld [vmem:[%s2770_s9 + $0x18] sm:$0xff]   ;;  %v2282_v39 = vld [vmem:[%s2770_s9 + $0x10] sm:$0xff]  }
  0x84   : > { %2080 = vmatpush3.bf16.msra.mxu0 %v2266_v23  ;;  %v2276_v33 = vld [vmem:[%s2770_s9 + $0xa0] sm:$0xff]   ;;  %v2279_v36 = vld [vmem:[%s2770_s9 + $0xd8] sm:$0xff]   ;;  %v2283_v40 = vld [vmem:[%s2770_s9 + $0xd0] sm:$0xff]  }
  0x85   : > { %2108 = vmatpush3.bf16.msra.mxu1 %v2268_v25  ;;  %2081 = vmatprep.subr.bf16.mxu0 %v2269_v26  ;;  %v2280_v37 = vld [vmem:[%s2770_s9 + $0x98] sm:$0xff]   ;;  %v2284_v41 = vld [vmem:[%s2770_s9 + $0x90] sm:$0xff]   ;;  %v2285_v42 = vld [vmem:[%s2770_s9 + $0x48] sm:$0xff]  }
  0x86   : > { %2109 = vmatprep.subr.bf16.mxu1 %v2271_v28  ;;  %v2286_v43 = vld [vmem:[%s2770_s9 + $0x8] sm:$0xff]   ;;  %v2289_v46 = vld [vmem:[%s2770_s9 + $0x40] sm:$0xff]   ;;  %v2296_v53 = vld [vmem:[%s2770_s9 + $0x178] sm:$0xff]  }
  0x87   : > { %v2287_v44 = vld [vmem:[%s2770_s9 + $0xc8] sm:$0xff]   ;;  %v2292_v47 = vld [vmem:[%s2920_s0] ss:$36 sps:$4 sm:$0xff]   ;;  %v2300_v54 = vld [vmem:[%s2770_s9 + $0x138] sm:$0xff]  }
  0x88   : > { %2082 = vmatpush3.bf16.msra.mxu0 %v2270_v27  ;;  %v2288_v45 = vld [vmem:[%s2770_s9 + $0x88] sm:$0xff]   ;;  %v2290_v48 = vld [vmem:[%s2770_s9] sm:$0xff]   ;;  %v2301_v55 = vld [vmem:[%s2770_s9 + $0x1f8] sm:$0xff]  }
  0x89   : > { %2110 = vmatpush3.bf16.msra.mxu1 %v2272_v29  ;;  %2083 = vmatprep.subr.bf16.mxu0 %v2273_v30  ;;  %v2317_v49 = vld [vmem:[%s2920_s0 + $0x4c] ss:$36 sps:$4 sm:$0xff]   ;;  %v2291_v50 = vld [vmem:[%s2770_s9 + $0xc0] sm:$0xff]   ;;  %v2302_v56 = vld [vmem:[%s2770_s9 + $0x1b8] sm:$0xff]  }
  0x8a   : > { %2111 = vmatprep.subr.bf16.mxu1 %v2275_v32  ;;  %v2297_v51 = vld [vmem:[%s2920_s0 + $0x8] ss:$36 sps:$4 sm:$0xff]   ;;  %v2295_v52 = vld [vmem:[%s2770_s9 + $0x80] sm:$0xff]   ;;  %v2303_v57 = vld [vmem:[%s2770_s9 + $0x170] sm:$0xff]  }
  0x8b   : > { %v2320_v58 = vld [vmem:[%s2920_s0 + $0x48] ss:$36 sps:$4 sm:$0xff]   ;;  %v2304_v59 = vld [vmem:[%s2770_s9 + $0x130] sm:$0xff]   ;;  %v2311_v2 = vld [vmem:[%s2770_s9 + $0x160] sm:$0xff]  }
  0x8c   : > { %2084 = vmatpush3.bf16.msra.mxu0 %v2274_v31  ;;  %v2305_v60 = vld [vmem:[%s2770_s9 + $0x1f0] sm:$0xff]   ;;  %v2307_v62 = vld [vmem:[%s2770_s9 + $0x168] sm:$0xff]   ;;  %v2312_v3 = vld [vmem:[%s2770_s9 + $0x120] sm:$0xff]  }
  0x8d   : > { %2112 = vmatpush3.bf16.msra.mxu1 %v2276_v33  ;;  %2085 = vmatprep.subr.bf16.mxu0 %v2277_v34  ;;  %v2306_v61 = vld [vmem:[%s2770_s9 + $0x1b0] sm:$0xff]   ;;  %v2308_v63 = vld [vmem:[%s2770_s9 + $0x128] sm:$0xff]   ;;  %v2313_v4 = vld [vmem:[%s2770_s9 + $0x1e0] sm:$0xff]  }
  0x8e   : > { %2113 = vmatprep.subr.bf16.mxu1 %v2279_v36  ;;  %v2309_v0 = vld [vmem:[%s2770_s9 + $0x1e8] sm:$0xff]   ;;  %v2314_v5 = vld [vmem:[%s2770_s9 + $0x1a0] sm:$0xff]   ;;  %v2315_v6 = vld [vmem:[%s2770_s9 + $0x158] sm:$0xff]  }
  0x8f   : > { %v2310_v1 = vld [vmem:[%s2770_s9 + $0x1a8] sm:$0xff]   ;;  %v2316_v7 = vld [vmem:[%s2770_s9 + $0x118] sm:$0xff]   ;;  %v2324_v11 = vld [vmem:[%s2770_s9 + $0x150] sm:$0xff]  }
  0x90   : > { %2086 = vmatpush3.bf16.msra.mxu0 %v2278_v35  ;;  %v2319_v8 = vld [vmem:[%s2770_s9 + $0x1d8] sm:$0xff]   ;;  %v2325_v12 = vld [vmem:[%s2920_s0 + $0x50] ss:$36 sps:$4 sm:$0xff]   ;;  %v2329_v16 = vld [vmem:[%s2770_s9 + $0x148] sm:$0xff]  }
  0x91   : > { %2114 = vmatpush3.bf16.msra.mxu1 %v2280_v37  ;;  %2087 = vmatprep.subr.bf16.mxu0 %v2281_v38  ;;  %v2321_v9 = vld [vmem:[%s2770_s9 + $0x198] sm:$0xff]   ;;  %v2326_v13 = vld [vmem:[%s2770_s9 + $0x110] sm:$0xff]   ;;  %v2330_v17 = vld [vmem:[%s2770_s9 + $0x108] sm:$0xff]  }
  0x92   : > { %2115 = vmatprep.subr.bf16.mxu1 %v2283_v40  ;;  %v2322_v10 = vld [vmem:[%s2920_s0 + $0x54] ss:$36 sps:$4 sm:$0xff]   ;;  %v2331_v18 = vld [vmem:[%s2770_s9 + $0x1c8] sm:$0xff]   ;;  %v2333_v20 = vld [vmem:[%s2770_s9 + $0x140] sm:$0xff]  }
  0x93   : > { %v2327_v14 = vld [vmem:[%s2770_s9 + $0x1d0] sm:$0xff]   ;;  %v2332_v19 = vld [vmem:[%s2770_s9 + $0x188] sm:$0xff]   ;;  %v2334_v21 = vld [vmem:[%s2770_s9 + $0x100] sm:$0xff]  }
  0x94   : > { %2088 = vmatpush3.bf16.msra.mxu0 %v2282_v39  ;;  %v2328_v15 = vld [vmem:[%s2770_s9 + $0x190] sm:$0xff]   ;;  %v2335_v22 = vld [vmem:[%s2770_s9 + $0x1c0] sm:$0xff]   ;;  %v2340_v26 = vld [vmem:[%s2770_s9 + $0x238] sm:$0xff]  }
  0x95   : > { %2116 = vmatpush3.bf16.msra.mxu1 %v2284_v41  ;;  %2089 = vmatprep.subr.bf16.mxu0 %v2285_v42  ;;  %v2336_v23 = vld [vmem:[%s2920_s0 + $0x10] ss:$36 sps:$4 sm:$0xff]   ;;  %v2339_v25 = vld [vmem:[%s2770_s9 + $0x180] sm:$0xff]   ;;  %v2341_v27 = vld [vmem:[%s2920_s0 + $0x18] ss:$36 sps:$4 sm:$0xff]  }
  0x96   : > { %2117 = vmatprep.subr.bf16.mxu1 %v2287_v44  ;;  %v2338_v24 = vld [vmem:[%s2920_s0 + $0x14] ss:$36 sps:$4 sm:$0xff]   ;;  %v2343_v28 = vld [vmem:[%s2920_s0 + $0x1c] ss:$36 sps:$4 sm:$0xff]   ;;  %v2348_v32 = vld [vmem:[%s2770_s9 + $0x228] sm:$0xff]  }
  0x97   : > { %v2344_v29 = vld [vmem:[%s2770_s9 + $0x230] sm:$0xff]   ;;  %v2345_v30 = vld [vmem:[%s2920_s0 + $0x5c] ss:$36 sps:$4 sm:$0xff]   ;;  %v2349_v33 = vld [vmem:[%s2920_s0 + $0x64] ss:$36 sps:$4 sm:$0xff]  }
  0x98   : > { %2090 = vmatpush3.bf16.msra.mxu0 %v2286_v43  ;;  %v2347_v31 = vld [vmem:[%s2920_s0 + $0x58] ss:$36 sps:$4 sm:$0xff]   ;;  %v2351_v34 = vld [vmem:[%s2920_s0 + $0x60] ss:$36 sps:$4 sm:$0xff]   ;;  %v2354_v38 = vld [vmem:[%s2770_s9 + $0x210] sm:$0xff]  }
  0x99   : > { %2118 = vmatpush3.bf16.msra.mxu1 %v2288_v45  ;;  %2091 = vmatprep.subr.bf16.mxu0 %v2289_v46  ;;  %v2352_v35 = vld [vmem:[%s2770_s9 + $0x220] sm:$0xff]   ;;  %v2353_v36 = vld [vmem:[%s2770_s9 + $0x218] sm:$0xff]   ;;  %v2355_v39 = vld [vmem:[%s2770_s9 + $0x208] sm:$0xff]  }
  0x9a   : > { %2119 = vmatprep.subr.bf16.mxu1 %v2291_v50  ;;  %v2357_v37 = vld [vmem:[%s2920_s0 + $0x20] ss:$36 sps:$4 sm:$0xff]   ;;  %v2358_v41 = vld [vmem:[%s2920_s0 + $0x68] ss:$36 sps:$4 sm:$0xff]  }
  0x9b   : > { %v2356_v40 = vld [vmem:[%s2770_s9 + $0x200] sm:$0xff]   ;;  %s831_s9 = scalar_select %p830_p11, %s2389_s14, 1 }
  0x9c   : > { %2092 = vmatpush3.bf16.msra.mxu0 %v2290_v48 }
  0x9d   : > { %2120 = vmatpush3.bf16.msra.mxu1 %v2295_v52  ;;  %2133 = vmatprep.subr.bf16.mxu0 %v2296_v53  ;;  %s832_s10 = scalar_lea.vmem %s2922_s2, %s831_s9 }
  0x9e   : > { %2161 = vmatprep.subr.bf16.mxu1 %v2301_v55 }
  0x9f   : > { %1563 = vmatmul.mubr.bf16.vlgmr.msra.gmra.mxu0 %v2292_v47 }
  0xa0   : > { %2134 = vmatpush3.bf16.msra.mxu0 %v2300_v54  ;;  %1570 = vmatprep.mubr.bf16.mxu0 %v2317_v49 }
  0xa1   : > { %1612 = vmatmul.mubr.bf16.vlgmr.msra.gmra.mxu1 %v2297_v51  ;;  %2135 = vmatprep.subr.bf16.mxu0 %v2303_v57 }
  0xa2   : > { %2162 = vmatpush3.bf16.msra.mxu1 %v2302_v56  ;;  %1619 = vmatprep.mubr.bf16.mxu1 %v2322_v10 }
  0xa3   : > { %2163 = vmatprep.subr.bf16.mxu1 %v2305_v60 }
  0xa4   : > { %2136 = vmatpush3.bf16.msra.mxu0 %v2304_v59 }
  0xa5   : > { %2137 = vmatprep.subr.bf16.mxu0 %v2307_v62 }
  0xa6   : > { %2164 = vmatpush3.bf16.msra.mxu1 %v2306_v61 }
  0xa7   : > { %1571 = vmatmul.mubr.bf16.gmra.mxu0 %v2320_v58  ;;  %2165 = vmatprep.subr.bf16.mxu1 %v2309_v0 }
  0xa8   : > { %2138 = vmatpush3.bf16.msra.mxu0 %v2308_v63  ;;  %1660 = vmatprep.mubr.bf16.mxu0 %v2338_v24 }
  0xa9   : > { %2139 = vmatprep.subr.bf16.mxu0 %v2311_v2  ;;  %1620 = vmatmul.mubr.bf16.gmra.mxu1 %v2325_v12 }
  0xaa   : > { %2166 = vmatpush3.bf16.msra.mxu1 %v2310_v1  ;;  %1709 = vmatprep.mubr.bf16.mxu1 %v2343_v28 }
  0xab   : > { %2167 = vmatprep.subr.bf16.mxu1 %v2313_v4 }
  0xac   : > { %2140 = vmatpush3.bf16.msra.mxu0 %v2312_v3 }
  0xad   : > { %2141 = vmatprep.subr.bf16.mxu0 %v2315_v6 }
  0xae   : > { %2168 = vmatpush3.bf16.msra.mxu1 %v2314_v5 }
  0xaf   : > { %2169 = vmatprep.subr.bf16.mxu1 %v2319_v8 }
  0xb0   : > { %2142 = vmatpush3.bf16.msra.mxu0 %v2316_v7 }
  0xb1   : > { %2143 = vmatprep.subr.bf16.mxu0 %v2324_v11 }
  0xb2   : > { %2170 = vmatpush3.bf16.msra.mxu1 %v2321_v9  ;;  %v1963_v9 = vld [vmem:[%s832_s10] ss:$0 sm:$0xff] }
  0xb3   : > { %2171 = vmatprep.subr.bf16.mxu1 %v2327_v14 }
  0xb4   : > { %2144 = vmatpush3.bf16.msra.mxu0 %v2326_v13 }
  0xb5   : > { %2145 = vmatprep.subr.bf16.mxu0 %v2329_v16 }
  0xb6   : > { %2172 = vmatpush3.bf16.msra.mxu1 %v2328_v15 }
  0xb7   : > { %2173 = vmatprep.subr.bf16.mxu1 %v2331_v18 }
  0xb8   : > { %2146 = vmatpush3.bf16.msra.mxu0 %v2330_v17 }
  0xb9   : > { %2147 = vmatprep.subr.bf16.mxu0 %v2333_v20 }
  0xba   : > { %2174 = vmatpush3.bf16.msra.mxu1 %v2332_v19 }
  0xbb   : > { %2175 = vmatprep.subr.bf16.mxu1 %v2335_v22 }
  0xbc   : > { %2148 = vmatpush3.bf16.msra.mxu0 %v2334_v21 }
  0xbd   : > { %2199 = vmatprep.subr.bf16.mxu0 %v2340_v26 }
  0xbe   : > { %2176 = vmatpush3.bf16.msra.mxu1 %v2339_v25 }
  0xbf   : > { %1661 = vmatmul.mubr.bf16.vlgmr.msra.gmra.mxu0 %v2336_v23 }
  0xc0   : > { %2200 = vmatpush3.bf16.msra.mxu0 %v2340_v26  ;;  %1668 = vmatprep.mubr.bf16.mxu0 %v2345_v30 }
  0xc1   : > { %1710 = vmatmul.mubr.bf16.vlgmr.msra.gmra.mxu1 %v2341_v27  ;;  %2201 = vmatprep.subr.bf16.mxu0 %v2344_v29 }
  0xc2   : > { %1717 = vmatprep.mubr.bf16.mxu1 %v2349_v33 }
  0xc4   : > { %2202 = vmatpush3.bf16.msra.mxu0 %v2344_v29 }
  0xc5   : > { %2203 = vmatprep.subr.bf16.mxu0 %v2348_v32 }
  0xc7   : > { %1669 = vmatmul.mubr.bf16.gmra.mxu0 %v2347_v31 }
  0xc8   : > { %2204 = vmatpush3.bf16.msra.mxu0 %v2348_v32  ;;  %2215 = vmatprep.mubr.bf16.mxu0 %v2357_v37 }
  0xc9   : > { %1718 = vmatmul.mubr.bf16.gmra.mxu1 %v2351_v34  ;;  %2205 = vmatprep.subr.bf16.mxu0 %v2352_v35 }
  0xcc   : > { %2206 = vmatpush3.bf16.msra.mxu0 %v2352_v35 }
  0xcd   : > { %2207 = vmatprep.subr.bf16.mxu0 %v2353_v36 }
  0xd0   : > { %2208 = vmatpush3.bf16.msra.mxu0 %v2353_v36 }
  0xd1   : > { %2209 = vmatprep.subr.bf16.mxu0 %v2354_v38 }
  0xd4   : > { %2210 = vmatpush3.bf16.msra.mxu0 %v2354_v38 }
  0xd5   : > { %2211 = vmatprep.subr.bf16.mxu0 %v2355_v39 }
  0xd8   : > { %2212 = vmatpush3.bf16.msra.mxu0 %v2355_v39 }
  0xd9   : > { %2213 = vmatprep.subr.bf16.mxu0 %v2356_v40 }
  0xdc   : > { %2214 = vmatpush3.bf16.msra.mxu0 %v2356_v40 }
  0xdf   : > { %2216 = vmatmul.mubr.bf16.vlgmr.msra.gmra.mxu0 %v2358_v41 }
 0x15f   : > { %v2093_v42 = vpop.f32.mrf.mxu0 }
 0x161   : > { %v2121_v43 = vpop.f32.mrf.mxu1  ;;  %v2094_v44 = vpop.f32.mrf.mxu0 }
 0x162   : > { %v2095_v6 = vadd.f32 %v2094_v44, %v2093_v42 }
 0x163   : > { %v2122_v45 = vpop.f32.mrf.mxu1  ;;  %v2096_v46 = vpop.f32.mrf.mxu0 }
 0x164   : > { %v1565_v14 = vadd.f32 %v2095_v6, %v1963_v9  ;;  %v2123_v15 = vadd.f32 %v2122_v45, %v2121_v43 }
 0x165   : > { %v2124_v47 = vpop.f32.mrf.mxu1  ;;  %v2097_v48 = vpop.f32.mrf.mxu0 }
 0x166   : > { %v2098_v11 = vadd.f32 %v2097_v48, %v2096_v46  ;;  %v1614_v26 = vadd.f32 %v2123_v15, %v1565_v14 }
 0x167   : > { %v2099_v49 = vpop.f32.mrf.mxu0  ;;  %v2125_v50 = vpop.f32.mrf.mxu1 }
 0x168   : > { %v1568_v21 = vadd.f32 %v2098_v11, %v1963_v9  ;;  %v2126_v22 = vadd.f32 %v2125_v50, %v2124_v47 }
 0x169   : > { %v2127_v51 = vpop.f32.mrf.mxu1  ;;  %v2100_v52 = vpop.f32.mrf.mxu0 }
 0x16a   : > { %v2101_v5 = vadd.f32 %v2100_v52, %v2099_v49  ;;  %v1617_v32 = vadd.f32 %v2126_v22, %v1568_v21 }
 0x16b   : > { %v2128_v53 = vpop.f32.mrf.mxu1  ;;  %v2102_v54 = vpop.f32.mrf.mxu0 }
 0x16c   : > { %v1573_v12 = vadd.f32 %v2101_v5, %v1963_v9  ;;  %v2129_v13 = vadd.f32 %v2128_v53, %v2127_v51 }
 0x16d   : > { %v2130_v55 = vpop.f32.mrf.mxu1  ;;  %v2103_v56 = vpop.f32.mrf.mxu0 }
 0x16e   : > { %v2104_v10 = vadd.f32 %v2103_v56, %v2102_v54  ;;  %v1622_v23 = vadd.f32 %v2129_v13, %v1573_v12 }
 0x16f   : > { %v2131_v58 = vpop.f32.mrf.mxu1 }
 0x170   : > { %v1576_v18 = vadd.f32 %v2104_v10, %v1963_v9  ;;  %v2132_v19 = vadd.f32 %v2131_v58, %v2130_v55 }
 0x172   : > { %v1625_v28 = vadd.f32 %v2132_v19, %v1576_v18 }
 0x17f   : > { %v2149_v57 = vpop.f32.mrf.mxu0 }
 0x181   : > { %v2150_v59 = vpop.f32.mrf.mxu0  ;;  %v2177_v60 = vpop.f32.mrf.mxu1 }
 0x182   : > { %v2151_v24 = vadd.f32 %v2150_v59, %v2149_v57 }
 0x183   : > { %v2152_v61 = vpop.f32.mrf.mxu0  ;;  %v2178_v62 = vpop.f32.mrf.mxu1 }
 0x184   : > { %v1663_v33 = vadd.f32 %v2151_v24, %v1614_v26  ;;  %v2179_v34 = vadd.f32 %v2178_v62, %v2177_v60 }
 0x185   : > { %v2153_v63 = vpop.f32.mrf.mxu0  ;;  %v2180_v0 = vpop.f32.mrf.mxu1 }
 0x186   : > { %v2154_v29 = vadd.f32 %v2153_v63, %v2152_v61  ;;  %v1712_v43 = vadd.f32 %v2179_v34, %v1663_v33 }
 0x187   : > { %v2155_v1 = vpop.f32.mrf.mxu0  ;;  %v2181_v2 = vpop.f32.mrf.mxu1 }
 0x188   : > { %v1666_v38 = vadd.f32 %v2154_v29, %v1617_v32  ;;  %v2182_v39 = vadd.f32 %v2181_v2, %v2180_v0 }
 0x189   : > { %v2156_v3 = vpop.f32.mrf.mxu0  ;;  %v2183_v4 = vpop.f32.mrf.mxu1 }
 0x18a   : > { %v2157_v20 = vadd.f32 %v2156_v3, %v2155_v1  ;;  %v1715_v48 = vadd.f32 %v2182_v39, %v1666_v38 }
 0x18b   : > { %v2158_v7 = vpop.f32.mrf.mxu0  ;;  %v2184_v8 = vpop.f32.mrf.mxu1 }
 0x18c   : > { %v1671_v30 = vadd.f32 %v2157_v20, %v1622_v23  ;;  %v2185_v31 = vadd.f32 %v2184_v8, %v2183_v4 }
 0x18d   : > { %v2159_v16 = vpop.f32.mrf.mxu0  ;;  %v2186_v17 = vpop.f32.mrf.mxu1 }
 0x18e   : > { %v2160_v25 = vadd.f32 %v2159_v16, %v2158_v7  ;;  %v1720_v40 = vadd.f32 %v2185_v31, %v1671_v30 }
 0x18f   : > { %v2187_v27 = vpop.f32.mrf.mxu1 }
 0x190   : > { %v1674_v35 = vadd.f32 %v2160_v25, %v1625_v28  ;;  %v2188_v36 = vadd.f32 %v2187_v27, %v2186_v17 }
 0x192   : > { %v1723_v44 = vadd.f32 %v2188_v36, %v1674_v35 }
 0x19f   : > { %v2217_v37 = vpop.f32.mrf.mxu0 }
 0x1a0   : > { %v1769_v42 = vadd.f32 %v2217_v37, %v1720_v40 }
 0x1a1   : > { %v1760_v41 = vpop.f32.mrf.mxu0 }
 0x1a2   : > { %v1761_v46 = vadd.f32 %v1760_v41, %v1712_v43  ;;  %v1777_v50 = vmax.f32 %v1769_v42, 0.0 }
 0x1a3   : > { %v2218_v45 = vpop.f32.mrf.mxu0 }
 0x1a4   : > { %v1772_v47 = vadd.f32 %v2218_v45, %v1723_v44  ;;  %v1775_v53 = vmax.f32 %v1761_v46, 0.0 }
 0x1a5   : > { %v1763_v49 = vpop.f32.mrf.mxu0 }
 0x1a6   : > { %v1778_v51 = vmax.f32 %v1772_v47, 0.0  ;;  %v1764_v52 = vadd.f32 %v1763_v49, %v1715_v48 }
 0x1a8   : > { %v2074_v54 = vpack.c.bf16 %v1778_v51, %v1777_v50  ;;  %v1776_v55 = vmax.f32 %v1764_v52, 0.0  ;;  %1805 = sbr.rel (!%p2454_p6) target bundleno = 437 (0x1b5), region = 77 }
 0x1aa   : > { %2076 = vst [vmem:[%s822_s18 + $0x8] sm:$0xff] %v2074_v54   ;;  %v2069_v56 = vpack.c.bf16 %v1776_v55, %v1775_v53 }
 0x1ac   : > { %2070 = vst [vmem:[%s822_s18] sm:$0xff] %v2069_v56  }
 0x1b1   : > { %v1831_v59 = vld [vmem:[%s822_s18 + $0x8] sm:$0xf]  ;;  %v1833_v60 = vld [vmem:[%s822_s18 + $0xc] sm:$0xf] }
 0x1b2   : > { %1832 = vst [vmem:[%s1810_s20 + $0x10] sm:$0xf] %v1831_v59  ;;  %1834 = vst [vmem:[%s1810_s20 + $0x18] sm:$0xf] %v1833_v60 }
 0x1b3   : > { %v1827_v57 = vld [vmem:[%s822_s18] sm:$0xf]  ;;  %v1829_v58 = vld [vmem:[%s822_s18 + $0x4] sm:$0xf] }
 0x1b4   : > { %1828 = vst [vmem:[%s1810_s20] sm:$0xf] %v1827_v57  ;;  %1830 = vst [vmem:[%s1810_s20 + $0x8] sm:$0xf] %v1829_v58 }
 0x1b5 PF: > { %s13_s16 = sadd.s32 1, %s2397_s16   ;;  %s2925_s12 = smov %s2385_s13 }
 0x1b6   : > { %p10_p12 = scmp.ge.s32.totalorder %s13_s16, 4   ;;  %s2926_s13 = smov %s2459_s22 }
 0x1b7   : > { %s2927_s14 = smov %s2393_s15  ;;  %s2928_s15 = smov %s2930_s17 }
 0x1b8   :  { %12 = sbr.rel (!%p10_p12) target bundleno = 3 (0x3), region = 155 }

// kernel: resnet_forward.12
= control target key start
LH: loop header
LB: loop body
LE: loop exit
PB: predicated region body
PF: predicated region fallthrough
CT: control target
= control target key end

     0   :  { %s1880_s1 = inlined_call_operand.vmem [shape: bf16[1152,128], index: 1, kind: input, shape index: {}]   ;;  %s1881_s0 = inlined_call_operand.vmem [shape: bf16[32,1152], index: 0, kind: input, shape index: {}]   ;;  %s1882_s4 = inlined_call_operand.vmem [shape: bf16[128,128], index: 4, kind: input, shape index: {}]   ;;  %s1883_s3 = inlined_call_operand.vmem [shape: bf16[32,128], index: 3, kind: input, shape index: {}]   ;;  %s1884_s2 = inlined_call_operand.vmem [shape: f32[1,128], index: 2, kind: input, shape index: {}]   ;;  %s1885_s5 = inlined_call_operand.vmem [shape: f32[1,128], index: 5, kind: input, shape index: {}]   ;;  %s1886_s6 = inlined_call_operand.vmem [shape: bf16[32,128], index: 6, kind: output, shape index: {}]  }
   0x1   :  { %v1425_v0 = vld [vmem:[%s1880_s1 + $0x78] sm:$0xff]   ;;  %v1429_v4 = vld [vmem:[%s1880_s1 + $0x70] sm:$0xff]   ;;  %v1433_v8 = vld [vmem:[%s1880_s1 + $0x68] sm:$0xff]  }
   0x2   :  { %v1426_v1 = vld [vmem:[%s1880_s1 + $0xf8] sm:$0xff]   ;;  %1253 = vmatprep.subr.bf16.mxu0 %v1425_v0  ;;  %v1430_v5 = vld [vmem:[%s1880_s1 + $0xf0] sm:$0xff]   ;;  %v1434_v9 = vld [vmem:[%s1880_s1 + $0xe8] sm:$0xff]  }
   0x3   :  { %v1427_v2 = vld [vmem:[%s1880_s1 + $0x38] sm:$0xff]   ;;  %1281 = vmatprep.subr.bf16.mxu1 %v1426_v1  ;;  %v1431_v6 = vld [vmem:[%s1880_s1 + $0x30] sm:$0xff]   ;;  %v1435_v10 = vld [vmem:[%s1880_s1 + $0x28] sm:$0xff]  }
   0x4   :  { %v1428_v3 = vld [vmem:[%s1880_s1 + $0xb8] sm:$0xff]   ;;  %1254 = vmatpush3.bf16.msra.mxu0 %v1427_v2  ;;  %v1432_v7 = vld [vmem:[%s1880_s1 + $0xb0] sm:$0xff]   ;;  %v1436_v11 = vld [vmem:[%s1880_s1 + $0xa8] sm:$0xff]  }
   0x5   :  { %1282 = vmatpush3.bf16.msra.mxu1 %v1428_v3  ;;  %1255 = vmatprep.subr.bf16.mxu0 %v1429_v4  ;;  %v1437_v12 = vld [vmem:[%s1880_s1 + $0x60] sm:$0xff]   ;;  %v1441_v16 = vld [vmem:[%s1880_s1 + $0x58] sm:$0xff]   ;;  %v1445_v20 = vld [vmem:[%s1880_s1 + $0x50] sm:$0xff]  }
   0x6   :  { %1283 = vmatprep.subr.bf16.mxu1 %v1430_v5  ;;  %v1438_v13 = vld [vmem:[%s1880_s1 + $0xe0] sm:$0xff]   ;;  %v1442_v17 = vld [vmem:[%s1880_s1 + $0xd8] sm:$0xff]   ;;  %v1446_v21 = vld [vmem:[%s1880_s1 + $0xd0] sm:$0xff]  }
   0x7   :  { %v1439_v14 = vld [vmem:[%s1880_s1 + $0x20] sm:$0xff]   ;;  %v1443_v18 = vld [vmem:[%s1880_s1 + $0x18] sm:$0xff]   ;;  %v1447_v22 = vld [vmem:[%s1880_s1 + $0x10] sm:$0xff]  }
   0x8   :  { %1256 = vmatpush3.bf16.msra.mxu0 %v1431_v6  ;;  %v1440_v15 = vld [vmem:[%s1880_s1 + $0xa0] sm:$0xff]   ;;  %v1444_v19 = vld [vmem:[%s1880_s1 + $0x98] sm:$0xff]   ;;  %v1448_v23 = vld [vmem:[%s1880_s1 + $0x90] sm:$0xff]  }
   0x9   :  { %1284 = vmatpush3.bf16.msra.mxu1 %v1432_v7  ;;  %1257 = vmatprep.subr.bf16.mxu0 %v1433_v8  ;;  %v1449_v24 = vld [vmem:[%s1880_s1 + $0x48] sm:$0xff]   ;;  %v1453_v28 = vld [vmem:[%s1880_s1 + $0x40] sm:$0xff]   ;;  %v1463_v36 = vld [vmem:[%s1880_s1 + $0x178] sm:$0xff]  }
   0xa   :  { %1285 = vmatprep.subr.bf16.mxu1 %v1434_v9  ;;  %v1450_v25 = vld [vmem:[%s1880_s1 + $0xc8] sm:$0xff]   ;;  %v1454_v29 = vld [vmem:[%s1880_s1 + $0xc0] sm:$0xff]   ;;  %v1464_v37 = vld [vmem:[%s1880_s1 + $0x1f8] sm:$0xff]  }
   0xb   :  { %v1451_v26 = vld [vmem:[%s1880_s1 + $0x8] sm:$0xff]   ;;  %v1455_v30 = vld [vmem:[%s1880_s1] sm:$0xff]   ;;  %v1465_v38 = vld [vmem:[%s1880_s1 + $0x138] sm:$0xff]  }
   0xc   :  { %1258 = vmatpush3.bf16.msra.mxu0 %v1435_v10  ;;  %v1452_v27 = vld [vmem:[%s1880_s1 + $0x88] sm:$0xff]   ;;  %v1456_v31 = vld [vmem:[%s1880_s1 + $0x80] sm:$0xff]   ;;  %v1466_v39 = vld [vmem:[%s1880_s1 + $0x1b8] sm:$0xff]  }
   0xd   :  { %1286 = vmatpush3.bf16.msra.mxu1 %v1436_v11  ;;  %1259 = vmatprep.subr.bf16.mxu0 %v1437_v12  ;;  %v1457_v32 = vld [vmem:[%s1881_s0] ss:$36 sps:$4 sm:$0xff]   ;;  %v1460_v34 = vld [vmem:[%s1881_s0 + $0x8] ss:$36 sps:$4 sm:$0xff]   ;;  %v1467_v40 = vld [vmem:[%s1880_s1 + $0x170] sm:$0xff]  }
   0xe   :  { %1287 = vmatprep.subr.bf16.mxu1 %v1438_v13  ;;  %v1459_v33 = vld [vmem:[%s1881_s0 + $0x4] ss:$36 sps:$4 sm:$0xff]   ;;  %v1462_v35 = vld [vmem:[%s1881_s0 + $0xc] ss:$36 sps:$4 sm:$0xff]   ;;  %v1481_v53 = vld [vmem:[%s1880_s1 + $0x158] sm:$0xff]  }
   0xf   :  { %751 = vmatprep.mubr.bf16.mxu0 %v1459_v33  ;;  %800 = vmatprep.mubr.bf16.mxu1 %v1462_v35  ;;  %v1468_v41 = vld [vmem:[%s1880_s1 + $0x1f0] sm:$0xff]   ;;  %v1471_v44 = vld [vmem:[%s1880_s1 + $0x168] sm:$0xff]   ;;  %v1475_v48 = vld [vmem:[%s1880_s1 + $0x160] sm:$0xff]  }
  0x10   :  { %1260 = vmatpush3.bf16.msra.mxu0 %v1439_v14  ;;  %v1469_v42 = vld [vmem:[%s1880_s1 + $0x130] sm:$0xff]   ;;  %v1472_v45 = vld [vmem:[%s1880_s1 + $0x1e8] sm:$0xff]   ;;  %v1476_v49 = vld [vmem:[%s1880_s1 + $0x1e0] sm:$0xff]  }
  0x11   :  { %1288 = vmatpush3.bf16.msra.mxu1 %v1440_v15  ;;  %1261 = vmatprep.subr.bf16.mxu0 %v1441_v16  ;;  %v1470_v43 = vld [vmem:[%s1880_s1 + $0x1b0] sm:$0xff]   ;;  %v1473_v46 = vld [vmem:[%s1880_s1 + $0x128] sm:$0xff]   ;;  %v1477_v50 = vld [vmem:[%s1880_s1 + $0x120] sm:$0xff]  }
  0x12   :  { %1289 = vmatprep.subr.bf16.mxu1 %v1442_v17  ;;  %v1474_v47 = vld [vmem:[%s1880_s1 + $0x1a8] sm:$0xff]   ;;  %v1478_v51 = vld [vmem:[%s1880_s1 + $0x1a0] sm:$0xff]   ;;  %v1482_v54 = vld [vmem:[%s1880_s1 + $0x1d8] sm:$0xff]  }
  0x13   :  { %v1479_v52 = vld [vmem:[%s1881_s0 + $0x4c] ss:$36 sps:$4 sm:$0xff]   ;;  %v1484_v56 = vld [vmem:[%s1880_s1 + $0x118] sm:$0xff]   ;;  %v1497_v4 = vld [vmem:[%s1880_s1 + $0x140] sm:$0xff]  }
  0x14   :  { %1262 = vmatpush3.bf16.msra.mxu0 %v1443_v18  ;;  %v1483_v55 = vld [vmem:[%s1881_s0 + $0x48] ss:$36 sps:$4 sm:$0xff]   ;;  %v1485_v57 = vld [vmem:[%s1880_s1 + $0x198] sm:$0xff]   ;;  %v1488_v59 = vld [vmem:[%s1881_s0 + $0x50] ss:$36 sps:$4 sm:$0xff]  }
  0x15   :  { %1290 = vmatpush3.bf16.msra.mxu1 %v1444_v19  ;;  %1263 = vmatprep.subr.bf16.mxu0 %v1445_v20  ;;  %v1486_v58 = vld [vmem:[%s1881_s0 + $0x54] ss:$36 sps:$4 sm:$0xff]   ;;  %v1493_v0 = vld [vmem:[%s1880_s1 + $0x148] sm:$0xff]   ;;  %v1498_v5 = vld [vmem:[%s1880_s1 + $0x1c0] sm:$0xff]  }
  0x16   :  { %1291 = vmatprep.subr.bf16.mxu1 %v1446_v21  ;;  %v1489_v60 = vld [vmem:[%s1880_s1 + $0x150] sm:$0xff]   ;;  %v1494_v1 = vld [vmem:[%s1880_s1 + $0x1c8] sm:$0xff]   ;;  %v1499_v6 = vld [vmem:[%s1880_s1 + $0x100] sm:$0xff]  }
  0x17   :  { %v1490_v61 = vld [vmem:[%s1880_s1 + $0x1d0] sm:$0xff]   ;;  %v1495_v2 = vld [vmem:[%s1880_s1 + $0x108] sm:$0xff]   ;;  %v1500_v7 = vld [vmem:[%s1880_s1 + $0x180] sm:$0xff]  }
  0x18   :  { %1264 = vmatpush3.bf16.msra.mxu0 %v1447_v22  ;;  %v1491_v62 = vld [vmem:[%s1880_s1 + $0x110] sm:$0xff]   ;;  %v1496_v3 = vld [vmem:[%s1880_s1 + $0x188] sm:$0xff]   ;;  %v1504_v10 = vld [vmem:[%s1881_s0 + $0x18] ss:$36 sps:$4 sm:$0xff]  }
  0x19   :  { %1292 = vmatpush3.bf16.msra.mxu1 %v1448_v23  ;;  %1265 = vmatprep.subr.bf16.mxu0 %v1449_v24  ;;  %v1492_v63 = vld [vmem:[%s1880_s1 + $0x190] sm:$0xff]   ;;  %v1506_v11 = vld [vmem:[%s1881_s0 + $0x1c] ss:$36 sps:$4 sm:$0xff]   ;;  %v1514_v18 = vld [vmem:[%s1880_s1 + $0x228] sm:$0xff]  }
  0x1a   :  { %1293 = vmatprep.subr.bf16.mxu1 %v1450_v25  ;;  %v1501_v8 = vld [vmem:[%s1881_s0 + $0x10] ss:$36 sps:$4 sm:$0xff]   ;;  %v1507_v12 = vld [vmem:[%s1880_s1 + $0x238] sm:$0xff]   ;;  %v1515_v19 = vld [vmem:[%s1882_s4 + $0x28] sm:$0xff]  }
  0x1b   :  { %v1503_v9 = vld [vmem:[%s1881_s0 + $0x14] ss:$36 sps:$4 sm:$0xff]   ;;  %v1511_v16 = vld [vmem:[%s1881_s0 + $0x5c] ss:$36 sps:$4 sm:$0xff]   ;;  %v1516_v20 = vld [vmem:[%s1881_s0 + $0x64] ss:$36 sps:$4 sm:$0xff]  }
  0x1c   :  { %1266 = vmatpush3.bf16.msra.mxu0 %v1451_v26  ;;  %v1508_v13 = vld [vmem:[%s1882_s4 + $0x38] sm:$0xff]   ;;  %v1509_v14 = vld [vmem:[%s1880_s1 + $0x230] sm:$0xff]   ;;  %v1518_v21 = vld [vmem:[%s1881_s0 + $0x60] ss:$36 sps:$4 sm:$0xff]  }
  0x1d   :  { %1294 = vmatpush3.bf16.msra.mxu1 %v1452_v27  ;;  %1267 = vmatprep.subr.bf16.mxu0 %v1453_v28  ;;  %v1510_v15 = vld [vmem:[%s1882_s4 + $0x30] sm:$0xff]   ;;  %v1513_v17 = vld [vmem:[%s1881_s0 + $0x58] ss:$36 sps:$4 sm:$0xff]   ;;  %v1519_v22 = vld [vmem:[%s1880_s1 + $0x220] sm:$0xff]  }
  0x1e   :  { %1295 = vmatprep.subr.bf16.mxu1 %v1454_v29  ;;  %v1520_v23 = vld [vmem:[%s1882_s4 + $0x20] sm:$0xff]   ;;  %v1521_v24 = vld [vmem:[%s1880_s1 + $0x218] sm:$0xff]   ;;  %v1523_v26 = vld [vmem:[%s1880_s1 + $0x210] sm:$0xff]  }
  0x1f   :  { %v1522_v25 = vld [vmem:[%s1882_s4 + $0x18] sm:$0xff]   ;;  %v1524_v27 = vld [vmem:[%s1882_s4 + $0x10] sm:$0xff]   ;;  %v1525_v28 = vld [vmem:[%s1880_s1 + $0x208] sm:$0xff]  }
  0x20   :  { %1268 = vmatpush3.bf16.msra.mxu0 %v1455_v30  ;;  %v1529_v29 = vld [vmem:[%s1881_s0 + $0x20] ss:$36 sps:$4 sm:$0xff]   ;;  %v1532_v35 = vld [vmem:[%s1883_s3 + $0x8] sm:$0xff]  }
  0x21   :  { %1296 = vmatpush3.bf16.msra.mxu1 %v1456_v31  ;;  %1309 = vmatprep.subr.bf16.mxu0 %v1463_v36  ;;  %v1530_v30 = vld [vmem:[%s1883_s3] sm:$0xff]   ;;  %v1526_v31 = vld [vmem:[%s1882_s4 + $0x8] sm:$0xff]  }
  0x22   :  { %1337 = vmatprep.subr.bf16.mxu1 %v1464_v37  ;;  %v1528_v33 = vld [vmem:[%s1882_s4] sm:$0xff]  }
  0x23   :  { %752 = vmatmul.mubr.bf16.vlgmr.msra.gmra.mxu0 %v1457_v32  ;;  %v1527_v32 = vld [vmem:[%s1880_s1 + $0x200] sm:$0xff]  }
  0x24   :  { %801 = vmatmul.mubr.bf16.vlgmr.msra.gmra.mxu1 %v1460_v34  ;;  %1310 = vmatpush3.bf16.msra.mxu0 %v1465_v38  ;;  %v1531_v34 = vld [vmem:[%s1881_s0 + $0x68] ss:$36 sps:$4 sm:$0xff]  }
  0x25   :  { %1338 = vmatpush3.bf16.msra.mxu1 %v1466_v39  ;;  %1311 = vmatprep.subr.bf16.mxu0 %v1467_v40 }
  0x26   :  { %1339 = vmatprep.subr.bf16.mxu1 %v1468_v41  ;;  %759 = vmatprep.mubr.bf16.mxu0 %v1479_v52 }
  0x27   :  { %808 = vmatprep.mubr.bf16.mxu1 %v1486_v58 }
  0x28   :  { %1312 = vmatpush3.bf16.msra.mxu0 %v1469_v42 }
  0x29   :  { %1340 = vmatpush3.bf16.msra.mxu1 %v1470_v43  ;;  %1313 = vmatprep.subr.bf16.mxu0 %v1471_v44 }
  0x2a   :  { %1341 = vmatprep.subr.bf16.mxu1 %v1472_v45 }
  0x2b   :  { %760 = vmatmul.mubr.bf16.gmra.mxu0 %v1483_v55 }
  0x2c   :  { %1314 = vmatpush3.bf16.msra.mxu0 %v1473_v46  ;;  %809 = vmatmul.mubr.bf16.gmra.mxu1 %v1488_v59 }
  0x2d   :  { %1342 = vmatpush3.bf16.msra.mxu1 %v1474_v47  ;;  %1315 = vmatprep.subr.bf16.mxu0 %v1475_v48 }
  0x2e   :  { %1343 = vmatprep.subr.bf16.mxu1 %v1476_v49  ;;  %849 = vmatprep.mubr.bf16.mxu0 %v1503_v9 }
  0x2f   :  { %898 = vmatprep.mubr.bf16.mxu1 %v1506_v11 }
  0x30   :  { %1316 = vmatpush3.bf16.msra.mxu0 %v1477_v50 }
  0x31   :  { %1344 = vmatpush3.bf16.msra.mxu1 %v1478_v51  ;;  %1317 = vmatprep.subr.bf16.mxu0 %v1481_v53 }
  0x32   :  { %1345 = vmatprep.subr.bf16.mxu1 %v1482_v54 }
  0x34   :  { %1318 = vmatpush3.bf16.msra.mxu0 %v1484_v56 }
  0x35   :  { %1346 = vmatpush3.bf16.msra.mxu1 %v1485_v57  ;;  %1319 = vmatprep.subr.bf16.mxu0 %v1489_v60 }
  0x36   :  { %1347 = vmatprep.subr.bf16.mxu1 %v1490_v61 }
  0x38   :  { %1320 = vmatpush3.bf16.msra.mxu0 %v1491_v62 }
  0x39   :  { %1348 = vmatpush3.bf16.msra.mxu1 %v1492_v63  ;;  %1321 = vmatprep.subr.bf16.mxu0 %v1493_v0 }
  0x3a   :  { %1349 = vmatprep.subr.bf16.mxu1 %v1494_v1 }
  0x3c   :  { %1322 = vmatpush3.bf16.msra.mxu0 %v1495_v2 }
  0x3d   :  { %1350 = vmatpush3.bf16.msra.mxu1 %v1496_v3  ;;  %1323 = vmatprep.subr.bf16.mxu0 %v1497_v4  ;;  %v1132_v3 = vld [vmem:[%s1884_s2] ss:$0 sm:$0xff] }
  0x3e   :  { %1351 = vmatprep.subr.bf16.mxu1 %v1498_v5 }
  0x40   :  { %1324 = vmatpush3.bf16.msra.mxu0 %v1499_v6 }
  0x41   :  { %1352 = vmatpush3.bf16.msra.mxu1 %v1500_v7  ;;  %1385 = vmatprep.subr.bf16.mxu0 %v1507_v12 }
  0x42   :  { %1405 = vmatprep.subr.bf16.mxu1 %v1508_v13 }
  0x43   :  { %850 = vmatmul.mubr.bf16.vlgmr.msra.gmra.mxu0 %v1501_v8 }
  0x44   :  { %899 = vmatmul.mubr.bf16.vlgmr.msra.gmra.mxu1 %v1504_v10  ;;  %1386 = vmatpush3.bf16.msra.mxu0 %v1507_v12 }
  0x45   :  { %1406 = vmatpush3.bf16.msra.mxu1 %v1508_v13  ;;  %1387 = vmatprep.subr.bf16.mxu0 %v1509_v14 }
  0x46   :  { %1407 = vmatprep.subr.bf16.mxu1 %v1510_v15  ;;  %857 = vmatprep.mubr.bf16.mxu0 %v1511_v16 }
  0x47   :  { %906 = vmatprep.mubr.bf16.mxu1 %v1516_v20 }
  0x48   :  { %1388 = vmatpush3.bf16.msra.mxu0 %v1509_v14 }
  0x49   :  { %1408 = vmatpush3.bf16.msra.mxu1 %v1510_v15  ;;  %1389 = vmatprep.subr.bf16.mxu0 %v1514_v18 }
  0x4a   :  { %1409 = vmatprep.subr.bf16.mxu1 %v1515_v19 }
  0x4b   :  { %858 = vmatmul.mubr.bf16.gmra.mxu0 %v1513_v17 }
  0x4c   :  { %1390 = vmatpush3.bf16.msra.mxu0 %v1514_v18  ;;  %907 = vmatmul.mubr.bf16.gmra.mxu1 %v1518_v21 }
  0x4d   :  { %1410 = vmatpush3.bf16.msra.mxu1 %v1515_v19  ;;  %1391 = vmatprep.subr.bf16.mxu0 %v1519_v22 }
  0x4e   :  { %1411 = vmatprep.subr.bf16.mxu1 %v1520_v23  ;;  %1401 = vmatprep.mubr.bf16.mxu0 %v1529_v29 }
  0x4f   :  { %1421 = vmatprep.mubr.bf16.mxu1 %v1530_v30  ;;  %v1223_v30 = vld [vmem:[%s1885_s5] ss:$0 sm:$0xff] }
  0x50   :  { %1392 = vmatpush3.bf16.msra.mxu0 %v1519_v22 }
  0x51   :  { %1412 = vmatpush3.bf16.msra.mxu1 %v1520_v23  ;;  %1393 = vmatprep.subr.bf16.mxu0 %v1521_v24 }
  0x52   :  { %1413 = vmatprep.subr.bf16.mxu1 %v1522_v25 }
  0x54   :  { %1394 = vmatpush3.bf16.msra.mxu0 %v1521_v24 }
  0x55   :  { %1414 = vmatpush3.bf16.msra.mxu1 %v1522_v25  ;;  %1395 = vmatprep.subr.bf16.mxu0 %v1523_v26 }
  0x56   :  { %1415 = vmatprep.subr.bf16.mxu1 %v1524_v27 }
  0x58   :  { %1396 = vmatpush3.bf16.msra.mxu0 %v1523_v26 }
  0x59   :  { %1416 = vmatpush3.bf16.msra.mxu1 %v1524_v27  ;;  %1397 = vmatprep.subr.bf16.mxu0 %v1525_v28 }
  0x5a   :  { %1417 = vmatprep.subr.bf16.mxu1 %v1526_v31 }
  0x5c   :  { %1398 = vmatpush3.bf16.msra.mxu0 %v1525_v28 }
  0x5d   :  { %1418 = vmatpush3.bf16.msra.mxu1 %v1526_v31  ;;  %1399 = vmatprep.subr.bf16.mxu0 %v1527_v32 }
  0x5e   :  { %1419 = vmatprep.subr.bf16.mxu1 %v1528_v33 }
  0x60   :  { %1400 = vmatpush3.bf16.msra.mxu0 %v1527_v32 }
  0x61   :  { %1420 = vmatpush3.bf16.msra.mxu1 %v1528_v33 }
  0x63   :  { %1402 = vmatmul.mubr.bf16.vlgmr.msra.gmra.mxu0 %v1531_v34 }
  0x64   :  { %1422 = vmatmul.mubr.bf16.vlgmr.msra.gmra.mxu1 %v1532_v35 }
  0xe3   :  { %v1269_v36 = vpop.f32.mrf.mxu0 }
  0xe4   :  { %v1297_v37 = vpop.f32.mrf.mxu1 }
  0xe5   :  { %v1270_v38 = vpop.f32.mrf.mxu0 }
  0xe6   :  { %v1298_v39 = vpop.f32.mrf.mxu1  ;;  %v1271_v0 = vadd.f32 %v1270_v38, %v1269_v36 }
  0xe7   :  { %v1272_v40 = vpop.f32.mrf.mxu0  ;;  %v1299_v14 = vadd.f32 %v1298_v39, %v1297_v37 }
  0xe8   :  { %v1300_v41 = vpop.f32.mrf.mxu1  ;;  %v754_v8 = vadd.f32 %v1271_v0, %v1132_v3 }
  0xe9   :  { %v1273_v42 = vpop.f32.mrf.mxu0 }
  0xea   :  { %v1301_v44 = vpop.f32.mrf.mxu1  ;;  %v1274_v7 = vadd.f32 %v1273_v42, %v1272_v40  ;;  %v803_v19 = vadd.f32 %v1299_v14, %v754_v8 }
  0xeb   :  { %v1275_v43 = vpop.f32.mrf.mxu0  ;;  %v1302_v23 = vadd.f32 %v1301_v44, %v1300_v41 }
  0xec   :  { %v1303_v45 = vpop.f32.mrf.mxu1  ;;  %v757_v17 = vadd.f32 %v1274_v7, %v1132_v3 }
  0xed   :  { %v1276_v46 = vpop.f32.mrf.mxu0 }
  0xee   :  { %v1304_v47 = vpop.f32.mrf.mxu1  ;;  %v1277_v63 = vadd.f32 %v1276_v46, %v1275_v43  ;;  %v806_v27 = vadd.f32 %v1302_v23, %v757_v17 }
  0xef   :  { %v1278_v48 = vpop.f32.mrf.mxu0  ;;  %v1305_v6 = vadd.f32 %v1304_v47, %v1303_v45 }
  0xf0   :  { %v1306_v49 = vpop.f32.mrf.mxu1  ;;  %v762_v5 = vadd.f32 %v1277_v63, %v1132_v3 }
  0xf1   :  { %v1279_v50 = vpop.f32.mrf.mxu0 }
  0xf2   :  { %v1307_v52 = vpop.f32.mrf.mxu1  ;;  %v1280_v4 = vadd.f32 %v1279_v50, %v1278_v48  ;;  %v811_v15 = vadd.f32 %v1305_v6, %v762_v5 }
  0xf3   :  { %v1308_v13 = vadd.f32 %v1307_v52, %v1306_v49 }
  0xf4   :  { %v765_v12 = vadd.f32 %v1280_v4, %v1132_v3 }
  0xf6   :  { %v814_v24 = vadd.f32 %v1308_v13, %v765_v12 }
 0x103   :  { %v1325_v51 = vpop.f32.mrf.mxu0 }
 0x104   :  { %v1353_v54 = vpop.f32.mrf.mxu1 }
 0x105   :  { %v1326_v53 = vpop.f32.mrf.mxu0 }
 0x106   :  { %v1354_v56 = vpop.f32.mrf.mxu1  ;;  %v1327_v16 = vadd.f32 %v1326_v53, %v1325_v51 }
 0x107   :  { %v1328_v55 = vpop.f32.mrf.mxu0  ;;  %v1355_v31 = vadd.f32 %v1354_v56, %v1353_v54 }
 0x108   :  { %v1356_v58 = vpop.f32.mrf.mxu1  ;;  %v852_v26 = vadd.f32 %v1327_v16, %v803_v19 }
 0x109   :  { %v1329_v57 = vpop.f32.mrf.mxu0 }
 0x10a   :  { %v1357_v60 = vpop.f32.mrf.mxu1  ;;  %v1330_v25 = vadd.f32 %v1329_v57, %v1328_v55  ;;  %v901_v38 = vadd.f32 %v1355_v31, %v852_v26 }
 0x10b   :  { %v1331_v59 = vpop.f32.mrf.mxu0  ;;  %v1358_v40 = vadd.f32 %v1357_v60, %v1356_v58 }
 0x10c   :  { %v1359_v62 = vpop.f32.mrf.mxu1  ;;  %v855_v34 = vadd.f32 %v1330_v25, %v806_v27 }
 0x10d   :  { %v1332_v61 = vpop.f32.mrf.mxu0 }
 0x10e   :  { %v1360_v2 = vpop.f32.mrf.mxu1  ;;  %v1333_v9 = vadd.f32 %v1332_v61, %v1331_v59  ;;  %v904_v48 = vadd.f32 %v1358_v40, %v855_v34 }
 0x10f   :  { %v1334_v1 = vpop.f32.mrf.mxu0  ;;  %v1361_v21 = vadd.f32 %v1360_v2, %v1359_v62 }
 0x110   :  { %v1362_v11 = vpop.f32.mrf.mxu1  ;;  %v860_v20 = vadd.f32 %v1333_v9, %v811_v15 }
 0x111   :  { %v1335_v10 = vpop.f32.mrf.mxu0 }
 0x112   :  { %v1336_v18 = vadd.f32 %v1335_v10, %v1334_v1  ;;  %v1363_v22 = vpop.f32.mrf.mxu1  ;;  %v909_v32 = vadd.f32 %v1361_v21, %v860_v20 }
 0x113   :  { %v1364_v29 = vadd.f32 %v1363_v22, %v1362_v11 }
 0x114   :  { %v863_v28 = vadd.f32 %v1336_v18, %v814_v24 }
 0x116   :  { %v912_v42 = vadd.f32 %v1364_v29, %v863_v28 }
 0x123   :  { %v1403_v33 = vpop.f32.mrf.mxu0 }
 0x124   :  { %v1423_v35 = vpop.f32.mrf.mxu1  ;;  %v958_v36 = vadd.f32 %v1403_v33, %v909_v32 }
 0x125   :  { %v1094_v37 = vadd.f32 %v1423_v35, %v1223_v30  ;;  %v949_v39 = vpop.f32.mrf.mxu0 }
 0x126   :  { %v1085_v41 = vpop.f32.mrf.mxu1  ;;  %v950_v43 = vadd.f32 %v949_v39, %v901_v38 }
 0x127   :  { %v1086_v44 = vadd.f32 %v1223_v30, %v1085_v41  ;;  %v1404_v45 = vpop.f32.mrf.mxu0  ;;  %v1102_v49 = vadd.f32 %v1094_v37, %v958_v36 }
 0x128   :  { %v961_v46 = vadd.f32 %v1404_v45, %v912_v42  ;;  %v1424_v47 = vpop.f32.mrf.mxu1 }
 0x129   :  { %v1097_v50 = vadd.f32 %v1424_v47, %v1223_v30  ;;  %v952_v51 = vpop.f32.mrf.mxu0  ;;  %v1100_v54 = vadd.f32 %v1086_v44, %v950_v43  ;;  %v1106_v57 = vmax.f32 %v1102_v49, 0.0 }
 0x12a   :  { %v953_v52 = vadd.f32 %v952_v51, %v904_v48  ;;  %v1088_v53 = vpop.f32.mrf.mxu1 }
 0x12b   :  { %v1103_v55 = vadd.f32 %v1097_v50, %v961_v46  ;;  %v1089_v56 = vadd.f32 %v1223_v30, %v1088_v53  ;;  %v1104_v58 = vmax.f32 %v1100_v54, 0.0 }
 0x12d   :  { %v1107_v59 = vmax.f32 %v1103_v55, 0.0  ;;  %v1101_v61 = vadd.f32 %v1089_v56, %v953_v52 }
 0x12f   :  { %v1250_v60 = vpack.c.bf16 %v1107_v59, %v1106_v57  ;;  %v1105_v62 = vmax.f32 %v1101_v61, 0.0 }
 0x131   :  { %1252 = vst [vmem:[%s1886_s6 + $0x8] sm:$0xff] %v1250_v60   ;;  %v1245_v63 = vpack.c.bf16 %v1105_v62, %v1104_v58 }
 0x133   :  { %1246 = vst [vmem:[%s1886_s6] sm:$0xff] %v1245_v63  }

// kernel: resnet_forward.15
= control target key start
LH: loop header
LB: loop body
LE: loop exit
PB: predicated region body
PF: predicated region fallthrough
CT: control target
= control target key end

     0   :  { %s435_s0 = inlined_call_operand.vmem [shape: bf16[2,16,256], index: 0, kind: input, shape index: {}]   ;;  %s436_s1 = inlined_call_operand.vmem [shape: bf16[256,128], index: 1, kind: input, shape index: {}]   ;;  %s437_s2 = inlined_call_operand.vmem [shape: f32[1,128], index: 2, kind: input, shape index: {}]   ;;  %s438_s3 = inlined_call_operand.hbm [shape: f32[2,128], index: 3, kind: output, shape index: {}]  }
   0x1   :  { %v310_v0 = vld [vmem:[%s436_s1 + $0x78] sm:$0xff]   ;;  %v312_v2 = vld [vmem:[%s436_s1 + $0x70] sm:$0xff]   ;;  %v314_v4 = vld [vmem:[%s436_s1 + $0x68] sm:$0xff]  }
   0x2   :  { %v311_v1 = vld [vmem:[%s436_s1 + $0x38] sm:$0xff]   ;;  %287 = vmatprep.subr.bf16.mxu0 %v310_v0  ;;  %v313_v3 = vld [vmem:[%s436_s1 + $0x30] sm:$0xff]   ;;  %v315_v5 = vld [vmem:[%s436_s1 + $0x28] sm:$0xff]  }
   0x3   :  { %288 = vmatpush3.bf16.msra.mxu0 %v311_v1  ;;  %v316_v6 = vld [vmem:[%s436_s1 + $0x60] sm:$0xff]   ;;  %v318_v8 = vld [vmem:[%s436_s1 + $0x58] sm:$0xff]   ;;  %v320_v10 = vld [vmem:[%s436_s1 + $0x50] sm:$0xff]  }
   0x4   :  { %289 = vmatprep.subr.bf16.mxu0 %v312_v2  ;;  %v317_v7 = vld [vmem:[%s436_s1 + $0x20] sm:$0xff]   ;;  %v319_v9 = vld [vmem:[%s436_s1 + $0x18] sm:$0xff]   ;;  %v17_v12 = vld [vmem:[%s435_s0 + $0x8] sm:$0xff] }
   0x5   :  { %v16_v11 = vld [vmem:[%s435_s0] sm:$0xff]  ;;  %v18_v13 = vld [vmem:[%s435_s0 + $0x10] sm:$0xff]  ;;  %v19_v14 = vld [vmem:[%s435_s0 + $0x18] sm:$0xff]  ;;  %v22_v17 = vunpack.c.l.bf16 %v17_v12  ;;  %v23_v18 = vunpack.c.h.bf16 %v17_v12 }
   0x6   :  { %v20_v15 = vunpack.c.l.bf16 %v16_v11  ;;  %v21_v16 = vunpack.c.h.bf16 %v16_v11 }
   0x7   :  { %290 = vmatpush3.bf16.msra.mxu0 %v313_v3 }
   0x8   :  { %291 = vmatprep.subr.bf16.mxu0 %v314_v4 }
   0xb   :  { %292 = vmatpush3.bf16.msra.mxu0 %v315_v5 }
   0xc   :  { %293 = vmatprep.subr.bf16.mxu0 %v316_v6 }
   0xf   :  { %294 = vmatpush3.bf16.msra.mxu0 %v317_v7 }
  0x10   :  { %295 = vmatprep.subr.bf16.mxu0 %v318_v8 }
  0x11   :  { %8 = vsyncpa [#allocation3], 0  ;;  %v24_v19 = vunpack.c.l.bf16 %v18_v13  ;;  %v25_v20 = vunpack.c.h.bf16 %v18_v13  ;;  %v26_v21 = vunpack.c.l.bf16 %v19_v14  ;;  %v27_v22 = vunpack.c.h.bf16 %v19_v14  ;;  %v321_v23 = vld [vmem:[%s436_s1 + $0x10] sm:$0xff]   ;;  %v322_v26 = vld [vmem:[%s436_s1 + $0x48] sm:$0xff]   ;;  %s348_s25 = smov [#allocation2]  }
  0x12   :  { %v35_v24 = vadd.f32 %v23_v18, %v21_v16  ;;  %v28_v25 = vadd.f32 %v22_v17, %v20_v15  ;;  %v323_v33 = vld [vmem:[%s436_s1 + $0x8] sm:$0xff]   ;;  %v324_v36 = vld [vmem:[%s436_s1 + $0x40] sm:$0xff]   ;;  %vm112_vm0 = vcmask 1041409   ;;  %s262_s26 = sshll.u32 %s348_s25, 4  ;;  %s263_s26 = int_to_ptr.vmem [resolvable:$true] %s262_s26 }
  0x13   :  { %296 = vmatpush3.bf16.msra.mxu0 %v319_v9  ;;  %v49_v27 = vadd.f32 %v27_v22, %v25_v20  ;;  %v42_v28 = vadd.f32 %v26_v21, %v24_v19  ;;  %v325_v43 = vld [vmem:[%s436_s1] sm:$0xff]   ;;  %s326_s27 = scalar_lea.vmem %s263_s26, 32  ;;  %p331_p1 = scmp.lt.s32.totalorder %s263_s26, %s263_s26 }
  0x14   :  { %297 = vmatprep.subr.bf16.mxu0 %v320_v10  ;;  %v36_v29 = vrot.slane %v35_v24, 4  ;;  %v29_v30 = vrot.slane %v28_v25, 4  ;;  %v270_v10 = vld [vmem:[%s437_s2] ss:$0 sm:$0xff]  ;;  %p327_p0 = scmp.ne.s32.totalorder %s263_s26, %s326_s27  ;;  %p332_p2 = scmp.lt.s32.totalorder %s326_s27, %s326_s27 }
  0x15   :  { %v50_v31 = vrot.slane %v49_v27, 4  ;;  %v43_v32 = vrot.slane %v42_v28, 4 }
  0x16   :  { %v37_v34 = vadd.f32 %v36_v29, %v35_v24  ;;  %v30_v35 = vadd.f32 %v29_v30, %v28_v25  ;;  %p333_p3 = por %p332_p2, %p331_p1 }
  0x17   :  { %298 = vmatpush3.bf16.msra.mxu0 %v321_v23  ;;  %v51_v37 = vadd.f32 %v50_v31, %v49_v27  ;;  %v44_v38 = vadd.f32 %v43_v32, %v42_v28 }
  0x18   :  { %299 = vmatprep.subr.bf16.mxu0 %v322_v26  ;;  %v38_v39 = vrot.slane %v37_v34, 2  ;;  %v31_v40 = vrot.slane %v30_v35, 2  ;;  %p334_p4 = pnand %p333_p3, %p327_p0 }
  0x19   :  { %v52_v41 = vrot.slane %v51_v37, 2  ;;  %v45_v42 = vrot.slane %v44_v38, 2 }
  0x1a   :  { %v39_v44 = vadd.f32 %v38_v39, %v37_v34  ;;  %v32_v45 = vadd.f32 %v31_v40, %v30_v35 }
  0x1b   :  { %300 = vmatpush3.bf16.msra.mxu0 %v323_v33  ;;  %v53_v46 = vadd.f32 %v52_v41, %v51_v37  ;;  %v46_v47 = vadd.f32 %v45_v42, %v44_v38 }
  0x1c   :  { %301 = vmatprep.subr.bf16.mxu0 %v324_v36  ;;  %v40_v48 = vrot.slane %v39_v44, 1  ;;  %v33_v49 = vrot.slane %v32_v45, 1 }
  0x1d   :  { %v54_v50 = vrot.slane %v53_v46, 1  ;;  %v47_v51 = vrot.slane %v46_v47, 1 }
  0x1e   :  { %v41_v52 = vadd.f32 %v40_v48, %v39_v44  ;;  %v34_v53 = vadd.f32 %v33_v49, %v32_v45 }
  0x1f   :  { %302 = vmatpush3.bf16.msra.mxu0 %v325_v43  ;;  %v55_v54 = vadd.f32 %v54_v50, %v53_v46  ;;  %v48_v55 = vadd.f32 %v47_v51, %v46_v47 }
  0x20   :  { %v58_v56 = vmul.f32 0.0625, %v41_v52  ;;  %v57_v57 = vmul.f32 0.0625, %v34_v53 }
  0x21   :  { %v60_v58 = vmul.f32 0.0625, %v55_v54  ;;  %v59_v59 = vmul.f32 0.0625, %v48_v55 }
  0x22   :  { %v62_v60 = vpack.c.bf16 %v58_v56, %v58_v56  ;;  %v61_v61 = vpack.c.bf16 %v57_v57, %v57_v57 }
  0x23   :  { %v64_v62 = vpack.c.bf16 %v60_v58, %v60_v58  ;;  %v63_v63 = vpack.c.bf16 %v59_v59, %v59_v59 }
  0x24   :  { %v109_v0 = vunpack.c.l.b16 %v62_v60  ;;  %v108_v1 = vunpack.c.l.b16 %v61_v61 }
  0x25   :  { %v111_v2 = vunpack.c.l.b16 %v64_v62  ;;  %v110_v3 = vunpack.c.l.b16 %v63_v63 }
  0x27   :  { %v114_v4 = vsel %vm112_vm0, %v111_v2, %v109_v0  ;;  %v113_v5 = vsel %vm112_vm0, %v110_v3, %v108_v1 }
  0x28   :  { %v116_v6 = vpack.c.b16 %v114_v4, %v114_v4  ;;  %v115_v7 = vpack.c.b16 %v113_v5, %v113_v5 }
  0x2a   :  { %247 = vmatprep.mubr.bf16.mxu0 %v116_v6 }
  0x2b   :  { %248 = vmatmul.mubr.bf16.vlgmr.msra.gmra.mxu0 %v115_v7 }
  0xeb   :  { %v303_v8 = vpop.f32.mrf.mxu0 }
  0xed   :  { %v304_v9 = vpop.f32.mrf.mxu0 }
  0xee   :  { %v305_v11 = vadd.f32 %v304_v9, %v303_v8 }
  0xef   :  { %v306_v12 = vpop.f32.mrf.mxu0 }
  0xf0   :  { %v250_v13 = vadd.f32 %v305_v11, %v270_v10 }
  0xf1   :  { %v307_v14 = vpop.f32.mrf.mxu0 }
  0xf2   :  { %255 = vst [vmem:[#allocation2] sm:$0x3] %v250_v13 }
  0xf3   :  { %337 = shalt.err (!%p334_p4)
}
  0xf4   :  { %265 = dma.vmem_to_hbm [thread:$0]  %s263_s26, 32, %s438_s3, [#allocation3]  }
  0xf5   :  { %346 = dma.done.wait [#allocation3], 32  }
  0xf6   :  { %347 = vsyncadd [#allocation3], 4294967264 }
  0xf7   :  { %269 = vsyncpa [#allocation3], 1 }

// kernel: resnet_forward.14
= control target key start
LH: loop header
LB: loop body
LE: loop exit
PB: predicated region body
PF: predicated region fallthrough
CT: control target
= control target key end

     0   :  { %s4663_s21 = smov 0   ;;  %s4665_s22 = smov 0   ;;  %s5684_s0 = inlined_call_operand.vmem [shape: bf16[32,2304], index: 0, kind: input, shape index: {}]   ;;  %s5685_s1 = inlined_call_operand.vmem [shape: bf16[2304,256], index: 1, kind: input, shape index: {}]   ;;  %s5686_s2 = inlined_call_operand.vmem [shape: f32[1,256], index: 2, kind: input, shape index: {}]   ;;  %s5687_s3 = inlined_call_operand.vmem [shape: bf16[32,128], index: 3, kind: input, shape index: {}]   ;;  %s5688_s4 = inlined_call_operand.vmem [shape: bf16[128,256], index: 4, kind: input, shape index: {}]   ;;  %s5689_s5 = inlined_call_operand.vmem [shape: f32[1,256], index: 5, kind: input, shape index: {}]   ;;  %s5690_s6 = inlined_call_operand.vmem [shape: bf16[32,256], index: 6, kind: output, shape index: {}]  }
   0x1   :  { %s4667_s23 = smov 0   ;;  %s4669_s24 = smov 0  }
   0x2   :  { %s4671_s25 = smov 0  }
   0x3 LB: > { %s25_s26 = sadd.s32 1, %s4622_s24  ;;  %s3829_s27 = sadd.s32 4294967295, %s4626_s25   ;;  %s4626_s25 = sphi %s4671_s25, %s16_s25   ;;  %s4622_s24 = sphi %s4669_s24, %s5712_s24   ;;  %s4618_s23 = sphi %s4667_s23, %s5711_s23   ;;  %s4614_s22 = sphi %s4665_s22, %s5710_s22   ;;  %s4610_s21 = sphi %s4663_s21, %s5709_s21  }
   0x4   : > { %p26_p0 = scmp.ge.s32.totalorder %s25_s26, 2  ;;  %p68_p1 = scmp.ne.s32.totalorder %s4614_s22, %s4610_s21 }
   0x5   : > { %p69_p2 = scmp.eq.s32.totalorder %s4626_s25, 0  ;;  %p204_p4 = scmp.eq.s32.totalorder %s3829_s27, 1 }
   0x6   : > { %s5714_s26 = smov (%p26_p0, %s25_s26), 0  ;;  %s61_s30 = sadd.s32 1, %s4614_s22 }
   0x7   : > { %p4695_p3 = por %p69_p2, %p68_p1  ;;  %s58_s29 = ssub.s32 %s4622_s24, %s5714_s26 }
   0x8   : > { %p59_p5 = scmp.eq.s32.totalorder %s58_s29, 0  ;;  %p4702_p6 = por %p204_p4, %p68_p1 }
   0x9   : > { %p3834_p7 = scmp.ge.s32.totalorder %s4626_s25, 2 }
   0xa   : > { %s4707_s8 = scalar_select %p59_p5, %s4614_s22, %s61_s30  }
   0xb   : > { %245 = sbr.rel (%p3834_p7) target bundleno = 226 (0xe2), region = 24 }
  0x10   : > { %248 = sbr.rel (!%p4695_p3) target bundleno = 212 (0xd4), region = 28  ;;  %s250_s9 = sand.u32 (%p4695_p3), 1, %s4614_s22  }
  0x11   : > { %s3835_s10 = sshll.u32 (%p4695_p3), %s4622_s24, 2  ;;  %s4338_s11 = smul.u32 (%p4695_p3), 1152, %s250_s9 }
  0x12   : > { %s4717_s14 = scalar_lea.vmem (%p4695_p3), %s5685_s1, %s3835_s10 }
  0x13   : > { %v271_v0 = vld [vmem:[%s4717_s14] sm:$0xf] (%p4695_p3)  ;;  %v273_v1 = vld [vmem:[%s4717_s14 + $0x8] sm:$0xf] (%p4695_p3)  ;;  %v275_v2 = vld [vmem:[%s4717_s14 + $0x10] sm:$0xf] (%p4695_p3) }
  0x14   : > { %v277_v3 = vld [vmem:[%s4717_s14 + $0x18] sm:$0xf] (%p4695_p3)  ;;  %v279_v4 = vld [vmem:[%s4717_s14 + $0x20] sm:$0xf] (%p4695_p3)  ;;  %s4724_s15 = scalar_lea.vmem (%p4695_p3), [#allocation2], %s4338_s11 }
  0x15   : > { %272 = vst [vmem:[%s4724_s15] sm:$0xf] %v271_v0  ;;  %274 = vst [vmem:[%s4724_s15 + $0x4] sm:$0xf] %v273_v1  ;;  %v281_v5 = vld [vmem:[%s4717_s14 + $0x28] sm:$0xf] }
  0x16   : > { %276 = vst [vmem:[%s4724_s15 + $0x8] sm:$0xf] %v275_v2  ;;  %278 = vst [vmem:[%s4724_s15 + $0xc] sm:$0xf] %v277_v3  ;;  %v283_v6 = vld [vmem:[%s4717_s14 + $0x30] sm:$0xf] }
  0x17   : > { %280 = vst [vmem:[%s4724_s15 + $0x10] sm:$0xf] %v279_v4  ;;  %v285_v7 = vld [vmem:[%s4717_s14 + $0x38] sm:$0xf]  ;;  %282 = vst [vmem:[%s4724_s15 + $0x14] sm:$0xf] %v281_v5 }
  0x18   : > { %284 = vst [vmem:[%s4724_s15 + $0x18] sm:$0xf] %v283_v6  ;;  %286 = vst [vmem:[%s4724_s15 + $0x1c] sm:$0xf] %v285_v7  ;;  %v287_v8 = vld [vmem:[%s4717_s14 + $0x40] sm:$0xf] }
  0x19   : > { %v289_v9 = vld [vmem:[%s4717_s14 + $0x48] sm:$0xf]  ;;  %v291_v10 = vld [vmem:[%s4717_s14 + $0x50] sm:$0xf]  ;;  %288 = vst [vmem:[%s4724_s15 + $0x20] sm:$0xf] %v287_v8 }
  0x1a   : > { %290 = vst [vmem:[%s4724_s15 + $0x24] sm:$0xf] %v289_v9  ;;  %292 = vst [vmem:[%s4724_s15 + $0x28] sm:$0xf] %v291_v10  ;;  %v293_v11 = vld [vmem:[%s4717_s14 + $0x58] sm:$0xf] }
  0x1b   : > { %v295_v12 = vld [vmem:[%s4717_s14 + $0x60] sm:$0xf]  ;;  %v297_v13 = vld [vmem:[%s4717_s14 + $0x68] sm:$0xf]  ;;  %294 = vst [vmem:[%s4724_s15 + $0x2c] sm:$0xf] %v293_v11 }
  0x1c   : > { %296 = vst [vmem:[%s4724_s15 + $0x30] sm:$0xf] %v295_v12  ;;  %298 = vst [vmem:[%s4724_s15 + $0x34] sm:$0xf] %v297_v13  ;;  %v299_v14 = vld [vmem:[%s4717_s14 + $0x70] sm:$0xf] }
  0x1d   : > { %v301_v15 = vld [vmem:[%s4717_s14 + $0x78] sm:$0xf]  ;;  %v303_v16 = vld [vmem:[%s4717_s14 + $0x80] sm:$0xf]  ;;  %300 = vst [vmem:[%s4724_s15 + $0x38] sm:$0xf] %v299_v14 }
  0x1e   : > { %302 = vst [vmem:[%s4724_s15 + $0x3c] sm:$0xf] %v301_v15  ;;  %304 = vst [vmem:[%s4724_s15 + $0x40] sm:$0xf] %v303_v16  ;;  %v305_v17 = vld [vmem:[%s4717_s14 + $0x88] sm:$0xf] }
  0x1f   : > { %v307_v18 = vld [vmem:[%s4717_s14 + $0x90] sm:$0xf]  ;;  %v309_v19 = vld [vmem:[%s4717_s14 + $0x98] sm:$0xf]  ;;  %306 = vst [vmem:[%s4724_s15 + $0x44] sm:$0xf] %v305_v17 }
  0x20   : > { %308 = vst [vmem:[%s4724_s15 + $0x48] sm:$0xf] %v307_v18  ;;  %310 = vst [vmem:[%s4724_s15 + $0x4c] sm:$0xf] %v309_v19  ;;  %v311_v20 = vld [vmem:[%s4717_s14 + $0xa0] sm:$0xf] }
  0x21   : > { %v313_v21 = vld [vmem:[%s4717_s14 + $0xa8] sm:$0xf]  ;;  %v315_v22 = vld [vmem:[%s4717_s14 + $0xb0] sm:$0xf]  ;;  %312 = vst [vmem:[%s4724_s15 + $0x50] sm:$0xf] %v311_v20 }
  0x22   : > { %314 = vst [vmem:[%s4724_s15 + $0x54] sm:$0xf] %v313_v21  ;;  %316 = vst [vmem:[%s4724_s15 + $0x58] sm:$0xf] %v315_v22  ;;  %v317_v23 = vld [vmem:[%s4717_s14 + $0xb8] sm:$0xf] }
  0x23   : > { %v319_v24 = vld [vmem:[%s4717_s14 + $0xc0] sm:$0xf]  ;;  %v321_v25 = vld [vmem:[%s4717_s14 + $0xc8] sm:$0xf]  ;;  %318 = vst [vmem:[%s4724_s15 + $0x5c] sm:$0xf] %v317_v23 }
  0x24   : > { %320 = vst [vmem:[%s4724_s15 + $0x60] sm:$0xf] %v319_v24  ;;  %322 = vst [vmem:[%s4724_s15 + $0x64] sm:$0xf] %v321_v25  ;;  %v323_v26 = vld [vmem:[%s4717_s14 + $0xd0] sm:$0xf] }
  0x25   : > { %v325_v27 = vld [vmem:[%s4717_s14 + $0xd8] sm:$0xf]  ;;  %v327_v28 = vld [vmem:[%s4717_s14 + $0xe0] sm:$0xf]  ;;  %324 = vst [vmem:[%s4724_s15 + $0x68] sm:$0xf] %v323_v26 }
  0x26   : > { %326 = vst [vmem:[%s4724_s15 + $0x6c] sm:$0xf] %v325_v27  ;;  %328 = vst [vmem:[%s4724_s15 + $0x70] sm:$0xf] %v327_v28  ;;  %v329_v29 = vld [vmem:[%s4717_s14 + $0xe8] sm:$0xf] }
  0x27   : > { %v331_v30 = vld [vmem:[%s4717_s14 + $0xf0] sm:$0xf]  ;;  %v333_v31 = vld [vmem:[%s4717_s14 + $0xf8] sm:$0xf]  ;;  %330 = vst [vmem:[%s4724_s15 + $0x74] sm:$0xf] %v329_v29 }
  0x28   : > { %332 = vst [vmem:[%s4724_s15 + $0x78] sm:$0xf] %v331_v30  ;;  %334 = vst [vmem:[%s4724_s15 + $0x7c] sm:$0xf] %v333_v31  ;;  %v335_v32 = vld [vmem:[%s4717_s14 + $0x100] sm:$0xf] }
  0x29   : > { %v337_v33 = vld [vmem:[%s4717_s14 + $0x108] sm:$0xf]  ;;  %v339_v34 = vld [vmem:[%s4717_s14 + $0x110] sm:$0xf]  ;;  %336 = vst [vmem:[%s4724_s15 + $0x80] sm:$0xf] %v335_v32 }
  0x2a   : > { %338 = vst [vmem:[%s4724_s15 + $0x84] sm:$0xf] %v337_v33  ;;  %340 = vst [vmem:[%s4724_s15 + $0x88] sm:$0xf] %v339_v34  ;;  %v341_v35 = vld [vmem:[%s4717_s14 + $0x118] sm:$0xf] }
  0x2b   : > { %v343_v36 = vld [vmem:[%s4717_s14 + $0x120] sm:$0xf]  ;;  %v345_v37 = vld [vmem:[%s4717_s14 + $0x128] sm:$0xf]  ;;  %342 = vst [vmem:[%s4724_s15 + $0x8c] sm:$0xf] %v341_v35 }
  0x2c   : > { %344 = vst [vmem:[%s4724_s15 + $0x90] sm:$0xf] %v343_v36  ;;  %346 = vst [vmem:[%s4724_s15 + $0x94] sm:$0xf] %v345_v37  ;;  %v347_v38 = vld [vmem:[%s4717_s14 + $0x130] sm:$0xf] }
  0x2d   : > { %v349_v39 = vld [vmem:[%s4717_s14 + $0x138] sm:$0xf]  ;;  %v351_v40 = vld [vmem:[%s4717_s14 + $0x140] sm:$0xf]  ;;  %348 = vst [vmem:[%s4724_s15 + $0x98] sm:$0xf] %v347_v38 }
  0x2e   : > { %350 = vst [vmem:[%s4724_s15 + $0x9c] sm:$0xf] %v349_v39  ;;  %352 = vst [vmem:[%s4724_s15 + $0xa0] sm:$0xf] %v351_v40  ;;  %v353_v41 = vld [vmem:[%s4717_s14 + $0x148] sm:$0xf] }
  0x2f   : > { %v355_v42 = vld [vmem:[%s4717_s14 + $0x150] sm:$0xf]  ;;  %v357_v43 = vld [vmem:[%s4717_s14 + $0x158] sm:$0xf]  ;;  %354 = vst [vmem:[%s4724_s15 + $0xa4] sm:$0xf] %v353_v41 }
  0x30   : > { %356 = vst [vmem:[%s4724_s15 + $0xa8] sm:$0xf] %v355_v42  ;;  %358 = vst [vmem:[%s4724_s15 + $0xac] sm:$0xf] %v357_v43  ;;  %v359_v44 = vld [vmem:[%s4717_s14 + $0x160] sm:$0xf] }
  0x31   : > { %v361_v45 = vld [vmem:[%s4717_s14 + $0x168] sm:$0xf]  ;;  %v363_v46 = vld [vmem:[%s4717_s14 + $0x170] sm:$0xf]  ;;  %360 = vst [vmem:[%s4724_s15 + $0xb0] sm:$0xf] %v359_v44 }
  0x32   : > { %362 = vst [vmem:[%s4724_s15 + $0xb4] sm:$0xf] %v361_v45  ;;  %364 = vst [vmem:[%s4724_s15 + $0xb8] sm:$0xf] %v363_v46  ;;  %v365_v47 = vld [vmem:[%s4717_s14 + $0x178] sm:$0xf] }
  0x33   : > { %v367_v48 = vld [vmem:[%s4717_s14 + $0x180] sm:$0xf]  ;;  %v369_v49 = vld [vmem:[%s4717_s14 + $0x188] sm:$0xf]  ;;  %366 = vst [vmem:[%s4724_s15 + $0xbc] sm:$0xf] %v365_v47 }
  0x34   : > { %368 = vst [vmem:[%s4724_s15 + $0xc0] sm:$0xf] %v367_v48  ;;  %370 = vst [vmem:[%s4724_s15 + $0xc4] sm:$0xf] %v369_v49  ;;  %v371_v50 = vld [vmem:[%s4717_s14 + $0x190] sm:$0xf] }
  0x35   : > { %v373_v51 = vld [vmem:[%s4717_s14 + $0x198] sm:$0xf]  ;;  %v375_v52 = vld [vmem:[%s4717_s14 + $0x1a0] sm:$0xf]  ;;  %372 = vst [vmem:[%s4724_s15 + $0xc8] sm:$0xf] %v371_v50 }
  0x36   : > { %374 = vst [vmem:[%s4724_s15 + $0xcc] sm:$0xf] %v373_v51  ;;  %376 = vst [vmem:[%s4724_s15 + $0xd0] sm:$0xf] %v375_v52  ;;  %v377_v53 = vld [vmem:[%s4717_s14 + $0x1a8] sm:$0xf] }
  0x37   : > { %v379_v54 = vld [vmem:[%s4717_s14 + $0x1b0] sm:$0xf]  ;;  %v381_v55 = vld [vmem:[%s4717_s14 + $0x1b8] sm:$0xf]  ;;  %378 = vst [vmem:[%s4724_s15 + $0xd4] sm:$0xf] %v377_v53 }
  0x38   : > { %380 = vst [vmem:[%s4724_s15 + $0xd8] sm:$0xf] %v379_v54  ;;  %382 = vst [vmem:[%s4724_s15 + $0xdc] sm:$0xf] %v381_v55  ;;  %v383_v56 = vld [vmem:[%s4717_s14 + $0x1c0] sm:$0xf] }
  0x39   : > { %v385_v57 = vld [vmem:[%s4717_s14 + $0x1c8] sm:$0xf]  ;;  %v387_v58 = vld [vmem:[%s4717_s14 + $0x1d0] sm:$0xf]  ;;  %384 = vst [vmem:[%s4724_s15 + $0xe0] sm:$0xf] %v383_v56 }
  0x3a   : > { %386 = vst [vmem:[%s4724_s15 + $0xe4] sm:$0xf] %v385_v57  ;;  %388 = vst [vmem:[%s4724_s15 + $0xe8] sm:$0xf] %v387_v58  ;;  %v389_v59 = vld [vmem:[%s4717_s14 + $0x1d8] sm:$0xf] }
  0x3b   : > { %v391_v60 = vld [vmem:[%s4717_s14 + $0x1e0] sm:$0xf]  ;;  %v393_v61 = vld [vmem:[%s4717_s14 + $0x1e8] sm:$0xf]  ;;  %390 = vst [vmem:[%s4724_s15 + $0xec] sm:$0xf] %v389_v59 }
  0x3c   : > { %392 = vst [vmem:[%s4724_s15 + $0xf0] sm:$0xf] %v391_v60  ;;  %394 = vst [vmem:[%s4724_s15 + $0xf4] sm:$0xf] %v393_v61  ;;  %v395_v62 = vld [vmem:[%s4717_s14 + $0x1f0] sm:$0xf] }
  0x3d   : > { %v397_v63 = vld [vmem:[%s4717_s14 + $0x1f8] sm:$0xf]  ;;  %v399_v0 = vld [vmem:[%s4717_s14 + $0x200] sm:$0xf]  ;;  %396 = vst [vmem:[%s4724_s15 + $0xf8] sm:$0xf] %v395_v62 }
  0x3e   : > { %398 = vst [vmem:[%s4724_s15 + $0xfc] sm:$0xf] %v397_v63  ;;  %400 = vst [vmem:[%s4724_s15 + $0x100] sm:$0xf] %v399_v0  ;;  %v401_v1 = vld [vmem:[%s4717_s14 + $0x208] sm:$0xf] }
  0x3f   : > { %v403_v2 = vld [vmem:[%s4717_s14 + $0x210] sm:$0xf]  ;;  %v405_v3 = vld [vmem:[%s4717_s14 + $0x218] sm:$0xf]  ;;  %402 = vst [vmem:[%s4724_s15 + $0x104] sm:$0xf] %v401_v1 }
  0x40   : > { %404 = vst [vmem:[%s4724_s15 + $0x108] sm:$0xf] %v403_v2  ;;  %406 = vst [vmem:[%s4724_s15 + $0x10c] sm:$0xf] %v405_v3  ;;  %v407_v4 = vld [vmem:[%s4717_s14 + $0x220] sm:$0xf] }
  0x41   : > { %v409_v5 = vld [vmem:[%s4717_s14 + $0x228] sm:$0xf]  ;;  %v411_v6 = vld [vmem:[%s4717_s14 + $0x230] sm:$0xf]  ;;  %408 = vst [vmem:[%s4724_s15 + $0x110] sm:$0xf] %v407_v4 }
  0x42   : > { %410 = vst [vmem:[%s4724_s15 + $0x114] sm:$0xf] %v409_v5  ;;  %412 = vst [vmem:[%s4724_s15 + $0x118] sm:$0xf] %v411_v6  ;;  %v413_v7 = vld [vmem:[%s4717_s14 + $0x238] sm:$0xf] }
  0x43   : > { %v415_v8 = vld [vmem:[%s4717_s14 + $0x240] sm:$0xf]  ;;  %v417_v9 = vld [vmem:[%s4717_s14 + $0x248] sm:$0xf]  ;;  %414 = vst [vmem:[%s4724_s15 + $0x11c] sm:$0xf] %v413_v7 }
  0x44   : > { %416 = vst [vmem:[%s4724_s15 + $0x120] sm:$0xf] %v415_v8  ;;  %418 = vst [vmem:[%s4724_s15 + $0x124] sm:$0xf] %v417_v9  ;;  %v419_v10 = vld [vmem:[%s4717_s14 + $0x250] sm:$0xf] }
  0x45   : > { %v421_v11 = vld [vmem:[%s4717_s14 + $0x258] sm:$0xf]  ;;  %v423_v12 = vld [vmem:[%s4717_s14 + $0x260] sm:$0xf]  ;;  %420 = vst [vmem:[%s4724_s15 + $0x128] sm:$0xf] %v419_v10 }
  0x46   : > { %422 = vst [vmem:[%s4724_s15 + $0x12c] sm:$0xf] %v421_v11  ;;  %424 = vst [vmem:[%s4724_s15 + $0x130] sm:$0xf] %v423_v12  ;;  %v425_v13 = vld [vmem:[%s4717_s14 + $0x268] sm:$0xf] }
  0x47   : > { %v427_v14 = vld [vmem:[%s4717_s14 + $0x270] sm:$0xf]  ;;  %v429_v15 = vld [vmem:[%s4717_s14 + $0x278] sm:$0xf]  ;;  %426 = vst [vmem:[%s4724_s15 + $0x134] sm:$0xf] %v425_v13 }
  0x48   : > { %428 = vst [vmem:[%s4724_s15 + $0x138] sm:$0xf] %v427_v14  ;;  %430 = vst [vmem:[%s4724_s15 + $0x13c] sm:$0xf] %v429_v15  ;;  %v431_v16 = vld [vmem:[%s4717_s14 + $0x280] sm:$0xf] }
  0x49   : > { %v433_v17 = vld [vmem:[%s4717_s14 + $0x288] sm:$0xf]  ;;  %v435_v18 = vld [vmem:[%s4717_s14 + $0x290] sm:$0xf]  ;;  %432 = vst [vmem:[%s4724_s15 + $0x140] sm:$0xf] %v431_v16 }
  0x4a   : > { %434 = vst [vmem:[%s4724_s15 + $0x144] sm:$0xf] %v433_v17  ;;  %436 = vst [vmem:[%s4724_s15 + $0x148] sm:$0xf] %v435_v18  ;;  %v437_v19 = vld [vmem:[%s4717_s14 + $0x298] sm:$0xf] }
  0x4b   : > { %v439_v20 = vld [vmem:[%s4717_s14 + $0x2a0] sm:$0xf]  ;;  %v441_v21 = vld [vmem:[%s4717_s14 + $0x2a8] sm:$0xf]  ;;  %438 = vst [vmem:[%s4724_s15 + $0x14c] sm:$0xf] %v437_v19 }
  0x4c   : > { %440 = vst [vmem:[%s4724_s15 + $0x150] sm:$0xf] %v439_v20  ;;  %442 = vst [vmem:[%s4724_s15 + $0x154] sm:$0xf] %v441_v21  ;;  %v443_v22 = vld [vmem:[%s4717_s14 + $0x2b0] sm:$0xf] }
  0x4d   : > { %v445_v23 = vld [vmem:[%s4717_s14 + $0x2b8] sm:$0xf]  ;;  %v447_v24 = vld [vmem:[%s4717_s14 + $0x2c0] sm:$0xf]  ;;  %444 = vst [vmem:[%s4724_s15 + $0x158] sm:$0xf] %v443_v22 }
  0x4e   : > { %446 = vst [vmem:[%s4724_s15 + $0x15c] sm:$0xf] %v445_v23  ;;  %448 = vst [vmem:[%s4724_s15 + $0x160] sm:$0xf] %v447_v24  ;;  %v449_v25 = vld [vmem:[%s4717_s14 + $0x2c8] sm:$0xf] }
  0x4f   : > { %v451_v26 = vld [vmem:[%s4717_s14 + $0x2d0] sm:$0xf]  ;;  %v453_v27 = vld [vmem:[%s4717_s14 + $0x2d8] sm:$0xf]  ;;  %450 = vst [vmem:[%s4724_s15 + $0x164] sm:$0xf] %v449_v25 }
  0x50   : > { %452 = vst [vmem:[%s4724_s15 + $0x168] sm:$0xf] %v451_v26  ;;  %454 = vst [vmem:[%s4724_s15 + $0x16c] sm:$0xf] %v453_v27  ;;  %v455_v28 = vld [vmem:[%s4717_s14 + $0x2e0] sm:$0xf] }
  0x51   : > { %v457_v29 = vld [vmem:[%s4717_s14 + $0x2e8] sm:$0xf]  ;;  %v459_v30 = vld [vmem:[%s4717_s14 + $0x2f0] sm:$0xf]  ;;  %456 = vst [vmem:[%s4724_s15 + $0x170] sm:$0xf] %v455_v28 }
  0x52   : > { %458 = vst [vmem:[%s4724_s15 + $0x174] sm:$0xf] %v457_v29  ;;  %460 = vst [vmem:[%s4724_s15 + $0x178] sm:$0xf] %v459_v30  ;;  %v461_v31 = vld [vmem:[%s4717_s14 + $0x2f8] sm:$0xf] }
  0x53   : > { %v463_v32 = vld [vmem:[%s4717_s14 + $0x300] sm:$0xf]  ;;  %v465_v33 = vld [vmem:[%s4717_s14 + $0x308] sm:$0xf]  ;;  %462 = vst [vmem:[%s4724_s15 + $0x17c] sm:$0xf] %v461_v31 }
  0x54   : > { %464 = vst [vmem:[%s4724_s15 + $0x180] sm:$0xf] %v463_v32  ;;  %466 = vst [vmem:[%s4724_s15 + $0x184] sm:$0xf] %v465_v33  ;;  %v467_v34 = vld [vmem:[%s4717_s14 + $0x310] sm:$0xf] }
  0x55   : > { %v469_v35 = vld [vmem:[%s4717_s14 + $0x318] sm:$0xf]  ;;  %v471_v36 = vld [vmem:[%s4717_s14 + $0x320] sm:$0xf]  ;;  %468 = vst [vmem:[%s4724_s15 + $0x188] sm:$0xf] %v467_v34 }
  0x56   : > { %470 = vst [vmem:[%s4724_s15 + $0x18c] sm:$0xf] %v469_v35  ;;  %472 = vst [vmem:[%s4724_s15 + $0x190] sm:$0xf] %v471_v36  ;;  %v473_v37 = vld [vmem:[%s4717_s14 + $0x328] sm:$0xf] }
  0x57   : > { %v475_v38 = vld [vmem:[%s4717_s14 + $0x330] sm:$0xf]  ;;  %v477_v39 = vld [vmem:[%s4717_s14 + $0x338] sm:$0xf]  ;;  %474 = vst [vmem:[%s4724_s15 + $0x194] sm:$0xf] %v473_v37 }
  0x58   : > { %476 = vst [vmem:[%s4724_s15 + $0x198] sm:$0xf] %v475_v38  ;;  %478 = vst [vmem:[%s4724_s15 + $0x19c] sm:$0xf] %v477_v39  ;;  %v479_v40 = vld [vmem:[%s4717_s14 + $0x340] sm:$0xf] }
  0x59   : > { %v481_v41 = vld [vmem:[%s4717_s14 + $0x348] sm:$0xf]  ;;  %v483_v42 = vld [vmem:[%s4717_s14 + $0x350] sm:$0xf]  ;;  %480 = vst [vmem:[%s4724_s15 + $0x1a0] sm:$0xf] %v479_v40 }
  0x5a   : > { %482 = vst [vmem:[%s4724_s15 + $0x1a4] sm:$0xf] %v481_v41  ;;  %484 = vst [vmem:[%s4724_s15 + $0x1a8] sm:$0xf] %v483_v42  ;;  %v485_v43 = vld [vmem:[%s4717_s14 + $0x358] sm:$0xf] }
  0x5b   : > { %v487_v44 = vld [vmem:[%s4717_s14 + $0x360] sm:$0xf]  ;;  %v489_v45 = vld [vmem:[%s4717_s14 + $0x368] sm:$0xf]  ;;  %486 = vst [vmem:[%s4724_s15 + $0x1ac] sm:$0xf] %v485_v43 }
  0x5c   : > { %488 = vst [vmem:[%s4724_s15 + $0x1b0] sm:$0xf] %v487_v44  ;;  %490 = vst [vmem:[%s4724_s15 + $0x1b4] sm:$0xf] %v489_v45  ;;  %v491_v46 = vld [vmem:[%s4717_s14 + $0x370] sm:$0xf] }
  0x5d   : > { %v493_v47 = vld [vmem:[%s4717_s14 + $0x378] sm:$0xf]  ;;  %v495_v48 = vld [vmem:[%s4717_s14 + $0x380] sm:$0xf]  ;;  %492 = vst [vmem:[%s4724_s15 + $0x1b8] sm:$0xf] %v491_v46 }
  0x5e   : > { %494 = vst [vmem:[%s4724_s15 + $0x1bc] sm:$0xf] %v493_v47  ;;  %496 = vst [vmem:[%s4724_s15 + $0x1c0] sm:$0xf] %v495_v48  ;;  %v497_v49 = vld [vmem:[%s4717_s14 + $0x388] sm:$0xf] }
  0x5f   : > { %v499_v50 = vld [vmem:[%s4717_s14 + $0x390] sm:$0xf]  ;;  %v501_v51 = vld [vmem:[%s4717_s14 + $0x398] sm:$0xf]  ;;  %498 = vst [vmem:[%s4724_s15 + $0x1c4] sm:$0xf] %v497_v49 }
  0x60   : > { %500 = vst [vmem:[%s4724_s15 + $0x1c8] sm:$0xf] %v499_v50  ;;  %502 = vst [vmem:[%s4724_s15 + $0x1cc] sm:$0xf] %v501_v51  ;;  %v503_v52 = vld [vmem:[%s4717_s14 + $0x3a0] sm:$0xf] }
  0x61   : > { %v505_v53 = vld [vmem:[%s4717_s14 + $0x3a8] sm:$0xf]  ;;  %v507_v54 = vld [vmem:[%s4717_s14 + $0x3b0] sm:$0xf]  ;;  %504 = vst [vmem:[%s4724_s15 + $0x1d0] sm:$0xf] %v503_v52 }
  0x62   : > { %506 = vst [vmem:[%s4724_s15 + $0x1d4] sm:$0xf] %v505_v53  ;;  %508 = vst [vmem:[%s4724_s15 + $0x1d8] sm:$0xf] %v507_v54  ;;  %v509_v55 = vld [vmem:[%s4717_s14 + $0x3b8] sm:$0xf] }
  0x63   : > { %v511_v56 = vld [vmem:[%s4717_s14 + $0x3c0] sm:$0xf]  ;;  %v513_v57 = vld [vmem:[%s4717_s14 + $0x3c8] sm:$0xf]  ;;  %510 = vst [vmem:[%s4724_s15 + $0x1dc] sm:$0xf] %v509_v55 }
  0x64   : > { %512 = vst [vmem:[%s4724_s15 + $0x1e0] sm:$0xf] %v511_v56  ;;  %514 = vst [vmem:[%s4724_s15 + $0x1e4] sm:$0xf] %v513_v57  ;;  %v515_v58 = vld [vmem:[%s4717_s14 + $0x3d0] sm:$0xf] }
  0x65   : > { %v517_v59 = vld [vmem:[%s4717_s14 + $0x3d8] sm:$0xf]  ;;  %v519_v60 = vld [vmem:[%s4717_s14 + $0x3e0] sm:$0xf]  ;;  %516 = vst [vmem:[%s4724_s15 + $0x1e8] sm:$0xf] %v515_v58 }
  0x66   : > { %518 = vst [vmem:[%s4724_s15 + $0x1ec] sm:$0xf] %v517_v59  ;;  %520 = vst [vmem:[%s4724_s15 + $0x1f0] sm:$0xf] %v519_v60  ;;  %v521_v61 = vld [vmem:[%s4717_s14 + $0x3e8] sm:$0xf] }
  0x67   : > { %v523_v62 = vld [vmem:[%s4717_s14 + $0x3f0] sm:$0xf]  ;;  %v525_v63 = vld [vmem:[%s4717_s14 + $0x3f8] sm:$0xf]  ;;  %522 = vst [vmem:[%s4724_s15 + $0x1f4] sm:$0xf] %v521_v61 }
  0x68   : > { %524 = vst [vmem:[%s4724_s15 + $0x1f8] sm:$0xf] %v523_v62  ;;  %526 = vst [vmem:[%s4724_s15 + $0x1fc] sm:$0xf] %v525_v63  ;;  %v527_v0 = vld [vmem:[%s4717_s14 + $0x400] sm:$0xf] }
  0x69   : > { %v529_v1 = vld [vmem:[%s4717_s14 + $0x408] sm:$0xf]  ;;  %v531_v2 = vld [vmem:[%s4717_s14 + $0x410] sm:$0xf]  ;;  %528 = vst [vmem:[%s4724_s15 + $0x200] sm:$0xf] %v527_v0 }
  0x6a   : > { %530 = vst [vmem:[%s4724_s15 + $0x204] sm:$0xf] %v529_v1  ;;  %532 = vst [vmem:[%s4724_s15 + $0x208] sm:$0xf] %v531_v2  ;;  %v533_v3 = vld [vmem:[%s4717_s14 + $0x418] sm:$0xf] }
  0x6b   : > { %v535_v4 = vld [vmem:[%s4717_s14 + $0x420] sm:$0xf]  ;;  %v537_v5 = vld [vmem:[%s4717_s14 + $0x428] sm:$0xf]  ;;  %534 = vst [vmem:[%s4724_s15 + $0x20c] sm:$0xf] %v533_v3 }
  0x6c   : > { %536 = vst [vmem:[%s4724_s15 + $0x210] sm:$0xf] %v535_v4  ;;  %538 = vst [vmem:[%s4724_s15 + $0x214] sm:$0xf] %v537_v5  ;;  %v539_v6 = vld [vmem:[%s4717_s14 + $0x430] sm:$0xf] }
  0x6d   : > { %v541_v7 = vld [vmem:[%s4717_s14 + $0x438] sm:$0xf]  ;;  %v543_v8 = vld [vmem:[%s4717_s14 + $0x440] sm:$0xf]  ;;  %540 = vst [vmem:[%s4724_s15 + $0x218] sm:$0xf] %v539_v6 }
  0x6e   : > { %542 = vst [vmem:[%s4724_s15 + $0x21c] sm:$0xf] %v541_v7  ;;  %544 = vst [vmem:[%s4724_s15 + $0x220] sm:$0xf] %v543_v8  ;;  %v545_v9 = vld [vmem:[%s4717_s14 + $0x448] sm:$0xf] }
  0x6f   : > { %v547_v10 = vld [vmem:[%s4717_s14 + $0x450] sm:$0xf]  ;;  %v549_v11 = vld [vmem:[%s4717_s14 + $0x458] sm:$0xf]  ;;  %546 = vst [vmem:[%s4724_s15 + $0x224] sm:$0xf] %v545_v9 }
  0x70   : > { %548 = vst [vmem:[%s4724_s15 + $0x228] sm:$0xf] %v547_v10  ;;  %550 = vst [vmem:[%s4724_s15 + $0x22c] sm:$0xf] %v549_v11  ;;  %v551_v12 = vld [vmem:[%s4717_s14 + $0x460] sm:$0xf] }
  0x71   : > { %v553_v13 = vld [vmem:[%s4717_s14 + $0x468] sm:$0xf]  ;;  %v555_v14 = vld [vmem:[%s4717_s14 + $0x470] sm:$0xf]  ;;  %552 = vst [vmem:[%s4724_s15 + $0x230] sm:$0xf] %v551_v12 }
  0x72   : > { %554 = vst [vmem:[%s4724_s15 + $0x234] sm:$0xf] %v553_v13  ;;  %556 = vst [vmem:[%s4724_s15 + $0x238] sm:$0xf] %v555_v14  ;;  %v557_v15 = vld [vmem:[%s4717_s14 + $0x478] sm:$0xf] }
  0x73   : > { %v559_v16 = vld [vmem:[%s4717_s14 + $0x480] sm:$0xf]  ;;  %v561_v17 = vld [vmem:[%s4717_s14 + $0x488] sm:$0xf]  ;;  %558 = vst [vmem:[%s4724_s15 + $0x23c] sm:$0xf] %v557_v15 }
  0x74   : > { %560 = vst [vmem:[%s4724_s15 + $0x240] sm:$0xf] %v559_v16  ;;  %562 = vst [vmem:[%s4724_s15 + $0x244] sm:$0xf] %v561_v17  ;;  %v563_v18 = vld [vmem:[%s4717_s14 + $0x490] sm:$0xf] }
  0x75   : > { %v565_v19 = vld [vmem:[%s4717_s14 + $0x498] sm:$0xf]  ;;  %v567_v20 = vld [vmem:[%s4717_s14 + $0x4a0] sm:$0xf]  ;;  %564 = vst [vmem:[%s4724_s15 + $0x248] sm:$0xf] %v563_v18 }
  0x76   : > { %566 = vst [vmem:[%s4724_s15 + $0x24c] sm:$0xf] %v565_v19  ;;  %568 = vst [vmem:[%s4724_s15 + $0x250] sm:$0xf] %v567_v20  ;;  %v569_v21 = vld [vmem:[%s4717_s14 + $0x4a8] sm:$0xf] }
  0x77   : > { %v571_v22 = vld [vmem:[%s4717_s14 + $0x4b0] sm:$0xf]  ;;  %v573_v23 = vld [vmem:[%s4717_s14 + $0x4b8] sm:$0xf]  ;;  %570 = vst [vmem:[%s4724_s15 + $0x254] sm:$0xf] %v569_v21 }
  0x78   : > { %572 = vst [vmem:[%s4724_s15 + $0x258] sm:$0xf] %v571_v22  ;;  %574 = vst [vmem:[%s4724_s15 + $0x25c] sm:$0xf] %v573_v23  ;;  %v575_v24 = vld [vmem:[%s4717_s14 + $0x4c0] sm:$0xf] }
  0x79   : > { %v577_v25 = vld [vmem:[%s4717_s14 + $0x4c8] sm:$0xf]  ;;  %v579_v26 = vld [vmem:[%s4717_s14 + $0x4d0] sm:$0xf]  ;;  %576 = vst [vmem:[%s4724_s15 + $0x260] sm:$0xf] %v575_v24 }
  0x7a   : > { %578 = vst [vmem:[%s4724_s15 + $0x264] sm:$0xf] %v577_v25  ;;  %580 = vst [vmem:[%s4724_s15 + $0x268] sm:$0xf] %v579_v26  ;;  %v581_v27 = vld [vmem:[%s4717_s14 + $0x4d8] sm:$0xf] }
  0x7b   : > { %v583_v28 = vld [vmem:[%s4717_s14 + $0x4e0] sm:$0xf]  ;;  %v585_v29 = vld [vmem:[%s4717_s14 + $0x4e8] sm:$0xf]  ;;  %582 = vst [vmem:[%s4724_s15 + $0x26c] sm:$0xf] %v581_v27 }
  0x7c   : > { %584 = vst [vmem:[%s4724_s15 + $0x270] sm:$0xf] %v583_v28  ;;  %586 = vst [vmem:[%s4724_s15 + $0x274] sm:$0xf] %v585_v29  ;;  %v587_v30 = vld [vmem:[%s4717_s14 + $0x4f0] sm:$0xf] }
  0x7d   : > { %v589_v31 = vld [vmem:[%s4717_s14 + $0x4f8] sm:$0xf]  ;;  %v591_v32 = vld [vmem:[%s4717_s14 + $0x500] sm:$0xf]  ;;  %588 = vst [vmem:[%s4724_s15 + $0x278] sm:$0xf] %v587_v30 }
  0x7e   : > { %590 = vst [vmem:[%s4724_s15 + $0x27c] sm:$0xf] %v589_v31  ;;  %592 = vst [vmem:[%s4724_s15 + $0x280] sm:$0xf] %v591_v32  ;;  %v593_v33 = vld [vmem:[%s4717_s14 + $0x508] sm:$0xf] }
  0x7f   : > { %v595_v34 = vld [vmem:[%s4717_s14 + $0x510] sm:$0xf]  ;;  %v597_v35 = vld [vmem:[%s4717_s14 + $0x518] sm:$0xf]  ;;  %594 = vst [vmem:[%s4724_s15 + $0x284] sm:$0xf] %v593_v33 }
  0x80   : > { %596 = vst [vmem:[%s4724_s15 + $0x288] sm:$0xf] %v595_v34  ;;  %598 = vst [vmem:[%s4724_s15 + $0x28c] sm:$0xf] %v597_v35  ;;  %v599_v36 = vld [vmem:[%s4717_s14 + $0x520] sm:$0xf] }
  0x81   : > { %v601_v37 = vld [vmem:[%s4717_s14 + $0x528] sm:$0xf]  ;;  %v603_v38 = vld [vmem:[%s4717_s14 + $0x530] sm:$0xf]  ;;  %600 = vst [vmem:[%s4724_s15 + $0x290] sm:$0xf] %v599_v36 }
  0x82   : > { %602 = vst [vmem:[%s4724_s15 + $0x294] sm:$0xf] %v601_v37  ;;  %604 = vst [vmem:[%s4724_s15 + $0x298] sm:$0xf] %v603_v38  ;;  %v605_v39 = vld [vmem:[%s4717_s14 + $0x538] sm:$0xf] }
  0x83   : > { %v607_v40 = vld [vmem:[%s4717_s14 + $0x540] sm:$0xf]  ;;  %v609_v41 = vld [vmem:[%s4717_s14 + $0x548] sm:$0xf]  ;;  %606 = vst [vmem:[%s4724_s15 + $0x29c] sm:$0xf] %v605_v39 }
  0x84   : > { %608 = vst [vmem:[%s4724_s15 + $0x2a0] sm:$0xf] %v607_v40  ;;  %610 = vst [vmem:[%s4724_s15 + $0x2a4] sm:$0xf] %v609_v41  ;;  %v611_v42 = vld [vmem:[%s4717_s14 + $0x550] sm:$0xf] }
  0x85   : > { %v613_v43 = vld [vmem:[%s4717_s14 + $0x558] sm:$0xf]  ;;  %v615_v44 = vld [vmem:[%s4717_s14 + $0x560] sm:$0xf]  ;;  %612 = vst [vmem:[%s4724_s15 + $0x2a8] sm:$0xf] %v611_v42 }
  0x86   : > { %614 = vst [vmem:[%s4724_s15 + $0x2ac] sm:$0xf] %v613_v43  ;;  %616 = vst [vmem:[%s4724_s15 + $0x2b0] sm:$0xf] %v615_v44  ;;  %v617_v45 = vld [vmem:[%s4717_s14 + $0x568] sm:$0xf] }
  0x87   : > { %v619_v46 = vld [vmem:[%s4717_s14 + $0x570] sm:$0xf]  ;;  %v621_v47 = vld [vmem:[%s4717_s14 + $0x578] sm:$0xf]  ;;  %618 = vst [vmem:[%s4724_s15 + $0x2b4] sm:$0xf] %v617_v45 }
  0x88   : > { %620 = vst [vmem:[%s4724_s15 + $0x2b8] sm:$0xf] %v619_v46  ;;  %622 = vst [vmem:[%s4724_s15 + $0x2bc] sm:$0xf] %v621_v47  ;;  %v623_v48 = vld [vmem:[%s4717_s14 + $0x580] sm:$0xf] }
  0x89   : > { %v625_v49 = vld [vmem:[%s4717_s14 + $0x588] sm:$0xf]  ;;  %v627_v50 = vld [vmem:[%s4717_s14 + $0x590] sm:$0xf]  ;;  %624 = vst [vmem:[%s4724_s15 + $0x2c0] sm:$0xf] %v623_v48 }
  0x8a   : > { %626 = vst [vmem:[%s4724_s15 + $0x2c4] sm:$0xf] %v625_v49  ;;  %628 = vst [vmem:[%s4724_s15 + $0x2c8] sm:$0xf] %v627_v50  ;;  %v629_v51 = vld [vmem:[%s4717_s14 + $0x598] sm:$0xf] }
  0x8b   : > { %v631_v52 = vld [vmem:[%s4717_s14 + $0x5a0] sm:$0xf]  ;;  %v633_v53 = vld [vmem:[%s4717_s14 + $0x5a8] sm:$0xf]  ;;  %630 = vst [vmem:[%s4724_s15 + $0x2cc] sm:$0xf] %v629_v51 }
  0x8c   : > { %632 = vst [vmem:[%s4724_s15 + $0x2d0] sm:$0xf] %v631_v52  ;;  %634 = vst [vmem:[%s4724_s15 + $0x2d4] sm:$0xf] %v633_v53  ;;  %v635_v54 = vld [vmem:[%s4717_s14 + $0x5b0] sm:$0xf] }
  0x8d   : > { %v637_v55 = vld [vmem:[%s4717_s14 + $0x5b8] sm:$0xf]  ;;  %v639_v56 = vld [vmem:[%s4717_s14 + $0x5c0] sm:$0xf]  ;;  %636 = vst [vmem:[%s4724_s15 + $0x2d8] sm:$0xf] %v635_v54 }
  0x8e   : > { %638 = vst [vmem:[%s4724_s15 + $0x2dc] sm:$0xf] %v637_v55  ;;  %640 = vst [vmem:[%s4724_s15 + $0x2e0] sm:$0xf] %v639_v56  ;;  %v641_v57 = vld [vmem:[%s4717_s14 + $0x5c8] sm:$0xf] }
  0x8f   : > { %v643_v58 = vld [vmem:[%s4717_s14 + $0x5d0] sm:$0xf]  ;;  %v645_v59 = vld [vmem:[%s4717_s14 + $0x5d8] sm:$0xf]  ;;  %642 = vst [vmem:[%s4724_s15 + $0x2e4] sm:$0xf] %v641_v57 }
  0x90   : > { %644 = vst [vmem:[%s4724_s15 + $0x2e8] sm:$0xf] %v643_v58  ;;  %646 = vst [vmem:[%s4724_s15 + $0x2ec] sm:$0xf] %v645_v59  ;;  %v647_v60 = vld [vmem:[%s4717_s14 + $0x5e0] sm:$0xf] }
  0x91   : > { %v649_v61 = vld [vmem:[%s4717_s14 + $0x5e8] sm:$0xf]  ;;  %v651_v62 = vld [vmem:[%s4717_s14 + $0x5f0] sm:$0xf]  ;;  %648 = vst [vmem:[%s4724_s15 + $0x2f0] sm:$0xf] %v647_v60 }
  0x92   : > { %650 = vst [vmem:[%s4724_s15 + $0x2f4] sm:$0xf] %v649_v61  ;;  %652 = vst [vmem:[%s4724_s15 + $0x2f8] sm:$0xf] %v651_v62  ;;  %v653_v63 = vld [vmem:[%s4717_s14 + $0x5f8] sm:$0xf] }
  0x93   : > { %v655_v0 = vld [vmem:[%s4717_s14 + $0x600] sm:$0xf]  ;;  %v657_v1 = vld [vmem:[%s4717_s14 + $0x608] sm:$0xf]  ;;  %654 = vst [vmem:[%s4724_s15 + $0x2fc] sm:$0xf] %v653_v63 }
  0x94   : > { %656 = vst [vmem:[%s4724_s15 + $0x300] sm:$0xf] %v655_v0  ;;  %658 = vst [vmem:[%s4724_s15 + $0x304] sm:$0xf] %v657_v1  ;;  %v659_v2 = vld [vmem:[%s4717_s14 + $0x610] sm:$0xf] }
  0x95   : > { %v661_v3 = vld [vmem:[%s4717_s14 + $0x618] sm:$0xf]  ;;  %v663_v4 = vld [vmem:[%s4717_s14 + $0x620] sm:$0xf]  ;;  %660 = vst [vmem:[%s4724_s15 + $0x308] sm:$0xf] %v659_v2 }
  0x96   : > { %662 = vst [vmem:[%s4724_s15 + $0x30c] sm:$0xf] %v661_v3  ;;  %664 = vst [vmem:[%s4724_s15 + $0x310] sm:$0xf] %v663_v4  ;;  %v665_v5 = vld [vmem:[%s4717_s14 + $0x628] sm:$0xf] }
  0x97   : > { %v667_v6 = vld [vmem:[%s4717_s14 + $0x630] sm:$0xf]  ;;  %v669_v7 = vld [vmem:[%s4717_s14 + $0x638] sm:$0xf]  ;;  %666 = vst [vmem:[%s4724_s15 + $0x314] sm:$0xf] %v665_v5 }
  0x98   : > { %668 = vst [vmem:[%s4724_s15 + $0x318] sm:$0xf] %v667_v6  ;;  %670 = vst [vmem:[%s4724_s15 + $0x31c] sm:$0xf] %v669_v7  ;;  %v671_v8 = vld [vmem:[%s4717_s14 + $0x640] sm:$0xf] }
  0x99   : > { %v673_v9 = vld [vmem:[%s4717_s14 + $0x648] sm:$0xf]  ;;  %v675_v10 = vld [vmem:[%s4717_s14 + $0x650] sm:$0xf]  ;;  %672 = vst [vmem:[%s4724_s15 + $0x320] sm:$0xf] %v671_v8 }
  0x9a   : > { %674 = vst [vmem:[%s4724_s15 + $0x324] sm:$0xf] %v673_v9  ;;  %676 = vst [vmem:[%s4724_s15 + $0x328] sm:$0xf] %v675_v10  ;;  %v677_v11 = vld [vmem:[%s4717_s14 + $0x658] sm:$0xf] }
  0x9b   : > { %v679_v12 = vld [vmem:[%s4717_s14 + $0x660] sm:$0xf]  ;;  %v681_v13 = vld [vmem:[%s4717_s14 + $0x668] sm:$0xf]  ;;  %678 = vst [vmem:[%s4724_s15 + $0x32c] sm:$0xf] %v677_v11 }
  0x9c   : > { %680 = vst [vmem:[%s4724_s15 + $0x330] sm:$0xf] %v679_v12  ;;  %682 = vst [vmem:[%s4724_s15 + $0x334] sm:$0xf] %v681_v13  ;;  %v683_v14 = vld [vmem:[%s4717_s14 + $0x670] sm:$0xf] }
  0x9d   : > { %v685_v15 = vld [vmem:[%s4717_s14 + $0x678] sm:$0xf]  ;;  %v687_v16 = vld [vmem:[%s4717_s14 + $0x680] sm:$0xf]  ;;  %684 = vst [vmem:[%s4724_s15 + $0x338] sm:$0xf] %v683_v14 }
  0x9e   : > { %686 = vst [vmem:[%s4724_s15 + $0x33c] sm:$0xf] %v685_v15  ;;  %688 = vst [vmem:[%s4724_s15 + $0x340] sm:$0xf] %v687_v16  ;;  %v689_v17 = vld [vmem:[%s4717_s14 + $0x688] sm:$0xf] }
  0x9f   : > { %v691_v18 = vld [vmem:[%s4717_s14 + $0x690] sm:$0xf]  ;;  %v693_v19 = vld [vmem:[%s4717_s14 + $0x698] sm:$0xf]  ;;  %690 = vst [vmem:[%s4724_s15 + $0x344] sm:$0xf] %v689_v17 }
  0xa0   : > { %692 = vst [vmem:[%s4724_s15 + $0x348] sm:$0xf] %v691_v18  ;;  %694 = vst [vmem:[%s4724_s15 + $0x34c] sm:$0xf] %v693_v19  ;;  %v695_v20 = vld [vmem:[%s4717_s14 + $0x6a0] sm:$0xf] }
  0xa1   : > { %v697_v21 = vld [vmem:[%s4717_s14 + $0x6a8] sm:$0xf]  ;;  %v699_v22 = vld [vmem:[%s4717_s14 + $0x6b0] sm:$0xf]  ;;  %696 = vst [vmem:[%s4724_s15 + $0x350] sm:$0xf] %v695_v20 }
  0xa2   : > { %698 = vst [vmem:[%s4724_s15 + $0x354] sm:$0xf] %v697_v21  ;;  %700 = vst [vmem:[%s4724_s15 + $0x358] sm:$0xf] %v699_v22  ;;  %v701_v23 = vld [vmem:[%s4717_s14 + $0x6b8] sm:$0xf] }
  0xa3   : > { %v703_v24 = vld [vmem:[%s4717_s14 + $0x6c0] sm:$0xf]  ;;  %v705_v25 = vld [vmem:[%s4717_s14 + $0x6c8] sm:$0xf]  ;;  %702 = vst [vmem:[%s4724_s15 + $0x35c] sm:$0xf] %v701_v23 }
  0xa4   : > { %704 = vst [vmem:[%s4724_s15 + $0x360] sm:$0xf] %v703_v24  ;;  %706 = vst [vmem:[%s4724_s15 + $0x364] sm:$0xf] %v705_v25  ;;  %v707_v26 = vld [vmem:[%s4717_s14 + $0x6d0] sm:$0xf] }
  0xa5   : > { %v709_v27 = vld [vmem:[%s4717_s14 + $0x6d8] sm:$0xf]  ;;  %v711_v28 = vld [vmem:[%s4717_s14 + $0x6e0] sm:$0xf]  ;;  %708 = vst [vmem:[%s4724_s15 + $0x368] sm:$0xf] %v707_v26 }
  0xa6   : > { %710 = vst [vmem:[%s4724_s15 + $0x36c] sm:$0xf] %v709_v27  ;;  %712 = vst [vmem:[%s4724_s15 + $0x370] sm:$0xf] %v711_v28  ;;  %v713_v29 = vld [vmem:[%s4717_s14 + $0x6e8] sm:$0xf] }
  0xa7   : > { %v715_v30 = vld [vmem:[%s4717_s14 + $0x6f0] sm:$0xf]  ;;  %v717_v31 = vld [vmem:[%s4717_s14 + $0x6f8] sm:$0xf]  ;;  %714 = vst [vmem:[%s4724_s15 + $0x374] sm:$0xf] %v713_v29 }
  0xa8   : > { %716 = vst [vmem:[%s4724_s15 + $0x378] sm:$0xf] %v715_v30  ;;  %718 = vst [vmem:[%s4724_s15 + $0x37c] sm:$0xf] %v717_v31  ;;  %v719_v32 = vld [vmem:[%s4717_s14 + $0x700] sm:$0xf] }
  0xa9   : > { %v721_v33 = vld [vmem:[%s4717_s14 + $0x708] sm:$0xf]  ;;  %v723_v34 = vld [vmem:[%s4717_s14 + $0x710] sm:$0xf]  ;;  %720 = vst [vmem:[%s4724_s15 + $0x380] sm:$0xf] %v719_v32 }
  0xaa   : > { %722 = vst [vmem:[%s4724_s15 + $0x384] sm:$0xf] %v721_v33  ;;  %724 = vst [vmem:[%s4724_s15 + $0x388] sm:$0xf] %v723_v34  ;;  %v725_v35 = vld [vmem:[%s4717_s14 + $0x718] sm:$0xf] }
  0xab   : > { %v727_v36 = vld [vmem:[%s4717_s14 + $0x720] sm:$0xf]  ;;  %v729_v37 = vld [vmem:[%s4717_s14 + $0x728] sm:$0xf]  ;;  %726 = vst [vmem:[%s4724_s15 + $0x38c] sm:$0xf] %v725_v35 }
  0xac   : > { %728 = vst [vmem:[%s4724_s15 + $0x390] sm:$0xf] %v727_v36  ;;  %730 = vst [vmem:[%s4724_s15 + $0x394] sm:$0xf] %v729_v37  ;;  %v731_v38 = vld [vmem:[%s4717_s14 + $0x730] sm:$0xf] }
  0xad   : > { %v733_v39 = vld [vmem:[%s4717_s14 + $0x738] sm:$0xf]  ;;  %v735_v40 = vld [vmem:[%s4717_s14 + $0x740] sm:$0xf]  ;;  %732 = vst [vmem:[%s4724_s15 + $0x398] sm:$0xf] %v731_v38 }
  0xae   : > { %734 = vst [vmem:[%s4724_s15 + $0x39c] sm:$0xf] %v733_v39  ;;  %736 = vst [vmem:[%s4724_s15 + $0x3a0] sm:$0xf] %v735_v40  ;;  %v737_v41 = vld [vmem:[%s4717_s14 + $0x748] sm:$0xf] }
  0xaf   : > { %v739_v42 = vld [vmem:[%s4717_s14 + $0x750] sm:$0xf]  ;;  %v741_v43 = vld [vmem:[%s4717_s14 + $0x758] sm:$0xf]  ;;  %738 = vst [vmem:[%s4724_s15 + $0x3a4] sm:$0xf] %v737_v41 }
  0xb0   : > { %740 = vst [vmem:[%s4724_s15 + $0x3a8] sm:$0xf] %v739_v42  ;;  %742 = vst [vmem:[%s4724_s15 + $0x3ac] sm:$0xf] %v741_v43  ;;  %v743_v44 = vld [vmem:[%s4717_s14 + $0x760] sm:$0xf] }
  0xb1   : > { %v745_v45 = vld [vmem:[%s4717_s14 + $0x768] sm:$0xf]  ;;  %v747_v46 = vld [vmem:[%s4717_s14 + $0x770] sm:$0xf]  ;;  %744 = vst [vmem:[%s4724_s15 + $0x3b0] sm:$0xf] %v743_v44 }
  0xb2   : > { %746 = vst [vmem:[%s4724_s15 + $0x3b4] sm:$0xf] %v745_v45  ;;  %748 = vst [vmem:[%s4724_s15 + $0x3b8] sm:$0xf] %v747_v46  ;;  %v749_v47 = vld [vmem:[%s4717_s14 + $0x778] sm:$0xf] }
  0xb3   : > { %v751_v48 = vld [vmem:[%s4717_s14 + $0x780] sm:$0xf]  ;;  %v753_v49 = vld [vmem:[%s4717_s14 + $0x788] sm:$0xf]  ;;  %750 = vst [vmem:[%s4724_s15 + $0x3bc] sm:$0xf] %v749_v47 }
  0xb4   : > { %752 = vst [vmem:[%s4724_s15 + $0x3c0] sm:$0xf] %v751_v48  ;;  %754 = vst [vmem:[%s4724_s15 + $0x3c4] sm:$0xf] %v753_v49  ;;  %v755_v50 = vld [vmem:[%s4717_s14 + $0x790] sm:$0xf] }
  0xb5   : > { %v757_v51 = vld [vmem:[%s4717_s14 + $0x798] sm:$0xf]  ;;  %v759_v52 = vld [vmem:[%s4717_s14 + $0x7a0] sm:$0xf]  ;;  %756 = vst [vmem:[%s4724_s15 + $0x3c8] sm:$0xf] %v755_v50 }
  0xb6   : > { %758 = vst [vmem:[%s4724_s15 + $0x3cc] sm:$0xf] %v757_v51  ;;  %760 = vst [vmem:[%s4724_s15 + $0x3d0] sm:$0xf] %v759_v52  ;;  %v761_v53 = vld [vmem:[%s4717_s14 + $0x7a8] sm:$0xf] }
  0xb7   : > { %v763_v54 = vld [vmem:[%s4717_s14 + $0x7b0] sm:$0xf]  ;;  %v765_v55 = vld [vmem:[%s4717_s14 + $0x7b8] sm:$0xf]  ;;  %762 = vst [vmem:[%s4724_s15 + $0x3d4] sm:$0xf] %v761_v53 }
  0xb8   : > { %764 = vst [vmem:[%s4724_s15 + $0x3d8] sm:$0xf] %v763_v54  ;;  %766 = vst [vmem:[%s4724_s15 + $0x3dc] sm:$0xf] %v765_v55  ;;  %v767_v56 = vld [vmem:[%s4717_s14 + $0x7c0] sm:$0xf] }
  0xb9   : > { %v769_v57 = vld [vmem:[%s4717_s14 + $0x7c8] sm:$0xf]  ;;  %v771_v58 = vld [vmem:[%s4717_s14 + $0x7d0] sm:$0xf]  ;;  %768 = vst [vmem:[%s4724_s15 + $0x3e0] sm:$0xf] %v767_v56 }
  0xba   : > { %770 = vst [vmem:[%s4724_s15 + $0x3e4] sm:$0xf] %v769_v57  ;;  %772 = vst [vmem:[%s4724_s15 + $0x3e8] sm:$0xf] %v771_v58  ;;  %v773_v59 = vld [vmem:[%s4717_s14 + $0x7d8] sm:$0xf] }
  0xbb   : > { %v775_v60 = vld [vmem:[%s4717_s14 + $0x7e0] sm:$0xf]  ;;  %v777_v61 = vld [vmem:[%s4717_s14 + $0x7e8] sm:$0xf]  ;;  %774 = vst [vmem:[%s4724_s15 + $0x3ec] sm:$0xf] %v773_v59 }
  0xbc   : > { %776 = vst [vmem:[%s4724_s15 + $0x3f0] sm:$0xf] %v775_v60  ;;  %778 = vst [vmem:[%s4724_s15 + $0x3f4] sm:$0xf] %v777_v61  ;;  %v779_v62 = vld [vmem:[%s4717_s14 + $0x7f0] sm:$0xf] }
  0xbd   : > { %v781_v63 = vld [vmem:[%s4717_s14 + $0x7f8] sm:$0xf]  ;;  %v783_v0 = vld [vmem:[%s4717_s14 + $0x800] sm:$0xf]  ;;  %780 = vst [vmem:[%s4724_s15 + $0x3f8] sm:$0xf] %v779_v62 }
  0xbe   : > { %782 = vst [vmem:[%s4724_s15 + $0x3fc] sm:$0xf] %v781_v63  ;;  %784 = vst [vmem:[%s4724_s15 + $0x400] sm:$0xf] %v783_v0  ;;  %v785_v1 = vld [vmem:[%s4717_s14 + $0x808] sm:$0xf] }
  0xbf   : > { %v787_v2 = vld [vmem:[%s4717_s14 + $0x810] sm:$0xf]  ;;  %v789_v3 = vld [vmem:[%s4717_s14 + $0x818] sm:$0xf]  ;;  %786 = vst [vmem:[%s4724_s15 + $0x404] sm:$0xf] %v785_v1 }
  0xc0   : > { %788 = vst [vmem:[%s4724_s15 + $0x408] sm:$0xf] %v787_v2  ;;  %790 = vst [vmem:[%s4724_s15 + $0x40c] sm:$0xf] %v789_v3  ;;  %v791_v4 = vld [vmem:[%s4717_s14 + $0x820] sm:$0xf] }
  0xc1   : > { %v793_v5 = vld [vmem:[%s4717_s14 + $0x828] sm:$0xf]  ;;  %v795_v6 = vld [vmem:[%s4717_s14 + $0x830] sm:$0xf]  ;;  %792 = vst [vmem:[%s4724_s15 + $0x410] sm:$0xf] %v791_v4 }
  0xc2   : > { %794 = vst [vmem:[%s4724_s15 + $0x414] sm:$0xf] %v793_v5  ;;  %796 = vst [vmem:[%s4724_s15 + $0x418] sm:$0xf] %v795_v6  ;;  %v797_v7 = vld [vmem:[%s4717_s14 + $0x838] sm:$0xf] }
  0xc3   : > { %v799_v8 = vld [vmem:[%s4717_s14 + $0x840] sm:$0xf]  ;;  %v801_v9 = vld [vmem:[%s4717_s14 + $0x848] sm:$0xf]  ;;  %798 = vst [vmem:[%s4724_s15 + $0x41c] sm:$0xf] %v797_v7 }
  0xc4   : > { %800 = vst [vmem:[%s4724_s15 + $0x420] sm:$0xf] %v799_v8  ;;  %802 = vst [vmem:[%s4724_s15 + $0x424] sm:$0xf] %v801_v9  ;;  %v803_v10 = vld [vmem:[%s4717_s14 + $0x850] sm:$0xf] }
  0xc5   : > { %v805_v11 = vld [vmem:[%s4717_s14 + $0x858] sm:$0xf]  ;;  %v807_v12 = vld [vmem:[%s4717_s14 + $0x860] sm:$0xf]  ;;  %804 = vst [vmem:[%s4724_s15 + $0x428] sm:$0xf] %v803_v10 }
  0xc6   : > { %806 = vst [vmem:[%s4724_s15 + $0x42c] sm:$0xf] %v805_v11  ;;  %808 = vst [vmem:[%s4724_s15 + $0x430] sm:$0xf] %v807_v12  ;;  %v809_v13 = vld [vmem:[%s4717_s14 + $0x868] sm:$0xf] }
  0xc7   : > { %v811_v14 = vld [vmem:[%s4717_s14 + $0x870] sm:$0xf]  ;;  %v813_v15 = vld [vmem:[%s4717_s14 + $0x878] sm:$0xf]  ;;  %810 = vst [vmem:[%s4724_s15 + $0x434] sm:$0xf] %v809_v13 }
  0xc8   : > { %812 = vst [vmem:[%s4724_s15 + $0x438] sm:$0xf] %v811_v14  ;;  %814 = vst [vmem:[%s4724_s15 + $0x43c] sm:$0xf] %v813_v15  ;;  %v815_v16 = vld [vmem:[%s4717_s14 + $0x880] sm:$0xf] }
  0xc9   : > { %v817_v17 = vld [vmem:[%s4717_s14 + $0x888] sm:$0xf]  ;;  %v819_v18 = vld [vmem:[%s4717_s14 + $0x890] sm:$0xf]  ;;  %816 = vst [vmem:[%s4724_s15 + $0x440] sm:$0xf] %v815_v16 }
  0xca   : > { %818 = vst [vmem:[%s4724_s15 + $0x444] sm:$0xf] %v817_v17  ;;  %820 = vst [vmem:[%s4724_s15 + $0x448] sm:$0xf] %v819_v18  ;;  %v821_v19 = vld [vmem:[%s4717_s14 + $0x898] sm:$0xf] }
  0xcb   : > { %v823_v20 = vld [vmem:[%s4717_s14 + $0x8a0] sm:$0xf]  ;;  %v825_v21 = vld [vmem:[%s4717_s14 + $0x8a8] sm:$0xf]  ;;  %822 = vst [vmem:[%s4724_s15 + $0x44c] sm:$0xf] %v821_v19 }
  0xcc   : > { %824 = vst [vmem:[%s4724_s15 + $0x450] sm:$0xf] %v823_v20  ;;  %826 = vst [vmem:[%s4724_s15 + $0x454] sm:$0xf] %v825_v21  ;;  %v827_v22 = vld [vmem:[%s4717_s14 + $0x8b0] sm:$0xf] }
  0xcd   : > { %v829_v23 = vld [vmem:[%s4717_s14 + $0x8b8] sm:$0xf]  ;;  %v831_v24 = vld [vmem:[%s4717_s14 + $0x8c0] sm:$0xf]  ;;  %828 = vst [vmem:[%s4724_s15 + $0x458] sm:$0xf] %v827_v22 }
  0xce   : > { %830 = vst [vmem:[%s4724_s15 + $0x45c] sm:$0xf] %v829_v23  ;;  %832 = vst [vmem:[%s4724_s15 + $0x460] sm:$0xf] %v831_v24  ;;  %v833_v25 = vld [vmem:[%s4717_s14 + $0x8c8] sm:$0xf] }
  0xcf   : > { %v835_v26 = vld [vmem:[%s4717_s14 + $0x8d0] sm:$0xf]  ;;  %v837_v27 = vld [vmem:[%s4717_s14 + $0x8d8] sm:$0xf]  ;;  %834 = vst [vmem:[%s4724_s15 + $0x464] sm:$0xf] %v833_v25 }
  0xd0   : > { %836 = vst [vmem:[%s4724_s15 + $0x468] sm:$0xf] %v835_v26  ;;  %838 = vst [vmem:[%s4724_s15 + $0x46c] sm:$0xf] %v837_v27  ;;  %v839_v28 = vld [vmem:[%s4717_s14 + $0x8e0] sm:$0xf] }
  0xd1   : > { %v841_v29 = vld [vmem:[%s4717_s14 + $0x8e8] sm:$0xf]  ;;  %v843_v30 = vld [vmem:[%s4717_s14 + $0x8f0] sm:$0xf]  ;;  %840 = vst [vmem:[%s4724_s15 + $0x470] sm:$0xf] %v839_v28 }
  0xd2   : > { %842 = vst [vmem:[%s4724_s15 + $0x474] sm:$0xf] %v841_v29  ;;  %844 = vst [vmem:[%s4724_s15 + $0x478] sm:$0xf] %v843_v30  ;;  %v845_v31 = vld [vmem:[%s4717_s14 + $0x8f8] sm:$0xf] }
  0xd3   : > { %846 = vst [vmem:[%s4724_s15 + $0x47c] sm:$0xf] %v845_v31 }
  0xd4 PF: > { %1452 = sbr.rel (!%p4695_p3) target bundleno = 226 (0xe2), region = 73  ;;  %s1454_s16 = sand.u32 (%p4695_p3), 1, %s4614_s22  }
  0xd5   : > { %s3837_s17 = sshll.u32 (%p4695_p3), %s4622_s24, 2  ;;  %s3836_s18 = sshll.u32 (%p4695_p3), %s1454_s16, 6 }
  0xd6   : > { %s5304_s27 = scalar_lea.vmem (%p4695_p3), %s5688_s4, %s3837_s17  ;;  %s1456_s28 = scalar_lea.vmem (%p4695_p3), [#allocation3], %s3836_s18 }
  0xd7   : > { %v1475_v32 = vld [vmem:[%s5304_s27] sm:$0xf] (%p4695_p3)  ;;  %v1477_v33 = vld [vmem:[%s5304_s27 + $0x8] sm:$0xf] (%p4695_p3)  ;;  %v1479_v34 = vld [vmem:[%s5304_s27 + $0x10] sm:$0xf] (%p4695_p3) }
  0xd8   : > { %1476 = vst [vmem:[%s1456_s28] sm:$0xf] (%p4695_p3), %v1475_v32  ;;  %1478 = vst [vmem:[%s1456_s28 + $0x4] sm:$0xf] (%p4695_p3), %v1477_v33  ;;  %v1481_v35 = vld [vmem:[%s5304_s27 + $0x18] sm:$0xf] (%p4695_p3) }
  0xd9   : > { %v1483_v36 = vld [vmem:[%s5304_s27 + $0x20] sm:$0xf]  ;;  %1480 = vst [vmem:[%s1456_s28 + $0x8] sm:$0xf] %v1479_v34  ;;  %1482 = vst [vmem:[%s1456_s28 + $0xc] sm:$0xf] %v1481_v35 }
  0xda   : > { %1484 = vst [vmem:[%s1456_s28 + $0x10] sm:$0xf] %v1483_v36  ;;  %v1485_v37 = vld [vmem:[%s5304_s27 + $0x28] sm:$0xf]  ;;  %v1487_v38 = vld [vmem:[%s5304_s27 + $0x30] sm:$0xf] }
  0xdb   : > { %v1489_v39 = vld [vmem:[%s5304_s27 + $0x38] sm:$0xf]  ;;  %1486 = vst [vmem:[%s1456_s28 + $0x14] sm:$0xf] %v1485_v37  ;;  %1488 = vst [vmem:[%s1456_s28 + $0x18] sm:$0xf] %v1487_v38 }
  0xdc   : > { %1490 = vst [vmem:[%s1456_s28 + $0x1c] sm:$0xf] %v1489_v39  ;;  %v1491_v40 = vld [vmem:[%s5304_s27 + $0x40] sm:$0xf]  ;;  %v1493_v41 = vld [vmem:[%s5304_s27 + $0x48] sm:$0xf] }
  0xdd   : > { %v1495_v42 = vld [vmem:[%s5304_s27 + $0x50] sm:$0xf]  ;;  %1492 = vst [vmem:[%s1456_s28 + $0x20] sm:$0xf] %v1491_v40  ;;  %1494 = vst [vmem:[%s1456_s28 + $0x24] sm:$0xf] %v1493_v41 }
  0xde   : > { %1496 = vst [vmem:[%s1456_s28 + $0x28] sm:$0xf] %v1495_v42  ;;  %v1497_v43 = vld [vmem:[%s5304_s27 + $0x58] sm:$0xf]  ;;  %v1499_v44 = vld [vmem:[%s5304_s27 + $0x60] sm:$0xf] }
  0xdf   : > { %v1501_v45 = vld [vmem:[%s5304_s27 + $0x68] sm:$0xf]  ;;  %1498 = vst [vmem:[%s1456_s28 + $0x2c] sm:$0xf] %v1497_v43  ;;  %1500 = vst [vmem:[%s1456_s28 + $0x30] sm:$0xf] %v1499_v44 }
  0xe0   : > { %1502 = vst [vmem:[%s1456_s28 + $0x34] sm:$0xf] %v1501_v45  ;;  %v1503_v46 = vld [vmem:[%s5304_s27 + $0x70] sm:$0xf]  ;;  %v1505_v47 = vld [vmem:[%s5304_s27 + $0x78] sm:$0xf] }
  0xe1   : > { %1504 = vst [vmem:[%s1456_s28 + $0x38] sm:$0xf] %v1503_v46  ;;  %1506 = vst [vmem:[%s1456_s28 + $0x3c] sm:$0xf] %v1505_v47 }
  0xe2 PF: > { %p3838_p8 = scmp.ge.s32.totalorder %s4626_s25, 1  ;;  %p1567_p9 = scmp.lt.s32.totalorder %s4626_s25, 3 }
  0xe4   : > { %p1568_p10 = pnand %p3838_p8, %p1567_p9 }
  0xe6   : > { %1571 = sbr.rel (%p1568_p10) target bundleno = 626 (0x272), region = 118 }
  0xeb   : > { %s5325_s29 = sand.u32 1, %s4610_s21   ;;  %v4413_v48 = vld [vmem:[%s5684_s0 + $0x4] ss:$72 sps:$4 sm:$0xff]   ;;  %v4411_v15 = vld [vmem:[%s5684_s0] ss:$72 sps:$4 sm:$0xff]   ;;  %p1637_p11 = scmp.lt.s32.totalorder %s4618_s23, 1 }
  0xec   : > { %s4339_s30 = smul.u32 1152, %s5325_s29  ;;  %v4418_v49 = vld [vmem:[%s5684_s0 + $0xc] ss:$72 sps:$4 sm:$0xff]   ;;  %3058 = vmatprep.mubr.bf16.mxu0 %v4413_v48  ;;  %v4416_v19 = vld [vmem:[%s5684_s0 + $0x8] ss:$72 sps:$4 sm:$0xff]   ;;  %s3839_s14 = sshll.u32 %s5325_s29, 6 }
  0xed   : > { %3107 = vmatprep.mubr.bf16.mxu1 %v4418_v49  ;;  %v4436_v17 = vld [vmem:[%s5684_s0 + $0x94] ss:$72 sps:$4 sm:$0xff]   ;;  %v4439_v26 = vld [vmem:[%s5684_s0 + $0x90] ss:$72 sps:$4 sm:$0xff]   ;;  %s5545_s27 = scalar_lea.vmem [#allocation3], %s3839_s14  ;;  %s3840_s18 = sshll.u32 %s5325_s29, 4 }
  0xee   : > { %s5334_s13 = scalar_lea.vmem [#allocation2], %s4339_s30  ;;  %v4441_v42 = vld [vmem:[%s5684_s0 + $0x9c] ss:$72 sps:$4 sm:$0xff]   ;;  %v4444_v44 = vld [vmem:[%s5684_s0 + $0x98] ss:$72 sps:$4 sm:$0xff]   ;;  %s1629_s19 = scalar_lea.vmem [#allocation4], %s3840_s18 }
  0xef   : > { %v4380_v50 = vld [vmem:[%s5334_s13 + $0x78] sm:$0xff]   ;;  %v4384_v54 = vld [vmem:[%s5334_s13 + $0x70] sm:$0xff]   ;;  %v4388_v58 = vld [vmem:[%s5334_s13 + $0x68] sm:$0xff]   ;;  %s5635_s11 = scalar_select %p1637_p11, %s4618_s23, 1 }
  0xf0   : > { %v4381_v51 = vld [vmem:[%s5334_s13 + $0x38] sm:$0xff]   ;;  %4056 = vmatprep.subr.bf16.mxu0 %v4380_v50  ;;  %v4385_v55 = vld [vmem:[%s5334_s13 + $0x30] sm:$0xff]   ;;  %v4389_v59 = vld [vmem:[%s5334_s13 + $0x28] sm:$0xff]   ;;  %s4038_s29 = sshll.u32 (%p4702_p6), %s4618_s23, 2 }
  0xf1   : > { %v4382_v52 = vld [vmem:[%s5334_s13 + $0xf8] sm:$0xff]   ;;  %4057 = vmatpush3.bf16.msra.mxu0 %v4381_v51  ;;  %v4386_v56 = vld [vmem:[%s5334_s13 + $0xf0] sm:$0xff]   ;;  %v4390_v60 = vld [vmem:[%s5334_s13 + $0xe8] sm:$0xff]   ;;  %s1639_s14 = scalar_lea.vmem %s5686_s2, %s5635_s11  ;;  %s1648_s17 = scalar_lea.vmem %s5689_s5, %s5635_s11 }
  0xf2   : > { %v4383_v53 = vld [vmem:[%s5334_s13 + $0xb8] sm:$0xff]   ;;  %4084 = vmatprep.subr.bf16.mxu1 %v4382_v52  ;;  %4058 = vmatprep.subr.bf16.mxu0 %v4384_v54  ;;  %v4387_v57 = vld [vmem:[%s5334_s13 + $0xb0] sm:$0xff]   ;;  %v4391_v61 = vld [vmem:[%s5334_s13 + $0xa8] sm:$0xff]  }
  0xf3   : > { %4085 = vmatpush3.bf16.msra.mxu1 %v4383_v53  ;;  %v4392_v62 = vld [vmem:[%s5334_s13 + $0x60] sm:$0xff]   ;;  %v4396_v2 = vld [vmem:[%s5334_s13 + $0x58] sm:$0xff]   ;;  %v4400_v6 = vld [vmem:[%s5334_s13 + $0x50] sm:$0xff]  }
  0xf4   : > { %4086 = vmatprep.subr.bf16.mxu1 %v4386_v56  ;;  %v4393_v63 = vld [vmem:[%s5334_s13 + $0x20] sm:$0xff]   ;;  %v4397_v3 = vld [vmem:[%s5334_s13 + $0x18] sm:$0xff]   ;;  %v4401_v7 = vld [vmem:[%s5334_s13 + $0x10] sm:$0xff]  }
  0xf5   : > { %4059 = vmatpush3.bf16.msra.mxu0 %v4385_v55  ;;  %v4394_v0 = vld [vmem:[%s5334_s13 + $0xe0] sm:$0xff]   ;;  %v4398_v4 = vld [vmem:[%s5334_s13 + $0xd8] sm:$0xff]   ;;  %v4402_v8 = vld [vmem:[%s5334_s13 + $0xd0] sm:$0xff]  }
  0xf6   : > { %4060 = vmatprep.subr.bf16.mxu0 %v4388_v58  ;;  %v4395_v1 = vld [vmem:[%s5334_s13 + $0xa0] sm:$0xff]   ;;  %v4399_v5 = vld [vmem:[%s5334_s13 + $0x98] sm:$0xff]   ;;  %v4403_v9 = vld [vmem:[%s5334_s13 + $0x90] sm:$0xff]  }
  0xf7   : > { %4087 = vmatpush3.bf16.msra.mxu1 %v4387_v57  ;;  %v4404_v10 = vld [vmem:[%s5334_s13 + $0x48] sm:$0xff]   ;;  %v4408_v14 = vld [vmem:[%s5334_s13 + $0x40] sm:$0xff]   ;;  %v4415_v21 = vld [vmem:[%s5334_s13 + $0x178] sm:$0xff]  }
  0xf8   : > { %4088 = vmatprep.subr.bf16.mxu1 %v4390_v60  ;;  %v4405_v11 = vld [vmem:[%s5334_s13 + $0x8] sm:$0xff]   ;;  %v4409_v16 = vld [vmem:[%s5334_s13] sm:$0xff]   ;;  %v4419_v22 = vld [vmem:[%s5334_s13 + $0x138] sm:$0xff]  }
  0xf9   : > { %4061 = vmatpush3.bf16.msra.mxu0 %v4389_v59  ;;  %v4406_v12 = vld [vmem:[%s5334_s13 + $0xc8] sm:$0xff]   ;;  %v4410_v18 = vld [vmem:[%s5334_s13 + $0xc0] sm:$0xff]   ;;  %v4420_v23 = vld [vmem:[%s5334_s13 + $0x1f8] sm:$0xff]  }
  0xfa   : > { %4062 = vmatprep.subr.bf16.mxu0 %v4392_v62  ;;  %v4407_v13 = vld [vmem:[%s5334_s13 + $0x88] sm:$0xff]   ;;  %v4414_v20 = vld [vmem:[%s5334_s13 + $0x80] sm:$0xff]   ;;  %v4421_v24 = vld [vmem:[%s5334_s13 + $0x1b8] sm:$0xff]  }
  0xfb   : > { %4089 = vmatpush3.bf16.msra.mxu1 %v4391_v61  ;;  %v4422_v25 = vld [vmem:[%s5334_s13 + $0x170] sm:$0xff]   ;;  %v4426_v30 = vld [vmem:[%s5334_s13 + $0x168] sm:$0xff]   ;;  %v4430_v34 = vld [vmem:[%s5334_s13 + $0x160] sm:$0xff]  }
  0xfc   : > { %4090 = vmatprep.subr.bf16.mxu1 %v4394_v0  ;;  %v4423_v27 = vld [vmem:[%s5334_s13 + $0x130] sm:$0xff]   ;;  %v4427_v31 = vld [vmem:[%s5334_s13 + $0x128] sm:$0xff]   ;;  %v4431_v35 = vld [vmem:[%s5334_s13 + $0x120] sm:$0xff]  }
  0xfd   : > { %4063 = vmatpush3.bf16.msra.mxu0 %v4393_v63  ;;  %v4424_v28 = vld [vmem:[%s5334_s13 + $0x1f0] sm:$0xff]   ;;  %v4428_v32 = vld [vmem:[%s5334_s13 + $0x1e8] sm:$0xff]   ;;  %v4432_v36 = vld [vmem:[%s5334_s13 + $0x1e0] sm:$0xff]  }
  0xfe   : > { %4064 = vmatprep.subr.bf16.mxu0 %v4396_v2  ;;  %v4425_v29 = vld [vmem:[%s5334_s13 + $0x1b0] sm:$0xff]   ;;  %v4429_v33 = vld [vmem:[%s5334_s13 + $0x1a8] sm:$0xff]   ;;  %v4433_v37 = vld [vmem:[%s5334_s13 + $0x1a0] sm:$0xff]  }
  0xff   : > { %4091 = vmatpush3.bf16.msra.mxu1 %v4395_v1  ;;  %v4434_v38 = vld [vmem:[%s5334_s13 + $0x158] sm:$0xff]   ;;  %v4443_v43 = vld [vmem:[%s5334_s13 + $0x150] sm:$0xff]   ;;  %v4448_v48 = vld [vmem:[%s5334_s13 + $0x148] sm:$0xff]  }
 0x100   : > { %4092 = vmatprep.subr.bf16.mxu1 %v4398_v4  ;;  %v4435_v39 = vld [vmem:[%s5334_s13 + $0x118] sm:$0xff]   ;;  %v4445_v45 = vld [vmem:[%s5334_s13 + $0x110] sm:$0xff]   ;;  %v4449_v49 = vld [vmem:[%s5334_s13 + $0x108] sm:$0xff]  }
 0x101   : > { %4065 = vmatpush3.bf16.msra.mxu0 %v4397_v3  ;;  %v4438_v40 = vld [vmem:[%s5334_s13 + $0x1d8] sm:$0xff]   ;;  %v4446_v46 = vld [vmem:[%s5334_s13 + $0x1d0] sm:$0xff]   ;;  %v4450_v50 = vld [vmem:[%s5334_s13 + $0x1c8] sm:$0xff]  }
 0x102   : > { %4066 = vmatprep.subr.bf16.mxu0 %v4400_v6  ;;  %v4440_v41 = vld [vmem:[%s5334_s13 + $0x198] sm:$0xff]   ;;  %v4447_v47 = vld [vmem:[%s5334_s13 + $0x190] sm:$0xff]   ;;  %v4451_v51 = vld [vmem:[%s5334_s13 + $0x188] sm:$0xff]  }
 0x103   : > { %4093 = vmatpush3.bf16.msra.mxu1 %v4399_v5  ;;  %v4452_v52 = vld [vmem:[%s5334_s13 + $0x140] sm:$0xff]   ;;  %v4455_v55 = vld [vmem:[%s5684_s0 + $0x10] ss:$72 sps:$4 sm:$0xff]   ;;  %v4457_v56 = vld [vmem:[%s5684_s0 + $0x14] ss:$72 sps:$4 sm:$0xff]  }
 0x104   : > { %4094 = vmatprep.subr.bf16.mxu1 %v4402_v8  ;;  %v4453_v53 = vld [vmem:[%s5334_s13 + $0x100] sm:$0xff]   ;;  %v4459_v58 = vld [vmem:[%s5334_s13 + $0x278] sm:$0xff]   ;;  %v4466_v0 = vld [vmem:[%s5334_s13 + $0x270] sm:$0xff]  }
 0x105   : > { %4067 = vmatpush3.bf16.msra.mxu0 %v4401_v7  ;;  %v4454_v54 = vld [vmem:[%s5334_s13 + $0x1c0] sm:$0xff]   ;;  %v4463_v61 = vld [vmem:[%s5334_s13 + $0x238] sm:$0xff]   ;;  %v4467_v1 = vld [vmem:[%s5334_s13 + $0x230] sm:$0xff]  }
 0x106   : > { %4068 = vmatprep.subr.bf16.mxu0 %v4404_v10  ;;  %v4458_v57 = vld [vmem:[%s5334_s13 + $0x180] sm:$0xff]   ;;  %v4464_v62 = vld [vmem:[%s5334_s13 + $0x2f8] sm:$0xff]   ;;  %v4468_v2 = vld [vmem:[%s5334_s13 + $0x2f0] sm:$0xff]  }
 0x107   : > { %4095 = vmatpush3.bf16.msra.mxu1 %v4403_v9  ;;  %v4460_v59 = vld [vmem:[%s5684_s0 + $0x18] ss:$72 sps:$4 sm:$0xff]   ;;  %v4462_v60 = vld [vmem:[%s5684_s0 + $0x1c] ss:$72 sps:$4 sm:$0xff]   ;;  %v4471_v4 = vld [vmem:[%s5334_s13 + $0x2b0] sm:$0xff]  }
 0x108   : > { %4096 = vmatprep.subr.bf16.mxu1 %v4406_v12  ;;  %v4465_v63 = vld [vmem:[%s5334_s13 + $0x2b8] sm:$0xff]   ;;  %v4469_v3 = vld [vmem:[%s5684_s0 + $0xa4] ss:$72 sps:$4 sm:$0xff]   ;;  %v4472_v5 = vld [vmem:[%s5684_s0 + $0xa0] ss:$72 sps:$4 sm:$0xff]  }
 0x109   : > { %4069 = vmatpush3.bf16.msra.mxu0 %v4405_v11  ;;  %v4473_v6 = vld [vmem:[%s5334_s13 + $0x268] sm:$0xff]   ;;  %v4480_v12 = vld [vmem:[%s5334_s13 + $0x260] sm:$0xff]  }
 0x10a   : > { %4070 = vmatprep.subr.bf16.mxu0 %v4408_v14  ;;  %v4474_v7 = vld [vmem:[%s5684_s0 + $0xac] ss:$72 sps:$4 sm:$0xff]   ;;  %v4477_v9 = vld [vmem:[%s5684_s0 + $0xa8] ss:$72 sps:$4 sm:$0xff]   ;;  %v4482_v14 = vld [vmem:[%s5334_s13 + $0x2e0] sm:$0xff]  }
 0x10b   : > { %4097 = vmatpush3.bf16.msra.mxu1 %v4407_v13  ;;  %v4476_v8 = vld [vmem:[%s5334_s13 + $0x228] sm:$0xff]   ;;  %v4481_v13 = vld [vmem:[%s5334_s13 + $0x220] sm:$0xff]  }
 0x10c   : > { %4098 = vmatprep.subr.bf16.mxu1 %v4410_v18  ;;  %v4478_v10 = vld [vmem:[%s5334_s13 + $0x2e8] sm:$0xff]   ;;  %v4486_v18 = vld [vmem:[%s5334_s13 + $0x2d8] sm:$0xff]  }
 0x10d   : > { %4071 = vmatpush3.bf16.msra.mxu0 %v4409_v16  ;;  %v4479_v11 = vld [vmem:[%s5334_s13 + $0x2a8] sm:$0xff]   ;;  %v4484_v16 = vld [vmem:[%s5334_s13 + $0x258] sm:$0xff]  }
 0x10e   : > { %4112 = vmatprep.subr.bf16.mxu0 %v4415_v21  ;;  %v4489_v21 = vld [vmem:[%s5334_s13 + $0x210] sm:$0xff]  }
 0x10f   : > { %4099 = vmatpush3.bf16.msra.mxu1 %v4414_v20  ;;  %v4488_v20 = vld [vmem:[%s5334_s13 + $0x250] sm:$0xff]  }
 0x110   : > { %3059 = vmatmul.mubr.bf16.vlgmr.msra.gmra.mxu0 %v4411_v15  ;;  %4140 = vmatprep.subr.bf16.mxu1 %v4420_v23  ;;  %v4483_v15 = vld [vmem:[%s5334_s13 + $0x2a0] sm:$0xff]   ;;  %v4491_v23 = vld [vmem:[%s5334_s13 + $0x290] sm:$0xff]  }
 0x111   : > { %4113 = vmatpush3.bf16.msra.mxu0 %v4419_v22  ;;  %3066 = vmatprep.mubr.bf16.mxu0 %v4436_v17  ;;  %v4485_v17 = vld [vmem:[%s5334_s13 + $0x218] sm:$0xff]   ;;  %v4490_v22 = vld [vmem:[%s5334_s13 + $0x2d0] sm:$0xff]  }
 0x112   : > { %3108 = vmatmul.mubr.bf16.vlgmr.msra.gmra.mxu1 %v4416_v19  ;;  %4114 = vmatprep.subr.bf16.mxu0 %v4422_v25  ;;  %v4487_v19 = vld [vmem:[%s5334_s13 + $0x298] sm:$0xff]   ;;  %v4493_v25 = vld [vmem:[%s5334_s13 + $0x208] sm:$0xff]  }
 0x113   : > { %4141 = vmatpush3.bf16.msra.mxu1 %v4421_v24  ;;  %3115 = vmatprep.mubr.bf16.mxu1 %v4441_v42  ;;  %v4492_v24 = vld [vmem:[%s5334_s13 + $0x248] sm:$0xff]   ;;  %v4512_v42 = vld [vmem:[%s5334_s13 + $0x3f0] sm:$0xff]  }
 0x114   : > { %4142 = vmatprep.subr.bf16.mxu1 %v4424_v28  ;;  %v4496_v28 = vld [vmem:[%s5334_s13 + $0x240] sm:$0xff]  }
 0x115   : > { %4115 = vmatpush3.bf16.msra.mxu0 %v4423_v27  ;;  %v4495_v27 = vld [vmem:[%s5334_s13 + $0x288] sm:$0xff]  }
 0x116   : > { %4116 = vmatprep.subr.bf16.mxu0 %v4426_v30  ;;  %v4498_v30 = vld [vmem:[%s5334_s13 + $0x2c0] sm:$0xff]  }
 0x117   : > { %4143 = vmatpush3.bf16.msra.mxu1 %v4425_v29  ;;  %v4497_v29 = vld [vmem:[%s5334_s13 + $0x200] sm:$0xff]  }
 0x118   : > { %3067 = vmatmul.mubr.bf16.gmra.mxu0 %v4439_v26  ;;  %4144 = vmatprep.subr.bf16.mxu1 %v4428_v32  ;;  %v4494_v26 = vld [vmem:[%s5334_s13 + $0x2c8] sm:$0xff]  }
 0x119   : > { %4117 = vmatpush3.bf16.msra.mxu0 %v4427_v31  ;;  %3156 = vmatprep.mubr.bf16.mxu0 %v4457_v56  ;;  %v4499_v31 = vld [vmem:[%s5684_s0 + $0x20] ss:$72 sps:$4 sm:$0xff]   ;;  %v4501_v32 = vld [vmem:[%s5684_s0 + $0x24] ss:$72 sps:$4 sm:$0xff]   ;;  %v4528_v56 = vld [vmem:[%s5334_s13 + $0x358] sm:$0xff]  }
 0x11a   : > { %4118 = vmatprep.subr.bf16.mxu0 %v4430_v34  ;;  %3116 = vmatmul.mubr.bf16.gmra.mxu1 %v4444_v44  ;;  %v4503_v34 = vld [vmem:[%s5334_s13 + $0x378] sm:$0xff]   ;;  %v4515_v44 = vld [vmem:[%s5334_s13 + $0x3b0] sm:$0xff]  }
 0x11b   : > { %4145 = vmatpush3.bf16.msra.mxu1 %v4429_v33  ;;  %3205 = vmatprep.mubr.bf16.mxu1 %v4462_v60  ;;  %v4502_v33 = vld [vmem:[%s5334_s13 + $0x280] sm:$0xff]   ;;  %v4532_v60 = vld [vmem:[%s5334_s13 + $0x350] sm:$0xff]  }
 0x11c   : > { %4146 = vmatprep.subr.bf16.mxu1 %v4432_v36  ;;  %v4506_v36 = vld [vmem:[%s5684_s0 + $0x2c] ss:$72 sps:$4 sm:$0xff]  }
 0x11d   : > { %4119 = vmatpush3.bf16.msra.mxu0 %v4431_v35  ;;  %v4504_v35 = vld [vmem:[%s5684_s0 + $0x28] ss:$72 sps:$4 sm:$0xff]  }
 0x11e   : > { %4120 = vmatprep.subr.bf16.mxu0 %v4434_v38  ;;  %v4508_v38 = vld [vmem:[%s5334_s13 + $0x3f8] sm:$0xff]  }
 0x11f   : > { %4147 = vmatpush3.bf16.msra.mxu1 %v4433_v37  ;;  %v4507_v37 = vld [vmem:[%s5334_s13 + $0x338] sm:$0xff]  }
 0x120   : > { %4148 = vmatprep.subr.bf16.mxu1 %v4438_v40  ;;  %v4510_v40 = vld [vmem:[%s5334_s13 + $0x370] sm:$0xff]  }
 0x121   : > { %4121 = vmatpush3.bf16.msra.mxu0 %v4435_v39  ;;  %v4509_v39 = vld [vmem:[%s5334_s13 + $0x3b8] sm:$0xff]  }
 0x122   : > { %4122 = vmatprep.subr.bf16.mxu0 %v4443_v43  ;;  %v4513_v43 = vld [vmem:[%s5684_s0 + $0xb4] ss:$72 sps:$4 sm:$0xff]  }
 0x123   : > { %4149 = vmatpush3.bf16.msra.mxu1 %v4440_v41  ;;  %v4511_v41 = vld [vmem:[%s5334_s13 + $0x330] sm:$0xff]  }
 0x124   : > { %4150 = vmatprep.subr.bf16.mxu1 %v4446_v46  ;;  %v4517_v46 = vld [vmem:[%s5334_s13 + $0x368] sm:$0xff]  }
 0x125   : > { %4123 = vmatpush3.bf16.msra.mxu0 %v4445_v45  ;;  %v4516_v45 = vld [vmem:[%s5684_s0 + $0xb0] ss:$72 sps:$4 sm:$0xff]  }
 0x126   : > { %4124 = vmatprep.subr.bf16.mxu0 %v4448_v48  ;;  %v4520_v48 = vld [vmem:[%s5334_s13 + $0x328] sm:$0xff]  }
 0x127   : > { %4151 = vmatpush3.bf16.msra.mxu1 %v4447_v47  ;;  %v4518_v47 = vld [vmem:[%s5684_s0 + $0xbc] ss:$72 sps:$4 sm:$0xff]  }
 0x128   : > { %4152 = vmatprep.subr.bf16.mxu1 %v4450_v50  ;;  %v4522_v50 = vld [vmem:[%s5334_s13 + $0x3e8] sm:$0xff]  }
 0x129   : > { %4125 = vmatpush3.bf16.msra.mxu0 %v4449_v49  ;;  %v4521_v49 = vld [vmem:[%s5684_s0 + $0xb8] ss:$72 sps:$4 sm:$0xff]  }
 0x12a   : > { %4126 = vmatprep.subr.bf16.mxu0 %v4452_v52  ;;  %v4524_v52 = vld [vmem:[%s5334_s13 + $0x360] sm:$0xff]  }
 0x12b   : > { %4153 = vmatpush3.bf16.msra.mxu1 %v4451_v51  ;;  %v4523_v51 = vld [vmem:[%s5334_s13 + $0x3a8] sm:$0xff]  }
 0x12c   : > { %4154 = vmatprep.subr.bf16.mxu1 %v4454_v54  ;;  %v4526_v54 = vld [vmem:[%s5334_s13 + $0x3e0] sm:$0xff]  }
 0x12d   : > { %4127 = vmatpush3.bf16.msra.mxu0 %v4453_v53  ;;  %v4525_v53 = vld [vmem:[%s5334_s13 + $0x320] sm:$0xff]  }
 0x12e   : > { %4168 = vmatprep.subr.bf16.mxu0 %v4459_v58  ;;  %v4530_v58 = vld [vmem:[%s5334_s13 + $0x3d8] sm:$0xff]  }
 0x12f   : > { %4155 = vmatpush3.bf16.msra.mxu1 %v4458_v57  ;;  %v4529_v57 = vld [vmem:[%s5334_s13 + $0x318] sm:$0xff]  }
 0x130   : > { %3157 = vmatmul.mubr.bf16.vlgmr.msra.gmra.mxu0 %v4455_v55  ;;  %4196 = vmatprep.subr.bf16.mxu1 %v4464_v62  ;;  %v4527_v55 = vld [vmem:[%s5334_s13 + $0x3a0] sm:$0xff]   ;;  %v4534_v62 = vld [vmem:[%s5334_s13 + $0x3d0] sm:$0xff]  }
 0x131   : > { %4169 = vmatpush3.bf16.msra.mxu0 %v4463_v61  ;;  %3164 = vmatprep.mubr.bf16.mxu0 %v4469_v3  ;;  %v4533_v61 = vld [vmem:[%s5334_s13 + $0x310] sm:$0xff]   ;;  %v4539_v3 = vld [vmem:[%s5334_s13 + $0x388] sm:$0xff]  }
 0x132   : > { %3206 = vmatmul.mubr.bf16.vlgmr.msra.gmra.mxu1 %v4460_v59  ;;  %4170 = vmatprep.subr.bf16.mxu0 %v4466_v0  ;;  %v4531_v59 = vld [vmem:[%s5334_s13 + $0x398] sm:$0xff]   ;;  %v4536_v0 = vld [vmem:[%s5334_s13 + $0x348] sm:$0xff]  }
 0x133   : > { %4197 = vmatpush3.bf16.msra.mxu1 %v4465_v63  ;;  %3213 = vmatprep.mubr.bf16.mxu1 %v4474_v7  ;;  %v4535_v63 = vld [vmem:[%s5334_s13 + $0x390] sm:$0xff]  }
 0x134   : > { %4198 = vmatprep.subr.bf16.mxu1 %v4468_v2  ;;  %v4538_v2 = vld [vmem:[%s5334_s13 + $0x3c8] sm:$0xff]   ;;  %v4543_v7 = vld [vmem:[%s5684_s0 + $0x30] ss:$72 sps:$4 sm:$0xff]  }
 0x135   : > { %4171 = vmatpush3.bf16.msra.mxu0 %v4467_v1  ;;  %v4537_v1 = vld [vmem:[%s5334_s13 + $0x308] sm:$0xff]  }
 0x136   : > { %4172 = vmatprep.subr.bf16.mxu0 %v4473_v6  ;;  %v4542_v6 = vld [vmem:[%s5334_s13 + $0x3c0] sm:$0xff]  }
 0x137   : > { %4199 = vmatpush3.bf16.msra.mxu1 %v4471_v4  ;;  %v4540_v4 = vld [vmem:[%s5334_s13 + $0x340] sm:$0xff]  }
 0x138   : > { %3165 = vmatmul.mubr.bf16.gmra.mxu0 %v4472_v5  ;;  %4200 = vmatprep.subr.bf16.mxu1 %v4478_v10  ;;  %v4541_v5 = vld [vmem:[%s5334_s13 + $0x300] sm:$0xff]   ;;  %v4547_v10 = vld [vmem:[%s5334_s13 + $0x478] sm:$0xff]  }
 0x139   : > { %4173 = vmatpush3.bf16.msra.mxu0 %v4476_v8  ;;  %3254 = vmatprep.mubr.bf16.mxu0 %v4501_v32  ;;  %v4545_v8 = vld [vmem:[%s5684_s0 + $0x34] ss:$72 sps:$4 sm:$0xff]  }
 0x13a   : > { %3214 = vmatmul.mubr.bf16.gmra.mxu1 %v4477_v9  ;;  %4174 = vmatprep.subr.bf16.mxu0 %v4480_v12  ;;  %v4546_v9 = vld [vmem:[%s5334_s13 + $0x380] sm:$0xff]   ;;  %v4572_v32 = vld [vmem:[%s5334_s13 + $0x410] sm:$0xff]  }
 0x13b   : > { %4201 = vmatpush3.bf16.msra.mxu1 %v4479_v11  ;;  %3303 = vmatprep.mubr.bf16.mxu1 %v4506_v36  ;;  %v4548_v11 = vld [vmem:[%s5684_s0 + $0x38] ss:$72 sps:$4 sm:$0xff]   ;;  %v4550_v12 = vld [vmem:[%s5684_s0 + $0x3c] ss:$72 sps:$4 sm:$0xff]   ;;  %v4576_v36 = vld [vmem:[%s5545_s27 + $0x8] sm:$0xff]  }
 0x13c   : > { %4202 = vmatprep.subr.bf16.mxu1 %v4482_v14  ;;  %v4552_v14 = vld [vmem:[%s5545_s27 + $0x38] sm:$0xff]  }
 0x13d   : > { %4175 = vmatpush3.bf16.msra.mxu0 %v4481_v13  ;;  %v4551_v13 = vld [vmem:[%s5334_s13 + $0x438] sm:$0xff]  }
 0x13e   : > { %4176 = vmatprep.subr.bf16.mxu0 %v4484_v16  ;;  %v4554_v16 = vld [vmem:[%s5334_s13 + $0x430] sm:$0xff]  }
 0x13f   : > { %4203 = vmatpush3.bf16.msra.mxu1 %v4483_v15  ;;  %v4553_v15 = vld [vmem:[%s5334_s13 + $0x470] sm:$0xff]  }
 0x140   : > { %4204 = vmatprep.subr.bf16.mxu1 %v4486_v18  ;;  %v4556_v18 = vld [vmem:[%s5684_s0 + $0xc4] ss:$72 sps:$4 sm:$0xff]  }
 0x141   : > { %4177 = vmatpush3.bf16.msra.mxu0 %v4485_v17  ;;  %v4555_v17 = vld [vmem:[%s5545_s27 + $0x30] sm:$0xff]  }
 0x142   : > { %4178 = vmatprep.subr.bf16.mxu0 %v4488_v20  ;;  %v4559_v20 = vld [vmem:[%s5334_s13 + $0x468] sm:$0xff]  }
 0x143   : > { %4205 = vmatpush3.bf16.msra.mxu1 %v4487_v19  ;;  %v4558_v19 = vld [vmem:[%s5684_s0 + $0xc0] ss:$72 sps:$4 sm:$0xff]  }
 0x144   : > { %4206 = vmatprep.subr.bf16.mxu1 %v4490_v22  ;;  %v4562_v22 = vld [vmem:[%s5334_s13 + $0x428] sm:$0xff]  }
 0x145   : > { %4179 = vmatpush3.bf16.msra.mxu0 %v4489_v21  ;;  %v4560_v21 = vld [vmem:[%s5684_s0 + $0xcc] ss:$72 sps:$4 sm:$0xff]  }
 0x146   : > { %4180 = vmatprep.subr.bf16.mxu0 %v4492_v24  ;;  %v4564_v24 = vld [vmem:[%s5545_s27 + $0x28] sm:$0xff]  }
 0x147   : > { %4207 = vmatpush3.bf16.msra.mxu1 %v4491_v23  ;;  %v4563_v23 = vld [vmem:[%s5684_s0 + $0xc8] ss:$72 sps:$4 sm:$0xff]  }
 0x148   : > { %4208 = vmatprep.subr.bf16.mxu1 %v4494_v26  ;;  %v4566_v26 = vld [vmem:[%s5334_s13 + $0x420] sm:$0xff]  }
 0x149   : > { %4181 = vmatpush3.bf16.msra.mxu0 %v4493_v25  ;;  %v4565_v25 = vld [vmem:[%s5334_s13 + $0x460] sm:$0xff]  }
 0x14a   : > { %4182 = vmatprep.subr.bf16.mxu0 %v4496_v28  ;;  %v4568_v28 = vld [vmem:[%s5334_s13 + $0x458] sm:$0xff]  }
 0x14b   : > { %4209 = vmatpush3.bf16.msra.mxu1 %v4495_v27  ;;  %v4567_v27 = vld [vmem:[%s5545_s27 + $0x20] sm:$0xff]  }
 0x14c   : > { %4210 = vmatprep.subr.bf16.mxu1 %v4498_v30  ;;  %v4570_v30 = vld [vmem:[%s5545_s27 + $0x18] sm:$0xff]  }
 0x14d   : > { %4183 = vmatpush3.bf16.msra.mxu0 %v4497_v29  ;;  %v4569_v29 = vld [vmem:[%s5334_s13 + $0x418] sm:$0xff]  }
 0x14e   : > { %4224 = vmatprep.subr.bf16.mxu0 %v4503_v34  ;;  %v4574_v34 = vld [vmem:[%s5334_s13 + $0x448] sm:$0xff]  }
 0x14f   : > { %4211 = vmatpush3.bf16.msra.mxu1 %v4502_v33  ;;  %v4573_v33 = vld [vmem:[%s5545_s27 + $0x10] sm:$0xff]  }
 0x150   : > { %3255 = vmatmul.mubr.bf16.vlgmr.msra.gmra.mxu0 %v4499_v31  ;;  %4252 = vmatprep.subr.bf16.mxu1 %v4508_v38  ;;  %v4571_v31 = vld [vmem:[%s5334_s13 + $0x450] sm:$0xff]   ;;  %v4578_v38 = vld [vmem:[%s5334_s13 + $0x400] sm:$0xff]  }
 0x151   : > { %4225 = vmatpush3.bf16.msra.mxu0 %v4507_v37  ;;  %3262 = vmatprep.mubr.bf16.mxu0 %v4513_v43  ;;  %v4577_v37 = vld [vmem:[%s5334_s13 + $0x440] sm:$0xff]   ;;  %v4585_v43 = vld [vmem:[%s5684_s0 + $0xd4] ss:$72 sps:$4 sm:$0xff]  }
 0x152   : > { %3304 = vmatmul.mubr.bf16.vlgmr.msra.gmra.mxu1 %v4504_v35  ;;  %4226 = vmatprep.subr.bf16.mxu0 %v4510_v40  ;;  %v4575_v35 = vld [vmem:[%s5334_s13 + $0x408] sm:$0xff]  }
 0x153   : > { %4253 = vmatpush3.bf16.msra.mxu1 %v4509_v39  ;;  %3311 = vmatprep.mubr.bf16.mxu1 %v4518_v47  ;;  %v4579_v39 = vld [vmem:[%s5545_s27] sm:$0xff]   ;;  %s3642_s27 = scalar_lea.vmem (%p4702_p6), %s5690_s6, %s4038_s29 }
 0x154   : > { %4254 = vmatprep.subr.bf16.mxu1 %v4512_v42  ;;  %v4582_v40 = vld [vmem:[%s5684_s0 + $0x44] ss:$72 sps:$4 sm:$0xff]   ;;  %v4580_v42 = vld [vmem:[%s5684_s0 + $0x40] ss:$72 sps:$4 sm:$0xff]  }
 0x155   : > { %4227 = vmatpush3.bf16.msra.mxu0 %v4511_v41  ;;  %v4583_v41 = vld [vmem:[%s5687_s3] sm:$0xff]  }
 0x156   : > { %4228 = vmatprep.subr.bf16.mxu0 %v4517_v46 }
 0x157   : > { %4255 = vmatpush3.bf16.msra.mxu1 %v4515_v44  ;;  %v4584_v44 = vld [vmem:[%s5687_s3 + $0x8] sm:$0xff]  }
 0x158   : > { %3263 = vmatmul.mubr.bf16.gmra.mxu0 %v4516_v45  ;;  %4256 = vmatprep.subr.bf16.mxu1 %v4522_v50  ;;  %v4587_v45 = vld [vmem:[%s5684_s0 + $0xd0] ss:$72 sps:$4 sm:$0xff]  }
 0x159   : > { %4229 = vmatpush3.bf16.msra.mxu0 %v4520_v48  ;;  %3352 = vmatprep.mubr.bf16.mxu0 %v4545_v8 }
 0x15a   : > { %3312 = vmatmul.mubr.bf16.gmra.mxu1 %v4521_v49  ;;  %4230 = vmatprep.subr.bf16.mxu0 %v4524_v52 }
 0x15b   : > { %4257 = vmatpush3.bf16.msra.mxu1 %v4523_v51  ;;  %3401 = vmatprep.mubr.bf16.mxu1 %v4550_v12 }
 0x15c   : > { %4258 = vmatprep.subr.bf16.mxu1 %v4526_v54 }
 0x15d   : > { %4231 = vmatpush3.bf16.msra.mxu0 %v4525_v53 }
 0x15e   : > { %4232 = vmatprep.subr.bf16.mxu0 %v4528_v56 }
 0x15f   : > { %4259 = vmatpush3.bf16.msra.mxu1 %v4527_v55 }
 0x160   : > { %4260 = vmatprep.subr.bf16.mxu1 %v4530_v58 }
 0x161   : > { %4233 = vmatpush3.bf16.msra.mxu0 %v4529_v57 }
 0x162   : > { %4234 = vmatprep.subr.bf16.mxu0 %v4532_v60 }
 0x163   : > { %4261 = vmatpush3.bf16.msra.mxu1 %v4531_v59 }
 0x164   : > { %4262 = vmatprep.subr.bf16.mxu1 %v4534_v62 }
 0x165   : > { %4235 = vmatpush3.bf16.msra.mxu0 %v4533_v61 }
 0x166   : > { %4236 = vmatprep.subr.bf16.mxu0 %v4536_v0 }
 0x167   : > { %4263 = vmatpush3.bf16.msra.mxu1 %v4535_v63 }
 0x168   : > { %4264 = vmatprep.subr.bf16.mxu1 %v4538_v2 }
 0x169   : > { %4237 = vmatpush3.bf16.msra.mxu0 %v4537_v1 }
 0x16a   : > { %4238 = vmatprep.subr.bf16.mxu0 %v4540_v4 }
 0x16b   : > { %4265 = vmatpush3.bf16.msra.mxu1 %v4539_v3 }
 0x16c   : > { %4266 = vmatprep.subr.bf16.mxu1 %v4542_v6 }
 0x16d   : > { %4239 = vmatpush3.bf16.msra.mxu0 %v4541_v5 }
 0x16e   : > { %4280 = vmatprep.subr.bf16.mxu0 %v4547_v10 }
 0x16f   : > { %4267 = vmatpush3.bf16.msra.mxu1 %v4546_v9 }
 0x170   : > { %3353 = vmatmul.mubr.bf16.vlgmr.msra.gmra.mxu0 %v4543_v7  ;;  %4318 = vmatprep.subr.bf16.mxu1 %v4552_v14 }
 0x171   : > { %4281 = vmatpush3.bf16.msra.mxu0 %v4551_v13  ;;  %3360 = vmatprep.mubr.bf16.mxu0 %v4556_v18 }
 0x172   : > { %3402 = vmatmul.mubr.bf16.vlgmr.msra.gmra.mxu1 %v4548_v11  ;;  %4282 = vmatprep.subr.bf16.mxu0 %v4553_v15 }
 0x173   : > { %4319 = vmatpush3.bf16.msra.mxu1 %v4552_v14  ;;  %3409 = vmatprep.mubr.bf16.mxu1 %v4560_v21 }
 0x174   : > { %4320 = vmatprep.subr.bf16.mxu1 %v4555_v17 }
 0x175   : > { %4283 = vmatpush3.bf16.msra.mxu0 %v4554_v16 }
 0x176   : > { %4284 = vmatprep.subr.bf16.mxu0 %v4559_v20 }
 0x177   : > { %4321 = vmatpush3.bf16.msra.mxu1 %v4555_v17 }
 0x178   : > { %3361 = vmatmul.mubr.bf16.gmra.mxu0 %v4558_v19  ;;  %4322 = vmatprep.subr.bf16.mxu1 %v4564_v24 }
 0x179   : > { %4285 = vmatpush3.bf16.msra.mxu0 %v4562_v22  ;;  %3450 = vmatprep.mubr.bf16.mxu0 %v4582_v40 }
 0x17a   : > { %3410 = vmatmul.mubr.bf16.gmra.mxu1 %v4563_v23  ;;  %4286 = vmatprep.subr.bf16.mxu0 %v4565_v25 }
 0x17b   : > { %4323 = vmatpush3.bf16.msra.mxu1 %v4564_v24  ;;  %4334 = vmatprep.mubr.bf16.mxu1 %v4583_v41 }
 0x17c   : > { %4324 = vmatprep.subr.bf16.mxu1 %v4567_v27 }
 0x17d   : > { %4287 = vmatpush3.bf16.msra.mxu0 %v4566_v26 }
 0x17e   : > { %4288 = vmatprep.subr.bf16.mxu0 %v4568_v28 }
 0x17f   : > { %4325 = vmatpush3.bf16.msra.mxu1 %v4567_v27 }
 0x180   : > { %4326 = vmatprep.subr.bf16.mxu1 %v4570_v30 }
 0x181   : > { %4289 = vmatpush3.bf16.msra.mxu0 %v4569_v29 }
 0x182   : > { %4290 = vmatprep.subr.bf16.mxu0 %v4571_v31 }
 0x183   : > { %4327 = vmatpush3.bf16.msra.mxu1 %v4570_v30 }
 0x184   : > { %4328 = vmatprep.subr.bf16.mxu1 %v4573_v33 }
 0x185   : > { %4291 = vmatpush3.bf16.msra.mxu0 %v4572_v32 }
 0x186   : > { %4292 = vmatprep.subr.bf16.mxu0 %v4574_v34 }
 0x187   : > { %4329 = vmatpush3.bf16.msra.mxu1 %v4573_v33 }
 0x188   : > { %4330 = vmatprep.subr.bf16.mxu1 %v4576_v36 }
 0x189   : > { %4293 = vmatpush3.bf16.msra.mxu0 %v4575_v35 }
 0x18a   : > { %4294 = vmatprep.subr.bf16.mxu0 %v4577_v37 }
 0x18b   : > { %4331 = vmatpush3.bf16.msra.mxu1 %v4576_v36  ;;  %v3841_v36 = vld [vmem:[%s1639_s14] ss:$0 sm:$0xff] }
 0x18c   : > { %4332 = vmatprep.subr.bf16.mxu1 %v4579_v39 }
 0x18d   : > { %4295 = vmatpush3.bf16.msra.mxu0 %v4578_v38 }
 0x18f   : > { %4333 = vmatpush3.bf16.msra.mxu1 %v4579_v39 }
 0x190   : > { %3451 = vmatmul.mubr.bf16.vlgmr.msra.gmra.mxu0 %v4580_v42 }
 0x191   : > { %3458 = vmatprep.mubr.bf16.mxu0 %v4585_v43 }
 0x192   : > { %4335 = vmatmul.mubr.bf16.vlgmr.msra.gmra.mxu1 %v4584_v44 }
 0x198   : > { %3459 = vmatmul.mubr.bf16.gmra.mxu0 %v4587_v45 }
 0x1d0   : > { %v4072_v46 = vpop.f32.mrf.mxu0 }
 0x1d2   : > { %v4100_v47 = vpop.f32.mrf.mxu1  ;;  %v4073_v48 = vpop.f32.mrf.mxu0 }
 0x1d3   : > { %v4074_v34 = vadd.f32 %v4073_v48, %v4072_v46 }
 0x1d4   : > { %v4101_v49 = vpop.f32.mrf.mxu1  ;;  %v4075_v50 = vpop.f32.mrf.mxu0 }
 0x1d5   : > { %v3061_v39 = vadd.f32 %v4074_v34, %v3841_v36  ;;  %v4102_v40 = vadd.f32 %v4101_v49, %v4100_v47 }
 0x1d6   : > { %v4103_v51 = vpop.f32.mrf.mxu1  ;;  %v4076_v52 = vpop.f32.mrf.mxu0 }
 0x1d7   : > { %v4077_v37 = vadd.f32 %v4076_v52, %v4075_v50 }
 0x1d8   : > { %v4078_v53 = vpop.f32.mrf.mxu0  ;;  %v4104_v54 = vpop.f32.mrf.mxu1 }
 0x1d9   : > { %v3064_v42 = vadd.f32 %v4077_v37, %v3841_v36  ;;  %v4105_v43 = vadd.f32 %v4104_v54, %v4103_v51 }
 0x1da   : > { %v5599_v55 = vpop.f32.mrf.mxu1  ;;  %v4079_v56 = vpop.f32.mrf.mxu0 }
 0x1db   : > { %v4080_v45 = vadd.f32 %v4079_v56, %v4078_v53 }
 0x1dc   : > { %v5601_v57 = vpop.f32.mrf.mxu1  ;;  %v5603_v58 = vpop.f32.mrf.mxu0 }
 0x1dd   : > { %v4108_v46 = vadd.f32 %v5601_v57, %v5599_v55 }
 0x1de   : > { %v5605_v59 = vpop.f32.mrf.mxu1  ;;  %v4082_v60 = vpop.f32.mrf.mxu0 }
 0x1df   : > { %v4083_v48 = vadd.f32 %v4082_v60, %v5603_v58 }
 0x1e0   : > { %v5607_v62 = vpop.f32.mrf.mxu1 }
 0x1f0   : > { %v4128_v61 = vpop.f32.mrf.mxu0 }
 0x1f2   : > { %v4156_v63 = vpop.f32.mrf.mxu1  ;;  %v4129_v0 = vpop.f32.mrf.mxu0 }
 0x1f3   : > { %v4130_v44 = vadd.f32 %v4129_v0, %v4128_v61  ;;  %v3072_v0 = vadd.f32 %v4083_v48, %v3841_v36 }
 0x1f4   : > { %v4157_v1 = vpop.f32.mrf.mxu1  ;;  %v4131_v2 = vpop.f32.mrf.mxu0 }
 0x1f6   : > { %v4159_v3 = vpop.f32.mrf.mxu1  ;;  %v4132_v4 = vpop.f32.mrf.mxu0 }
 0x1f8   : > { %v4160_v5 = vpop.f32.mrf.mxu1  ;;  %v4134_v6 = vpop.f32.mrf.mxu0 }
 0x1f9   : > { %v4161_v49 = vadd.f32 %v4160_v5, %v4159_v3 }
 0x1fa   : > { %v5609_v7 = vpop.f32.mrf.mxu1  ;;  %v4135_v8 = vpop.f32.mrf.mxu0 }
 0x1fb   : > { %v4136_v54 = vadd.f32 %v4135_v8, %v4134_v6 }
 0x1fc   : > { %v5611_v9 = vpop.f32.mrf.mxu1  ;;  %v5613_v10 = vpop.f32.mrf.mxu0 }
 0x1fd   : > { %v4164_v58 = vadd.f32 %v5611_v9, %v5609_v7 }
 0x1fe   : > { %v5615_v11 = vpop.f32.mrf.mxu1  ;;  %v5617_v12 = vpop.f32.mrf.mxu0 }
 0x1ff   : > { %5693 = vst [vmem:[#allocation5_spill] sm:$0xff] %v5615_v11  ;;  %v3069_v11 = vadd.f32 %v4080_v45, %v3841_v36  ;;  %v4139_v60 = vadd.f32 %v5617_v12, %v5613_v10 }
 0x200   : > { %v5619_v14 = vpop.f32.mrf.mxu1 }
 0x201   : > { %5694 = vst [vmem:[#allocation6_spill] sm:$0xff] %v5619_v14  ;;  %v4158_v14 = vadd.f32 %v4157_v1, %v4156_v63  ;;  %v3118_v61 = vadd.f32 %v4108_v46, %v3069_v11 }
 0x203   : > { %v3167_v57 = vadd.f32 %v4136_v54, %v3118_v61 }
 0x210   : > { %v4184_v13 = vpop.f32.mrf.mxu0 }
 0x212   : > { %v4212_v15 = vpop.f32.mrf.mxu1  ;;  %v4185_v16 = vpop.f32.mrf.mxu0 }
 0x213   : > { %v4186_v52 = vadd.f32 %v4185_v16, %v4184_v13  ;;  %v3216_v16 = vadd.f32 %v4164_v58, %v3167_v57 }
 0x214   : > { %v4213_v17 = vpop.f32.mrf.mxu1  ;;  %v4187_v18 = vpop.f32.mrf.mxu0 }
 0x216   : > { %v4215_v19 = vpop.f32.mrf.mxu1  ;;  %v4188_v20 = vpop.f32.mrf.mxu0 }
 0x217   : > { %v4189_v56 = vadd.f32 %v4188_v20, %v4187_v18  ;;  %v5702_v18 = vld [vmem:[#allocation6_spill] sm:$0xff] }
 0x218   : > { %v4216_v21 = vpop.f32.mrf.mxu1  ;;  %v4190_v22 = vpop.f32.mrf.mxu0 }
 0x219   : > { %v4217_v5 = vadd.f32 %v4216_v21, %v4215_v19 }
 0x21a   : > { %v5621_v23 = vpop.f32.mrf.mxu1  ;;  %v4191_v24 = vpop.f32.mrf.mxu0 }
 0x21b   : > { %5695 = vst [vmem:[#allocation7_spill] sm:$0xff] %v5621_v23  ;;  %v4192_v11 = vadd.f32 %v4191_v24, %v4190_v22 }
 0x21c   : > { %v5623_v25 = vpop.f32.mrf.mxu1  ;;  %v5625_v26 = vpop.f32.mrf.mxu0 }
 0x21d   : > { %5696 = vst [vmem:[#allocation8_spill] sm:$0xff] %v5623_v25  ;;  %5697 = vst [vmem:[#allocation9_spill] sm:$0xff] %v5625_v26  ;;  %v3113_v25 = vadd.f32 %v4105_v43, %v3064_v42  ;;  %v3265_v10 = vadd.f32 %v4192_v11, %v3216_v16 }
 0x21e   : > { %v5627_v27 = vpop.f32.mrf.mxu1  ;;  %v5630_v28 = vpop.f32.mrf.mxu0 }
 0x21f   : > { %5698 = vst [vmem:[#allocation10_spill] sm:$0xff] %v5627_v27  ;;  %5699 = vst [vmem:[#allocation11_spill] sm:$0xff] %v5630_v28  ;;  %v3110_v27 = vadd.f32 %v4102_v40, %v3061_v39  ;;  %v4133_v28 = vadd.f32 %v4132_v4, %v4131_v2  ;;  %v4111_v2 = vadd.f32 %v5607_v62, %v5605_v59 }
 0x220   : > { %v5632_v30 = vpop.f32.mrf.mxu1 }
 0x221   : > { %5700 = vst [vmem:[#allocation12_spill] sm:$0xff] %v5632_v30  ;;  %v3159_v23 = vadd.f32 %v4130_v44, %v3110_v27  ;;  %v3162_v47 = vadd.f32 %v4133_v28, %v3113_v25  ;;  %v4214_v27 = vadd.f32 %v4213_v17, %v4212_v15  ;;  %v3121_v8 = vadd.f32 %v4111_v2, %v3072_v0  ;;  %v5701_v17 = vld [vmem:[#allocation5_spill] sm:$0xff] }
 0x222   : > { %v4167_v20 = vadd.f32 %v5702_v18, %v5701_v17  ;;  %v5703_v12 = vld [vmem:[#allocation7_spill] sm:$0xff] }
 0x223   : > { %v3208_v53 = vadd.f32 %v4158_v14, %v3159_v23  ;;  %v3211_v1 = vadd.f32 %v4161_v49, %v3162_v47  ;;  %v3170_v15 = vadd.f32 %v4139_v60, %v3121_v8 }
 0x224   : > { %v5704_v19 = vld [vmem:[#allocation8_spill] sm:$0xff]  ;;  %v5705_v22 = vld [vmem:[#allocation9_spill] sm:$0xff] }
 0x225   : > { %v3257_v4 = vadd.f32 %v4186_v52, %v3208_v53  ;;  %v3260_v3 = vadd.f32 %v4189_v56, %v3211_v1  ;;  %v4220_v21 = vadd.f32 %v5704_v19, %v5703_v12  ;;  %v3219_v36 = vadd.f32 %v4167_v20, %v3170_v15 }
 0x226   : > { %v5706_v24 = vld [vmem:[#allocation11_spill] sm:$0xff]  ;;  %v5707_v44 = vld [vmem:[#allocation10_spill] sm:$0xff] }
 0x227   : > { %v3306_v59 = vadd.f32 %v4214_v27, %v3257_v4  ;;  %v3309_v23 = vadd.f32 %v4217_v5, %v3260_v3  ;;  %v4195_v28 = vadd.f32 %v5706_v24, %v5705_v22  ;;  %v3314_v42 = vadd.f32 %v4220_v21, %v3265_v10 }
 0x228   : > { %v5708_v45 = vld [vmem:[#allocation12_spill] sm:$0xff] }
 0x229   : > { %v3268_v43 = vadd.f32 %v4195_v28, %v3219_v36  ;;  %v4223_v46 = vadd.f32 %v5708_v45, %v5707_v44 }
 0x22b   : > { %v3317_v61 = vadd.f32 %v4223_v46, %v3268_v43 }
 0x230   : > { %v4240_v29 = vpop.f32.mrf.mxu0 }
 0x232   : > { %v4268_v31 = vpop.f32.mrf.mxu1  ;;  %v4241_v32 = vpop.f32.mrf.mxu0 }
 0x233   : > { %v4242_v6 = vadd.f32 %v4241_v32, %v4240_v29 }
 0x234   : > { %v4269_v33 = vpop.f32.mrf.mxu1  ;;  %v4243_v35 = vpop.f32.mrf.mxu0 }
 0x235   : > { %v3355_v7 = vadd.f32 %v4242_v6, %v3306_v59  ;;  %v4270_v9 = vadd.f32 %v4269_v33, %v4268_v31  ;;  %v4022_v33 = vld [vmem:[%s1648_s17] ss:$0 sm:$0xff] }
 0x236   : > { %v4271_v38 = vpop.f32.mrf.mxu1  ;;  %v4244_v41 = vpop.f32.mrf.mxu0 }
 0x237   : > { %v4245_v62 = vadd.f32 %v4244_v41, %v4243_v35  ;;  %v3404_v40 = vadd.f32 %v4270_v9, %v3355_v7 }
 0x238   : > { %v4272_v30 = vpop.f32.mrf.mxu1  ;;  %v4246_v26 = vpop.f32.mrf.mxu0 }
 0x239   : > { %v3358_v32 = vadd.f32 %v4245_v62, %v3309_v23  ;;  %v4273_v34 = vadd.f32 %v4272_v30, %v4271_v38 }
 0x23a   : > { %v4274_v50 = vpop.f32.mrf.mxu1  ;;  %v4247_v51 = vpop.f32.mrf.mxu0 }
 0x23b   : > { %v4248_v37 = vadd.f32 %v4247_v51, %v4246_v26  ;;  %v3407_v47 = vadd.f32 %v4273_v34, %v3358_v32 }
 0x23c   : > { %v4275_v63 = vpop.f32.mrf.mxu1  ;;  %v4249_v55 = vpop.f32.mrf.mxu0 }
 0x23d   : > { %v3363_v53 = vadd.f32 %v4248_v37, %v3314_v42  ;;  %v4276_v30 = vadd.f32 %v4275_v63, %v4274_v50 }
 0x23e   : > { %v4277_v13 = vpop.f32.mrf.mxu1  ;;  %v4250_v14 = vpop.f32.mrf.mxu0 }
 0x23f   : > { %v4251_v38 = vadd.f32 %v4250_v14, %v4249_v55  ;;  %v3412_v57 = vadd.f32 %v4276_v30, %v3363_v53 }
 0x240   : > { %v4278_v29 = vpop.f32.mrf.mxu1 }
 0x241   : > { %v3366_v58 = vadd.f32 %v4251_v38, %v3317_v61  ;;  %v4279_v60 = vadd.f32 %v4278_v29, %v4277_v13 }
 0x243   : > { %v3415_v55 = vadd.f32 %v4279_v60, %v3366_v58 }
 0x250   : > { %v4296_v25 = vpop.f32.mrf.mxu0 }
 0x252   : > { %v4297_v35 = vpop.f32.mrf.mxu0  ;;  %v4336_v31 = vpop.f32.mrf.mxu1 }
 0x253   : > { %v4298_v39 = vadd.f32 %v4297_v35, %v4296_v25  ;;  %v3597_v59 = vadd.f32 %v4336_v31, %v4022_v33 }
 0x254   : > { %v4299_v41 = vpop.f32.mrf.mxu0  ;;  %v3588_v48 = vpop.f32.mrf.mxu1 }
 0x255   : > { %v3453_v49 = vadd.f32 %v4298_v39, %v3404_v40  ;;  %v3589_v52 = vadd.f32 %v4022_v33, %v3588_v48 }
 0x256   : > { %v4300_v54 = vpop.f32.mrf.mxu0  ;;  %v4337_v51 = vpop.f32.mrf.mxu1 }
 0x257   : > { %v4301_v26 = vadd.f32 %v4300_v54, %v4299_v41  ;;  %v3603_v1 = vadd.f32 %v3589_v52, %v3453_v49  ;;  %v3600_v16 = vadd.f32 %v4337_v51, %v4022_v33 }
 0x258   : > { %v4302_v56 = vpop.f32.mrf.mxu0  ;;  %v3591_v2 = vpop.f32.mrf.mxu1 }
 0x259   : > { %v3456_v0 = vadd.f32 %v4301_v26, %v3407_v47  ;;  %v3592_v4 = vadd.f32 %v4022_v33, %v3591_v2  ;;  %v3607_v11 = vmax.f32 %v3603_v1, 0.0 }
 0x25a   : > { %v4303_v27 = vpop.f32.mrf.mxu0 }
 0x25b   : > { %v4304_v3 = vadd.f32 %v4303_v27, %v4302_v56  ;;  %v3604_v5 = vadd.f32 %v3592_v4, %v3456_v0 }
 0x25c   : > { %v4305_v6 = vpop.f32.mrf.mxu0 }
 0x25d   : > { %v3461_v8 = vadd.f32 %v4304_v3, %v3412_v57  ;;  %v3608_v50 = vmax.f32 %v3604_v5, 0.0 }
 0x25e   : > { %v4306_v63 = vpop.f32.mrf.mxu0 }
 0x25f   : > { %v4307_v62 = vadd.f32 %v4306_v63, %v4305_v6  ;;  %v4048_v14 = vpack.c.bf16 %v3608_v50, %v3607_v11  ;;  %v3605_v15 = vadd.f32 %v3597_v59, %v3461_v8 }
 0x261   : > { %v3464_v17 = vadd.f32 %v4307_v62, %v3415_v55  ;;  %4049 = vst [vmem:[%s1629_s19] sm:$0xff] %v4048_v14   ;;  %v3609_v20 = vmax.f32 %v3605_v15, 0.0 }
 0x263   : > { %v3606_v18 = vadd.f32 %v3600_v16, %v3464_v17 }
 0x265   : > { %v3610_v13 = vmax.f32 %v3606_v18, 0.0  ;;  %3637 = sbr.rel (!%p4702_p6) target bundleno = 626 (0x272), region = 130 }
 0x267   : > { %v4053_v23 = vpack.c.bf16 %v3610_v13, %v3609_v20 }
 0x268   : > { %v3659_v7 = vld [vmem:[%s1629_s19] sm:$0xf] (%p4702_p6)  ;;  %v3661_v9 = vld [vmem:[%s1629_s19 + $0x4] sm:$0xf] (%p4702_p6) }
 0x269   : > { %4055 = vst [vmem:[%s1629_s19 + $0x8] sm:$0xff] %v4053_v23   ;;  %3660 = vst [vmem:[%s3642_s27] sm:$0xf] (%p4702_p6), %v3659_v7 }
 0x26a   : > { %3662 = vst [vmem:[%s3642_s27 + $0x8] sm:$0xf] %v3661_v9 }
 0x270   : > { %v3663_v25 = vld [vmem:[%s1629_s19 + $0x8] sm:$0xf]  ;;  %v3665_v10 = vld [vmem:[%s1629_s19 + $0xc] sm:$0xf] }
 0x271   : > { %3664 = vst [vmem:[%s3642_s27 + $0x10] sm:$0xf] %v3663_v25  ;;  %3666 = vst [vmem:[%s3642_s27 + $0x18] sm:$0xf] %v3665_v10 }
 0x272 PF: > { %s16_s25 = sadd.s32 1, %s4626_s25   ;;  %s5709_s21 = smov %s4614_s22 }
 0x273   : > { %p13_p12 = scmp.ge.s32.totalorder %s16_s25, 4   ;;  %s5710_s22 = smov %s4707_s8 }
 0x274   : > { %s5711_s23 = smov %s4622_s24  ;;  %s5712_s24 = smov %s5714_s26 }
 0x275   :  { %15 = sbr.rel (!%p13_p12) target bundleno = 3 (0x3), region = 222 }

</bundles_post_ra>
